<compile_context>
chip_gen: v7x
topology: tpu7x:2x2x1
jax: 0.10.0
libtpu: 0.0.40
codegen_flags: <defaults>
</compile_context>

<pallas_src>
import functools
import math

import jax
import jax.numpy as jnp
from jax import lax
from jax.experimental import pallas as pl
from jax.experimental.pallas import tpu as pltpu


# ---------------------------------------------------------------------------
# small helpers
# ---------------------------------------------------------------------------
def _round_up(n, m):
    return ((n + m - 1) // m) * m


def _pick_tile(n, candidates):
    for c in candidates:
        if n % c == 0:
            return c
    return n


@functools.lru_cache(maxsize=None)
def _vmem_capacity_bytes():
    """Physical VMEM of the current chip; conservative fallback (v7x = 64 MiB/TC)."""
    try:
        cap = getattr(pltpu.get_tpu_info(), "vmem_capacity_bytes", None)
        if cap:
            return int(cap)
    except Exception:
        pass
    return 64 * 1024 * 1024


@functools.lru_cache(maxsize=None)
def _const_weight_pipeline_mode():
    """Single-buffer constant-index weight blocks (halves weight VMEM) if this
    JAX/Mosaic supports pipeline_mode=pl.Buffered(1); otherwise fall back."""
    try:
        mode = pl.Buffered(1)

        def _probe(x_ref, o_ref):
            o_ref[...] = x_ref[...]

        x = jnp.arange(8 * 128, dtype=jnp.float32).reshape(8, 128)
        out = pl.pallas_call(
            _probe,
            out_shape=jax.ShapeDtypeStruct((8, 128), jnp.float32),
            grid=(2,),
            in_specs=[pl.BlockSpec((8, 128), lambda i: (0, 0), pipeline_mode=mode)],
            out_specs=pl.BlockSpec((8, 128), lambda i: (0, 0)),
        )(x)
        if not bool(jnp.all(out == x)):
            return None
        return mode
    except Exception:
        return None


def _const_spec(shape):
    """BlockSpec for a grid-invariant (constant index) block."""
    nd = len(shape)
    idx = lambda *_: (0,) * nd
    mode = _const_weight_pipeline_mode()
    if mode is not None:
        return pl.BlockSpec(shape, idx, pipeline_mode=mode)
    return pl.BlockSpec(shape, idx)


# ---------------------------------------------------------------------------
# in-kernel math (f32 on VPU/EUP; MXU inputs bf16, accumulation f32)
# ---------------------------------------------------------------------------
def _layernorm(x, scale, shift, eps=1e-5):
    mean = jnp.mean(x, axis=-1, keepdims=True)
    var = jnp.mean((x - mean) ** 2, axis=-1, keepdims=True)   # unbiased=False
    return scale * ((x - mean) * lax.rsqrt(var + eps)) + shift


def _gelu(x):
    c = jnp.float32(math.sqrt(2.0 / math.pi))
    return 0.5 * x * (1.0 + jnp.tanh(c * (x + 0.044715 * (x * x * x))))


# ---------------------------------------------------------------------------
# Pallas kernels
# ---------------------------------------------------------------------------
def transformer_block_kernel(x_ref, mask_ref, ln1_s_ref, ln1_b_ref,
                             wqkv_ref, wo_ref, bo_ref,
                             ln2_s_ref, ln2_b_ref,
                             w1_ref, b1_ref, w2_ref, b2_ref,
                             o_ref, *, num_heads, q_tile, ffn_chunk):
    f32, bf16 = jnp.float32, jnp.bfloat16
    T, D = x_ref.shape
    H = num_heads
    hd = D // H
    Dff = w1_ref.shape[1]

    x = x_ref[...].astype(f32)                                   # (T, D) residual stream

    # ---- LN1 + fused QKV: one full-width (T,D)x(D,3D) MXU pass -------------
    h1 = _layernorm(x, ln1_s_ref[...], ln1_b_ref[...]).astype(bf16)
    qkv = jnp.dot(h1, wqkv_ref[...], preferred_element_type=f32)  # (T, 3D)

    # head split: static lane slices -> (H, T, hd) bf16 (columns are (q|k|v, head, hd))
    def split_heads(base):
        parts = [qkv[:, base + h * hd: base + (h + 1) * hd] for h in range(H)]
        return jnp.stack(parts, axis=0).astype(bf16)

    q = split_heads(0)          # 1/sqrt(hd) already folded into the Q weight columns
    k = split_heads(D)
    v = split_heads(2 * D)

    # ---- attention, tiled over query blocks; causal KV clipping ------------
    n_qt = T // q_tile
    for qi in range(n_qt):
        q0 = qi * q_tile
        kv_len = q0 + q_tile                                     # keys beyond are fully masked
        qt = q[:, q0:q0 + q_tile, :]                             # (H, TQ, hd)
        kt = k[:, :kv_len, :]
        vt = v[:, :kv_len, :]

        s = jnp.einsum("htf,hsf->hts", qt, kt,
                       preferred_element_type=f32)               # (H, TQ, kv_len)
        s = s + mask_ref[q0:q0 + q_tile, :kv_len]                # additive finite mask
        s = s - jnp.max(s, axis=-1, keepdims=True)
        p = jnp.exp(s)
        l = jnp.sum(p, axis=-1, keepdims=True)                   # (H, TQ, 1), >= 1
        ctx = jnp.einsum("hts,hsf->htf", p.astype(bf16), vt,
                         preferred_element_type=f32)             # unnormalized context
        ctx = ctx * pl.reciprocal(l, approx=True)                # normalize after PV

        # head merge folded into the output projection: full-depth (TQ,D)x(D,D)
        merged = jnp.concatenate([ctx[h] for h in range(H)], axis=-1).astype(bf16)
        attn = jnp.dot(merged, wo_ref[...], preferred_element_type=f32)
        xt = x[q0:q0 + q_tile, :] + attn + bo_ref[...]
        # dropout layers are identity (inference, drop_rate = 0.0)

        # ---- feed-forward, K-tiled over the hidden dim ----------------------
        h2 = _layernorm(xt, ln2_s_ref[...], ln2_b_ref[...]).astype(bf16)
        ff = jnp.zeros((q_tile, D), f32)
        for c0 in range(0, Dff, ffn_chunk):
            hblk = jnp.dot(h2, w1_ref[:, c0:c0 + ffn_chunk],
                           preferred_element_type=f32) + b1_ref[:, c0:c0 + ffn_chunk]
            ff = ff + jnp.dot(_gelu(hblk).astype(bf16), w2_ref[c0:c0 + ffn_chunk, :],
                              preferred_element_type=f32)
        o_ref[q0:q0 + q_tile, :] = (xt + ff + b2_ref[...]).astype(o_ref.dtype)


def final_norm_kernel(x_ref, s_ref, b_ref, o_ref):
    h = _layernorm(x_ref[...].astype(jnp.float32), s_ref[...], b_ref[...])
    o_ref[...] = h.astype(o_ref.dtype)


def head_matmul_kernel(x_ref, w_ref, o_ref):
    o_ref[...] = jnp.dot(x_ref[...], w_ref[...], preferred_element_type=jnp.float32)


# ---------------------------------------------------------------------------
# wrappers
# ---------------------------------------------------------------------------
def run_transformer_block(x, mask, p, num_heads):
    B, T, D = x.shape
    H = num_heads
    Dff = p["w1"].shape[1]
    TQ = _pick_tile(T, (512, 256, 128))
    CK = _pick_tile(Dff, (2048, 1024, 512, 256, 128))

    in_specs = [
        pl.BlockSpec((None, T, D), lambda b: (b, 0, 0)),       # x, one batch row / step
        _const_spec((T, T)),                                   # additive causal mask (f32)
        _const_spec((1, D)), _const_spec((1, D)),              # ln1 scale / shift
        _const_spec((D, 3 * D)),                               # fused Wqkv (bf16)
        _const_spec((D, D)), _const_spec((1, D)),              # Wo (bf16), bo (f32)
        _const_spec((1, D)), _const_spec((1, D)),              # ln2 scale / shift
        _const_spec((D, Dff)), _const_spec((1, Dff)),          # W1 (bf16), b1 (f32)
        _const_spec((Dff, D)), _const_spec((1, D)),            # W2 (bf16), b2 (f32)
    ]
    out_spec = pl.BlockSpec((None, T, D), lambda b: (b, 0, 0))

    flops = int(B * (2 * T * D * (4 * D + 2 * Dff) + 4 * T * T * D))
    transcendentals = int(B * (H * T * T + T * Dff))
    bytes_accessed = int((8 * D * D + 4 * D * Dff) * 2 + T * T * 4 + 4 * B * T * D)
    cost = pl.CostEstimate(flops=flops, transcendentals=transcendentals,
                           bytes_accessed=bytes_accessed)

    wbuf = 1 if _const_weight_pipeline_mode() is not None else 2
    est = wbuf * ((4 * D * D + 2 * D * Dff) * 2 + T * T * 4)   # weights + mask
    est += 4 * T * D * 2                                       # x in/out, double-buffered
    est += 28 * T * D                                          # resident activations
    est += 8 * H * TQ * T + 12 * TQ * CK + 16 * TQ * D         # per-q-tile intermediates
    cap = _vmem_capacity_bytes()
    vmem_limit = int(min(cap, max(32 * 1024 * 1024, 2 * est)))

    kernel = functools.partial(transformer_block_kernel,
                               num_heads=H, q_tile=TQ, ffn_chunk=CK)
    # TODO(synk): add a q-tile grid axis (and stream W1/W2 over a reduction axis)
    # for v7x 2-TC parallelism / very large emb_dim; prefetch layer i+1 weights
    # behind layer i compute with cross-call DMA futures.
    return pl.pallas_call(
        kernel,
        out_shape=jax.ShapeDtypeStruct((B, T, D), jnp.bfloat16),
        grid=(B,),
        in_specs=in_specs,
        out_specs=out_spec,
        compiler_params=pltpu.CompilerParams(
            dimension_semantics=("parallel",),
            vmem_limit_bytes=vmem_limit),
        cost_estimate=cost,
    )(x, mask, p["ln1_s"], p["ln1_b"], p["wqkv"], p["wo"], p["bo"],
      p["ln2_s"], p["ln2_b"], p["w1"], p["b1"], p["w2"], p["b2"])


def run_final_norm(x, ln_s, ln_b):
    B, T, D = x.shape
    cap = _vmem_capacity_bytes()
    vmem_limit = int(min(cap, max(32 * 1024 * 1024, 16 * T * D)))
    return pl.pallas_call(
        final_norm_kernel,
        out_shape=jax.ShapeDtypeStruct((B, T, D), jnp.bfloat16),
        grid=(B,),
        in_specs=[pl.BlockSpec((None, T, D), lambda b: (b, 0, 0)),
                  _const_spec((1, D)), _const_spec((1, D))],
        out_specs=pl.BlockSpec((None, T, D), lambda b: (b, 0, 0)),
        compiler_params=pltpu.CompilerParams(
            dimension_semantics=("parallel",),
            vmem_limit_bytes=vmem_limit),
    )(x, ln_s, ln_b)


def _head_footprint(D, TT, tv):
    # double-buffered weight block + double-buffered f32 output block + x block
    return 2 * (D * tv * 2) + 2 * (TT * tv * 4) + 2 * (TT * D * 2)


def run_head(xn, w_out):
    B, T, D = xn.shape
    V_cols = w_out.shape[1]                       # already a multiple of 128
    cap = _vmem_capacity_bytes()

    TT = _pick_tile(T, (256, 128))
    budget = max(cap // 3, 8 * 1024 * 1024)       # per-generation VMEM-aware tile sizing
    TV = 128
    for cand in (4096, 2048, 1024, 512, 256, 128):
        if _head_footprint(D, TT, cand) <= budget:
            TV = cand
            break
    TV = min(TV, V_cols)
    Vp = _round_up(V_cols, TV)                    # pad vocab up to the tile multiple
    if Vp != V_cols:
        w_out = jnp.pad(w_out, ((0, 0), (0, Vp - V_cols)))

    grid = (B, T // TT, Vp // TV)
    in_specs = [
        pl.BlockSpec((None, TT, D), lambda b, t, j: (b, t, 0)),
        pl.BlockSpec((D, TV), lambda b, t, j: (0, j)),          # streamed weight blocks
    ]
    out_spec = pl.BlockSpec((None, TT, TV), lambda b, t, j: (b, t, j))

    flops = int(2 * B * T * D * Vp)
    bytes_accessed = int(D * Vp * 2 + B * T * D * 2 + B * T * Vp * 4)
    cost = pl.CostEstimate(flops=flops, transcendentals=0, bytes_accessed=bytes_accessed)
    vmem_limit = int(min(cap, max(32 * 1024 * 1024, 2 * _head_footprint(D, TT, TV))))

    # TODO(synk): bf16 logits would halve the HBM writeback; kept f32 to match the
    # PyTorch reference dtype.
    return pl.pallas_call(
        head_matmul_kernel,
        out_shape=jax.ShapeDtypeStruct((B, T, Vp), jnp.float32),
        grid=grid,
        in_specs=in_specs,
        out_specs=out_spec,
        compiler_params=pltpu.CompilerParams(
            dimension_semantics=("parallel", "parallel", "parallel"),
            vmem_limit_bytes=vmem_limit),
        cost_estimate=cost,
    )(xn, w_out)


def _causal_mask(T):
    upper = jnp.triu(jnp.ones((T, T), dtype=bool), k=1)
    return jnp.where(upper, jnp.float32(-1e30), jnp.float32(0.0))


def gpt_forward(token_ids, params, cfg):
    B, T0 = token_ids.shape
    D = cfg["emb_dim"]
    V = cfg["vocab_size"]
    C = cfg["context_length"]
    H = cfg["n_heads"]
    assert D % H == 0, "emb_dim must be divisible by n_heads"
    assert D % 128 == 0, "emb_dim must be a multiple of 128 (lane width)"
    assert T0 <= C, "sequence length exceeds context_length"

    # pad seq to a lane multiple (128); pad rows are inert under the causal mask.
    T = _round_up(T0, 128)
    ids = token_ids if T == T0 else jnp.pad(token_ids, ((0, 0), (0, T - T0)))
    pos_idx = jnp.minimum(jnp.arange(T), C - 1)   # clamp only affects pad rows

    tok = jnp.take(params["tok_emb"], ids, axis=0)                 # (B, T, D)
    pos = jnp.take(params["pos_emb"], pos_idx, axis=0)[None]       # (1, T, D)
    x = (tok + pos).astype(jnp.bfloat16)
    # drop_emb is identity (inference, drop_rate = 0.0)

    mask = _causal_mask(T)
    for layer_params in params["blocks"]:
        x = run_transformer_block(x, mask, layer_params, H)

    xn = run_final_norm(x, params["final_ln_s"], params["final_ln_b"])
    # TODO(synk): for autoregressive decode, slice xn to the last valid position
    # before the vocab projection.
    logits = run_head(xn, params["w_out"])
    return logits[:, :T0, :V]


# ---------------------------------------------------------------------------
# deterministic parameter construction (kernel layouts, bf16 matmul weights)
# ---------------------------------------------------------------------------
def init_params(cfg, key):
    D = cfg["emb_dim"]
    V = cfg["vocab_size"]
    C = cfg["context_length"]
    H = cfg["n_heads"]
    hd = D // H
    Vp = _round_up(V, 128)
    bf16 = jnp.bfloat16

    def nrm(k, shape, scale=0.02):
        return scale * jax.random.normal(k, shape, dtype=jnp.float32)

    keys = iter(jax.random.split(key, 4 + 16 * cfg["n_layers"]))
    params = {
        "tok_emb": nrm(next(keys), (V, D)).astype(bf16),
        "pos_emb": nrm(next(keys), (C, D)).astype(bf16),
        "final_ln_s": jnp.ones((1, D), jnp.float32),
        "final_ln_b": jnp.zeros((1, D), jnp.float32),
        # vocab projection padded to a 128-lane multiple (sliced back after the head)
        "w_out": jnp.pad(nrm(next(keys), (D, V)), ((0, 0), (0, Vp - V))).astype(bf16),
        "blocks": [],
    }
    for _ in range(cfg["n_layers"]):
        wq = nrm(next(keys), (D, D)) * (1.0 / math.sqrt(hd))   # softmax scale folded in
        wk = nrm(next(keys), (D, D))
        wv = nrm(next(keys), (D, D))
        blk = {
            "ln1_s": jnp.ones((1, D), jnp.float32),
            "ln1_b": jnp.zeros((1, D), jnp.float32),
            # fused QKV weight, stored (in, out); columns = (q|k|v, head, head_dim)
            "wqkv": jnp.concatenate([wq, wk, wv], axis=1).astype(bf16),
            "wo": nrm(next(keys), (D, D)).astype(bf16),        # (in=(head, hd), out)
            "bo": nrm(next(keys), (1, D)),
            "ln2_s": jnp.ones((1, D), jnp.float32),
            "ln2_b": jnp.zeros((1, D), jnp.float32),
            "w1": nrm(next(keys), (D, 4 * D)).astype(bf16),
            "b1": nrm(next(keys), (1, 4 * D)),
            "w2": nrm(next(keys), (4 * D, D)).astype(bf16),
            "b2": nrm(next(keys), (1, D)),
        }
        params["blocks"].append(blk)
    return params


# ---------------------------------------------------------------------------
if __name__ == "__main__":
    cfg = {
        "vocab_size": 256,
        "context_length": 16,
        "emb_dim": 128,
        "n_heads": 4,
        "n_layers": 2,
        "drop_rate": 0.0,
        "qkv_bias": False,
    }
    key = jax.random.PRNGKey(0)
    pkey, dkey = jax.random.split(key)
    params = init_params(cfg, pkey)

    batch, seq = 2, 8
    token_ids = jax.random.randint(dkey, (batch, seq), 0, cfg["vocab_size"],
                                   dtype=jnp.int32)

    logits = jax.block_until_ready(gpt_forward(token_ids, params, cfg))
    assert logits.shape == (batch, seq, cfg["vocab_size"])
    assert logits.dtype == jnp.float32
    assert bool(jnp.all(jnp.isfinite(logits)))
    print("KERNEL_OK")
</pallas_src>

<mosaic_0001>
module attributes {stable_mosaic.version = 11 : i64} {
  func.func @_probe(%arg0: i32, %arg1: memref<8x128xf32, #tpu.memory_space<vmem>>, %arg2: memref<8x128xf32, #tpu.memory_space<vmem>>) attributes {dimension_semantics = [#tpu.dimension_semantics<arbitrary>], iteration_bounds = array<i64: 2>, scalar_prefetch = 0 : i64, scratch_operands = 0 : i64, tpu.core_type = #tpu.core_type<tc>, window_params = [{pipeline_mode = #tpu.pipeline_mode<synchronous>, transform_indices = @transform_0, window_bounds = array<i64: 8, 128>}, {pipeline_mode = #tpu.pipeline_mode<synchronous>, transform_indices = @transform_1, window_bounds = array<i64: 8, 128>}]} {
    %c0 = arith.constant 0 : index
    %c0_0 = arith.constant 0 : index
    %0 = vector.load %arg1[%c0, %c0_0] : memref<8x128xf32, #tpu.memory_space<vmem>>, vector<8x128xf32>
    %c0_1 = arith.constant 0 : index
    %c0_2 = arith.constant 0 : index
    %1 = vector.load %arg2[%c0_1, %c0_2] : memref<8x128xf32, #tpu.memory_space<vmem>>, vector<8x128xf32>
    tpu.vector_store %arg2[%c0_1, %c0_2], %0 {strides = array<i32>} : memref<8x128xf32, #tpu.memory_space<vmem>>, vector<8x128xf32>,
    return
  }
  func.func @transform_0(%arg0: i32) -> (i32, i32) {
    %c0_i32 = arith.constant 0 : i32
    %c0_i32_0 = arith.constant 0 : i32
    %c0_i32_1 = arith.constant 0 : i32
    return %c0_i32, %c0_i32_0 : i32, i32
  }
  func.func @transform_1(%arg0: i32) -> (i32, i32) {
    %c0_i32 = arith.constant 0 : i32
    %c0_i32_0 = arith.constant 0 : i32
    %c0_i32_1 = arith.constant 0 : i32
    return %c0_i32, %c0_i32_0 : i32, i32
  }
}

module attributes {stable_mosaic.version = 11 : i64} {
  func.func @transformer_block_kernel(%arg0: i32, %arg1: memref<1x128x128xbf16, #tpu.memory_space<vmem>>, %arg2: memref<128x128xf32, #tpu.memory_space<vmem>>, %arg3: memref<1x128xf32, #tpu.memory_space<vmem>>, %arg4: memref<1x128xf32, #tpu.memory_space<vmem>>, %arg5: memref<128x384xbf16, #tpu.memory_space<vmem>>, %arg6: memref<128x128xbf16, #tpu.memory_space<vmem>>, %arg7: memref<1x128xf32, #tpu.memory_space<vmem>>, %arg8: memref<1x128xf32, #tpu.memory_space<vmem>>, %arg9: memref<1x128xf32, #tpu.memory_space<vmem>>, %arg10: memref<128x512xbf16, #tpu.memory_space<vmem>>, %arg11: memref<1x512xf32, #tpu.memory_space<vmem>>, %arg12: memref<512x128xbf16, #tpu.memory_space<vmem>>, %arg13: memref<1x128xf32, #tpu.memory_space<vmem>>, %arg14: memref<1x128x128xbf16, #tpu.memory_space<vmem>>) attributes {dimension_semantics = [#tpu.dimension_semantics<parallel>], iteration_bounds = array<i64: 2>, scalar_prefetch = 0 : i64, scratch_operands = 0 : i64, tpu.core_type = #tpu.core_type<tc>, window_params = [{transform_indices = @transform_0, window_bounds = array<i64: 1, 128, 128>}, {pipeline_mode = #tpu.pipeline_mode<synchronous>, transform_indices = @transform_1, window_bounds = array<i64: 128, 128>}, {pipeline_mode = #tpu.pipeline_mode<synchronous>, transform_indices = @transform_2, window_bounds = array<i64: 1, 128>}, {pipeline_mode = #tpu.pipeline_mode<synchronous>, transform_indices = @transform_3, window_bounds = array<i64: 1, 128>}, {pipeline_mode = #tpu.pipeline_mode<synchronous>, transform_indices = @transform_4, window_bounds = array<i64: 128, 384>}, {pipeline_mode = #tpu.pipeline_mode<synchronous>, transform_indices = @transform_5, window_bounds = array<i64: 128, 128>}, {pipeline_mode = #tpu.pipeline_mode<synchronous>, transform_indices = @transform_6, window_bounds = array<i64: 1, 128>}, {pipeline_mode = #tpu.pipeline_mode<synchronous>, transform_indices = @transform_7, window_bounds = array<i64: 1, 128>}, {pipeline_mode = #tpu.pipeline_mode<synchronous>, transform_indices = @transform_8, window_bounds = array<i64: 1, 128>}, {pipeline_mode = #tpu.pipeline_mode<synchronous>, transform_indices = @transform_9, window_bounds = array<i64: 128, 512>}, {pipeline_mode = #tpu.pipeline_mode<synchronous>, transform_indices = @transform_10, window_bounds = array<i64: 1, 512>}, {pipeline_mode = #tpu.pipeline_mode<synchronous>, transform_indices = @transform_11, window_bounds = array<i64: 512, 128>}, {pipeline_mode = #tpu.pipeline_mode<synchronous>, transform_indices = @transform_12, window_bounds = array<i64: 1, 128>}, {transform_indices = @transform_13, window_bounds = array<i64: 1, 128, 128>}]} {
    %c0 = arith.constant 0 : index
    %c0_0 = arith.constant 0 : index
    %c0_1 = arith.constant 0 : index
    %0 = vector.load %arg1[%c0, %c0_0, %c0_1] : memref<1x128x128xbf16, #tpu.memory_space<vmem>>, vector<1x128x128xbf16>
    %1 = vector.shape_cast %0 : vector<1x128x128xbf16> to vector<128x128xbf16>
    %2 = arith.extf %1 : vector<128x128xbf16> to vector<128x128xf32>
    %c0_2 = arith.constant 0 : index
    %c0_3 = arith.constant 0 : index
    %3 = vector.load %arg3[%c0_2, %c0_3] : memref<1x128xf32, #tpu.memory_space<vmem>>, vector<1x128xf32>
    %c0_4 = arith.constant 0 : index
    %c0_5 = arith.constant 0 : index
    %4 = vector.load %arg4[%c0_4, %c0_5] : memref<1x128xf32, #tpu.memory_space<vmem>>, vector<1x128xf32>
    %cst = arith.constant dense<0.000000e+00> : vector<128xf32>
    %5 = vector.multi_reduction <add>, %2, %cst [1] : vector<128x128xf32> to vector<128xf32>
    %6 = vector.shape_cast %5 : vector<128xf32> to vector<128x1xf32>
    %cst_6 = arith.constant 1.280000e+02 : f32
    %7 = vector.broadcast %cst_6 : f32 to vector<128x1xf32>
    %8 = arith.divf %6, %7 : vector<128x1xf32>
    %9 = vector.broadcast %8 : vector<128x1xf32> to vector<128x128xf32>
    %10 = arith.subf %2, %9 : vector<128x128xf32>
    %11 = arith.mulf %10, %10 : vector<128x128xf32>
    %cst_7 = arith.constant dense<0.000000e+00> : vector<128xf32>
    %12 = vector.multi_reduction <add>, %11, %cst_7 [1] : vector<128x128xf32> to vector<128xf32>
    %13 = vector.shape_cast %12 : vector<128xf32> to vector<128x1xf32>
    %cst_8 = arith.constant 1.280000e+02 : f32
    %14 = vector.broadcast %cst_8 : f32 to vector<128x1xf32>
    %15 = arith.divf %13, %14 : vector<128x1xf32>
    %16 = vector.broadcast %8 : vector<128x1xf32> to vector<128x128xf32>
    %17 = arith.subf %2, %16 : vector<128x128xf32>
    %cst_9 = arith.constant 9.99999974E-6 : f32
    %18 = vector.broadcast %cst_9 : f32 to vector<128x1xf32>
    %19 = arith.addf %15, %18 : vector<128x1xf32>
    %20 = math.rsqrt %19 : vector<128x1xf32>
    %21 = vector.broadcast %20 : vector<128x1xf32> to vector<128x128xf32>
    %22 = arith.mulf %17, %21 : vector<128x128xf32>
    %23 = vector.broadcast %3 : vector<1x128xf32> to vector<128x128xf32>
    %24 = arith.mulf %23, %22 : vector<128x128xf32>
    %25 = vector.broadcast %4 : vector<1x128xf32> to vector<128x128xf32>
    %26 = arith.addf %24, %25 : vector<128x128xf32>
    %27 = arith.truncf %26 : vector<128x128xf32> to vector<128x128xbf16>
    %c0_10 = arith.constant 0 : index
    %c0_11 = arith.constant 0 : index
    %28 = vector.load %arg5[%c0_10, %c0_11] : memref<128x384xbf16, #tpu.memory_space<vmem>>, vector<128x384xbf16>
    %cst_12 = arith.constant dense<0.000000e+00> : vector<128x384xf32>
    %29 = tpu.matmul %27, %28, %cst_12 {dimension_numbers = #tpu.dot_dimension_numbers<[1], [0], [0], [1], [0, 0, 1, 1], [], []>} : vector<128x128xbf16>, vector<128x384xbf16>, vector<128x384xf32> -> vector<128x384xf32>
    %30 = vector.extract_strided_slice %29 {offsets = [0, 0], sizes = [128, 32], strides = [1, 1]} : vector<128x384xf32> to vector<128x32xf32>
    %31 = vector.extract_strided_slice %29 {offsets = [0, 32], sizes = [128, 32], strides = [1, 1]} : vector<128x384xf32> to vector<128x32xf32>
    %32 = vector.extract_strided_slice %29 {offsets = [0, 64], sizes = [128, 32], strides = [1, 1]} : vector<128x384xf32> to vector<128x32xf32>
    %33 = vector.extract_strided_slice %29 {offsets = [0, 96], sizes = [128, 32], strides = [1, 1]} : vector<128x384xf32> to vector<128x32xf32>
    %34 = vector.shape_cast %30 : vector<128x32xf32> to vector<1x128x32xf32>
    %35 = vector.shape_cast %31 : vector<128x32xf32> to vector<1x128x32xf32>
    %36 = vector.shape_cast %32 : vector<128x32xf32> to vector<1x128x32xf32>
    %37 = vector.shape_cast %33 : vector<128x32xf32> to vector<1x128x32xf32>
    %38 = tpu.concatenate %34, %35, %36, %37 in 0 : vector<1x128x32xf32>, vector<1x128x32xf32>, vector<1x128x32xf32>, vector<1x128x32xf32> -> vector<4x128x32xf32>
    %39 = arith.truncf %38 : vector<4x128x32xf32> to vector<4x128x32xbf16>
    %40 = vector.extract_strided_slice %29 {offsets = [0, 128], sizes = [128, 32], strides = [1, 1]} : vector<128x384xf32> to vector<128x32xf32>
    %41 = vector.extract_strided_slice %29 {offsets = [0, 160], sizes = [128, 32], strides = [1, 1]} : vector<128x384xf32> to vector<128x32xf32>
    %42 = vector.extract_strided_slice %29 {offsets = [0, 192], sizes = [128, 32], strides = [1, 1]} : vector<128x384xf32> to vector<128x32xf32>
    %43 = vector.extract_strided_slice %29 {offsets = [0, 224], sizes = [128, 32], strides = [1, 1]} : vector<128x384xf32> to vector<128x32xf32>
    %44 = vector.shape_cast %40 : vector<128x32xf32> to vector<1x128x32xf32>
    %45 = vector.shape_cast %41 : vector<128x32xf32> to vector<1x128x32xf32>
    %46 = vector.shape_cast %42 : vector<128x32xf32> to vector<1x128x32xf32>
    %47 = vector.shape_cast %43 : vector<128x32xf32> to vector<1x128x32xf32>
    %48 = tpu.concatenate %44, %45, %46, %47 in 0 : vector<1x128x32xf32>, vector<1x128x32xf32>, vector<1x128x32xf32>, vector<1x128x32xf32> -> vector<4x128x32xf32>
    %49 = arith.truncf %48 : vector<4x128x32xf32> to vector<4x128x32xbf16>
    %50 = vector.extract_strided_slice %29 {offsets = [0, 256], sizes = [128, 32], strides = [1, 1]} : vector<128x384xf32> to vector<128x32xf32>
    %51 = vector.extract_strided_slice %29 {offsets = [0, 288], sizes = [128, 32], strides = [1, 1]} : vector<128x384xf32> to vector<128x32xf32>
    %52 = vector.extract_strided_slice %29 {offsets = [0, 320], sizes = [128, 32], strides = [1, 1]} : vector<128x384xf32> to vector<128x32xf32>
    %53 = vector.extract_strided_slice %29 {offsets = [0, 352], sizes = [128, 32], strides = [1, 1]} : vector<128x384xf32> to vector<128x32xf32>
    %54 = vector.shape_cast %50 : vector<128x32xf32> to vector<1x128x32xf32>
    %55 = vector.shape_cast %51 : vector<128x32xf32> to vector<1x128x32xf32>
    %56 = vector.shape_cast %52 : vector<128x32xf32> to vector<1x128x32xf32>
    %57 = vector.shape_cast %53 : vector<128x32xf32> to vector<1x128x32xf32>
    %58 = tpu.concatenate %54, %55, %56, %57 in 0 : vector<1x128x32xf32>, vector<1x128x32xf32>, vector<1x128x32xf32>, vector<1x128x32xf32> -> vector<4x128x32xf32>
    %59 = arith.truncf %58 : vector<4x128x32xf32> to vector<4x128x32xbf16>
    "tpu.trace_start"() <{level = 10 : i32, message = "htf,hsf->hts"}> : () -> ()
    %cst_13 = arith.constant dense<0.000000e+00> : vector<4x128x128xf32>
    %60 = tpu.matmul %39, %49, %cst_13 {dimension_numbers = #tpu.dot_dimension_numbers<[2], [2], [1], [1], [0, 0, 0, 1, 1, 1], [0], [0]>} : vector<4x128x32xbf16>, vector<4x128x32xbf16>, vector<4x128x128xf32> -> vector<4x128x128xf32>
    "tpu.trace_stop"() : () -> ()
    %c0_14 = arith.constant 0 : index
    %c0_15 = arith.constant 0 : index
    %61 = vector.load %arg2[%c0_14, %c0_15] : memref<128x128xf32, #tpu.memory_space<vmem>>, vector<128x128xf32>
    %62 = vector.shape_cast %61 : vector<128x128xf32> to vector<1x128x128xf32>
    %63 = vector.broadcast %62 : vector<1x128x128xf32> to vector<4x128x128xf32>
    %64 = arith.addf %60, %63 : vector<4x128x128xf32>
    %cst_16 = arith.constant dense<0xFF800000> : vector<4x128xf32>
    %65 = vector.multi_reduction <maximumf>, %64, %cst_16 [2] : vector<4x128x128xf32> to vector<4x128xf32>
    %66 = vector.shape_cast %65 : vector<4x128xf32> to vector<4x128x1xf32>
    %67 = vector.broadcast %66 : vector<4x128x1xf32> to vector<4x128x128xf32>
    %68 = arith.subf %64, %67 : vector<4x128x128xf32>
    %69 = math.exp %68 : vector<4x128x128xf32>
    %cst_17 = arith.constant dense<0.000000e+00> : vector<4x128xf32>
    %70 = vector.multi_reduction <add>, %69, %cst_17 [2] : vector<4x128x128xf32> to vector<4x128xf32>
    %71 = vector.shape_cast %70 : vector<4x128xf32> to vector<4x128x1xf32>
    %72 = arith.truncf %69 : vector<4x128x128xf32> to vector<4x128x128xbf16>
    "tpu.trace_start"() <{level = 10 : i32, message = "hts,hsf->htf"}> : () -> ()
    %cst_18 = arith.constant dense<0.000000e+00> : vector<4x128x32xf32>
    %73 = tpu.matmul %72, %59, %cst_18 {dimension_numbers = #tpu.dot_dimension_numbers<[2], [1], [1], [2], [0, 0, 0, 1, 1, 2], [0], [0]>} : vector<4x128x128xbf16>, vector<4x128x32xbf16>, vector<4x128x32xf32> -> vector<4x128x32xf32>
    "tpu.trace_stop"() : () -> ()
    %74 = tpu.reciprocal %71 {approx = true} : vector<4x128x1xf32> -> vector<4x128x1xf32>
    %75 = vector.broadcast %74 : vector<4x128x1xf32> to vector<4x128x32xf32>
    %76 = arith.mulf %73, %75 : vector<4x128x32xf32>
    %77 = vector.extract_strided_slice %76 {offsets = [0, 0, 0], sizes = [1, 128, 32], strides = [1, 1, 1]} : vector<4x128x32xf32> to vector<1x128x32xf32>
    %78 = vector.shape_cast %77 : vector<1x128x32xf32> to vector<128x32xf32>
    %79 = vector.extract_strided_slice %76 {offsets = [1, 0, 0], sizes = [1, 128, 32], strides = [1, 1, 1]} : vector<4x128x32xf32> to vector<1x128x32xf32>
    %80 = vector.shape_cast %79 : vector<1x128x32xf32> to vector<128x32xf32>
    %81 = vector.extract_strided_slice %76 {offsets = [2, 0, 0], sizes = [1, 128, 32], strides = [1, 1, 1]} : vector<4x128x32xf32> to vector<1x128x32xf32>
    %82 = vector.shape_cast %81 : vector<1x128x32xf32> to vector<128x32xf32>
    %83 = vector.extract_strided_slice %76 {offsets = [3, 0, 0], sizes = [1, 128, 32], strides = [1, 1, 1]} : vector<4x128x32xf32> to vector<1x128x32xf32>
    %84 = vector.shape_cast %83 : vector<1x128x32xf32> to vector<128x32xf32>
    %85 = tpu.concatenate %78, %80, %82, %84 in 1 : vector<128x32xf32>, vector<128x32xf32>, vector<128x32xf32>, vector<128x32xf32> -> vector<128x128xf32>
    %86 = arith.truncf %85 : vector<128x128xf32> to vector<128x128xbf16>
    %c0_19 = arith.constant 0 : index
    %c0_20 = arith.constant 0 : index
    %87 = vector.load %arg6[%c0_19, %c0_20] : memref<128x128xbf16, #tpu.memory_space<vmem>>, vector<128x128xbf16>
    %cst_21 = arith.constant dense<0.000000e+00> : vector<128x128xf32>
    %88 = tpu.matmul %86, %87, %cst_21 {dimension_numbers = #tpu.dot_dimension_numbers<[1], [0], [0], [1], [0, 0, 1, 1], [], []>} : vector<128x128xbf16>, vector<128x128xbf16>, vector<128x128xf32> -> vector<128x128xf32>
    %89 = arith.addf %2, %88 : vector<128x128xf32>
    %c0_22 = arith.constant 0 : index
    %c0_23 = arith.constant 0 : index
    %90 = vector.load %arg7[%c0_22, %c0_23] : memref<1x128xf32, #tpu.memory_space<vmem>>, vector<1x128xf32>
    %91 = vector.broadcast %90 : vector<1x128xf32> to vector<128x128xf32>
    %92 = arith.addf %89, %91 : vector<128x128xf32>
    %c0_24 = arith.constant 0 : index
    %c0_25 = arith.constant 0 : index
    %93 = vector.load %arg8[%c0_24, %c0_25] : memref<1x128xf32, #tpu.memory_space<vmem>>, vector<1x128xf32>
    %c0_26 = arith.constant 0 : index
    %c0_27 = arith.constant 0 : index
    %94 = vector.load %arg9[%c0_26, %c0_27] : memref<1x128xf32, #tpu.memory_space<vmem>>, vector<1x128xf32>
    %cst_28 = arith.constant dense<0.000000e+00> : vector<128xf32>
    %95 = vector.multi_reduction <add>, %92, %cst_28 [1] : vector<128x128xf32> to vector<128xf32>
    %96 = vector.shape_cast %95 : vector<128xf32> to vector<128x1xf32>
    %cst_29 = arith.constant 1.280000e+02 : f32
    %97 = vector.broadcast %cst_29 : f32 to vector<128x1xf32>
    %98 = arith.divf %96, %97 : vector<128x1xf32>
    %99 = vector.broadcast %98 : vector<128x1xf32> to vector<128x128xf32>
    %100 = arith.subf %92, %99 : vector<128x128xf32>
    %101 = arith.mulf %100, %100 : vector<128x128xf32>
    %cst_30 = arith.constant dense<0.000000e+00> : vector<128xf32>
    %102 = vector.multi_reduction <add>, %101, %cst_30 [1] : vector<128x128xf32> to vector<128xf32>
    %103 = vector.shape_cast %102 : vector<128xf32> to vector<128x1xf32>
    %cst_31 = arith.constant 1.280000e+02 : f32
    %104 = vector.broadcast %cst_31 : f32 to vector<128x1xf32>
    %105 = arith.divf %103, %104 : vector<128x1xf32>
    %106 = vector.broadcast %98 : vector<128x1xf32> to vector<128x128xf32>
    %107 = arith.subf %92, %106 : vector<128x128xf32>
    %cst_32 = arith.constant 9.99999974E-6 : f32
    %108 = vector.broadcast %cst_32 : f32 to vector<128x1xf32>
    %109 = arith.addf %105, %108 : vector<128x1xf32>
    %110 = math.rsqrt %109 : vector<128x1xf32>
    %111 = vector.broadcast %110 : vector<128x1xf32> to vector<128x128xf32>
    %112 = arith.mulf %107, %111 : vector<128x128xf32>
    %113 = vector.broadcast %93 : vector<1x128xf32> to vector<128x128xf32>
    %114 = arith.mulf %113, %112 : vector<128x128xf32>
    %115 = vector.broadcast %94 : vector<1x128xf32> to vector<128x128xf32>
    %116 = arith.addf %114, %115 : vector<128x128xf32>
    %117 = arith.truncf %116 : vector<128x128xf32> to vector<128x128xbf16>
    %cst_33 = arith.constant 0.000000e+00 : f32
    %118 = vector.broadcast %cst_33 : f32 to vector<128x128xf32>
    %c0_34 = arith.constant 0 : index
    %c0_35 = arith.constant 0 : index
    %119 = vector.load %arg10[%c0_34, %c0_35] : memref<128x512xbf16, #tpu.memory_space<vmem>>, vector<128x512xbf16>
    %cst_36 = arith.constant dense<0.000000e+00> : vector<128x512xf32>
    %120 = tpu.matmul %117, %119, %cst_36 {dimension_numbers = #tpu.dot_dimension_numbers<[1], [0], [0], [1], [0, 0, 1, 1], [], []>} : vector<128x128xbf16>, vector<128x512xbf16>, vector<128x512xf32> -> vector<128x512xf32>
    %c0_37 = arith.constant 0 : index
    %c0_38 = arith.constant 0 : index
    %121 = vector.load %arg11[%c0_37, %c0_38] : memref<1x512xf32, #tpu.memory_space<vmem>>, vector<1x512xf32>
    %122 = vector.broadcast %121 : vector<1x512xf32> to vector<128x512xf32>
    %123 = arith.addf %120, %122 : vector<128x512xf32>
    %cst_39 = arith.constant 5.000000e-01 : f32
    %124 = vector.broadcast %cst_39 : f32 to vector<128x512xf32>
    %125 = arith.mulf %124, %123 : vector<128x512xf32>
    %126 = arith.mulf %123, %123 : vector<128x512xf32>
    %127 = arith.mulf %126, %123 : vector<128x512xf32>
    %cst_40 = arith.constant 4.471500e-02 : f32
    %128 = vector.broadcast %cst_40 : f32 to vector<128x512xf32>
    %129 = arith.mulf %128, %127 : vector<128x512xf32>
    %130 = arith.addf %123, %129 : vector<128x512xf32>
    %cst_41 = arith.constant 0.797884583 : f32
    %131 = vector.broadcast %cst_41 : f32 to vector<128x512xf32>
    %132 = arith.mulf %131, %130 : vector<128x512xf32>
    %133 = math.tanh %132 : vector<128x512xf32>
    %cst_42 = arith.constant 1.000000e+00 : f32
    %134 = vector.broadcast %cst_42 : f32 to vector<128x512xf32>
    %135 = arith.addf %134, %133 : vector<128x512xf32>
    %136 = arith.mulf %125, %135 : vector<128x512xf32>
    %137 = arith.truncf %136 : vector<128x512xf32> to vector<128x512xbf16>
    %c0_43 = arith.constant 0 : index
    %c0_44 = arith.constant 0 : index
    %138 = vector.load %arg12[%c0_43, %c0_44] : memref<512x128xbf16, #tpu.memory_space<vmem>>, vector<512x128xbf16>
    %cst_45 = arith.constant dense<0.000000e+00> : vector<128x128xf32>
    %139 = tpu.matmul %137, %138, %cst_45 {dimension_numbers = #tpu.dot_dimension_numbers<[1], [0], [0], [1], [0, 0, 1, 1], [], []>} : vector<128x512xbf16>, vector<512x128xbf16>, vector<128x128xf32> -> vector<128x128xf32>
    %140 = arith.addf %118, %139 : vector<128x128xf32>
    %141 = arith.addf %92, %140 : vector<128x128xf32>
    %c0_46 = arith.constant 0 : index
    %c0_47 = arith.constant 0 : index
    %142 = vector.load %arg13[%c0_46, %c0_47] : memref<1x128xf32, #tpu.memory_space<vmem>>, vector<1x128xf32>
    %143 = vector.broadcast %142 : vector<1x128xf32> to vector<128x128xf32>
    %144 = arith.addf %141, %143 : vector<128x128xf32>
    %145 = arith.truncf %144 : vector<128x128xf32> to vector<128x128xbf16>
    %c0_48 = arith.constant 0 : index
    %c0_49 = arith.constant 0 : index
    %c0_50 = arith.constant 0 : index
    %146 = vector.load %arg14[%c0_48, %c0_49, %c0_50] : memref<1x128x128xbf16, #tpu.memory_space<vmem>>, vector<1x128x128xbf16>
    %147 = vector.shape_cast %146 : vector<1x128x128xbf16> to vector<128x128xbf16>
    %148 = vector.shape_cast %145 : vector<128x128xbf16> to vector<1x128x128xbf16>
    tpu.vector_store %arg14[%c0_48, %c0_49, %c0_50], %148 {strides = array<i32>} : memref<1x128x128xbf16, #tpu.memory_space<vmem>>, vector<1x128x128xbf16>,
    return
  }
  func.func @transform_0(%arg0: i32) -> (i32, i32, i32) {
    %c0_i32 = arith.constant 0 : i32
    %c0_i32_0 = arith.constant 0 : i32
    %c0_i32_1 = arith.constant 0 : i32
    return %arg0, %c0_i32, %c0_i32_0 : i32, i32, i32
  }
  func.func @transform_1(%arg0: i32) -> (i32, i32) {
    %c0_i32 = arith.constant 0 : i32
    %c0_i32_0 = arith.constant 0 : i32
    %c0_i32_1 = arith.constant 0 : i32
    return %c0_i32, %c0_i32_0 : i32, i32
  }
  func.func @transform_2(%arg0: i32) -> (i32, i32) {
    %c0_i32 = arith.constant 0 : i32
    %c0_i32_0 = arith.constant 0 : i32
    %c0_i32_1 = arith.constant 0 : i32
    return %c0_i32, %c0_i32_0 : i32, i32
  }
  func.func @transform_3(%arg0: i32) -> (i32, i32) {
    %c0_i32 = arith.constant 0 : i32
    %c0_i32_0 = arith.constant 0 : i32
    %c0_i32_1 = arith.constant 0 : i32
    return %c0_i32, %c0_i32_0 : i32, i32
  }
  func.func @transform_4(%arg0: i32) -> (i32, i32) {
    %c0_i32 = arith.constant 0 : i32
    %c0_i32_0 = arith.constant 0 : i32
    %c0_i32_1 = arith.constant 0 : i32
    return %c0_i32, %c0_i32_0 : i32, i32
  }
  func.func @transform_5(%arg0: i32) -> (i32, i32) {
    %c0_i32 = arith.constant 0 : i32
    %c0_i32_0 = arith.constant 0 : i32
    %c0_i32_1 = arith.constant 0 : i32
    return %c0_i32, %c0_i32_0 : i32, i32
  }
  func.func @transform_6(%arg0: i32) -> (i32, i32) {
    %c0_i32 = arith.constant 0 : i32
    %c0_i32_0 = arith.constant 0 : i32
    %c0_i32_1 = arith.constant 0 : i32
    return %c0_i32, %c0_i32_0 : i32, i32
  }
  func.func @transform_7(%arg0: i32) -> (i32, i32) {
    %c0_i32 = arith.constant 0 : i32
    %c0_i32_0 = arith.constant 0 : i32
    %c0_i32_1 = arith.constant 0 : i32
    return %c0_i32, %c0_i32_0 : i32, i32
  }
  func.func @transform_8(%arg0: i32) -> (i32, i32) {
    %c0_i32 = arith.constant 0 : i32
    %c0_i32_0 = arith.constant 0 : i32
    %c0_i32_1 = arith.constant 0 : i32
    return %c0_i32, %c0_i32_0 : i32, i32
  }
  func.func @transform_9(%arg0: i32) -> (i32, i32) {
    %c0_i32 = arith.constant 0 : i32
    %c0_i32_0 = arith.constant 0 : i32
    %c0_i32_1 = arith.constant 0 : i32
    return %c0_i32, %c0_i32_0 : i32, i32
  }
  func.func @transform_10(%arg0: i32) -> (i32, i32) {
    %c0_i32 = arith.constant 0 : i32
    %c0_i32_0 = arith.constant 0 : i32
    %c0_i32_1 = arith.constant 0 : i32
    return %c0_i32, %c0_i32_0 : i32, i32
  }
  func.func @transform_11(%arg0: i32) -> (i32, i32) {
    %c0_i32 = arith.constant 0 : i32
    %c0_i32_0 = arith.constant 0 : i32
    %c0_i32_1 = arith.constant 0 : i32
    return %c0_i32, %c0_i32_0 : i32, i32
  }
  func.func @transform_12(%arg0: i32) -> (i32, i32) {
    %c0_i32 = arith.constant 0 : i32
    %c0_i32_0 = arith.constant 0 : i32
    %c0_i32_1 = arith.constant 0 : i32
    return %c0_i32, %c0_i32_0 : i32, i32
  }
  func.func @transform_13(%arg0: i32) -> (i32, i32, i32) {
    %c0_i32 = arith.constant 0 : i32
    %c0_i32_0 = arith.constant 0 : i32
    %c0_i32_1 = arith.constant 0 : i32
    return %arg0, %c0_i32, %c0_i32_0 : i32, i32, i32
  }
}

</mosaic_0001>

<bundles_post_ra>
// kernel: tpu_custom_call.1
= control target key start
LH: loop header
LB: loop body
LE: loop exit
PB: predicated region body
PF: predicated region fallthrough
CT: control target
= control target key end

     0   :  { %6 = vsyncpa [#allocation3], 0  ;;  %s340_s0 = inlined_call_operand.hbm [shape: f32[8,128], index: 0, kind: input, shape index: {}]   ;;  %s341_s1 = inlined_call_operand.hbm [shape: f32[8,128], index: 1, kind: output, shape index: {}]  }
   0x1   :  { %7 = vsyncpa [#allocation4], 0  ;;  %s261_s6 = smov 0  }
   0x2 LB: > { %s144_s7 = sadd.s32 4294967295, %s247_s6   ;;  %p145_p0 = scmp.ge.s32.totalorder %s247_s6, 1  ;;  %s247_s6 = sphi %s261_s6, %s13_s6  }
   0x3   : > { %p60_p1 = scmp.lt.s32.totalorder %s247_s6, 3  ;;  %p275_p3 = scmp.eq.s32.totalorder %s144_s7, 0 }
   0x4   : > { %s249_s10 = smov [#allocation2]   ;;  %s179_s15 = scalar_lea.hbm %s340_s0, 128 }
   0x5   : > { %p269_p2 = pnand %p145_p0, %p60_p1  ;;  %s73_s11 = sshll.u32 %s249_s10, 4  ;;  %s74_s11 = int_to_ptr.vmem [resolvable:$true] %s73_s11 }
   0x6   : > { %s346_s9 = scalar_select %p275_p3, 1, 0 }
   0x7   : > { %s345_s8 = scalar_select %p269_p2, 1, 0 }
   0x8   : > { %p161_p4 = pneg %p269_p2  ;;  %p180_p6 = scmp.ne.s32.totalorder %s340_s0, %s179_s15 }
   0x9   : > { %p186_p10 = scmp.lt.u32.totalorder %s179_s15, %s340_s0 }
   0xa   : > { %p283_p5 = pnand %p275_p3, %p161_p4 }
   0xc   : > { %p181_p7 = pneg %p283_p5 }
   0xe   : > { %p182_p8 = pnand %p181_p7, %p180_p6 }
  0x10   : > { %p183_p9 = pneg %p182_p8 }
  0x12   : > { %p188_p11 = pnand %p186_p10, %p183_p9 }
  0x14   : > { %191 = shalt.err (!%p188_p11)
}
  0x15   : > { %s192_s20 = scalar_lea.vmem %s74_s11, 128  ;;  %p200_p1 = scmp.lt.s32.totalorder %s74_s11, %s74_s11 }
  0x16   : > { %p193_p12 = scmp.ne.s32.totalorder %s74_s11, %s192_s20  ;;  %p201_p4 = scmp.lt.s32.totalorder %s192_s20, %s192_s20 }
  0x18   : > { %p195_p13 = pnand %p193_p12, %p181_p7  ;;  %p202_p3 = por %p201_p4, %p200_p1 }
  0x1a   : > { %p196_p0 = pneg %p195_p13 }
  0x1c   : > { %p203_p2 = pnand %p202_p3, %p196_p0 }
  0x1e   : > { %206 = shalt.err (!%p203_p2)
}
  0x1f   : > { %164 = dma.hbm_to_vmem [thread:$0]  (!%p283_p5), %s340_s0, 128, %s74_s11, [#allocation3]  }
  0x20   : > { %p348_p6 = scmp.ne.s32.totalorder %s345_s8, 0 }
  0x21   : > { %p349_p8 = scmp.ne.s32.totalorder (!%p348_p6), %s346_s9, 0 }
  0x22   : > { %86 = sbr.rel (%p348_p6) target bundleno = 67 (0x43), region = 24 }
  0x29   : > { %238 = dma.done.wait (%p349_p8), [#allocation3], 128  }
  0x2a   : > { %240 = vsyncadd (%p349_p8), [#allocation3], 4294967168  ;;  %s250_s23 = smov [#allocation5]   ;;  %p311_p2 = scmp.eq.s32.totalorder %s144_s7, 1  ;;  %v96_v0 = vld [vmem:[#allocation2] sm:$0xff] }
  0x2b   : > { %s105_s24 = sshll.u32 %s250_s23, 4  ;;  %97 = vst [vmem:[#allocation5] sm:$0xff] %v96_v0  ;;  %s106_s24 = int_to_ptr.vmem [resolvable:$true] %s105_s24 }
  0x2c   : > { %s207_s26 = scalar_lea.vmem %s106_s24, 128  ;;  %p214_p9 = scmp.lt.s32.totalorder %s106_s24, %s106_s24 }
  0x2d   : > { %p208_p3 = scmp.ne.s32.totalorder %s106_s24, %s207_s26  ;;  %p215_p10 = scmp.lt.s32.totalorder %s207_s26, %s207_s26 }
  0x2f   : > { %p209_p5 = pnand %p208_p3, %p311_p2  ;;  %p216_p11 = por %p215_p10, %p214_p9 }
  0x31   : > { %p210_p7 = pneg %p209_p5 }
  0x33   : > { %p217_p12 = pnand %p216_p11, %p210_p7 }
  0x35   : > { %220 = shalt.err (!%p217_p12)
}
  0x36   : > { %s221_s29 = scalar_lea.hbm %s341_s1, 128 }
  0x37   : > { %p222_p13 = scmp.ne.s32.totalorder %s341_s1, %s221_s29  ;;  %p227_p4 = scmp.lt.u32.totalorder %s221_s29, %s341_s1 }
  0x39   : > { %p223_p0 = pnand %p222_p13, %p311_p2 }
  0x3b   : > { %p224_p1 = pneg %p223_p0 }
  0x3d   : > { %p229_p6 = pnand %p227_p4, %p224_p1 }
  0x3f   : > { %232 = shalt.err (!%p229_p6)
}
  0x40   : > { %158 = dma.vmem_to_hbm [thread:$0]  (%p311_p2), %s106_s24, 128, %s341_s1, [#allocation4]  }
  0x41   : > { %242 = dma.done.wait (%p311_p2), [#allocation4], 128  }
  0x42   : > { %244 = vsyncadd (%p311_p2), [#allocation4], 4294967168 }
  0x43 PF: > { %s13_s6 = sadd.s32 1, %s247_s6  }
  0x44   : > { %p10_p8 = scmp.ge.s32.totalorder %s13_s6, 4  }
  0x46   :  { %12 = sbr.rel (!%p10_p8) target bundleno = 2 (0x2), region = 53 }
  0x4d   :  { %118 = vsyncpa [#allocation3], 1 }
  0x4e   :  { %120 = vsyncpa [#allocation3 + $0x1], 1 }
  0x4f   :  { %121 = vsyncpa [#allocation4], 1 }
  0x50   :  { %123 = vsyncpa [#allocation4 + $0x1], 1 }

// kernel: tpu_custom_call.1
= control target key start
LH: loop header
LB: loop body
LE: loop exit
PB: predicated region body
PF: predicated region fallthrough
CT: control target
= control target key end

     0   :  { %s11034_s0 = inlined_call_operand.hbm [shape: bf16[2,128,128], index: 0, kind: input, shape index: {}]   ;;  %s11035_s1 = inlined_call_operand.hbm [shape: f32[128,128], index: 1, kind: input, shape index: {}]   ;;  %s11036_s2 = inlined_call_operand.vmem [shape: f32[1,128], index: 2, kind: input, shape index: {}]   ;;  %s11037_s3 = inlined_call_operand.vmem [shape: f32[1,128], index: 3, kind: input, shape index: {}]   ;;  %s11038_s4 = inlined_call_operand.hbm [shape: bf16[128,384], index: 4, kind: input, shape index: {}]   ;;  %s11039_s5 = inlined_call_operand.hbm [shape: bf16[128,128], index: 5, kind: input, shape index: {}]   ;;  %s11040_s6 = inlined_call_operand.vmem [shape: f32[1,128], index: 6, kind: input, shape index: {}]   ;;  %s11041_s7 = inlined_call_operand.vmem [shape: f32[1,128], index: 7, kind: input, shape index: {}]   ;;  %s11042_s8 = inlined_call_operand.vmem [shape: f32[1,128], index: 8, kind: input, shape index: {}]   ;;  %s11043_s9 = inlined_call_operand.hbm [shape: bf16[128,512], index: 9, kind: input, shape index: {}]   ;;  %s11044_s10 = inlined_call_operand.vmem [shape: f32[1,512], index: 10, kind: input, shape index: {}]   ;;  %s11045_s11 = inlined_call_operand.hbm [shape: bf16[512,128], index: 11, kind: input, shape index: {}]   ;;  %s11046_s12 = inlined_call_operand.vmem [shape: f32[1,128], index: 12, kind: input, shape index: {}]   ;;  %s11047_s13 = inlined_call_operand.hbm [shape: bf16[2,128,128], index: 13, kind: output, shape index: {}]  }
   0x1   :  { %11130 = sst [smem:[#allocation63_spill]] %s11035_s1 }
   0x2   :  { %11131 = sst [smem:[#allocation64_spill]] %s11038_s4 }
   0x3   :  { %11132 = sst [smem:[#allocation65_spill]] %s11041_s7 }
   0x4   :  { %11133 = sst [smem:[#allocation66_spill]] %s11042_s8 }
   0x5   :  { %11134 = sst [smem:[#allocation67_spill]] %s11044_s10 }
   0x6   :  { %11135 = sst [smem:[#allocation68_spill]] %s11046_s12 }
   0x7   :  { %11136 = sst [smem:[#allocation69_spill]] %s11047_s13 }
   0x8   :  { %18 = vsyncpa [#allocation3], 0 }
   0x9   :  { %20 = vsyncpa [#allocation3 + $0x1], 0 }
   0xa   :  { %21 = vsyncpa [#allocation6], 0 }
   0xb   :  { %22 = vsyncpa [#allocation9], 0 }
   0xc   :  { %23 = vsyncpa [#allocation12], 0 }
   0xd   :  { %24 = vsyncpa [#allocation4], 0 }
   0xe   :  { %26 = vsyncpa [#allocation4 + $0x1], 0  ;;  %s8199_s25 = smov 0   ;;  %s8201_s26 = smov 0  }
   0xf   :  { %s8203_s27 = smov 0   ;;  %s8205_s28 = smov 0  }
  0x10 LB: > { %s8109_s29 = smov [#allocation5]   ;;  %s8220_s14 = sadd.s32 4294967295, %s8107_s28   ;;  %s8107_s28 = sphi %s8205_s28, %s11341_s28   ;;  %s8103_s27 = sphi %s8203_s27, %s11340_s27   ;;  %s8099_s26 = sphi %s8201_s26, %s11339_s26   ;;  %s8095_s25 = sphi %s8199_s25, %s11338_s25  }
  0x11   : > { %s353_s30 = sshll.u32 %s8109_s29, 4  ;;  %p5768_p0 = scmp.ge.s32.totalorder %s8107_s28, 1  ;;  %s8225_s30 = int_to_ptr.vmem [resolvable:$true] %s353_s30 }
  0x12   : > { %p11049_p1 = scmp.eq.s32.totalorder %s8220_s14, 0  ;;  %p341_p2 = scmp.lt.s32.totalorder %s8107_s28, 3 }
  0x13   : > { %s8110_s16 = smov [#allocation8]   ;;  %s8111_s19 = smov [#allocation7]  }
  0x14   : > { %p8227_p3 = pnand %p5768_p0, %p341_p2  ;;  %s385_s17 = sshll.u32 %s8110_s16, 4  ;;  %s8240_s17 = int_to_ptr.vmem [resolvable:$true] %s385_s17 }
  0x15   : > { %s8242_s20 = sshll.u32 %s8111_s19, 4  ;;  %s11139_s1 = sld [smem:[#allocation63_spill]]  ;;  %s373_s20 = int_to_ptr.vmem [resolvable:$true] %s8242_s20 }
  0x16   : > { %s11137_s15 = scalar_select %p8227_p3, 1, 0 }
  0x17   : > { %p6725_p5 = pneg %p8227_p3 }
  0x19   : > { %p8236_p6 = pnand %p6725_p5, %p11049_p1 }
  0x1b   : > { %s7859_s23 = scalar_lea.hbm %s11139_s1, 2048  ;;  %p8252_p8 = pneg %p8236_p6 }
  0x1c   : > { %p7860_p7 = scmp.ne.s32.totalorder %s11139_s1, %s7859_s23  ;;  %p7866_p11 = scmp.lt.u32.totalorder %s7859_s23, %s11139_s1 }
  0x1e   : > { %p7862_p9 = pnand %p8252_p8, %p7860_p7 }
  0x20   : > { %p7863_p10 = pneg %p7862_p9 }
  0x22   : > { %p7868_p12 = pnand %p7866_p11, %p7863_p10 }
  0x24   : > { %7871 = shalt.err (!%p7868_p12)
}
  0x25   : > { %s7872_s21 = scalar_lea.vmem %s8225_s30, 2048  ;;  %p7880_p5 = scmp.lt.s32.totalorder %s8225_s30, %s8225_s30 }
  0x26   : > { %p7873_p13 = scmp.ne.s32.totalorder %s8225_s30, %s7872_s21  ;;  %p7881_p4 = scmp.lt.s32.totalorder %s7872_s21, %s7872_s21 }
  0x28   : > { %p7875_p0 = pnand %p7873_p13, %p8252_p8  ;;  %p7882_p7 = por %p7881_p4, %p7880_p5 }
  0x2a   : > { %p7876_p2 = pneg %p7875_p0 }
  0x2c   : > { %p7883_p9 = pnand %p7882_p7, %p7876_p2 }
  0x2e   : > { %7886 = shalt.err (!%p7883_p9)
}
  0x2f   : > { %s8112_s22 = smov 128   ;;  %s8113_s13 = smov 8  }
  0x30   : > { %6728 = dma.hbm_to_vmem [thread:$0]  (!%p8236_p6), %s11139_s1, 2048, %s8225_s30, [#allocation6], %s8112_s22, %s8112_s22, %s8113_s13  }
  0x31   : > { %s7887_s12 = scalar_lea.hbm %s11039_s5, 1024 }
  0x32   : > { %p7888_p4 = scmp.ne.s32.totalorder %s11039_s5, %s7887_s12  ;;  %p7894_p12 = scmp.lt.u32.totalorder %s7887_s12, %s11039_s5 }
  0x34   : > { %p7890_p10 = pnand %p7888_p4, %p8252_p8 }
  0x36   : > { %p7891_p11 = pneg %p7890_p10 }
  0x38   : > { %p7896_p13 = pnand %p7894_p12, %p7891_p11 }
  0x3a   : > { %7899 = shalt.err (!%p7896_p13)
}
  0x3b   : > { %s7900_s30 = scalar_lea.vmem %s8240_s17, 1024  ;;  %p7908_p7 = scmp.lt.s32.totalorder %s8240_s17, %s8240_s17 }
  0x3c   : > { %p7901_p0 = scmp.ne.s32.totalorder %s8240_s17, %s7900_s30  ;;  %p7909_p9 = scmp.lt.s32.totalorder %s7900_s30, %s7900_s30 }
  0x3e   : > { %p7903_p2 = pnand %p7901_p0, %p8252_p8  ;;  %p7910_p4 = por %p7909_p9, %p7908_p7 }
  0x40   : > { %p7904_p5 = pneg %p7903_p2 }
  0x42   : > { %p7911_p10 = pnand %p7910_p4, %p7904_p5 }
  0x44   : > { %7914 = shalt.err (!%p7911_p10)
}
  0x45   : > { %s11051_s8 = smov 64   ;;  %s11053_s7 = smov 4  }
  0x46   : > { %6734 = dma.hbm_to_vmem [thread:$0]  (!%p8236_p6), %s11039_s5, 1024, %s8240_s17, [#allocation9], %s11051_s8, %s11051_s8, %s11053_s7  }
  0x47   : > { %s11141_s4 = sld [smem:[#allocation64_spill]] }
  0x4d   : > { %s7915_s23 = scalar_lea.hbm %s11141_s4, 3072 }
  0x4e   : > { %p7916_p11 = scmp.ne.s32.totalorder %s11141_s4, %s7915_s23  ;;  %p7922_p0 = scmp.lt.u32.totalorder %s7915_s23, %s11141_s4 }
  0x50   : > { %p7918_p12 = pnand %p7916_p11, %p8252_p8 }
  0x52   : > { %p7919_p13 = pneg %p7918_p12 }
  0x54   : > { %p7924_p2 = pnand %p7922_p0, %p7919_p13 }
  0x56   : > { %7927 = shalt.err (!%p7924_p2)
}
  0x57   : > { %s7928_s30 = scalar_lea.vmem %s373_s20, 3072  ;;  %p7936_p4 = scmp.lt.s32.totalorder %s373_s20, %s373_s20 }
  0x58   : > { %p7929_p5 = scmp.ne.s32.totalorder %s373_s20, %s7928_s30  ;;  %p7937_p10 = scmp.lt.s32.totalorder %s7928_s30, %s7928_s30 }
  0x5a   : > { %p7931_p7 = pnand %p7929_p5, %p8252_p8  ;;  %p7938_p1 = por %p7937_p10, %p7936_p4 }
  0x5c   : > { %p7932_p9 = pneg %p7931_p7 }
  0x5e   : > { %p7939_p3 = pnand %p7938_p1, %p7932_p9 }
  0x60   : > { %7942 = shalt.err (!%p7939_p3)
}
  0x61   : > { %s8116_s17 = smov 192   ;;  %s8117_s10 = smov 12  }
  0x62   : > { %6731 = dma.hbm_to_vmem [thread:$0]  (!%p8236_p6), %s11141_s4, 3072, %s373_s20, [#allocation6], %s8116_s17, %s8116_s17, %s8117_s10  }
  0x63   : > { %s8118_s13 = smov [#allocation10]   ;;  %s7943_s19 = scalar_lea.hbm %s11043_s9, 4096 }
  0x64   : > { %s407_s23 = sshll.u32 %s8118_s13, 4  ;;  %p7944_p1 = scmp.ne.s32.totalorder %s11043_s9, %s7943_s19  ;;  %s408_s23 = int_to_ptr.vmem [resolvable:$true] %s407_s23 }
  0x65   : > { %p7950_p12 = scmp.lt.u32.totalorder %s7943_s19, %s11043_s9 }
  0x66   : > { %p7946_p3 = pnand %p7944_p1, %p8252_p8 }
  0x68   : > { %p7947_p11 = pneg %p7946_p3 }
  0x6a   : > { %p7952_p13 = pnand %p7950_p12, %p7947_p11 }
  0x6c   : > { %7955 = shalt.err (!%p7952_p13)
}
  0x6d   : > { %s7956_s20 = scalar_lea.vmem %s408_s23, 4096  ;;  %p7964_p7 = scmp.lt.s32.totalorder %s408_s23, %s408_s23 }
  0x6e   : > { %p7957_p0 = scmp.ne.s32.totalorder %s408_s23, %s7956_s20  ;;  %p7965_p9 = scmp.lt.s32.totalorder %s7956_s20, %s7956_s20 }
  0x70   : > { %p7959_p2 = pnand %p7957_p0, %p8252_p8  ;;  %p7966_p4 = por %p7965_p9, %p7964_p7 }
  0x72   : > { %p7960_p5 = pneg %p7959_p2 }
  0x74   : > { %p7967_p10 = pnand %p7966_p4, %p7960_p5 }
  0x76   : > { %7970 = shalt.err (!%p7967_p10)
}
  0x77   : > { %s8119_s17 = smov 256   ;;  %s8120_s10 = smov 16  }
  0x78   : > { %6737 = dma.hbm_to_vmem [thread:$0]  (!%p8236_p6), %s11043_s9, 4096, %s408_s23, [#allocation9], %s8119_s17, %s8119_s17, %s8120_s10  }
  0x79   : > { %s8121_s12 = smov [#allocation11]   ;;  %s7971_s29 = scalar_lea.hbm %s11045_s11, 4096 }
  0x7a   : > { %s423_s22 = sshll.u32 %s8121_s12, 4  ;;  %p7972_p1 = scmp.ne.s32.totalorder %s11045_s11, %s7971_s29  ;;  %s424_s22 = int_to_ptr.vmem [resolvable:$true] %s423_s22 }
  0x7b   : > { %p7978_p12 = scmp.lt.u32.totalorder %s7971_s29, %s11045_s11 }
  0x7c   : > { %p7974_p3 = pnand %p7972_p1, %p8252_p8 }
  0x7e   : > { %p7975_p11 = pneg %p7974_p3 }
  0x80   : > { %p7980_p13 = pnand %p7978_p12, %p7975_p11 }
  0x82   : > { %7983 = shalt.err (!%p7980_p13)
}
  0x83   : > { %s7984_s23 = scalar_lea.vmem %s424_s22, 4096  ;;  %p7992_p7 = scmp.lt.s32.totalorder %s424_s22, %s424_s22 }
  0x84   : > { %p7985_p0 = scmp.ne.s32.totalorder %s424_s22, %s7984_s23  ;;  %p7993_p9 = scmp.lt.s32.totalorder %s7984_s23, %s7984_s23 }
  0x86   : > { %p7987_p2 = pnand %p7985_p0, %p8252_p8  ;;  %p7994_p4 = por %p7993_p9, %p7992_p7 }
  0x88   : > { %p7988_p5 = pneg %p7987_p2 }
  0x8a   : > { %p7995_p10 = pnand %p7994_p4, %p7988_p5 }
  0x8c   : > { %7998 = shalt.err (!%p7995_p10)
}
  0x8d   : > { %s11142_s17 = smov 4   ;;  %s11143_s10 = smov 64  }
  0x8e   : > { %6740 = dma.hbm_to_vmem [thread:$0]  (!%p8236_p6), %s11045_s11, 4096, %s424_s22, [#allocation12], %s11143_s10, %s11143_s10, %s11142_s17  }
  0x8f   : > { %s5767_s18 = sadd.s32 4294967294, %s8107_s28   ;;  %s8359_s16 = sadd.s32 1, %s8107_s28  }
  0x90   : > { %s39_s12 = sadd.s32 1, %s8103_s27  ;;  %s36_s13 = ssub.s32 %s8107_s28, %s8359_s16 }
  0x91   : > { %p46_p8 = scmp.ne.s32.totalorder %s8103_s27, %s8099_s26  ;;  %p37_p1 = scmp.eq.s32.totalorder %s36_s13, 0 }
  0x92   : > { %p47_p3 = scmp.eq.s32.totalorder %s8107_s28, 0  ;;  %p52_p11 = scmp.ne.s32.totalorder %s8099_s26, %s8095_s25 }
  0x93   : > { %p328_p12 = scmp.eq.s32.totalorder %s8220_s14, 1  ;;  %p11144_p0 = scmp.eq.s32.totalorder %s8220_s14, 0 }
  0x94   : > { %s8371_s24 = scalar_select %p37_p1, %s8103_s27, %s39_s12  }
  0x95   : > { %p48_p13 = por %p47_p3, %p46_p8  ;;  %p8375_p2 = por %p11144_p0, %p52_p11 }
  0x96   : > { %p8379_p6 = por %p328_p12, %p46_p8  ;;  %p334_p5 = scmp.eq.s32.totalorder %s5767_s18, 1 }
  0x97   : > { %p6754_p7 = scmp.lt.s32.totalorder %s8107_s28, 2  ;;  %s440_s19 = sand.u32 1, %s8103_s27  }
  0x98   : > { %s11146_s22 = scalar_select %p8379_p6, 1, 0 }
  0x99   : > { %p8385_p9 = por %p334_p5, %p52_p11  ;;  %s5775_s30 = sshll.u32 %s440_s19, 6 }
  0x9a   : > { %s5941_s20 = sshll.u32 %s8107_s28, 10  ;;  %s444_s12 = scalar_lea.vmem [#allocation2], %s5775_s30 }
  0x9b   : > { %s11147_s21 = scalar_select %p8385_p9, 1, 0 }
  0x9c   : > { %s8393_s7 = scalar_lea.hbm %s11034_s0, %s5941_s20  ;;  %s451_s13 = sshll.u32 %s444_s12, 4  ;;  %s8399_s13 = int_to_ptr.vmem [resolvable:$true] %s451_s13 }
  0x9d   : > { %p8395_p4 = pnand %p6754_p7, %p48_p13  ;;  %s8401_s1 = scalar_lea.sflag [#allocation3], %s440_s19 }
  0x9e   : > { %s7999_s4 = scalar_lea.hbm %s8393_s7, 1024  ;;  %s8004_s23 = scalar_lea.hbm %s11034_s0, 2048 }
  0x9f   : > { %p8000_p10 = scmp.ne.s32.totalorder %s8393_s7, %s7999_s4  ;;  %p8001_p8 = pneg %p8395_p4 }
  0xa0   : > { %p8005_p11 = scmp.lt.u32.totalorder %s8393_s7, %s11034_s0  ;;  %p8006_p12 = scmp.lt.u32.totalorder %s8004_s23, %s7999_s4 }
  0xa1   : > { %p8002_p1 = pnand %p8001_p8, %p8000_p10  ;;  %p8008_p0 = scmp.lt.u32.totalorder %s7999_s4, %s8393_s7 }
  0xa2   : > { %p8007_p13 = por %p8006_p12, %p8005_p11 }
  0xa3   : > { %p8003_p3 = pneg %p8002_p1 }
  0xa4   : > { %p8009_p5 = por %p8008_p0, %p8007_p13 }
  0xa6   : > { %p8010_p7 = pnand %p8009_p5, %p8003_p3 }
  0xa8   : > { %8013 = shalt.err (!%p8010_p7)
}
  0xa9   : > { %s8014_s19 = scalar_lea.vmem %s8399_s13, 1024  ;;  %s8122_s30 = smov [#allocation2]  }
  0xaa   : > { %p8015_p10 = scmp.ne.s32.totalorder %s8399_s13, %s8014_s19  ;;  %s8019_s20 = sshll.u32 %s8122_s30, 4  ;;  %s8020_s20 = int_to_ptr.vmem [resolvable:$false] %s8019_s20 }
  0xab   : > { %s8021_s8 = scalar_lea.vmem %s8020_s20, 2048  ;;  %p8022_p6 = scmp.lt.s32.totalorder %s8399_s13, %s8020_s20 }
  0xac   : > { %p8017_p1 = pnand %p8015_p10, %p8001_p8  ;;  %p8023_p11 = scmp.lt.s32.totalorder %s8021_s8, %s8014_s19 }
  0xae   : > { %p8018_p9 = pneg %p8017_p1  ;;  %p8024_p12 = por %p8023_p11, %p8022_p6 }
  0xb0   : > { %p8025_p13 = pnand %p8024_p12, %p8018_p9 }
  0xb2   : > { %8028 = shalt.err (!%p8025_p13)
}
  0xb3   : > { %6744 = dma.hbm_to_vmem [thread:$0]  (!%p8395_p4), %s8393_s7, 1024, %s8399_s13, %s8401_s1, %s11143_s10, %s11143_s10, %s11142_s17  }
  0xb4   : > { %p11149_p8 = scmp.ne.s32.totalorder %s11137_s15, 0 }
  0xb6   : > { %463 = sbr.rel (%p11149_p8) target bundleno = 2972 (0xb9c), region = 72 }
  0xbd   : > { %s8435_s4 = sand.u32 1, %s8099_s26  }
  0xbe   : > { %s5779_s23 = sshll.u32 %s8435_s4, 6  ;;  %s466_s12 = scalar_lea.sflag [#allocation3], %s8435_s4 }
  0xbf   : > { %s8441_s18 = scalar_lea.vmem [#allocation2], %s5779_s23 }
  0xc0   : > { %8074 = dma.done.wait (%p8375_p2), %s466_s12, 1024  }
  0xc1   : > { %8076 = vsyncadd (%p8375_p2), %s466_s12, 4294966272  ;;  %p11150_p6 = scmp.eq.s32.totalorder %s8220_s14, 0 }
  0xc3   : > { %8078 = dma.done.wait (%p11150_p6), [#allocation6], 5120   ;;  %p11151_p9 = pmov %p11150_p6 }
  0xc4   : > { %p11152_p4 = pmov %p11150_p6 }
  0xc5   : > { %8080 = vsyncadd (%p11151_p9), [#allocation6], 4294962176 }
  0xc6   : > { %8082 = dma.done.wait (%p11152_p4), [#allocation9], 5120   ;;  %p11153_p3 = pmov %p11152_p4 }
  0xc8   : > { %8084 = vsyncadd (%p11153_p3), [#allocation9], 4294962176  ;;  %p11154_p0 = pmov %p11153_p3 }
  0xca   : > { %8086 = dma.done.wait (%p11154_p0), [#allocation12], 4096   ;;  %p11155_p5 = pmov %p11154_p0 }
  0xcb   : > { %v5960_v0 = vld [vmem:[%s8441_s18] sm:$0xff]   ;;  %v6031_v1 = vld [vmem:[%s8441_s18 + $0x8] sm:$0xff]   ;;  %v6032_v4 = vld [vmem:[%s8441_s18 + $0x10] sm:$0xff]   ;;  %vm1758_vm0 = vcmask 261120   ;;  %s8124_s29 = smov 96   ;;  %s8125_s7 = smov 64  }
  0xcc   : > { %8088 = vsyncadd (%p11155_p5), [#allocation12], 4294963200  ;;  %v8461_v2 = vunpack.c.l.bf16 %v5960_v0  ;;  %v8463_v3 = vunpack.c.l.bf16 %v6031_v1  ;;  %v8468_v5 = vunpack.c.h.bf16 %v5960_v0  ;;  %v8470_v6 = vunpack.c.h.bf16 %v6031_v1  ;;  %v6033_v7 = vld [vmem:[%s8441_s18 + $0x18] sm:$0xff]   ;;  %v6034_v10 = vld [vmem:[%s8441_s18 + $0x20] sm:$0xff]   ;;  %s8126_s13 = smov 32   ;;  %s11276_s12 = sld [smem:[#allocation65_spill]] }
  0xcd   : > { %v8475_v8 = vunpack.c.l.bf16 %v6032_v4  ;;  %v8477_v9 = vunpack.c.h.bf16 %v6032_v4  ;;  %v8482_v11 = vunpack.c.l.bf16 %v6033_v7  ;;  %v8484_v12 = vunpack.c.h.bf16 %v6033_v7  ;;  %v6035_v13 = vld [vmem:[%s8441_s18 + $0x28] sm:$0xff]   ;;  %v6036_v16 = vld [vmem:[%s8441_s18 + $0x30] sm:$0xff]   ;;  %v6037_v19 = vld [vmem:[%s8441_s18 + $0x38] sm:$0xff]   ;;  %s11277_s15 = sld [smem:[#allocation66_spill]]  ;;  %s11318_s30 = sld [smem:[#allocation68_spill]] }
  0xce   : > { %11156 = vst [vmem:[#allocation19_spill] sm:$0xff] %v8461_v2  ;;  %11157 = vst [vmem:[#allocation20_spill] sm:$0xff] %v8463_v3  ;;  %567 = vadd.xlane.f32.xlu0 %v8461_v2  ;;  %571 = vadd.xlane.f32.xlu1 %v8463_v3  ;;  %v8489_v14 = vunpack.c.l.bf16 %v6034_v10  ;;  %v8491_v15 = vunpack.c.h.bf16 %v6034_v10  ;;  %v8496_v17 = vunpack.c.l.bf16 %v6035_v13  ;;  %v8498_v18 = vunpack.c.h.bf16 %v6035_v13  ;;  %v7291_v24 = vld [vmem:[#allocation7 + $0x4] ss:$12 sps:$4 sm:$0xff]   ;;  %v7293_v25 = vld [vmem:[#allocation7] ss:$12 sps:$4 sm:$0xff]  }
  0xcf   : > { %11158 = vst [vmem:[#allocation21_spill] sm:$0xff] %v8468_v5  ;;  %11159 = vst [vmem:[#allocation22_spill] sm:$0xff] %v8470_v6  ;;  %v8503_v20 = vunpack.c.l.bf16 %v6036_v16  ;;  %v8505_v21 = vunpack.c.h.bf16 %v6036_v16  ;;  %v8509_v22 = vunpack.c.l.bf16 %v6037_v19  ;;  %v8511_v23 = vunpack.c.h.bf16 %v6037_v19  ;;  %v7294_v26 = vld [vmem:[#allocation7 + $0x1c] ss:$12 sps:$4 sm:$0xff]   ;;  %956 = vmatprep.subr.bf16.mxu0 %v7291_v24  ;;  %v7297_v4 = vld [vmem:[#allocation7 + $0x18] ss:$12 sps:$4 sm:$0xff]  }
  0xd0   : > { %11160 = vst [vmem:[#allocation23_spill] sm:$0xff] %v8475_v8  ;;  %11161 = vst [vmem:[#allocation24_spill] sm:$0xff] %v8477_v9  ;;  %v7296_v27 = vld [vmem:[#allocation7 + $0x8] ss:$12 sps:$4 sm:$0xff]   ;;  %957 = vmatpush1.bf16.msra.mxu0 %v7293_v25  ;;  %v7300_v25 = vld [vmem:[#allocation7 + $0x20] ss:$12 sps:$4 sm:$0xff]  }
  0xd1   : > { %11162 = vst [vmem:[#allocation25_spill] sm:$0xff] %v8482_v11  ;;  %11163 = vst [vmem:[#allocation26_spill] sm:$0xff] %v8484_v12  ;;  %6333 = vmatprep.subr.bf16.mxu1 %v7296_v27  ;;  %958 = vmatprep.subr.bf16.mxu0 %v7294_v26  ;;  %v7298_v24 = vld [vmem:[#allocation7 + $0x34] ss:$12 sps:$4 sm:$0xff]   ;;  %vm3543_vm1 = vcmask 523264   ;;  %vm3560_vm2 = vcmask 785408  }
  0xd2   : > { %569 = vadd.xlane.f32.xlu0 %v8468_v5  ;;  %573 = vadd.xlane.f32.xlu1 %v8470_v6  ;;  %11164 = vst [vmem:[#allocation27_spill] sm:$0xff] %v8489_v14  ;;  %11165 = vst [vmem:[#allocation28_spill] sm:$0xff] %v8491_v15  ;;  %s10943_s20 = scalar_lea.vmem [#allocation13], %s5779_s23  ;;  %s5958_s23 = sshll.u32 %s8220_s14, 10 }
  0xd3   : > { %11166 = vst [vmem:[#allocation29_spill] sm:$0xff] %v8496_v17  ;;  %11167 = vst [vmem:[#allocation30_spill] sm:$0xff] %v8498_v18  ;;  %6334 = vmatpush3.bf16.msra.mxu1 %v7296_v27  ;;  %s5646_s8 = sshll.u32 %s10943_s20, 4  ;;  %s11334_s1 = sld [smem:[#allocation69_spill]]  ;;  %s10987_s8 = int_to_ptr.vmem [resolvable:$true] %s5646_s8 }
  0xd4   : > { %11168 = vst [vmem:[#allocation31_spill] sm:$0xff] %v8503_v20  ;;  %11169 = vst [vmem:[#allocation32_spill] sm:$0xff] %v8505_v21  ;;  %959 = vmatpush1.bf16.msra.mxu0 %v7297_v4  ;;  %6335 = vmatprep.subr.bf16.mxu1 %v7300_v25  ;;  %v7313_v4 = vld [vmem:[#allocation7 + $0x78] ss:$12 sps:$4 sm:$0xff]   ;;  %s5633_s17 = scalar_lea.sflag [#allocation4], %s8435_s4  ;;  %s8029_s10 = scalar_lea.vmem %s10987_s8, 1024 }
  0xd5   : > { %11170 = vst [vmem:[#allocation33_spill] sm:$0xff] %v8509_v22  ;;  %11171 = vst [vmem:[#allocation34_spill] sm:$0xff] %v8511_v23  ;;  %960 = vmatprep.subr.bf16.mxu0 %v7298_v24  ;;  %v7321_v24 = vld [vmem:[#allocation7 + $0xa8] ss:$12 sps:$4 sm:$0xff]   ;;  %p8030_p2 = scmp.ne.s32.totalorder %s10987_s8, %s8029_s10  ;;  %p11335_p7 = scmp.ne.s32.totalorder %s11146_s22, 0 }
  0xd6   : > { %575 = vadd.xlane.f32.xlu0 %v8475_v8  ;;  %577 = vadd.xlane.f32.xlu1 %v8477_v9  ;;  %s8127_s14 = smov [#allocation13]  }
  0xd7   : > { %6336 = vmatpush3.bf16.msra.mxu1 %v7300_v25  ;;  %v7322_v25 = vld [vmem:[#allocation7 + $0xb0] ss:$12 sps:$4 sm:$0xff]   ;;  %p8031_p10 = pnand %p8030_p2, %p11335_p7 }
  0xd9   : > { %p8032_p1 = pneg %p8031_p10 }
  0xda   : > { %579 = vadd.xlane.f32.xlu0 %v8482_v11  ;;  %581 = vadd.xlane.f32.xlu1 %v8484_v12 }
  0xde   : > { %583 = vadd.xlane.f32.xlu0 %v8489_v14  ;;  %585 = vadd.xlane.f32.xlu1 %v8491_v15 }
  0xe2   : > { %587 = vadd.xlane.f32.xlu0 %v8496_v17  ;;  %589 = vadd.xlane.f32.xlu1 %v8498_v18 }
  0xe6   : > { %591 = vadd.xlane.f32.xlu0 %v8503_v20  ;;  %593 = vadd.xlane.f32.xlu1 %v8505_v21 }
  0xea   : > { %595 = vadd.xlane.f32.xlu0 %v8509_v22  ;;  %597 = vadd.xlane.f32.xlu1 %v8511_v23 }
 0x15b   : > { %v568_v28 = vpop.xlane.xlu0 %567  ;;  %v572_v29 = vpop.xlane.xlu1 %571 }
 0x15c   : > { %v600_v30 = vmul.f32 0.0078125, %v568_v28  ;;  %v602_v31 = vmul.f32 0.0078125, %v572_v29 }
 0x15e   : > { %v8516_v32 = vsub.f32 %v8461_v2, %v600_v30  ;;  %v8519_v33 = vsub.f32 %v8463_v3, %v602_v31  ;;  %v7301_v31 = vld [vmem:[#allocation7 + $0x30] ss:$12 sps:$4 sm:$0xff]  }
 0x15f   : > { %v570_v34 = vpop.xlane.xlu0 %569  ;;  %v574_v35 = vpop.xlane.xlu1 %573  ;;  %961 = vmatpush1.bf16.msra.mxu0 %v7301_v31 }
 0x160   : > { %v601_v36 = vmul.f32 0.0078125, %v570_v34  ;;  %v632_v37 = vmul.f32 %v8516_v32, %v8516_v32  ;;  %v603_v38 = vmul.f32 0.0078125, %v574_v35  ;;  %v634_v39 = vmul.f32 %v8519_v33, %v8519_v33 }
 0x162   : > { %648 = vadd.xlane.f32.xlu0 %v632_v37  ;;  %v8526_v40 = vsub.f32 %v8468_v5, %v601_v36  ;;  %v8529_v41 = vsub.f32 %v8470_v6, %v603_v38 }
 0x163   : > { %v576_v42 = vpop.xlane.xlu0 %575  ;;  %v578_v43 = vpop.xlane.xlu1 %577 }
 0x164   : > { %v604_v44 = vmul.f32 0.0078125, %v576_v42  ;;  %v633_v45 = vmul.f32 %v8526_v40, %v8526_v40  ;;  %v605_v46 = vmul.f32 0.0078125, %v578_v43  ;;  %v635_v47 = vmul.f32 %v8529_v41, %v8529_v41  ;;  %v7302_v42 = vld [vmem:[#allocation7 + $0x4c] ss:$12 sps:$4 sm:$0xff]  }
 0x165   : > { %v7304_v43 = vld [vmem:[#allocation7 + $0x38] ss:$12 sps:$4 sm:$0xff]   ;;  %962 = vmatprep.subr.bf16.mxu0 %v7302_v42 }
 0x166   : > { %652 = vadd.xlane.f32.xlu0 %v634_v39  ;;  %650 = vadd.xlane.f32.xlu1 %v633_v45  ;;  %v8536_v48 = vsub.f32 %v8475_v8, %v604_v44  ;;  %v8539_v49 = vsub.f32 %v8477_v9, %v605_v46  ;;  %v7305_v46 = vld [vmem:[#allocation7 + $0x48] ss:$12 sps:$4 sm:$0xff]  }
 0x167   : > { %v580_v50 = vpop.xlane.xlu0 %579  ;;  %v582_v51 = vpop.xlane.xlu1 %581  ;;  %6337 = vmatprep.subr.bf16.mxu1 %v7304_v43  ;;  %963 = vmatpush1.bf16.msra.mxu0 %v7305_v46 }
 0x168   : > { %v606_v52 = vmul.f32 0.0078125, %v580_v50  ;;  %v636_v53 = vmul.f32 %v8536_v48, %v8536_v48  ;;  %v607_v54 = vmul.f32 0.0078125, %v582_v51  ;;  %v637_v55 = vmul.f32 %v8539_v49, %v8539_v49  ;;  %6338 = vmatpush3.bf16.msra.mxu1 %v7304_v43 }
 0x16a   : > { %654 = vadd.xlane.f32.xlu1 %v635_v47  ;;  %656 = vadd.xlane.f32.xlu0 %v636_v53  ;;  %v8546_v56 = vsub.f32 %v8482_v11, %v606_v52  ;;  %v8549_v57 = vsub.f32 %v8484_v12, %v607_v54 }
 0x16b   : > { %v584_v58 = vpop.xlane.xlu0 %583  ;;  %v586_v59 = vpop.xlane.xlu1 %585 }
 0x16c   : > { %v608_v60 = vmul.f32 0.0078125, %v584_v58  ;;  %v638_v61 = vmul.f32 %v8546_v56, %v8546_v56  ;;  %v609_v62 = vmul.f32 0.0078125, %v586_v59  ;;  %v639_v63 = vmul.f32 %v8549_v57, %v8549_v57  ;;  %v7308_v58 = vld [vmem:[#allocation7 + $0x50] ss:$12 sps:$4 sm:$0xff]   ;;  %v7309_v59 = vld [vmem:[#allocation7 + $0x60] ss:$12 sps:$4 sm:$0xff]  }
 0x16d   : > { %6339 = vmatprep.subr.bf16.mxu1 %v7308_v58 }
 0x16e   : > { %658 = vadd.xlane.f32.xlu1 %v637_v55  ;;  %660 = vadd.xlane.f32.xlu0 %v638_v61  ;;  %v8556_v0 = vsub.f32 %v8489_v14, %v608_v60  ;;  %v8559_v1 = vsub.f32 %v8491_v15, %v609_v62  ;;  %v7306_v55 = vld [vmem:[#allocation7 + $0x64] ss:$12 sps:$4 sm:$0xff]   ;;  %v7310_v62 = vld [vmem:[#allocation7 + $0x7c] ss:$12 sps:$4 sm:$0xff]  }
 0x16f   : > { %v588_v7 = vpop.xlane.xlu0 %587  ;;  %v590_v10 = vpop.xlane.xlu1 %589  ;;  %964 = vmatprep.subr.bf16.mxu0 %v7306_v55  ;;  %6340 = vmatpush3.bf16.msra.mxu1 %v7308_v58 }
 0x170   : > { %v610_v13 = vmul.f32 0.0078125, %v588_v7  ;;  %v640_v16 = vmul.f32 %v8556_v0, %v8556_v0  ;;  %v611_v19 = vmul.f32 0.0078125, %v590_v10  ;;  %v641_v26 = vmul.f32 %v8559_v1, %v8559_v1  ;;  %965 = vmatpush1.bf16.msra.mxu0 %v7309_v59  ;;  %v7314_v7 = vld [vmem:[#allocation7 + $0x94] ss:$12 sps:$4 sm:$0xff]  }
 0x171   : > { %966 = vmatprep.subr.bf16.mxu0 %v7310_v62  ;;  %v7316_v10 = vld [vmem:[#allocation7 + $0x80] ss:$12 sps:$4 sm:$0xff]  }
 0x172   : > { %662 = vadd.xlane.f32.xlu1 %v639_v63  ;;  %664 = vadd.xlane.f32.xlu0 %v640_v16  ;;  %v8566_v27 = vsub.f32 %v8496_v17, %v610_v13  ;;  %v8569_v28 = vsub.f32 %v8498_v18, %v611_v19  ;;  %v7312_v63 = vld [vmem:[#allocation7 + $0x68] ss:$12 sps:$4 sm:$0xff]   ;;  %v7317_v13 = vld [vmem:[#allocation7 + $0x90] ss:$12 sps:$4 sm:$0xff]   ;;  %v7318_v16 = vld [vmem:[#allocation7 + $0xac] ss:$12 sps:$4 sm:$0xff]  }
 0x173   : > { %v592_v29 = vpop.xlane.xlu0 %591  ;;  %v594_v30 = vpop.xlane.xlu1 %593  ;;  %6341 = vmatprep.subr.bf16.mxu1 %v7312_v63  ;;  %v7320_v19 = vld [vmem:[#allocation7 + $0x98] ss:$12 sps:$4 sm:$0xff]  }
 0x174   : > { %v612_v34 = vmul.f32 0.0078125, %v592_v29  ;;  %v642_v35 = vmul.f32 %v8566_v27, %v8566_v27  ;;  %v613_v36 = vmul.f32 0.0078125, %v594_v30  ;;  %v643_v37 = vmul.f32 %v8569_v28, %v8569_v28  ;;  %967 = vmatpush1.bf16.msra.mxu0 %v7313_v4  ;;  %6342 = vmatpush3.bf16.msra.mxu1 %v7312_v63 }
 0x175   : > { %968 = vmatprep.subr.bf16.mxu0 %v7314_v7  ;;  %6343 = vmatprep.subr.bf16.mxu1 %v7316_v10 }
 0x176   : > { %666 = vadd.xlane.f32.xlu1 %v641_v26  ;;  %668 = vadd.xlane.f32.xlu0 %v642_v35  ;;  %v8576_v38 = vsub.f32 %v8503_v20, %v612_v34  ;;  %v8579_v39 = vsub.f32 %v8505_v21, %v613_v36  ;;  %v11056_v26 = vmov 0  }
 0x177   : > { %v596_v44 = vpop.xlane.xlu0 %595  ;;  %v598_v45 = vpop.xlane.xlu1 %597  ;;  %988 = vmatprep.mubr.bf16.mxu0 %v11056_v26 }
 0x178   : > { %v614_v47 = vmul.f32 0.0078125, %v596_v44  ;;  %v644_v50 = vmul.f32 %v8576_v38, %v8576_v38  ;;  %v615_v51 = vmul.f32 0.0078125, %v598_v45  ;;  %v645_v52 = vmul.f32 %v8579_v39, %v8579_v39  ;;  %969 = vmatpush1.bf16.msra.mxu0 %v7317_v13  ;;  %6344 = vmatpush3.bf16.msra.mxu1 %v7316_v10 }
 0x179   : > { %970 = vmatprep.subr.bf16.mxu0 %v7318_v16  ;;  %6345 = vmatprep.subr.bf16.mxu1 %v7320_v19  ;;  %v8600_v16 = vld [vmem:[%s11036_s2] ss:$0 sm:$0xff] }
 0x17a   : > { %670 = vadd.xlane.f32.xlu1 %v643_v37  ;;  %672 = vadd.xlane.f32.xlu0 %v644_v50  ;;  %v8586_v53 = vsub.f32 %v8509_v22, %v614_v47  ;;  %v8589_v54 = vsub.f32 %v8511_v23, %v615_v51 }
 0x17c   : > { %v646_v60 = vmul.f32 %v8586_v53, %v8586_v53  ;;  %v647_v61 = vmul.f32 %v8589_v54, %v8589_v54  ;;  %971 = vmatpush1.bf16.msra.mxu0 %v7321_v24  ;;  %6346 = vmatpush3.bf16.msra.mxu1 %v7320_v19 }
 0x17d   : > { %6347 = vmatprep.subr.bf16.mxu1 %v7322_v25 }
 0x17e   : > { %674 = vadd.xlane.f32.xlu1 %v645_v52  ;;  %676 = vadd.xlane.f32.xlu0 %v646_v60 }
 0x180   : > { %6348 = vmatpush3.bf16.msra.mxu1 %v7322_v25 }
 0x182   : > { %678 = vadd.xlane.f32.xlu1 %v647_v61 }
 0x1ef   : > { %v649_v29 = vpop.xlane.xlu0 %648 }
 0x1f0   : > { %v680_v30 = vmul.f32 0.0078125, %v649_v29 }
 0x1f2   : > { %v696_v31 = vadd.f32 1e-05, %v680_v30 }
 0x1f3   : > { %v651_v34 = vpop.xlane.xlu1 %650  ;;  %v653_v35 = vpop.xlane.xlu0 %652 }
 0x1f4   : > { %7411 = vrsqrt.f32 %v696_v31  ;;  %v681_v36 = vmul.f32 0.0078125, %v651_v34  ;;  %v682_v37 = vmul.f32 0.0078125, %v653_v35 }
 0x1f6   : > { %v697_v42 = vadd.f32 1e-05, %v681_v36  ;;  %v698_v43 = vadd.f32 1e-05, %v682_v37  ;;  %v8607_v37 = vld [vmem:[%s11037_s3] ss:$0 sm:$0xff] }
 0x1f7   : > { %v655_v44 = vpop.xlane.xlu1 %654  ;;  %v657_v45 = vpop.xlane.xlu0 %656 }
 0x1f8   : > { %7413 = vrsqrt.f32 %v697_v42  ;;  %v683_v46 = vmul.f32 0.0078125, %v655_v44  ;;  %v684_v47 = vmul.f32 0.0078125, %v657_v45 }
 0x1f9   : > { %7415 = vrsqrt.f32 %v698_v43 }
 0x1fa   : > { %v699_v50 = vadd.f32 1e-05, %v683_v46  ;;  %v700_v51 = vadd.f32 1e-05, %v684_v47 }
 0x1fb   : > { %v659_v52 = vpop.xlane.xlu1 %658  ;;  %v661_v55 = vpop.xlane.xlu0 %660 }
 0x1fc   : > { %7417 = vrsqrt.f32 %v699_v50  ;;  %v685_v58 = vmul.f32 0.0078125, %v659_v52  ;;  %v686_v59 = vmul.f32 0.0078125, %v661_v55 }
 0x1fd   : > { %7419 = vrsqrt.f32 %v700_v51 }
 0x1fe   : > { %v7412_v60 = vpop.eup %7411  ;;  %v701_v61 = vadd.f32 1e-05, %v685_v58  ;;  %v702_v62 = vadd.f32 1e-05, %v686_v59 }
 0x1ff   : > { %v663_v63 = vpop.xlane.xlu1 %662  ;;  %v665_v4 = vpop.xlane.xlu0 %664  ;;  %v728_v7 = vmul.f32 %v7412_v60, %v8516_v32 }
 0x200   : > { %7421 = vrsqrt.f32 %v701_v61  ;;  %v687_v10 = vmul.f32 0.0078125, %v663_v63  ;;  %v688_v13 = vmul.f32 0.0078125, %v665_v4 }
 0x201   : > { %7423 = vrsqrt.f32 %v702_v62  ;;  %v750_v35 = vmul.f32 %v8600_v16, %v728_v7 }
 0x202   : > { %v7414_v19 = vpop.eup %7413  ;;  %v703_v24 = vadd.f32 1e-05, %v687_v10  ;;  %v704_v25 = vadd.f32 1e-05, %v688_v13 }
 0x203   : > { %v7416_v29 = vpop.eup %7415  ;;  %v667_v30 = vpop.xlane.xlu1 %666  ;;  %v729_v34 = vmul.f32 %v7414_v19, %v8526_v40  ;;  %v772_v52 = vadd.f32 %v8607_v37, %v750_v35 }
 0x204   : > { %v669_v31 = vpop.xlane.xlu0 %668  ;;  %7425 = vrsqrt.f32 %v703_v24  ;;  %v689_v32 = vmul.f32 0.0078125, %v667_v30  ;;  %v730_v42 = vmul.f32 %v7416_v29, %v8519_v33 }
 0x205   : > { %v690_v36 = vmul.f32 0.0078125, %v669_v31  ;;  %7427 = vrsqrt.f32 %v704_v25  ;;  %v751_v43 = vmul.f32 %v8600_v16, %v729_v34 }
 0x206   : > { %v7418_v44 = vpop.eup %7417  ;;  %v705_v45 = vadd.f32 1e-05, %v689_v32  ;;  %v752_v40 = vmul.f32 %v8600_v16, %v730_v42 }
 0x207   : > { %v706_v46 = vadd.f32 1e-05, %v690_v36  ;;  %v7420_v47 = vpop.eup %7419  ;;  %v671_v50 = vpop.xlane.xlu1 %670  ;;  %v773_v55 = vadd.f32 %v8607_v37, %v751_v43  ;;  %v731_v58 = vmul.f32 %v7418_v44, %v8529_v41 }
 0x208   : > { %v673_v51 = vpop.xlane.xlu0 %672  ;;  %7429 = vrsqrt.f32 %v705_v45  ;;  %v691_v59 = vmul.f32 0.0078125, %v671_v50  ;;  %v732_v62 = vmul.f32 %v7420_v47, %v8536_v48  ;;  %v774_v10 = vadd.f32 %v8607_v37, %v752_v40 }
 0x209   : > { %v692_v33 = vmul.f32 0.0078125, %v673_v51  ;;  %7431 = vrsqrt.f32 %v706_v46  ;;  %v788_v60 = vpack.c.bf16 %v773_v55, %v772_v52  ;;  %v753_v61 = vmul.f32 %v8600_v16, %v731_v58 }
 0x20a   : > { %v7422_v63 = vpop.eup %7421  ;;  %v707_v4 = vadd.f32 1e-05, %v691_v59  ;;  %v754_v29 = vmul.f32 %v8600_v16, %v732_v62 }
 0x20b   : > { %v708_v7 = vadd.f32 1e-05, %v692_v33  ;;  %v7424_v13 = vpop.eup %7423  ;;  %v675_v19 = vpop.xlane.xlu1 %674  ;;  %989 = vmatmul.mubr.bf16.vlgmr.msra.gmra.mrb[0].mxu0 %v788_v60  ;;  %6349 = vmatprep.mubr.bf16.mxu1 %v788_v60  ;;  %v775_v41 = vadd.f32 %v8607_v37, %v753_v61  ;;  %v733_v25 = vmul.f32 %v7422_v63, %v8539_v49 }
 0x20c   : > { %v677_v24 = vpop.xlane.xlu0 %676  ;;  %7433 = vrsqrt.f32 %v707_v4  ;;  %v693_v30 = vmul.f32 0.0078125, %v675_v19  ;;  %998 = vmatprep.mubr.bf16.mxu0 %v11056_v26  ;;  %v734_v48 = vmul.f32 %v7424_v13, %v8546_v56  ;;  %v776_v45 = vadd.f32 %v8607_v37, %v754_v29 }
 0x20d   : > { %v694_v31 = vmul.f32 0.0078125, %v677_v24  ;;  %7435 = vrsqrt.f32 %v708_v7  ;;  %v789_v34 = vpack.c.bf16 %v775_v41, %v774_v10  ;;  %v755_v35 = vmul.f32 %v8600_v16, %v733_v25 }
 0x20e   : > { %v7426_v32 = vpop.eup %7425  ;;  %v709_v36 = vadd.f32 1e-05, %v693_v30  ;;  %v756_v43 = vmul.f32 %v8600_v16, %v734_v48 }
 0x20f   : > { %v710_v42 = vadd.f32 1e-05, %v694_v31  ;;  %v7428_v44 = vpop.eup %7427  ;;  %v679_v49 = vpop.xlane.xlu1 %678  ;;  %6350 = vmatmul.mubr.bf16.vlgmr.msra.gmra.mrb[0].mxu1 %v789_v34  ;;  %v777_v46 = vadd.f32 %v8607_v37, %v755_v35  ;;  %v735_v40 = vmul.f32 %v7426_v32, %v8549_v57 }
 0x210   : > { %7437 = vrsqrt.f32 %v709_v36  ;;  %v695_v56 = vmul.f32 0.0078125, %v679_v49  ;;  %v736_v47 = vmul.f32 %v7428_v44, %v8556_v0  ;;  %v778_v58 = vadd.f32 %v8607_v37, %v756_v43 }
 0x211   : > { %7439 = vrsqrt.f32 %v710_v42  ;;  %v790_v50 = vpack.c.bf16 %v777_v46, %v776_v45  ;;  %v757_v51 = vmul.f32 %v8600_v16, %v735_v40 }
 0x212   : > { %v7430_v52 = vpop.eup %7429  ;;  %v711_v55 = vadd.f32 1e-05, %v695_v56  ;;  %v758_v57 = vmul.f32 %v8600_v16, %v736_v47 }
 0x213   : > { %v7432_v59 = vpop.eup %7431  ;;  %999 = vmatmul.mubr.bf16.gmra.mrb[4].mxu0 %v789_v34  ;;  %6353 = vmatprep.mubr.bf16.mxu1 %v790_v50  ;;  %v779_v33 = vadd.f32 %v8607_v37, %v757_v51  ;;  %v737_v60 = vmul.f32 %v7430_v52, %v8559_v1 }
 0x214   : > { %7441 = vrsqrt.f32 %v711_v55  ;;  %1008 = vmatprep.mubr.bf16.mxu0 %v11056_v26  ;;  %v738_v0 = vmul.f32 %v7432_v59, %v8566_v27  ;;  %v780_v10 = vadd.f32 %v8607_v37, %v758_v57 }
 0x215   : > { %v791_v61 = vpack.c.bf16 %v779_v33, %v778_v58  ;;  %v759_v62 = vmul.f32 %v8600_v16, %v737_v60 }
 0x216   : > { %v7434_v63 = vpop.eup %7433  ;;  %v760_v4 = vmul.f32 %v8600_v16, %v738_v0 }
 0x217   : > { %v7436_v7 = vpop.eup %7435  ;;  %6354 = vmatmul.mubr.bf16.gmra.mrb[4].mxu1 %v791_v61  ;;  %v781_v13 = vadd.f32 %v8607_v37, %v759_v62  ;;  %v739_v1 = vmul.f32 %v7434_v63, %v8569_v28 }
 0x218   : > { %v740_v19 = vmul.f32 %v7436_v7, %v8576_v38  ;;  %v782_v25 = vadd.f32 %v8607_v37, %v760_v4 }
 0x219   : > { %v792_v24 = vpack.c.bf16 %v781_v13, %v780_v10  ;;  %v761_v41 = vmul.f32 %v8600_v16, %v739_v1 }
 0x21a   : > { %v7438_v27 = vpop.eup %7437  ;;  %v762_v48 = vmul.f32 %v8600_v16, %v740_v19 }
 0x21b   : > { %v7440_v29 = vpop.eup %7439  ;;  %1009 = vmatmul.mubr.bf16.gmra.mrb[8].mxu0 %v790_v50  ;;  %6357 = vmatprep.mubr.bf16.mxu1 %v792_v24  ;;  %v783_v30 = vadd.f32 %v8607_v37, %v761_v41  ;;  %v741_v31 = vmul.f32 %v7438_v27, %v8579_v39 }
 0x21c   : > { %1018 = vmatprep.mubr.bf16.mxu0 %v11056_v26  ;;  %v742_v28 = vmul.f32 %v7440_v29, %v8586_v53  ;;  %v784_v32 = vadd.f32 %v8607_v37, %v762_v48 }
 0x21d   : > { %v793_v38 = vpack.c.bf16 %v783_v30, %v782_v25  ;;  %v763_v34 = vmul.f32 %v8600_v16, %v741_v31 }
 0x21e   : > { %v7442_v35 = vpop.eup %7441  ;;  %v764_v43 = vmul.f32 %v8600_v16, %v742_v28 }
 0x21f   : > { %6358 = vmatmul.mubr.bf16.gmra.mrb[8].mxu1 %v793_v38  ;;  %v785_v36 = vadd.f32 %v8607_v37, %v763_v34  ;;  %v743_v42 = vmul.f32 %v7442_v35, %v8589_v54 }
 0x220   : > { %v786_v53 = vadd.f32 %v8607_v37, %v764_v43 }
 0x221   : > { %v794_v39 = vpack.c.bf16 %v785_v36, %v784_v32  ;;  %v765_v44 = vmul.f32 %v8600_v16, %v743_v42 }
 0x223   : > { %1019 = vmatmul.mubr.bf16.gmra.mrb[12].mxu0 %v791_v61  ;;  %6361 = vmatprep.mubr.bf16.mxu1 %v794_v39  ;;  %v787_v49 = vadd.f32 %v8607_v37, %v765_v44 }
 0x224   : > { %1028 = vmatprep.mubr.bf16.mxu0 %v11056_v26 }
 0x225   : > { %v795_v45 = vpack.c.bf16 %v787_v49, %v786_v53 }
 0x227   : > { %6362 = vmatmul.mubr.bf16.gmra.mrb[12].mxu1 %v795_v45 }
 0x22b   : > { %1029 = vmatmul.mubr.bf16.gmra.mrb[16].mxu0 %v792_v24 }
 0x22c   : > { %1038 = vmatprep.mubr.bf16.mxu0 %v11056_v26 }
 0x233   : > { %1039 = vmatmul.mubr.bf16.gmra.mrb[20].mxu0 %v793_v38 }
 0x234   : > { %1048 = vmatprep.mubr.bf16.mxu0 %v11056_v26 }
 0x23b   : > { %1049 = vmatmul.mubr.bf16.gmra.mrb[24].mxu0 %v794_v39 }
 0x23c   : > { %1058 = vmatprep.mubr.bf16.mxu0 %v11056_v26 }
 0x243   : > { %1059 = vmatmul.mubr.bf16.gmra.mrb[28].mxu0 %v795_v45 }
 0x2de   : > { %v990_v54 = vpop.f32.mrb[0].mxu0 }
 0x2df   : > { %v992_v16 = vpop.f32.mrb[1].mxu0 }
 0x2e0   : > { %v994_v46 = vpop.f32.mrb[2].mxu0 }
 0x2e1   : > { %v1326_v40 = vpack.c.bf16 %v994_v46, %v990_v54  ;;  %v996_v37 = vpop.f32.mrb[3].mxu0  ;;  %v8661_v56 = vpack.i.bf16 %v994_v46, %v990_v54 }
 0x2e2   : > { %v1518_v47 = vpack.c.bf16 %v996_v37, %v992_v16  ;;  %v6351_v50 = vpop.f32.mrb[0].mxu1  ;;  %v8663_v51 = vpack.i.bf16 %v996_v37, %v992_v16 }
 0x2e3   : > { %v1103_v52 = vpop.f32.mrb[1].mxu1  ;;  %6381 = vmatprep.mubr.msk.bf16.mxu0 %vm1758_vm0, %v1326_v40 }
 0x2e4   : > { %6812 = vrot.lane.b32.xlu0 %v8663_v51, %s8124_s29  ;;  %v6352_v55 = vpop.f32.mrb[2].mxu1  ;;  %6669 = vmatprep.subr.msk.bf16.mxu0 %vm1758_vm0, %v1518_v47  ;;  %v1784_v58 = vsel %vm1758_vm0, %v1518_v47, 0 }
 0x2e5   : > { %v1106_v59 = vpop.f32.mrb[3].mxu1  ;;  %6366 = vmatpush3.bf16.xpose.msra.mxu0 %v1784_v58  ;;  %v8670_v33 = vpack.i.bf16 %v6352_v55, %v6351_v50  ;;  %v8672_v60 = vpack.c.bf16 %v6352_v55, %v6351_v50 }
 0x2e6   : > { %v8674_v57 = vpop.f32.mrb[4].mxu0  ;;  %v8676_v0 = vpack.i.bf16 %v1106_v59, %v1103_v52  ;;  %v8678_v61 = vpack.c.bf16 %v1106_v59, %v1103_v52 }
 0x2e7   : > { %v1002_v62 = vpop.f32.mrb[5].mxu0 }
 0x2e8   : > { %v8680_v63 = vpop.f32.mrb[6].mxu0 }
 0x2e9   : > { %v1006_v7 = vpop.f32.mrb[7].mxu0  ;;  %v8686_v10 = vpack.i.bf16 %v8680_v63, %v8674_v57 }
 0x2ea   : > { %v1519_v13 = vpack.c.bf16 %v1006_v7, %v1002_v62  ;;  %v6355_v1 = vpop.f32.mrb[4].mxu1  ;;  %v8688_v19 = vpack.i.bf16 %v1006_v7, %v1002_v62 }
 0x2eb   : > { %v1119_v24 = vpop.f32.mrb[5].mxu1 }
 0x2ec   : > { %6817 = vrot.lane.b32.xlu1 %v8688_v19, %s8124_s29  ;;  %v6356_v41 = vpop.f32.mrb[6].mxu1  ;;  %6670 = vmatprep.subr.msk.bf16.mxu0 %vm1758_vm0, %v1519_v13  ;;  %v1787_v27 = vsel %vm1758_vm0, %v1519_v13, 0 }
 0x2ed   : > { %v1122_v25 = vpop.f32.mrb[7].mxu1  ;;  %6368 = vmatpush3.bf16.xpose.msra.mxu0 %v1787_v27  ;;  %v8694_v29 = vpack.i.bf16 %v6356_v41, %v6355_v1  ;;  %v8696_v30 = vpack.c.bf16 %v6356_v41, %v6355_v1 }
 0x2ee   : > { %v8698_v31 = vpop.f32.mrb[8].mxu0  ;;  %v8700_v48 = vpack.i.bf16 %v1122_v25, %v1119_v24  ;;  %v8702_v28 = vpack.c.bf16 %v1122_v25, %v1119_v24 }
 0x2ef   : > { %v1012_v38 = vpop.f32.mrb[9].mxu0 }
 0x2f0   : > { %v8704_v34 = vpop.f32.mrb[10].mxu0 }
 0x2f1   : > { %v1016_v32 = vpop.f32.mrb[11].mxu0  ;;  %v8710_v36 = vpack.i.bf16 %v8704_v34, %v8698_v31 }
 0x2f2   : > { %v1520_v42 = vpack.c.bf16 %v1016_v32, %v1012_v38  ;;  %v6359_v43 = vpop.f32.mrb[8].mxu1  ;;  %v8712_v39 = vpack.i.bf16 %v1016_v32, %v1012_v38 }
 0x2f3   : > { %v1135_v44 = vpop.f32.mrb[9].mxu1 }
 0x2f4   : > { %6822 = vrot.lane.b32.xlu1 %v8712_v39, %s8124_s29  ;;  %v6360_v53 = vpop.f32.mrb[10].mxu1  ;;  %6671 = vmatprep.subr.msk.bf16.mxu0 %vm1758_vm0, %v1520_v42  ;;  %v1790_v49 = vsel %vm1758_vm0, %v1520_v42, 0 }
 0x2f5   : > { %v8718_v45 = vpack.i.bf16 %v6360_v53, %v6359_v43  ;;  %v1138_v54 = vpop.f32.mrb[11].mxu1  ;;  %6370 = vmatpush3.bf16.xpose.msra.mxu0 %v1790_v49  ;;  %v8720_v16 = vpack.c.bf16 %v6360_v53, %v6359_v43 }
 0x2f6   : > { %v8722_v46 = vpack.i.bf16 %v1138_v54, %v1135_v44  ;;  %v8724_v40 = vpop.f32.mrb[12].mxu0  ;;  %v8726_v37 = vpack.c.bf16 %v1138_v54, %v1135_v44 }
 0x2f7   : > { %v1022_v47 = vpop.f32.mrb[13].mxu0 }
 0x2f8   : > { %v8728_v50 = vpop.f32.mrb[14].mxu0 }
 0x2f9   : > { %v1026_v55 = vpop.f32.mrb[15].mxu0  ;;  %v8734_v58 = vpack.i.bf16 %v8728_v50, %v8724_v40 }
 0x2fa   : > { %v1521_v59 = vpack.c.bf16 %v1026_v55, %v1022_v47  ;;  %v6363_v62 = vpop.f32.mrb[12].mxu1  ;;  %v8736_v7 = vpack.i.bf16 %v1026_v55, %v1022_v47 }
 0x2fb   : > { %v1151_v13 = vpop.f32.mrb[13].mxu1 }
 0x2fc   : > { %6827 = vrot.lane.b32.xlu1 %v8736_v7, %s8124_s29  ;;  %v6364_v1 = vpop.f32.mrb[14].mxu1  ;;  %6672 = vmatprep.subr.msk.bf16.mxu0 %vm1758_vm0, %v1521_v59  ;;  %v1793_v24 = vsel %vm1758_vm0, %v1521_v59, 0 }
 0x2fd   : > { %v8742_v41 = vpack.i.bf16 %v6364_v1, %v6363_v62  ;;  %v1154_v27 = vpop.f32.mrb[15].mxu1  ;;  %6372 = vmatpush3.bf16.xpose.msra.mxu0 %v1793_v24  ;;  %v8744_v25 = vpack.c.bf16 %v6364_v1, %v6363_v62 }
 0x2fe   : > { %v8746_v38 = vpack.i.bf16 %v1154_v27, %v1151_v13  ;;  %v8748_v32 = vpop.f32.mrb[16].mxu0  ;;  %v8750_v42 = vpack.c.bf16 %v1154_v27, %v1151_v13 }
 0x2ff   : > { %11172 = vst [vmem:[#allocation35_spill] sm:$0xff] %v8742_v41  ;;  %v1032_v43 = vpop.f32.mrb[17].mxu0 }
 0x300   : > { %v1034_v44 = vpop.f32.mrb[18].mxu0 }
 0x301   : > { %v1330_v53 = vpack.c.bf16 %v1034_v44, %v8748_v32  ;;  %v1036_v49 = vpop.f32.mrb[19].mxu0  ;;  %v8754_v54 = vpack.i.bf16 %v1034_v44, %v8748_v32 }
 0x302   : > { %v1522_v47 = vpack.c.bf16 %v1036_v49, %v1032_v43  ;;  %v6831_v55 = vpack.i.bf16 %v1036_v49, %v1032_v43 }
 0x304   : > { %6832 = vrot.lane.b32.xlu0 %v6831_v55, %s8124_s29  ;;  %6673 = vmatprep.subr.msk.bf16.mxu0 %vm1758_vm0, %v1522_v47  ;;  %v1796_v59 = vsel %vm1758_vm0, %v1522_v47, 0 }
 0x305   : > { %6374 = vmatpush3.bf16.xpose.msra.mxu0 %v1796_v59 }
 0x306   : > { %v1040_v62 = vpop.f32.mrb[20].mxu0 }
 0x307   : > { %v1042_v13 = vpop.f32.mrb[21].mxu0 }
 0x308   : > { %v1044_v1 = vpop.f32.mrb[22].mxu0 }
 0x309   : > { %v1331_v24 = vpack.c.bf16 %v1044_v1, %v1040_v62  ;;  %v1046_v27 = vpop.f32.mrb[23].mxu0  ;;  %v8759_v26 = vpack.i.bf16 %v1044_v1, %v1040_v62 }
 0x30a   : > { %v1523_v52 = vpack.c.bf16 %v1046_v27, %v1042_v13  ;;  %v6836_v35 = vpack.i.bf16 %v1046_v27, %v1042_v13 }
 0x30c   : > { %6837 = vrot.lane.b32.xlu1 %v6836_v35, %s8124_s29  ;;  %6674 = vmatprep.subr.msk.bf16.mxu0 %vm1758_vm0, %v1523_v52  ;;  %v1799_v32 = vsel %vm1758_vm0, %v1523_v52, 0 }
 0x30d   : > { %6376 = vmatpush3.bf16.xpose.msra.mxu0 %v1799_v32 }
 0x30e   : > { %v1050_v43 = vpop.f32.mrb[24].mxu0 }
 0x30f   : > { %v1052_v44 = vpop.f32.mrb[25].mxu0 }
 0x310   : > { %v1054_v49 = vpop.f32.mrb[26].mxu0 }
 0x311   : > { %v1332_v47 = vpack.c.bf16 %v1054_v49, %v1050_v43  ;;  %v1056_v59 = vpop.f32.mrb[27].mxu0  ;;  %v8764_v4 = vpack.i.bf16 %v1054_v49, %v1050_v43 }
 0x312   : > { %v1524_v23 = vpack.c.bf16 %v1056_v59, %v1052_v44  ;;  %v6841_v21 = vpack.i.bf16 %v1056_v59, %v1052_v44  ;;  %v11174_v59 = vpack.c.bf16 %v8704_v34, %v8698_v31 }
 0x314   : > { %6842 = vrot.lane.b32.xlu0 %v6841_v21, %s8124_s29  ;;  %6675 = vmatprep.subr.msk.bf16.mxu0 %vm1758_vm0, %v1524_v23  ;;  %v1802_v62 = vsel %vm1758_vm0, %v1524_v23, 0 }
 0x315   : > { %6378 = vmatpush3.bf16.xpose.msra.mxu0 %v1802_v62 }
 0x316   : > { %v1060_v13 = vpop.f32.mrb[28].mxu0 }
 0x317   : > { %v1062_v1 = vpop.f32.mrb[29].mxu0 }
 0x318   : > { %6852 = vrot.lane.b32.xlu0 %v8663_v51, %s8125_s7  ;;  %v1064_v52 = vpop.f32.mrb[30].mxu0 }
 0x319   : > { %v1333_v27 = vpack.c.bf16 %v1064_v52, %v1060_v13  ;;  %v1066_v32 = vpop.f32.mrb[31].mxu0  ;;  %v8771_v43 = vpack.i.bf16 %v1064_v52, %v1060_v13 }
 0x31a   : > { %v1525_v49 = vpack.c.bf16 %v1066_v32, %v1062_v1  ;;  %v6846_v44 = vpack.i.bf16 %v1066_v32, %v1062_v1 }
 0x31c   : > { %6862 = vrot.lane.b32.xlu0 %v8663_v51, %s8126_s13  ;;  %6847 = vrot.lane.b32.xlu1 %v6846_v44, %s8124_s29  ;;  %v1805_v23 = vsel %vm1758_vm0, %v1525_v49, 0  ;;  %v11173_v51 = vpack.c.bf16 %v8680_v63, %v8674_v57  ;;  %v11175_v57 = vpack.c.bf16 %v8728_v50, %v8724_v40 }
 0x31d   : > { %6676 = vmatprep.subr.msk.bf16.mxu0 %vm1758_vm0, %v1525_v49 }
 0x31e   : > { %6380 = vmatpush3.bf16.xpose.msra.mxu0 %v1805_v23 }
 0x320   : > { %6872 = vrot.lane.b32.xlu0 %v8688_v19, %s8125_s7  ;;  %6857 = vrot.lane.b32.xlu1 %v8661_v56, %s8124_s29 }
 0x324   : > { %6882 = vrot.lane.b32.xlu0 %v8712_v39, %s8125_s7  ;;  %6867 = vrot.lane.b32.xlu1 %v8686_v10, %s8124_s29 }
 0x325   : > { %6382 = vmatmul.mubr.msk.bf16.vlgmr.msra.gmra.mrb[32].mxu0 %vm1758_vm0, %v11173_v51 }
 0x326   : > { %6385 = vmatprep.mubr.msk.bf16.mxu0 %vm1758_vm0, %v11174_v59 }
 0x328   : > { %6892 = vrot.lane.b32.xlu0 %v8736_v7, %s8125_s7  ;;  %6877 = vrot.lane.b32.xlu1 %v8688_v19, %s8126_s13 }
 0x32c   : > { %6902 = vrot.lane.b32.xlu0 %v6831_v55, %s8125_s7  ;;  %6887 = vrot.lane.b32.xlu1 %v8712_v39, %s8126_s13 }
 0x32d   : > { %6386 = vmatmul.mubr.msk.bf16.gmra.mrb[36].mxu0 %vm1758_vm0, %v11175_v57 }
 0x32e   : > { %6389 = vmatprep.mubr.msk.bf16.mxu0 %vm1758_vm0, %v1330_v53 }
 0x330   : > { %6912 = vrot.lane.b32.xlu0 %v8710_v36, %s8124_s29  ;;  %6897 = vrot.lane.b32.xlu1 %v8736_v7, %s8126_s13 }
 0x334   : > { %6922 = vrot.lane.b32.xlu0 %v8734_v58, %s8124_s29  ;;  %6907 = vrot.lane.b32.xlu1 %v6831_v55, %s8126_s13 }
 0x335   : > { %6390 = vmatmul.mubr.msk.bf16.gmra.mrb[40].mxu0 %vm1758_vm0, %v1331_v24 }
 0x336   : > { %6393 = vmatprep.mubr.msk.bf16.mxu0 %vm1758_vm0, %v1332_v47 }
 0x338   : > { %6932 = vrot.lane.b32.xlu0 %v8754_v54, %s8124_s29  ;;  %6917 = vrot.lane.b32.xlu1 %v6836_v35, %s8125_s7 }
 0x33c   : > { %6942 = vrot.lane.b32.xlu0 %v8759_v26, %s8124_s29  ;;  %6927 = vrot.lane.b32.xlu1 %v6836_v35, %s8126_s13 }
 0x33d   : > { %6394 = vmatmul.mubr.msk.bf16.gmra.mrb[44].mxu0 %vm1758_vm0, %v1333_v27 }
 0x340   : > { %6952 = vrot.lane.b32.xlu0 %v8764_v4, %s8124_s29  ;;  %6937 = vrot.lane.b32.xlu1 %v6841_v21, %s8125_s7 }
 0x344   : > { %6957 = vrot.lane.b32.xlu0 %v8771_v43, %s8124_s29  ;;  %6947 = vrot.lane.b32.xlu1 %v6841_v21, %s8126_s13 }
 0x348   : > { %6962 = vrot.lane.b32.xlu0 %v8661_v56, %s8125_s7  ;;  %6967 = vrot.lane.b32.xlu1 %v6846_v44, %s8125_s7 }
 0x34c   : > { %6982 = vrot.lane.b32.xlu0 %v8661_v56, %s8126_s13  ;;  %6972 = vrot.lane.b32.xlu1 %v6846_v44, %s8126_s13 }
 0x350   : > { %6992 = vrot.lane.b32.xlu0 %v8710_v36, %s8125_s7  ;;  %6977 = vrot.lane.b32.xlu1 %v8686_v10, %s8125_s7 }
 0x354   : > { %7002 = vrot.lane.b32.xlu0 %v8710_v36, %s8126_s13  ;;  %6987 = vrot.lane.b32.xlu1 %v8686_v10, %s8126_s13 }
 0x356   : > { %v6813_v21 = vpop.permute.xlu0 %6812 }
 0x357   : > { %v6815_v63 = vunpack.i.h.bf16 %v6813_v21  ;;  %v6814_v19 = vunpack.i.l.bf16 %v6813_v21 }
 0x358   : > { %7012 = vrot.lane.b32.xlu0 %v8754_v54, %s8125_s7  ;;  %6997 = vrot.lane.b32.xlu1 %v8734_v58, %s8125_s7 }
 0x359   : > { %v1526_v56 = vpack.c.bf16 %v6815_v63, %v6814_v19 }
 0x35b   : > { %6677 = vmatprep.subr.msk.bf16.mxu1 %vm1758_vm0, %v1526_v56  ;;  %v1929_v31 = vsel %vm1758_vm0, %v1526_v56, 0 }
 0x35c   : > { %7022 = vrot.lane.b32.xlu0 %v8754_v54, %s8126_s13  ;;  %7007 = vrot.lane.b32.xlu1 %v8734_v58, %s8126_s13 }
 0x35d   : > { %6398 = vmatpush3.bf16.xpose.msra.mxu1 %v1929_v31 }
 0x35e   : > { %v6818_v10 = vpop.permute.xlu1 %6817 }
 0x35f   : > { %v6820_v34 = vunpack.i.h.bf16 %v6818_v10  ;;  %v6819_v35 = vunpack.i.l.bf16 %v6818_v10 }
 0x360   : > { %7032 = vrot.lane.b32.xlu0 %v8764_v4, %s8125_s7  ;;  %7017 = vrot.lane.b32.xlu1 %v8759_v26, %s8125_s7 }
 0x361   : > { %v1527_v36 = vpack.c.bf16 %v6820_v34, %v6819_v35 }
 0x363   : > { %6678 = vmatprep.subr.msk.bf16.mxu1 %vm1758_vm0, %v1527_v36  ;;  %v1932_v39 = vsel %vm1758_vm0, %v1527_v36, 0 }
 0x364   : > { %7042 = vrot.lane.b32.xlu0 %v8764_v4, %s8126_s13  ;;  %7027 = vrot.lane.b32.xlu1 %v8759_v26, %s8126_s13 }
 0x365   : > { %6400 = vmatpush3.bf16.xpose.msra.mxu1 %v1932_v39 }
 0x366   : > { %v6823_v40 = vpop.permute.xlu1 %6822 }
 0x367   : > { %v6825_v50 = vunpack.i.h.bf16 %v6823_v40  ;;  %v6824_v58 = vunpack.i.l.bf16 %v6823_v40 }
 0x368   : > { %7052 = vrot.lane.b32.xlu0 %v8676_v0, %s8124_s29  ;;  %7037 = vrot.lane.b32.xlu1 %v8771_v43, %s8125_s7 }
 0x369   : > { %v1528_v7 = vpack.c.bf16 %v6825_v50, %v6824_v58 }
 0x36b   : > { %6679 = vmatprep.subr.msk.bf16.mxu1 %vm1758_vm0, %v1528_v7  ;;  %v1935_v53 = vsel %vm1758_vm0, %v1528_v7, 0 }
 0x36c   : > { %7062 = vrot.lane.b32.xlu0 %v8700_v48, %s8124_s29  ;;  %7047 = vrot.lane.b32.xlu1 %v8771_v43, %s8126_s13 }
 0x36d   : > { %6402 = vmatpush3.bf16.xpose.msra.mxu1 %v1935_v53 }
 0x36e   : > { %v6828_v26 = vpop.permute.xlu1 %6827 }
 0x36f   : > { %v6830_v4 = vunpack.i.h.bf16 %v6828_v26  ;;  %v6829_v54 = vunpack.i.l.bf16 %v6828_v26 }
 0x370   : > { %7072 = vrot.lane.b32.xlu0 %v8722_v46, %s8124_s29  ;;  %7057 = vrot.lane.b32.xlu1 %v8670_v33, %s8124_s29 }
 0x371   : > { %v1529_v55 = vpack.c.bf16 %v6830_v4, %v6829_v54 }
 0x373   : > { %6680 = vmatprep.subr.msk.bf16.mxu1 %vm1758_vm0, %v1529_v55  ;;  %v1938_v24 = vsel %vm1758_vm0, %v1529_v55, 0 }
 0x374   : > { %7082 = vrot.lane.b32.xlu0 %v8746_v38, %s8124_s29  ;;  %7067 = vrot.lane.b32.xlu1 %v8694_v29, %s8124_s29 }
 0x375   : > { %6404 = vmatpush3.bf16.xpose.msra.mxu1 %v1938_v24 }
 0x376   : > { %v6833_v47 = vpop.permute.xlu0 %6832 }
 0x377   : > { %v6835_v62 = vunpack.i.h.bf16 %v6833_v47  ;;  %v6834_v13 = vunpack.i.l.bf16 %v6833_v47 }
 0x378   : > { %7092 = vrot.lane.b32.xlu0 %v8676_v0, %s8125_s7  ;;  %7077 = vrot.lane.b32.xlu1 %v8718_v45, %s8124_s29 }
 0x379   : > { %v1530_v1 = vpack.c.bf16 %v6835_v62, %v6834_v13 }
 0x37b   : > { %6681 = vmatprep.subr.msk.bf16.mxu1 %vm1758_vm0, %v1530_v1  ;;  %v1941_v52 = vsel %vm1758_vm0, %v1530_v1, 0 }
 0x37c   : > { %7102 = vrot.lane.b32.xlu0 %v8670_v33, %s8125_s7  ;;  %7087 = vrot.lane.b32.xlu1 %v8742_v41, %s8124_s29 }
 0x37d   : > { %6406 = vmatpush3.bf16.xpose.msra.mxu1 %v1941_v52 }
 0x37e   : > { %v6838_v27 = vpop.permute.xlu1 %6837 }
 0x37f   : > { %v6840_v32 = vunpack.i.h.bf16 %v6838_v27  ;;  %v6839_v43 = vunpack.i.l.bf16 %v6838_v27 }
 0x380   : > { %7112 = vrot.lane.b32.xlu0 %v8700_v48, %s8125_s7  ;;  %7097 = vrot.lane.b32.xlu1 %v8676_v0, %s8126_s13 }
 0x381   : > { %v1531_v49 = vpack.c.bf16 %v6840_v32, %v6839_v43 }
 0x383   : > { %6682 = vmatprep.subr.msk.bf16.mxu1 %vm1758_vm0, %v1531_v49  ;;  %v1944_v44 = vsel %vm1758_vm0, %v1531_v49, 0 }
 0x384   : > { %7122 = vrot.lane.b32.xlu0 %v8694_v29, %s8125_s7  ;;  %7107 = vrot.lane.b32.xlu1 %v8670_v33, %s8126_s13 }
 0x385   : > { %6408 = vmatpush3.bf16.xpose.msra.mxu1 %v1944_v44 }
 0x386   : > { %v6843_v23 = vpop.permute.xlu0 %6842 }
 0x387   : > { %v6845_v51 = vunpack.i.h.bf16 %v6843_v23  ;;  %v6844_v59 = vunpack.i.l.bf16 %v6843_v23 }
 0x388   : > { %7132 = vrot.lane.b32.xlu0 %v8722_v46, %s8125_s7  ;;  %7117 = vrot.lane.b32.xlu1 %v8700_v48, %s8126_s13 }
 0x389   : > { %v1532_v0 = vpack.c.bf16 %v6845_v51, %v6844_v59 }
 0x38a   : > { %v6853_v57 = vpop.permute.xlu0 %6852 }
 0x38b   : > { %v6855_v21 = vunpack.i.h.bf16 %v6853_v57  ;;  %v6854_v63 = vunpack.i.l.bf16 %v6853_v57  ;;  %6683 = vmatprep.subr.msk.bf16.mxu1 %vm1758_vm0, %v1532_v0  ;;  %v1947_v19 = vsel %vm1758_vm0, %v1532_v0, 0 }
 0x38c   : > { %7142 = vrot.lane.b32.xlu0 %v8718_v45, %s8125_s7  ;;  %7127 = vrot.lane.b32.xlu1 %v8694_v29, %s8126_s13 }
 0x38d   : > { %v1534_v33 = vpack.c.bf16 %v6855_v21, %v6854_v63  ;;  %6410 = vmatpush3.bf16.xpose.msra.mxu1 %v1947_v19 }
 0x38e   : > { %v6848_v56 = vpop.permute.xlu1 %6847  ;;  %v6863_v31 = vpop.permute.xlu0 %6862 }
 0x38f   : > { %v6850_v10 = vunpack.i.h.bf16 %v6848_v56  ;;  %v6849_v48 = vunpack.i.l.bf16 %v6848_v56  ;;  %6685 = vmatprep.subr.msk.bf16.mxu0 %vm1758_vm0, %v1534_v33  ;;  %v6865_v34 = vunpack.i.h.bf16 %v6863_v31  ;;  %v6864_v35 = vunpack.i.l.bf16 %v6863_v31 }
 0x390   : > { %7152 = vrot.lane.b32.xlu0 %v8746_v38, %s8125_s7  ;;  %7137 = vrot.lane.b32.xlu1 %v8722_v46, %s8126_s13  ;;  %v2074_v36 = vsel %vm1758_vm0, %v1534_v33, 0 }
 0x391   : > { %v1533_v39 = vpack.c.bf16 %v6850_v10, %v6849_v48  ;;  %6430 = vmatpush3.bf16.xpose.msra.mxu0 %v2074_v36  ;;  %v1542_v26 = vpack.c.bf16 %v6865_v34, %v6864_v35 }
 0x392   : > { %v6858_v29 = vpop.permute.xlu1 %6857  ;;  %v6873_v40 = vpop.permute.xlu0 %6872 }
 0x393   : > { %v6860_v50 = vunpack.i.h.bf16 %v6858_v29  ;;  %v6859_v58 = vunpack.i.l.bf16 %v6858_v29  ;;  %v6875_v7 = vunpack.i.h.bf16 %v6873_v40  ;;  %v6874_v53 = vunpack.i.l.bf16 %v6873_v40  ;;  %6684 = vmatprep.subr.msk.bf16.mxu1 %vm1758_vm0, %v1533_v39 }
 0x394   : > { %7147 = vrot.lane.b32.xlu1 %v8718_v45, %s8126_s13  ;;  %v1950_v4 = vsel %vm1758_vm0, %v1533_v39, 0  ;;  %v2219_v59 = vsel %vm1758_vm0, %v1542_v26, 0 }
 0x395   : > { %v1334_v54 = vpack.c.bf16 %v6860_v50, %v6859_v58  ;;  %v1535_v46 = vpack.c.bf16 %v6875_v7, %v6874_v53  ;;  %6412 = vmatpush3.bf16.xpose.msra.mxu1 %v1950_v4 }
 0x396   : > { %6693 = vmatprep.subr.msk.bf16.mxu1 %vm1758_vm0, %v1542_v26  ;;  %v6868_v55 = vpop.permute.xlu1 %6867  ;;  %v6883_v24 = vpop.permute.xlu0 %6882 }
 0x397   : > { %v6870_v47 = vunpack.i.h.bf16 %v6868_v55  ;;  %v6869_v62 = vunpack.i.l.bf16 %v6868_v55  ;;  %v6885_v13 = vunpack.i.h.bf16 %v6883_v24  ;;  %v6884_v1 = vunpack.i.l.bf16 %v6883_v24  ;;  %6413 = vmatprep.mubr.msk.bf16.mxu1 %vm1758_vm0, %v1334_v54  ;;  %6686 = vmatprep.subr.msk.bf16.mxu0 %vm1758_vm0, %v1535_v46 }
 0x398   : > { %7157 = vrot.lane.b32.xlu1 %v8746_v38, %s8126_s13  ;;  %v2077_v45 = vsel %vm1758_vm0, %v1535_v46, 0 }
 0x399   : > { %v1335_v52 = vpack.c.bf16 %v6870_v47, %v6869_v62  ;;  %v1536_v27 = vpack.c.bf16 %v6885_v13, %v6884_v1  ;;  %6432 = vmatpush3.bf16.xpose.msra.mxu0 %v2077_v45 }
 0x39a   : > { %v6878_v32 = vpop.permute.xlu1 %6877  ;;  %v6893_v43 = vpop.permute.xlu0 %6892 }
 0x39b   : > { %v6880_v49 = vunpack.i.h.bf16 %v6878_v32  ;;  %v6879_v44 = vunpack.i.l.bf16 %v6878_v32  ;;  %6687 = vmatprep.subr.msk.bf16.mxu0 %vm1758_vm0, %v1536_v27  ;;  %v6895_v23 = vunpack.i.h.bf16 %v6893_v43  ;;  %v6894_v51 = vunpack.i.l.bf16 %v6893_v43 }
 0x39c   : > { %6414 = vmatmul.mubr.msk.bf16.vlgmr.msra.gmra.mrb[16].mxu1 %vm1758_vm0, %v1335_v52  ;;  %v2080_v33 = vsel %vm1758_vm0, %v1536_v27, 0 }
 0x39d   : > { %v1543_v0 = vpack.c.bf16 %v6880_v49, %v6879_v44  ;;  %6462 = vmatpush3.bf16.xpose.msra.mxu1 %v2219_v59  ;;  %v1537_v21 = vpack.c.bf16 %v6895_v23, %v6894_v51 }
 0x39e   : > { %v6888_v38 = vpop.permute.xlu1 %6887  ;;  %v6903_v57 = vpop.permute.xlu0 %6902 }
 0x39f   : > { %6694 = vmatprep.subr.msk.bf16.mxu1 %vm1758_vm0, %v1543_v0  ;;  %v6890_v63 = vunpack.i.h.bf16 %v6888_v38  ;;  %v6889_v19 = vunpack.i.l.bf16 %v6888_v38  ;;  %v6905_v35 = vunpack.i.h.bf16 %v6903_v57  ;;  %v6904_v36 = vunpack.i.l.bf16 %v6903_v57 }
 0x3a0   : > { %v2222_v39 = vsel %vm1758_vm0, %v1543_v0, 0  ;;  %v2083_v54 = vsel %vm1758_vm0, %v1537_v21, 0 }
 0x3a1   : > { %6434 = vmatpush3.bf16.xpose.msra.mxu0 %v2080_v33  ;;  %v1544_v34 = vpack.c.bf16 %v6890_v63, %v6889_v19  ;;  %v1538_v53 = vpack.c.bf16 %v6905_v35, %v6904_v36 }
 0x3a2   : > { %6688 = vmatprep.subr.msk.bf16.mxu0 %vm1758_vm0, %v1537_v21  ;;  %v6898_v56 = vpop.permute.xlu1 %6897  ;;  %v6913_v31 = vpop.permute.xlu0 %6912 }
 0x3a3   : > { %v6915_v10 = vunpack.i.h.bf16 %v6913_v31  ;;  %v6914_v48 = vunpack.i.l.bf16 %v6913_v31  ;;  %v6900_v26 = vunpack.i.h.bf16 %v6898_v56  ;;  %v6899_v4 = vunpack.i.l.bf16 %v6898_v56 }
 0x3a4   : > { %v2225_v52 = vsel %vm1758_vm0, %v1544_v34, 0  ;;  %v2086_v0 = vsel %vm1758_vm0, %v1538_v53, 0 }
 0x3a5   : > { %v1336_v29 = vpack.c.bf16 %v6915_v10, %v6914_v48  ;;  %6464 = vmatpush3.bf16.xpose.msra.mxu1 %v2222_v39  ;;  %v1545_v13 = vpack.c.bf16 %v6900_v26, %v6899_v4 }
 0x3a6   : > { %6695 = vmatprep.subr.msk.bf16.mxu1 %vm1758_vm0, %v1544_v34  ;;  %v6908_v40 = vpop.permute.xlu1 %6907  ;;  %v6923_v50 = vpop.permute.xlu0 %6922 }
 0x3a7   : > { %v6925_v58 = vunpack.i.h.bf16 %v6923_v50  ;;  %v6924_v7 = vunpack.i.l.bf16 %v6923_v50  ;;  %6417 = vmatprep.mubr.msk.bf16.mxu1 %vm1758_vm0, %v1336_v29  ;;  %v6910_v23 = vunpack.i.h.bf16 %v6908_v40  ;;  %v6909_v51 = vunpack.i.l.bf16 %v6908_v40 }
 0x3a8   : > { %v2228_v10 = vsel %vm1758_vm0, %v1545_v13, 0 }
 0x3a9   : > { %v1337_v46 = vpack.c.bf16 %v6925_v58, %v6924_v7  ;;  %6436 = vmatpush3.bf16.xpose.msra.mxu0 %v2083_v54  ;;  %v1546_v33 = vpack.c.bf16 %v6910_v23, %v6909_v51 }
 0x3aa   : > { %6689 = vmatprep.subr.msk.bf16.mxu0 %vm1758_vm0, %v1538_v53  ;;  %v6918_v55 = vpop.permute.xlu1 %6917  ;;  %v6933_v24 = vpop.permute.xlu0 %6932 }
 0x3ab   : > { %v6935_v47 = vunpack.i.h.bf16 %v6933_v24  ;;  %v6934_v62 = vunpack.i.l.bf16 %v6933_v24  ;;  %6418 = vmatmul.mubr.msk.bf16.gmra.mrb[20].mxu1 %vm1758_vm0, %v1337_v46  ;;  %v6920_v1 = vunpack.i.h.bf16 %v6918_v55  ;;  %v6919_v45 = vunpack.i.l.bf16 %v6918_v55 }
 0x3ad   : > { %v1338_v27 = vpack.c.bf16 %v6935_v47, %v6934_v62  ;;  %6466 = vmatpush3.bf16.xpose.msra.mxu1 %v2225_v52  ;;  %v1539_v59 = vpack.c.bf16 %v6920_v1, %v6919_v45  ;;  %v2231_v47 = vsel %vm1758_vm0, %v1546_v33, 0 }
 0x3ae   : > { %6696 = vmatprep.subr.msk.bf16.mxu1 %vm1758_vm0, %v1545_v13  ;;  %v6928_v32 = vpop.permute.xlu1 %6927  ;;  %v6943_v43 = vpop.permute.xlu0 %6942 }
 0x3af   : > { %v6945_v49 = vunpack.i.h.bf16 %v6943_v43  ;;  %v6944_v44 = vunpack.i.l.bf16 %v6943_v43  ;;  %6421 = vmatprep.mubr.msk.bf16.mxu1 %vm1758_vm0, %v1338_v27  ;;  %v6930_v29 = vunpack.i.h.bf16 %v6928_v32  ;;  %v6929_v40 = vunpack.i.l.bf16 %v6928_v32 }
 0x3b0   : > { %v2089_v58 = vsel %vm1758_vm0, %v1539_v59, 0 }
 0x3b1   : > { %v1339_v38 = vpack.c.bf16 %v6945_v49, %v6944_v44  ;;  %6438 = vmatpush3.bf16.xpose.msra.mxu0 %v2086_v0  ;;  %v1547_v46 = vpack.c.bf16 %v6930_v29, %v6929_v40 }
 0x3b2   : > { %6690 = vmatprep.subr.msk.bf16.mxu0 %vm1758_vm0, %v1539_v59  ;;  %v6938_v57 = vpop.permute.xlu1 %6937  ;;  %v6953_v21 = vpop.permute.xlu0 %6952 }
 0x3b3   : > { %v6955_v63 = vunpack.i.h.bf16 %v6953_v21  ;;  %v6954_v19 = vunpack.i.l.bf16 %v6953_v21  ;;  %6422 = vmatmul.mubr.msk.bf16.gmra.mrb[24].mxu1 %vm1758_vm0, %v1339_v38  ;;  %v6940_v56 = vunpack.i.h.bf16 %v6938_v57  ;;  %v6939_v31 = vunpack.i.l.bf16 %v6938_v57 }
 0x3b4   : > { %v2234_v0 = vsel %vm1758_vm0, %v1547_v46, 0 }
 0x3b5   : > { %v1340_v48 = vpack.c.bf16 %v6955_v63, %v6954_v19  ;;  %6468 = vmatpush3.bf16.xpose.msra.mxu1 %v2228_v10  ;;  %v1540_v50 = vpack.c.bf16 %v6940_v56, %v6939_v31 }
 0x3b6   : > { %6697 = vmatprep.subr.msk.bf16.mxu1 %vm1758_vm0, %v1546_v33  ;;  %v6948_v34 = vpop.permute.xlu1 %6947  ;;  %v6958_v35 = vpop.permute.xlu0 %6957 }
 0x3b7   : > { %v6960_v36 = vunpack.i.h.bf16 %v6958_v35  ;;  %v6959_v39 = vunpack.i.l.bf16 %v6958_v35  ;;  %6425 = vmatprep.mubr.msk.bf16.mxu1 %vm1758_vm0, %v1340_v48  ;;  %v6950_v27 = vunpack.i.h.bf16 %v6948_v34  ;;  %v6949_v32 = vunpack.i.l.bf16 %v6948_v34 }
 0x3b8   : > { %v2092_v49 = vsel %vm1758_vm0, %v1540_v50, 0 }
 0x3b9   : > { %v1341_v7 = vpack.c.bf16 %v6960_v36, %v6959_v39  ;;  %6440 = vmatpush3.bf16.xpose.msra.mxu0 %v2089_v58  ;;  %v1548_v59 = vpack.c.bf16 %v6950_v27, %v6949_v32 }
 0x3ba   : > { %6691 = vmatprep.subr.msk.bf16.mxu0 %vm1758_vm0, %v1540_v50  ;;  %v6968_v53 = vpop.permute.xlu1 %6967  ;;  %v6963_v26 = vpop.permute.xlu0 %6962 }
 0x3bb   : > { %v6965_v4 = vunpack.i.h.bf16 %v6963_v26  ;;  %v6964_v54 = vunpack.i.l.bf16 %v6963_v26  ;;  %6426 = vmatmul.mubr.msk.bf16.gmra.mrb[28].mxu1 %vm1758_vm0, %v1341_v7  ;;  %v6970_v55 = vunpack.i.h.bf16 %v6968_v53  ;;  %v6969_v24 = vunpack.i.l.bf16 %v6968_v53 }
 0x3bc   : > { %v2237_v36 = vsel %vm1758_vm0, %v1548_v59, 0 }
 0x3bd   : > { %v1342_v62 = vpack.c.bf16 %v6965_v4, %v6964_v54  ;;  %6470 = vmatpush3.bf16.xpose.msra.mxu1 %v2231_v47  ;;  %v1541_v43 = vpack.c.bf16 %v6970_v55, %v6969_v24 }
 0x3be   : > { %6698 = vmatprep.subr.msk.bf16.mxu1 %vm1758_vm0, %v1547_v46  ;;  %v6973_v13 = vpop.permute.xlu1 %6972  ;;  %v6983_v1 = vpop.permute.xlu0 %6982 }
 0x3bf   : > { %v6985_v45 = vunpack.i.h.bf16 %v6983_v1  ;;  %v6984_v52 = vunpack.i.l.bf16 %v6983_v1  ;;  %6445 = vmatprep.mubr.msk.bf16.mxu0 %vm1758_vm0, %v1342_v62  ;;  %v6975_v21 = vunpack.i.h.bf16 %v6973_v13  ;;  %v6974_v63 = vunpack.i.l.bf16 %v6973_v13 }
 0x3c0   : > { %v2095_v19 = vsel %vm1758_vm0, %v1541_v43, 0 }
 0x3c1   : > { %v1350_v44 = vpack.c.bf16 %v6985_v45, %v6984_v52  ;;  %6442 = vmatpush3.bf16.xpose.msra.mxu0 %v2092_v49  ;;  %v1549_v35 = vpack.c.bf16 %v6975_v21, %v6974_v63 }
 0x3c2   : > { %6692 = vmatprep.subr.msk.bf16.mxu0 %vm1758_vm0, %v1541_v43  ;;  %v6978_v23 = vpop.permute.xlu1 %6977  ;;  %v6993_v51 = vpop.permute.xlu0 %6992 }
 0x3c3   : > { %6477 = vmatprep.mubr.msk.bf16.mxu1 %vm1758_vm0, %v1350_v44  ;;  %v6980_v33 = vunpack.i.h.bf16 %v6978_v23  ;;  %v6979_v56 = vunpack.i.l.bf16 %v6978_v23  ;;  %v6995_v48 = vunpack.i.h.bf16 %v6993_v51  ;;  %v6994_v34 = vunpack.i.l.bf16 %v6993_v51 }
 0x3c4   : > { %v2240_v46 = vsel %vm1758_vm0, %v1549_v35, 0 }
 0x3c5   : > { %6472 = vmatpush3.bf16.xpose.msra.mxu1 %v2234_v0  ;;  %v1343_v39 = vpack.c.bf16 %v6980_v33, %v6979_v56  ;;  %v1344_v50 = vpack.c.bf16 %v6995_v48, %v6994_v34 }
 0x3c6   : > { %6699 = vmatprep.subr.msk.bf16.mxu1 %vm1758_vm0, %v1548_v59  ;;  %v6988_v38 = vpop.permute.xlu1 %6987  ;;  %v7003_v57 = vpop.permute.xlu0 %7002 }
 0x3c7   : > { %v6990_v55 = vunpack.i.h.bf16 %v6988_v38  ;;  %v6989_v24 = vunpack.i.l.bf16 %v6988_v38  ;;  %v7005_v47 = vunpack.i.h.bf16 %v7003_v57  ;;  %v7004_v62 = vunpack.i.l.bf16 %v7003_v57 }
 0x3c9   : > { %6444 = vmatpush3.bf16.xpose.msra.mxu0 %v2095_v19  ;;  %v1351_v52 = vpack.c.bf16 %v6990_v55, %v6989_v24  ;;  %v1352_v27 = vpack.c.bf16 %v7005_v47, %v7004_v62 }
 0x3ca   : > { %6493 = vmatprep.subr.bf16.mxu0 %v8678_v61  ;;  %v6998_v31 = vpop.permute.xlu1 %6997  ;;  %v7013_v10 = vpop.permute.xlu0 %7012 }
 0x3cb   : > { %v7000_v58 = vunpack.i.h.bf16 %v6998_v31  ;;  %v6999_v7 = vunpack.i.l.bf16 %v6998_v31  ;;  %v7015_v4 = vunpack.i.h.bf16 %v7013_v10  ;;  %v7014_v54 = vunpack.i.l.bf16 %v7013_v10 }
 0x3cd   : > { %6474 = vmatpush3.bf16.xpose.msra.mxu1 %v2237_v36  ;;  %v1345_v13 = vpack.c.bf16 %v7000_v58, %v6999_v7  ;;  %v1346_v45 = vpack.c.bf16 %v7015_v4, %v7014_v54 }
 0x3ce   : > { %6700 = vmatprep.subr.msk.bf16.mxu1 %vm1758_vm0, %v1549_v35  ;;  %v7008_v29 = vpop.permute.xlu1 %7007  ;;  %v7023_v40 = vpop.permute.xlu0 %7022 }
 0x3cf   : > { %v7010_v0 = vunpack.i.h.bf16 %v7008_v29  ;;  %v7009_v38 = vunpack.i.l.bf16 %v7008_v29  ;;  %v7025_v57 = vunpack.i.h.bf16 %v7023_v40  ;;  %v7024_v21 = vunpack.i.l.bf16 %v7023_v40 }
 0x3d0   : > { %6446 = vmatmul.mubr.msk.bf16.vlgmr.msra.gmra.mrb[48].mxu0 %vm1758_vm0, %v1343_v39 }
 0x3d1   : > { %6449 = vmatprep.mubr.msk.bf16.mxu0 %vm1758_vm0, %v1344_v50  ;;  %6494 = vmatpush3.bf16.msra.mxu0 %v8678_v61  ;;  %v1353_v31 = vpack.c.bf16 %v7010_v0, %v7009_v38  ;;  %v9007_v38 = vld [vmem:[#allocation5] sm:$0xff] }
 0x3d2   : > { %6495 = vmatprep.subr.bf16.mxu0 %v8672_v60  ;;  %v7018_v53 = vpop.permute.xlu1 %7017  ;;  %v7033_v26 = vpop.permute.xlu0 %7032 }
 0x3d3   : > { %v7019_v32 = vunpack.i.l.bf16 %v7018_v53  ;;  %v7035_v44 = vunpack.i.h.bf16 %v7033_v26  ;;  %v7034_v23 = vunpack.i.l.bf16 %v7033_v26 }
 0x3d5   : > { %6476 = vmatpush3.bf16.xpose.msra.mxu1 %v2240_v46  ;;  %6496 = vmatpush3.bf16.msra.mxu0 %v8672_v60  ;;  %v7020_v60 = vunpack.i.h.bf16 %v7018_v53  ;;  %v1348_v56 = vpack.c.bf16 %v7035_v44, %v7034_v23 }
 0x3d6   : > { %6497 = vmatprep.subr.bf16.mxu0 %v8702_v28  ;;  %v8971_v61 = vpop.permute.xlu1 %7027  ;;  %v8973_v1 = vpop.permute.xlu0 %7042 }
 0x3d7   : > { %v1347_v63 = vpack.c.bf16 %v7020_v60, %v7019_v32  ;;  %v7029_v58 = vunpack.i.l.bf16 %v8971_v61  ;;  %v7045_v4 = vunpack.i.h.bf16 %v8973_v1  ;;  %v7044_v54 = vunpack.i.l.bf16 %v8973_v1 }
 0x3d8   : > { %6450 = vmatmul.mubr.msk.bf16.gmra.mrb[52].mxu0 %vm1758_vm0, %v1345_v13 }
 0x3d9   : > { %6453 = vmatprep.mubr.msk.bf16.mxu0 %vm1758_vm0, %v1346_v45  ;;  %6498 = vmatpush3.bf16.msra.mxu0 %v8702_v28  ;;  %v1356_v62 = vpack.c.bf16 %v7045_v4, %v7044_v54  ;;  %v9035_v4 = vld [vmem:[#allocation5 + $0x38] sm:$0xff] }
 0x3da   : > { %6499 = vmatprep.subr.bf16.mxu0 %v8696_v30  ;;  %v7038_v43 = vpop.permute.xlu1 %7037  ;;  %v7053_v49 = vpop.permute.xlu0 %7052 }
 0x3db   : > { %v7055_v51 = vunpack.i.h.bf16 %v7053_v49  ;;  %v7054_v59 = vunpack.i.l.bf16 %v7053_v49  ;;  %v7040_v10 = vunpack.i.h.bf16 %v7038_v43  ;;  %v7039_v48 = vunpack.i.l.bf16 %v7038_v43 }
 0x3dc   : > { %6478 = vmatmul.mubr.msk.bf16.vlgmr.msra.gmra.mrb[32].mxu1 %vm1758_vm0, %v1351_v52 }
 0x3dd   : > { %6481 = vmatprep.mubr.msk.bf16.mxu1 %vm1758_vm0, %v1352_v27  ;;  %6500 = vmatpush3.bf16.msra.mxu0 %v8696_v30  ;;  %v1718_v28 = vpack.c.bf16 %v7055_v51, %v7054_v59  ;;  %v1354_v30 = vpack.c.bf16 %v7025_v57, %v7024_v21  ;;  %v1349_v7 = vpack.c.bf16 %v7040_v10, %v7039_v48  ;;  %v9015_v10 = vld [vmem:[#allocation5 + $0x18] sm:$0xff] }
 0x3de   : > { %6501 = vmatprep.subr.bf16.mxu0 %v8726_v37  ;;  %v7048_v19 = vpop.permute.xlu1 %7047  ;;  %v7063_v33 = vpop.permute.xlu0 %7062 }
 0x3df   : > { %6525 = vmatprep.subr.bf16.mxu1 %v1718_v28  ;;  %v7065_v36 = vunpack.i.h.bf16 %v7063_v33  ;;  %v7064_v39 = vunpack.i.l.bf16 %v7063_v33  ;;  %v7049_v60 = vunpack.i.l.bf16 %v7048_v19 }
 0x3e0   : > { %6454 = vmatmul.mubr.msk.bf16.gmra.mrb[56].mxu0 %vm1758_vm0, %v1347_v63  ;;  %6526 = vmatpush3.bf16.msra.mxu1 %v1718_v28  ;;  %v9005_v28 = vld [vmem:[#allocation5 + $0x10] sm:$0xff] }
 0x3e1   : > { %6457 = vmatprep.mubr.msk.bf16.mxu0 %vm1758_vm0, %v1348_v56  ;;  %6502 = vmatpush3.bf16.msra.mxu0 %v8726_v37  ;;  %v7030_v37 = vunpack.i.h.bf16 %v8971_v61  ;;  %v1720_v46 = vpack.c.bf16 %v7065_v36, %v7064_v39 }
 0x3e2   : > { %6503 = vmatprep.subr.bf16.mxu0 %v8720_v16  ;;  %v7058_v34 = vpop.permute.xlu1 %7057  ;;  %v7073_v35 = vpop.permute.xlu0 %7072 }
 0x3e3   : > { %v7060_v29 = vunpack.i.h.bf16 %v7058_v34  ;;  %v7059_v40 = vunpack.i.l.bf16 %v7058_v34  ;;  %v1355_v24 = vpack.c.bf16 %v7030_v37, %v7029_v58  ;;  %v7075_v1 = vunpack.i.h.bf16 %v7073_v35 }
 0x3e4   : > { %6482 = vmatmul.mubr.msk.bf16.gmra.mrb[36].mxu1 %vm1758_vm0, %v1353_v31  ;;  %v7074_v45 = vunpack.i.l.bf16 %v7073_v35 }
 0x3e5   : > { %6485 = vmatprep.mubr.msk.bf16.mxu1 %vm1758_vm0, %v1354_v30  ;;  %6504 = vmatpush3.bf16.msra.mxu0 %v8720_v16  ;;  %v1719_v50 = vpack.c.bf16 %v7060_v29, %v7059_v40  ;;  %v9022_v40 = vld [vmem:[#allocation5 + $0x8] sm:$0xff] }
 0x3e6   : > { %6505 = vmatprep.subr.bf16.mxu0 %v8750_v42  ;;  %v7068_v53 = vpop.permute.xlu1 %7067  ;;  %v7083_v26 = vpop.permute.xlu0 %7082  ;;  %v1722_v44 = vpack.c.bf16 %v7075_v1, %v7074_v45 }
 0x3e7   : > { %6527 = vmatprep.subr.bf16.mxu1 %v1719_v50  ;;  %v7070_v16 = vunpack.i.h.bf16 %v7068_v53  ;;  %v7069_v55 = vunpack.i.l.bf16 %v7068_v53  ;;  %v7084_v59 = vunpack.i.l.bf16 %v7083_v26 }
 0x3e8   : > { %6458 = vmatmul.mubr.msk.bf16.gmra.mrb[60].mxu0 %vm1758_vm0, %v1349_v7  ;;  %6528 = vmatpush3.bf16.msra.mxu1 %v1719_v50  ;;  %v9024_v50 = vld [vmem:[#allocation5 + $0x30] sm:$0xff] }
 0x3e9   : > { %6506 = vmatpush3.bf16.msra.mxu0 %v8750_v42  ;;  %6529 = vmatprep.subr.bf16.mxu1 %v1720_v46  ;;  %v1721_v52 = vpack.c.bf16 %v7070_v16, %v7069_v55  ;;  %v7050_v42 = vunpack.i.h.bf16 %v7048_v19 }
 0x3ea   : > { %6507 = vmatprep.subr.bf16.mxu0 %v8744_v25  ;;  %v7093_v47 = vpop.permute.xlu0 %7092  ;;  %v7078_v32 = vpop.permute.xlu1 %7077 }
 0x3eb   : > { %v7095_v13 = vunpack.i.h.bf16 %v7093_v47  ;;  %v7094_v61 = vunpack.i.l.bf16 %v7093_v47  ;;  %v7080_v43 = vunpack.i.h.bf16 %v7078_v32  ;;  %v7079_v49 = vunpack.i.l.bf16 %v7078_v32  ;;  %v9048_v47 = vld [vmem:[#allocation5 + $0x28] sm:$0xff] }
 0x3ec   : > { %6486 = vmatmul.mubr.msk.bf16.gmra.mrb[40].mxu1 %vm1758_vm0, %v1355_v24  ;;  %v1357_v23 = vpack.c.bf16 %v7050_v42, %v7049_v60  ;;  %v9062_v60 = vld [vmem:[#allocation5 + $0x40] sm:$0xff] }
 0x3ed   : > { %6489 = vmatprep.mubr.msk.bf16.mxu1 %vm1758_vm0, %v1356_v62  ;;  %6508 = vmatpush3.bf16.msra.mxu0 %v8744_v25  ;;  %v9001_v27 = vpack.c.bf16 %v7095_v13, %v7094_v61  ;;  %v7085_v25 = vunpack.i.h.bf16 %v7083_v26  ;;  %v1723_v0 = vpack.c.bf16 %v7080_v43, %v7079_v49  ;;  %v9050_v62 = vld [vmem:[#allocation5 + $0x50] sm:$0xff] }
 0x3ee   : > { %6530 = vmatpush3.bf16.msra.mxu1 %v1720_v46  ;;  %v7088_v51 = vpop.permute.xlu1 %7087  ;;  %v9037_v46 = vld [vmem:[#allocation5 + $0x20] sm:$0xff] }
 0x3ef   : > { %6531 = vmatprep.subr.bf16.mxu1 %v1721_v52  ;;  %6557 = vmatprep.subr.bf16.mxu0 %v9001_v27  ;;  %v7090_v21 = vunpack.i.h.bf16 %v7088_v51  ;;  %v7089_v63 = vunpack.i.l.bf16 %v7088_v51  ;;  %v1724_v56 = vpack.c.bf16 %v7085_v25, %v7084_v59 }
 0x3f1   : > { %v1725_v29 = vpack.c.bf16 %v7090_v21, %v7089_v63  ;;  %v9086_v63 = vld [vmem:[#allocation5 + $0x60] sm:$0xff] }
 0x3f2   : > { %6532 = vmatpush3.bf16.msra.mxu1 %v1721_v52  ;;  %v7098_v31 = vpop.permute.xlu1 %7097  ;;  %v9060_v52 = vld [vmem:[#allocation5 + $0x58] sm:$0xff] }
 0x3f3   : > { %6533 = vmatprep.subr.bf16.mxu1 %v1722_v44  ;;  %v7100_v35 = vunpack.i.h.bf16 %v7098_v31  ;;  %v7099_v36 = vunpack.i.l.bf16 %v7098_v31 }
 0x3f4   : > { %6490 = vmatmul.mubr.msk.bf16.gmra.mrb[44].mxu1 %vm1758_vm0, %v1357_v23  ;;  %v9074_v23 = vld [vmem:[#allocation5 + $0x70] sm:$0xff] }
 0x3f5   : > { %v9033_v26 = vpack.c.bf16 %v7100_v35, %v7099_v36  ;;  %v9104_v35 = vpop.permute.xlu0 %7102 }
 0x3f6   : > { %6534 = vmatpush3.bf16.msra.mxu1 %v1722_v44  ;;  %v9072_v44 = vld [vmem:[#allocation5 + $0x48] sm:$0xff]  ;;  %v9106_v36 = vpop.permute.xlu1 %7107 }
 0x3f7   : > { %6535 = vmatprep.subr.bf16.mxu1 %v1723_v0  ;;  %11176 = vst [vmem:[#allocation36_spill] sm:$0xff] %v9033_v26  ;;  %11178 = vst [vmem:[#allocation38_spill] sm:$0xff] %v9106_v36 }
 0x3f8   : > { %v6383_v57 = vpop.f32.mrb[32].mxu0 }
 0x3f9   : > { %v9010_v19 = vadd.f32 %v6383_v57, %v9005_v28  ;;  %v1841_v33 = vpop.f32.mrb[33].mxu0  ;;  %v9084_v57 = vld [vmem:[#allocation5 + $0x78] sm:$0xff] }
 0x3fa   : > { %v9013_v30 = vadd.f32 %v1841_v33, %v9007_v38  ;;  %6536 = vmatpush3.bf16.msra.mxu1 %v1723_v0  ;;  %v6384_v48 = vpop.f32.mrb[34].mxu0 }
 0x3fb   : > { %6537 = vmatprep.subr.bf16.mxu1 %v1724_v56  ;;  %2343 = vmax.xlane.f32.xlu0 %v9010_v19  ;;  %v1844_v34 = vpop.f32.mrb[35].mxu0  ;;  %v9020_v39 = vadd.f32 %v6384_v48, %v9015_v10  ;;  %v9096_v48 = vld [vmem:[#allocation5 + $0x68] sm:$0xff] }
 0x3fc   : > { %2339 = vmax.xlane.f32.xlu1 %v9013_v30  ;;  %v9028_v58 = vadd.f32 %v1844_v34, %v9022_v40  ;;  %11177 = vst [vmem:[#allocation37_spill] sm:$0xff] %v9096_v48 }
 0x3fe   : > { %6538 = vmatpush3.bf16.msra.mxu1 %v1724_v56 }
 0x3ff   : > { %6539 = vmatprep.subr.bf16.mxu1 %v1725_v29  ;;  %2345 = vmax.xlane.f32.xlu0 %v9020_v39 }
 0x400   : > { %v6387_v37 = vpop.f32.mrb[36].mxu0 }
 0x401   : > { %v9031_v7 = vadd.f32 %v6387_v37, %v9024_v50  ;;  %v1857_v53 = vpop.f32.mrb[37].mxu0  ;;  %v9110_v37 = vpop.permute.xlu1 %7117 }
 0x402   : > { %6540 = vmatpush3.bf16.msra.mxu1 %v1725_v29  ;;  %v6388_v54 = vpop.f32.mrb[38].mxu0  ;;  %v9046_v24 = vadd.f32 %v1857_v53, %v9037_v46  ;;  %v9108_v29 = vpop.permute.xlu0 %7112  ;;  %11179 = vst [vmem:[#allocation39_spill] sm:$0xff] %v9110_v37 }
 0x403   : > { %6589 = vmatprep.subr.bf16.mxu1 %v9033_v26  ;;  %v1860_v16 = vpop.f32.mrb[39].mxu0  ;;  %2341 = vmax.xlane.f32.xlu0 %v9028_v58  ;;  %v9043_v55 = vadd.f32 %v6388_v54, %v9035_v4 }
 0x404   : > { %2351 = vmax.xlane.f32.xlu1 %v9031_v7  ;;  %v9055_v61 = vadd.f32 %v1860_v16, %v9048_v47 }
 0x407   : > { %2353 = vmax.xlane.f32.xlu0 %v9043_v55 }
 0x408   : > { %2347 = vmax.xlane.f32.xlu1 %v9046_v24  ;;  %v6391_v13 = vpop.f32.mrb[40].mxu0 }
 0x409   : > { %v9058_v1 = vadd.f32 %v6391_v13, %v9050_v62  ;;  %v1873_v45 = vpop.f32.mrb[41].mxu0 }
 0x40a   : > { %v6392_v42 = vpop.f32.mrb[42].mxu0  ;;  %v9070_v49 = vadd.f32 %v1873_v45, %v9062_v60  ;;  %v9117_v45 = vpop.permute.xlu0 %7122 }
 0x40b   : > { %v1876_v32 = vpop.f32.mrb[43].mxu0  ;;  %2349 = vmax.xlane.f32.xlu0 %v9055_v61  ;;  %v9067_v43 = vadd.f32 %v6392_v42, %v9060_v52 }
 0x40c   : > { %2359 = vmax.xlane.f32.xlu1 %v9058_v1  ;;  %v9079_v25 = vadd.f32 %v1876_v32, %v9072_v44  ;;  %v9122_v32 = vpop.permute.xlu1 %7127 }
 0x40d   : > { %11181 = vst [vmem:[#allocation41_spill] sm:$0xff] %v9122_v32 }
 0x40f   : > { %2361 = vmax.xlane.f32.xlu0 %v9067_v43 }
 0x410   : > { %2355 = vmax.xlane.f32.xlu1 %v9070_v49  ;;  %v6395_v51 = vpop.f32.mrb[44].mxu0 }
 0x411   : > { %v9082_v59 = vadd.f32 %v6395_v51, %v9074_v23  ;;  %v1889_v0 = vpop.f32.mrb[45].mxu0 }
 0x412   : > { %v6396_v21 = vpop.f32.mrb[46].mxu0  ;;  %v9094_v31 = vadd.f32 %v1889_v0, %v9086_v63  ;;  %v9128_v0 = vpop.permute.xlu0 %7132 }
 0x413   : > { %v1892_v33 = vpop.f32.mrb[47].mxu0  ;;  %2357 = vmax.xlane.f32.xlu0 %v9079_v25  ;;  %v9091_v56 = vadd.f32 %v6396_v21, %v9084_v57  ;;  %v9130_v21 = vpop.permute.xlu1 %7137 }
 0x414   : > { %2367 = vmax.xlane.f32.xlu1 %v9082_v59  ;;  %v9101_v34 = vadd.f32 %v1892_v33, %v9096_v48  ;;  %11183 = vst [vmem:[#allocation43_spill] sm:$0xff] %v9130_v21 }
 0x416   : > { %v9132_v33 = vpop.permute.xlu0 %7142 }
 0x417   : > { %2369 = vmax.xlane.f32.xlu0 %v9091_v56  ;;  %v9136_v22 = vpop.permute.xlu1 %7147 }
 0x418   : > { %2363 = vmax.xlane.f32.xlu1 %v9094_v31  ;;  %11184 = vst [vmem:[#allocation44_spill] sm:$0xff] %v9136_v22 }
 0x41b   : > { %2365 = vmax.xlane.f32.xlu0 %v9101_v34  ;;  %v9146_v17 = vpop.permute.xlu1 %7157 }
 0x41c   : > { %11185 = vst [vmem:[#allocation45_spill] sm:$0xff] %v9146_v17 }
 0x46f   : > { %v6415_v53 = vpop.f32.mrb[16].mxu1 }
 0x470   : > { %v9113_v54 = vadd.f32 %v6415_v53, %v9005_v28  ;;  %v1986_v16 = vpop.f32.mrb[17].mxu1 }
 0x471   : > { %v9115_v13 = vpop.f32.mrb[18].mxu1  ;;  %v9125_v51 = vadd.f32 %v1986_v16, %v9007_v38  ;;  %v9144_v16 = vpop.permute.xlu0 %7152 }
 0x472   : > { %11180 = vst [vmem:[#allocation40_spill] sm:$0xff] %v9113_v54  ;;  %2375 = vmax.xlane.f32.xlu1 %v9113_v54  ;;  %v9120_v42 = vpop.f32.mrb[19].mxu1 }
 0x473   : > { %11182 = vst [vmem:[#allocation42_spill] sm:$0xff] %v9125_v51 }
 0x476   : > { %2371 = vmax.xlane.f32.xlu1 %v9125_v51 }
 0x47e   : > { %v9134_v53 = vpop.f32.mrb[20].mxu1 }
 0x47f   : > { %v9138_v20 = vpop.f32.mrb[21].mxu1 }
 0x480   : > { %v9140_v18 = vpop.f32.mrb[22].mxu1 }
 0x481   : > { %v9142_v15 = vpop.f32.mrb[23].mxu1 }
 0x486   : > { %v9148_v14 = vpop.f32.mrb[24].mxu1 }
 0x487   : > { %v9150_v12 = vpop.f32.mrb[25].mxu1 }
 0x488   : > { %v2344_v9 = vpop.xlane.xlu0 %2343  ;;  %v9152_v11 = vpop.f32.mrb[26].mxu1 }
 0x489   : > { %v2340_v8 = vpop.xlane.xlu1 %2339  ;;  %v9154_v6 = vpop.f32.mrb[27].mxu1  ;;  %v2469_v22 = vsub.f32 %v9010_v19, %v2344_v9 }
 0x48a   : > { %v2467_v5 = vsub.f32 %v9013_v30, %v2340_v8 }
 0x48b   : > { %v2535_v8 = vmul.f32 1.442695, %v2469_v22 }
 0x48c   : > { %v2346_v3 = vpop.xlane.xlu0 %2345  ;;  %v2531_v17 = vmul.f32 1.442695, %v2467_v5 }
 0x48d   : > { %v2470_v2 = vsub.f32 %v9020_v39, %v2346_v3 }
 0x48e   : > { %v9159_v21 = vpop.f32.mrb[28].mxu1  ;;  %7443 = vpow2.f32 %v2531_v17 }
 0x48f   : > { %v9161_v32 = vpop.f32.mrb[29].mxu1  ;;  %v2537_v26 = vmul.f32 1.442695, %v2470_v2 }
 0x490   : > { %v2342_v37 = vpop.xlane.xlu0 %2341  ;;  %v9163_v36 = vpop.f32.mrb[30].mxu1 }
 0x491   : > { %11186 = vst [vmem:[#allocation46_spill] sm:$0xff] %v9163_v36  ;;  %v2352_v54 = vpop.xlane.xlu1 %2351  ;;  %v2468_v51 = vsub.f32 %v9028_v58, %v2342_v37  ;;  %v9166_v41 = vpop.f32.mrb[31].mxu1  ;;  %7445 = vpow2.f32 %v2537_v26 }
 0x492   : > { %v2473_v2 = vsub.f32 %v9031_v7, %v2352_v54  ;;  %v7104_v54 = vunpack.i.l.bf16 %v9104_v35 }
 0x493   : > { %v2533_v30 = vmul.f32 1.442695, %v2468_v51 }
 0x494   : > { %v2354_v3 = vpop.xlane.xlu0 %2353  ;;  %v2543_v22 = vmul.f32 1.442695, %v2473_v2 }
 0x495   : > { %7447 = vpow2.f32 %v2533_v30  ;;  %v2348_v9 = vpop.xlane.xlu1 %2347  ;;  %v2474_v5 = vsub.f32 %v9043_v55, %v2354_v3  ;;  %v7105_v55 = vunpack.i.h.bf16 %v9104_v35 }
 0x496   : > { %7449 = vpow2.f32 %v2535_v8  ;;  %v2471_v19 = vsub.f32 %v9046_v24, %v2348_v9 }
 0x497   : > { %v2545_v39 = vmul.f32 1.442695, %v2474_v5 }
 0x498   : > { %v2539_v48 = vmul.f32 1.442695, %v2471_v19  ;;  %v2350_v36 = vpop.xlane.xlu0 %2349  ;;  %v9172_v51 = vpop.eup %7443 }
 0x499   : > { %v2360_v58 = vpop.xlane.xlu1 %2359  ;;  %v2472_v37 = vsub.f32 %v9055_v61, %v2350_v36  ;;  %7451 = vpow2.f32 %v2545_v39 }
 0x49a   : > { %7453 = vpow2.f32 %v2539_v48  ;;  %v2477_v61 = vsub.f32 %v9058_v1, %v2360_v58  ;;  %v1727_v1 = vpack.c.bf16 %v7105_v55, %v7104_v54  ;;  %v7114_v58 = vunpack.i.l.bf16 %v9108_v29 }
 0x49b   : > { %v2541_v17 = vmul.f32 1.442695, %v2472_v37  ;;  %v9176_v24 = vpop.eup %7445  ;;  %v7125_v55 = vunpack.i.h.bf16 %v9117_v45 }
 0x49c   : > { %v2362_v26 = vpop.xlane.xlu0 %2361  ;;  %v2551_v39 = vmul.f32 1.442695, %v2477_v61 }
 0x49d   : > { %7455 = vpow2.f32 %v2541_v17  ;;  %v2356_v8 = vpop.xlane.xlu1 %2355  ;;  %v2478_v7 = vsub.f32 %v9067_v43, %v2362_v26 }
 0x49e   : > { %7457 = vpow2.f32 %v2543_v22  ;;  %v2475_v36 = vsub.f32 %v9070_v49, %v2356_v8  ;;  %v7115_v49 = vunpack.i.h.bf16 %v9108_v29 }
 0x49f   : > { %v9181_v30 = vpop.eup %7447  ;;  %v2553_v48 = vmul.f32 1.442695, %v2478_v7 }
 0x4a0   : > { %v9183_v3 = vpop.eup %7449  ;;  %v2547_v9 = vmul.f32 1.442695, %v2475_v36  ;;  %v2358_v5 = vpop.xlane.xlu0 %2357  ;;  %v2787_v2 = vpack.c.bf16 %v9181_v30, %v9172_v51 }
 0x4a1   : > { %v2368_v43 = vpop.xlane.xlu1 %2367  ;;  %v2476_v19 = vsub.f32 %v9079_v25, %v2358_v5  ;;  %v2788_v35 = vpack.c.bf16 %v9176_v24, %v9183_v3  ;;  %7459 = vpow2.f32 %v2553_v48  ;;  %v7124_v48 = vunpack.i.l.bf16 %v9117_v45 }
 0x4a2   : > { %6509 = vmatprep.mubr.bf16.mxu0 %v2787_v2  ;;  %7461 = vpow2.f32 %v2547_v9 }
 0x4a3   : > { %v2549_v37 = vmul.f32 1.442695, %v2476_v19  ;;  %v6447_v22 = vpop.f32.mrb[48].mxu0  ;;  %6510 = vmatmul.mubr.bf16.vlgmr.msra.gmra.mrb[64].mxu0 %v2788_v35  ;;  %v9196_v8 = vpop.eup %7451  ;;  %v1728_v19 = vpack.c.bf16 %v7115_v49, %v7114_v58 }
 0x4a4   : > { %v9193_v17 = vadd.f32 %v6447_v22, %v9005_v28  ;;  %6558 = vmatpush3.bf16.msra.mxu0 %v9001_v27  ;;  %v2370_v25 = vpop.xlane.xlu0 %2369  ;;  %v2131_v26 = vpop.f32.mrb[49].mxu0  ;;  %v2481_v27 = vsub.f32 %v9082_v59, %v2368_v43  ;;  %v7134_v22 = vunpack.i.l.bf16 %v9128_v0 }
 0x4a5   : > { %7463 = vpow2.f32 %v2549_v37  ;;  %v2364_v7 = vpop.xlane.xlu1 %2363  ;;  %v2482_v29 = vsub.f32 %v9091_v56, %v2370_v25  ;;  %v9201_v54 = vadd.f32 %v2131_v26, %v9007_v38  ;;  %6559 = vmatprep.subr.bf16.mxu0 %v1727_v1  ;;  %v6448_v61 = vpop.f32.mrb[50].mxu0  ;;  %v9216_v37 = vadd.f32 %v9115_v13, %v9015_v10 }
 0x4a6   : > { %v9203_v36 = vpop.eup %7453  ;;  %7465 = vpow2.f32 %v2551_v39  ;;  %v2479_v9 = vsub.f32 %v9094_v31, %v2364_v7  ;;  %2407 = vmax.xlane.f32.xlu0 %v9193_v17  ;;  %v2134_v5 = vpop.f32.mrb[51].mxu0  ;;  %v9221_v43 = vadd.f32 %v6448_v61, %v9015_v10  ;;  %v2559_v58 = vmul.f32 1.442695, %v2481_v27 }
 0x4a7   : > { %v9209_v2 = vpop.eup %7455  ;;  %v2561_v56 = vmul.f32 1.442695, %v2482_v29  ;;  %2403 = vmax.xlane.f32.xlu1 %v9201_v54  ;;  %v1729_v13 = vpack.c.bf16 %v7125_v55, %v7124_v48  ;;  %v9238_v55 = vadd.f32 %v9134_v53, %v9024_v50  ;;  %v7145_v27 = vunpack.i.h.bf16 %v9132_v33 }
 0x4a8   : > { %v9212_v35 = vpop.eup %7457  ;;  %v2555_v45 = vmul.f32 1.442695, %v2479_v9  ;;  %6560 = vmatpush3.bf16.msra.mxu0 %v1727_v1  ;;  %v2366_v59 = vpop.xlane.xlu0 %2365  ;;  %v2789_v31 = vpack.c.bf16 %v9209_v2, %v9203_v36  ;;  %v7135_v1 = vunpack.i.h.bf16 %v9128_v0  ;;  %v7144_v9 = vunpack.i.l.bf16 %v9132_v33 }
 0x4a9   : > { %v2480_v39 = vsub.f32 %v9101_v34, %v2366_v59  ;;  %6561 = vmatprep.subr.bf16.mxu0 %v1728_v19  ;;  %v2790_v49 = vpack.c.bf16 %v9196_v8, %v9212_v35  ;;  %7467 = vpow2.f32 %v2561_v56  ;;  %v9232_v34 = vadd.f32 %v9120_v42, %v9022_v40  ;;  %11188 = vst [vmem:[#allocation48_spill] sm:$0xff] %v9238_v55 }
 0x4aa   : > { %6513 = vmatprep.mubr.bf16.mxu0 %v2789_v31  ;;  %2377 = vmax.xlane.f32.xlu0 %v9216_v37  ;;  %7469 = vpow2.f32 %v2555_v45  ;;  %v1730_v53 = vpack.c.bf16 %v7135_v1, %v7134_v22  ;;  %v9255_v45 = vadd.f32 %v2134_v5, %v9022_v40  ;;  %v7155_v5 = vunpack.i.h.bf16 %v9144_v16 }
 0x4ab   : > { %v2557_v25 = vmul.f32 1.442695, %v2480_v39  ;;  %v6451_v26 = vpop.f32.mrb[52].mxu0  ;;  %6514 = vmatmul.mubr.bf16.gmra.mrb[68].mxu0 %v2790_v49  ;;  %2409 = vmax.xlane.f32.xlu1 %v9221_v43  ;;  %v9234_v29 = vpop.eup %7459  ;;  %v9263_v39 = vadd.f32 %v9138_v20, %v9037_v46  ;;  %v1731_v20 = vpack.c.bf16 %v7145_v27, %v7144_v9 }
 0x4ac   : > { %6562 = vmatpush3.bf16.msra.mxu0 %v1728_v19  ;;  %v2147_v7 = vpop.f32.mrb[53].mxu0  ;;  %11187 = vst [vmem:[#allocation47_spill] sm:$0xff] %v9234_v29  ;;  %v9242_v61 = vpop.eup %7461  ;;  %v9278_v22 = vadd.f32 %v6451_v26, %v9024_v50 }
 0x4ad   : > { %7471 = vpow2.f32 %v2557_v25  ;;  %6563 = vmatprep.subr.bf16.mxu0 %v1729_v13  ;;  %v9240_v0 = vpop.f32.mrb[54].mxu0  ;;  %11189 = vst [vmem:[#allocation49_spill] sm:$0xff] %v9242_v61  ;;  %11191 = vst [vmem:[#allocation51_spill] sm:$0xff] %v9263_v39 }
 0x4ae   : > { %7473 = vpow2.f32 %v2559_v58  ;;  %v2150_v48 = vpop.f32.mrb[55].mxu0  ;;  %2373 = vmax.xlane.f32.xlu0 %v9232_v34  ;;  %11192 = vst [vmem:[#allocation52_spill] sm:$0xff] %v9278_v22 }
 0x4af   : > { %v9245_v42 = vpop.eup %7463  ;;  %v9249_v56 = vpop.f32.mrb[32].mxu1  ;;  %2383 = vmax.xlane.f32.xlu1 %v9238_v55 }
 0x4b0   : > { %v9252_v19 = vpop.eup %7465  ;;  %6564 = vmatpush3.bf16.msra.mxu0 %v1729_v13  ;;  %v9257_v59 = vpop.f32.mrb[33].mxu1  ;;  %v2791_v31 = vpack.c.bf16 %v9245_v42, %v9242_v61  ;;  %v7154_v13 = vunpack.i.l.bf16 %v9144_v16  ;;  %v9306_v61 = vadd.f32 %v9148_v14, %v9050_v62 }
 0x4b1   : > { %11190 = vst [vmem:[#allocation50_spill] sm:$0xff] %v9252_v19  ;;  %6565 = vmatprep.subr.bf16.mxu0 %v1730_v53  ;;  %v9265_v33 = vpop.f32.mrb[34].mxu1  ;;  %v2792_v49 = vpack.c.bf16 %v9234_v29, %v9252_v19 }
 0x4b2   : > { %v9269_v58 = vpop.f32.mrb[35].mxu1  ;;  %6517 = vmatprep.mubr.bf16.mxu0 %v2791_v31  ;;  %2405 = vmax.xlane.f32.xlu0 %v9255_v45  ;;  %v9285_v31 = vadd.f32 %v2150_v48, %v9048_v47  ;;  %v1732_v9 = vpack.c.bf16 %v7155_v5, %v7154_v13  ;;  %v9300_v48 = vadd.f32 %v2147_v7, %v9037_v46 }
 0x4b3   : > { %v9274_v1 = vpop.f32.mrb[56].mxu0  ;;  %6518 = vmatmul.mubr.bf16.gmra.mrb[72].mxu0 %v2792_v49  ;;  %2379 = vmax.xlane.f32.xlu1 %v9263_v39  ;;  %v9282_v55 = vpop.eup %7467  ;;  %11199 = vst [vmem:[#allocation59_spill] sm:$0xff] %v9306_v61  ;;  %v9316_v13 = vadd.f32 %v9140_v18, %v9035_v4 }
 0x4b4   : > { %6566 = vmatpush3.bf16.msra.mxu0 %v1730_v53  ;;  %v9280_v25 = vpop.f32.mrb[57].mxu0  ;;  %11193 = vst [vmem:[#allocation53_spill] sm:$0xff] %v9282_v55  ;;  %11194 = vst [vmem:[#allocation54_spill] sm:$0xff] %v9285_v31  ;;  %v9289_v16 = vpop.eup %7469 }
 0x4b5   : > { %6567 = vmatprep.subr.bf16.mxu0 %v1731_v20  ;;  %v9287_v29 = vpop.f32.mrb[58].mxu0  ;;  %11195 = vst [vmem:[#allocation55_spill] sm:$0xff] %v9289_v16  ;;  %11198 = vst [vmem:[#allocation58_spill] sm:$0xff] %v9300_v48 }
 0x4b6   : > { %v9291_v49 = vpop.f32.mrb[59].mxu0  ;;  %2415 = vmax.xlane.f32.xlu0 %v9278_v22 }
 0x4b7   : > { %v9294_v27 = vpop.eup %7471  ;;  %v6483_v26 = vpop.f32.mrb[36].mxu1  ;;  %2413 = vmax.xlane.f32.xlu1 %v9285_v31 }
 0x4b8   : > { %11196 = vst [vmem:[#allocation56_spill] sm:$0xff] %v9294_v27  ;;  %v9297_v53 = vpop.eup %7473  ;;  %6568 = vmatpush3.bf16.msra.mxu0 %v1731_v20  ;;  %v2292_v39 = vpop.f32.mrb[37].mxu1  ;;  %v2793_v19 = vpack.c.bf16 %v9294_v27, %v9289_v16  ;;  %v9322_v20 = vadd.f32 %v9150_v12, %v9062_v60 }
 0x4b9   : > { %11197 = vst [vmem:[#allocation57_spill] sm:$0xff] %v9297_v53  ;;  %6569 = vmatprep.subr.bf16.mxu0 %v1732_v9  ;;  %v6484_v22 = vpop.f32.mrb[38].mxu1  ;;  %v2794_v31 = vpack.c.bf16 %v9282_v55, %v9297_v53 }
 0x4ba   : > { %v2295_v5 = vpop.f32.mrb[39].mxu1  ;;  %6521 = vmatprep.mubr.bf16.mxu0 %v2793_v19  ;;  %2411 = vmax.xlane.f32.xlu0 %v9300_v48  ;;  %11200 = vst [vmem:[#allocation60_spill] sm:$0xff] %v9322_v20  ;;  %v9340_v48 = vadd.f32 %v9142_v15, %v9048_v47 }
 0x4bb   : > { %v9311_v7 = vpop.f32.mrb[60].mxu0  ;;  %6522 = vmatmul.mubr.bf16.gmra.mrb[76].mxu0 %v2794_v31  ;;  %2391 = vmax.xlane.f32.xlu1 %v9306_v61  ;;  %v9330_v31 = vadd.f32 %v9240_v0, %v9035_v4  ;;  %v9344_v61 = vadd.f32 %v9161_v32, %v9086_v63  ;;  %v9362_v32 = vadd.f32 %v9154_v6, %v9072_v44  ;;  %v11204_v6 = vld [vmem:[#allocation37_spill] sm:$0xff] }
 0x4bc   : > { %6570 = vmatpush3.bf16.msra.mxu0 %v1732_v9  ;;  %v9318_v14 = vpop.f32.mrb[61].mxu0  ;;  %v9334_v9 = vadd.f32 %v9159_v21, %v9074_v23  ;;  %v9352_v21 = vadd.f32 %v9152_v11, %v9060_v52  ;;  %v11203_v11 = vld [vmem:[#allocation46_spill] sm:$0xff] }
 0x4bd   : > { %v9324_v55 = vpop.f32.mrb[62].mxu0  ;;  %11202 = vst [vmem:[#allocation62_spill] sm:$0xff] %v9344_v61 }
 0x4be   : > { %v2182_v19 = vpop.f32.mrb[63].mxu0  ;;  %2385 = vmax.xlane.f32.xlu0 %v9316_v13  ;;  %11201 = vst [vmem:[#allocation61_spill] sm:$0xff] %v9334_v9 }
 0x4bf   : > { %v6487_v27 = vpop.f32.mrb[40].mxu1  ;;  %2387 = vmax.xlane.f32.xlu1 %v9322_v20 }
 0x4c0   : > { %v2308_v18 = vpop.f32.mrb[41].mxu1 }
 0x4c1   : > { %v6488_v53 = vpop.f32.mrb[42].mxu1 }
 0x4c2   : > { %v2311_v12 = vpop.f32.mrb[43].mxu1  ;;  %2417 = vmax.xlane.f32.xlu0 %v9330_v31 }
 0x4c3   : > { %2399 = vmax.xlane.f32.xlu1 %v9334_v9  ;;  %v9356_v9 = vadd.f32 %v9249_v56, %v9005_v28  ;;  %v9372_v28 = vadd.f32 %v11203_v11, %v9084_v57  ;;  %v9376_v56 = vadd.f32 %v9269_v58, %v9022_v40  ;;  %v9391_v11 = vadd.f32 %v9257_v59, %v9007_v38 }
 0x4c4   : > { %v9394_v40 = vadd.f32 %v6484_v22, %v9035_v4  ;;  %v9407_v38 = vadd.f32 %v2292_v39, %v9037_v46  ;;  %v9412_v4 = vadd.f32 %v9280_v25, %v9062_v60  ;;  %v9422_v59 = vadd.f32 %v9274_v1, %v9050_v62 }
 0x4c5   : > { %v9425_v46 = vadd.f32 %v2311_v12, %v9072_v44  ;;  %v9431_v39 = vadd.f32 %v9287_v29, %v9060_v52  ;;  %v9434_v58 = vadd.f32 %v6488_v53, %v9060_v52  ;;  %v9439_v1 = vadd.f32 %v2308_v18, %v9062_v60  ;;  %v11206_v53 = vld [vmem:[#allocation42_spill] sm:$0xff] }
 0x4c6   : > { %2381 = vmax.xlane.f32.xlu0 %v9340_v48  ;;  %v9447_v29 = vadd.f32 %v6487_v27, %v9050_v62  ;;  %v9451_v52 = vadd.f32 %v9324_v55, %v9084_v57  ;;  %v9457_v60 = vadd.f32 %v9318_v14, %v9086_v63  ;;  %v9466_v62 = vadd.f32 %v9311_v7, %v9074_v23  ;;  %v11207_v14 = vld [vmem:[#allocation40_spill] sm:$0xff] }
 0x4c7   : > { %v9347_v0 = vpop.f32.mrb[44].mxu1  ;;  %2395 = vmax.xlane.f32.xlu1 %v9344_v61  ;;  %v9366_v61 = vadd.f32 %v9265_v33, %v9015_v10  ;;  %v9382_v10 = vadd.f32 %v9166_v41, %v11204_v6  ;;  %v9385_v33 = vadd.f32 %v6483_v26, %v9024_v50  ;;  %v9399_v41 = vadd.f32 %v2295_v5, %v9048_v47  ;;  %v11205_v50 = vld [vmem:[#allocation35_spill] sm:$0xff] }
 0x4c8   : > { %v2324_v20 = vpop.f32.mrb[45].mxu1  ;;  %v9416_v47 = vadd.f32 %v9291_v49, %v9072_v44  ;;  %v9442_v44 = vadd.f32 %v2182_v19, %v11204_v6  ;;  %v9480_v27 = vadd.f32 %v9347_v0, %v9074_v23 }
 0x4c9   : > { %v6492_v15 = vpop.f32.mrb[46].mxu1  ;;  %v9474_v49 = vadd.f32 %v2324_v20, %v9086_v63 }
 0x4ca   : > { %v2327_v16 = vpop.f32.mrb[47].mxu1  ;;  %2393 = vmax.xlane.f32.xlu0 %v9352_v21  ;;  %v9469_v55 = vadd.f32 %v6492_v15, %v9084_v57 }
 0x4cb   : > { %2439 = vmax.xlane.f32.xlu1 %v9356_v9  ;;  %v9460_v22 = vadd.f32 %v2327_v16, %v11204_v6 }
 0x4ce   : > { %2389 = vmax.xlane.f32.xlu0 %v9362_v32 }
 0x4cf   : > { %2441 = vmax.xlane.f32.xlu1 %v9366_v61 }
 0x4d2   : > { %2401 = vmax.xlane.f32.xlu0 %v9372_v28 }
 0x4d3   : > { %2437 = vmax.xlane.f32.xlu1 %v9376_v56 }
 0x4d6   : > { %2397 = vmax.xlane.f32.xlu0 %v9382_v10 }
 0x4d7   : > { %2447 = vmax.xlane.f32.xlu1 %v9385_v33 }
 0x4da   : > { %2435 = vmax.xlane.f32.xlu0 %v9391_v11 }
 0x4db   : > { %2449 = vmax.xlane.f32.xlu1 %v9394_v40 }
 0x4df   : > { %2445 = vmax.xlane.f32.xlu1 %v9399_v41 }
 0x4f0   : > { %7162 = vrot.lane.b32.xlu0 %v11205_v50, %s8125_s7  ;;  %7167 = vrot.lane.b32.xlu1 %v11205_v50, %s8126_s13 }
 0x4ff   : > { %v2376_v25 = vpop.xlane.xlu1 %2375 }
 0x500   : > { %v2485_v20 = vsub.f32 %v11207_v14, %v2376_v25 }
 0x503   : > { %v2372_v16 = vpop.xlane.xlu1 %2371 }
 0x504   : > { %v2483_v5 = vsub.f32 %v11206_v53, %v2372_v16  ;;  %v11208_v16 = vld [vmem:[#allocation49_spill] sm:$0xff] }
 0x506   : > { %v2563_v19 = vmul.f32 1.442695, %v2483_v5  ;;  %v11209_v5 = vld [vmem:[#allocation38_spill] sm:$0xff] }
 0x50f   : > { %2443 = vmax.xlane.f32.xlu0 %v9407_v38 }
 0x513   : > { %2419 = vmax.xlane.f32.xlu0 %v9412_v4 }
 0x514   : > { %2421 = vmax.xlane.f32.xlu1 %v9416_v47 }
 0x517   : > { %2423 = vmax.xlane.f32.xlu0 %v9422_v59 }
 0x518   : > { %2453 = vmax.xlane.f32.xlu1 %v9425_v46 }
 0x51b   : > { %2425 = vmax.xlane.f32.xlu0 %v9431_v39 }
 0x51c   : > { %2457 = vmax.xlane.f32.xlu1 %v9434_v58 }
 0x51f   : > { %2451 = vmax.xlane.f32.xlu0 %v9439_v1 }
 0x520   : > { %2429 = vmax.xlane.f32.xlu1 %v9442_v44 }
 0x523   : > { %2455 = vmax.xlane.f32.xlu0 %v9447_v29 }
 0x524   : > { %2433 = vmax.xlane.f32.xlu1 %v9451_v52 }
 0x527   : > { %2427 = vmax.xlane.f32.xlu0 %v9457_v60 }
 0x528   : > { %2461 = vmax.xlane.f32.xlu1 %v9460_v22 }
 0x52b   : > { %2431 = vmax.xlane.f32.xlu0 %v9466_v62 }
 0x52c   : > { %2465 = vmax.xlane.f32.xlu1 %v9469_v55 }
 0x52f   : > { %2459 = vmax.xlane.f32.xlu0 %v9474_v49 }
 0x530   : > { %2661 = vadd.xlane.f32.xlu1 %v9181_v30 }
 0x533   : > { %v2408_v26 = vpop.xlane.xlu0 %2407  ;;  %2463 = vmax.xlane.f32.xlu0 %v9480_v27 }
 0x534   : > { %2665 = vadd.xlane.f32.xlu1 %v9176_v24  ;;  %v2404_v57 = vpop.xlane.xlu1 %2403 }
 0x535   : > { %v2499_v12 = vsub.f32 %v9201_v54, %v2404_v57 }
 0x537   : > { %v2378_v7 = vpop.xlane.xlu0 %2377  ;;  %2659 = vadd.xlane.f32.xlu0 %v9172_v51  ;;  %v2595_v6 = vmul.f32 1.442695, %v2499_v12 }
 0x538   : > { %v2486_v63 = vsub.f32 %v9216_v37, %v2378_v7  ;;  %2669 = vadd.xlane.f32.xlu1 %v9209_v2  ;;  %v2410_v30 = vpop.xlane.xlu1 %2409  ;;  %v2567_v2 = vmul.f32 1.442695, %v2485_v20  ;;  %v7110_v7 = vunpack.i.h.bf16 %v11209_v5  ;;  %v11210_v20 = vld [vmem:[#allocation50_spill] sm:$0xff] }
 0x539   : > { %v2502_v23 = vsub.f32 %v9221_v43, %v2410_v30 }
 0x53a   : > { %v2569_v18 = vmul.f32 1.442695, %v2486_v63  ;;  %v7109_v63 = vunpack.i.l.bf16 %v11209_v5 }
 0x53b   : > { %v2601_v24 = vmul.f32 1.442695, %v2502_v23  ;;  %2663 = vadd.xlane.f32.xlu0 %v9183_v3  ;;  %v2374_v0 = vpop.xlane.xlu0 %2373 }
 0x53c   : > { %7475 = vpow2.f32 %v2569_v18  ;;  %v2484_v51 = vsub.f32 %v9232_v34, %v2374_v0  ;;  %2673 = vadd.xlane.f32.xlu1 %v9196_v8  ;;  %v9494_v37 = vpop.xlane.xlu1 %2383  ;;  %v11211_v0 = vld [vmem:[#allocation39_spill] sm:$0xff] }
 0x53d   : > { %7477 = vpow2.f32 %v2563_v19 }
 0x53e   : > { %v2565_v15 = vmul.f32 1.442695, %v2484_v51  ;;  %7479 = vpow2.f32 %v2601_v24  ;;  %v7120_v51 = vunpack.i.h.bf16 %v11211_v0 }
 0x53f   : > { %2667 = vadd.xlane.f32.xlu0 %v9203_v36  ;;  %v2406_v43 = vpop.xlane.xlu0 %2405  ;;  %v2501_v36 = vsub.f32 %v9193_v17, %v2408_v26 }
 0x540   : > { %7481 = vpow2.f32 %v2565_v15  ;;  %v2500_v54 = vsub.f32 %v9255_v45, %v2406_v43  ;;  %2677 = vadd.xlane.f32.xlu1 %v9245_v42  ;;  %v2380_v3 = vpop.xlane.xlu1 %2379  ;;  %v11212_v43 = vld [vmem:[#allocation51_spill] sm:$0xff] }
 0x541   : > { %7483 = vpow2.f32 %v2567_v2  ;;  %v2599_v14 = vmul.f32 1.442695, %v2501_v36  ;;  %v7119_v2 = vunpack.i.l.bf16 %v11211_v0  ;;  %v11214_v36 = vld [vmem:[#allocation47_spill] sm:$0xff] }
 0x542   : > { %v2597_v34 = vmul.f32 1.442695, %v2500_v54  ;;  %7485 = vpow2.f32 %v2595_v6  ;;  %v1735_v6 = vpack.c.bf16 %v7110_v7, %v7109_v63  ;;  %v2487_v54 = vsub.f32 %v11212_v43, %v2380_v3  ;;  %v11216_v3 = vld [vmem:[#allocation48_spill] sm:$0xff] }
 0x543   : > { %2671 = vadd.xlane.f32.xlu0 %v9212_v35  ;;  %v9500_v8 = vpop.xlane.xlu0 %2415  ;;  %v2489_v63 = vsub.f32 %v11216_v3, %v9494_v37  ;;  %v11219_v37 = vld [vmem:[#allocation54_spill] sm:$0xff] }
 0x544   : > { %7487 = vpow2.f32 %v2597_v34  ;;  %v9502_v50 = vpop.xlane.xlu1 %2413  ;;  %v11213_v34 = vld [vmem:[#allocation36_spill] sm:$0xff] }
 0x545   : > { %7489 = vpow2.f32 %v2599_v14 }
 0x546   : > { %v7476_v25 = vpop.eup %7475 }
 0x547   : > { %2675 = vadd.xlane.f32.xlu0 %v11208_v16  ;;  %v9506_v57 = vpop.xlane.xlu0 %2411  ;;  %2697 = vadd.xlane.f32.xlu1 %v7476_v25  ;;  %v9508_v42 = vpop.eup %7477 }
 0x548   : > { %v9510_v45 = vpop.xlane.xlu1 %2391  ;;  %v9512_v53 = vpop.eup %7479 }
 0x54a   : > { %v7482_v35 = vpop.eup %7481 }
 0x54b   : > { %v7484_v30 = vpop.eup %7483  ;;  %2679 = vadd.xlane.f32.xlu0 %v11210_v20  ;;  %v2386_v17 = vpop.xlane.xlu0 %2385  ;;  %2729 = vadd.xlane.f32.xlu1 %v9512_v53  ;;  %v2795_v26 = vpack.c.bf16 %v7482_v35, %v9508_v42  ;;  %v11215_v20 = vld [vmem:[#allocation41_spill] sm:$0xff] }
 0x54c   : > { %v2490_v23 = vsub.f32 %v9316_v13, %v2386_v17  ;;  %v2388_v19 = vpop.xlane.xlu1 %2387  ;;  %v2796_v18 = vpack.c.bf16 %v7476_v25, %v7484_v30  ;;  %v9520_v12 = vpop.eup %7485  ;;  %v7130_v17 = vunpack.i.h.bf16 %v11215_v20  ;;  %v7129_v7 = vunpack.i.l.bf16 %v11215_v20  ;;  %v11222_v20 = vld [vmem:[#allocation44_spill] sm:$0xff] }
 0x54d   : > { %6541 = vmatprep.mubr.bf16.mxu1 %v2795_v26  ;;  %v1736_v26 = vpack.c.bf16 %v7120_v51, %v7119_v2  ;;  %v11220_v51 = vld [vmem:[#allocation43_spill] sm:$0xff] }
 0x54e   : > { %v7488_v24 = vpop.eup %7487  ;;  %v2577_v15 = vmul.f32 1.442695, %v2490_v23  ;;  %6542 = vmatmul.mubr.bf16.vlgmr.msra.gmra.mrb[48].mxu1 %v2796_v18  ;;  %v2571_v23 = vmul.f32 1.442695, %v2487_v54  ;;  %v11217_v18 = vld [vmem:[#allocation55_spill] sm:$0xff]  ;;  %v7140_v2 = vunpack.i.h.bf16 %v11220_v51  ;;  %v11221_v54 = vld [vmem:[#allocation60_spill] sm:$0xff] }
 0x54f   : > { %6590 = vmatpush3.bf16.msra.mxu1 %v11213_v34  ;;  %2681 = vadd.xlane.f32.xlu0 %v11214_v36  ;;  %v2418_v13 = vpop.xlane.xlu0 %2417  ;;  %v2803_v25 = vpack.c.bf16 %v7488_v24, %v9520_v12  ;;  %v2575_v34 = vmul.f32 1.442695, %v2489_v63  ;;  %v2504_v36 = vsub.f32 %v11219_v37, %v9502_v50  ;;  %v11223_v63 = vld [vmem:[#allocation59_spill] sm:$0xff] }
 0x550   : > { %7491 = vpow2.f32 %v2577_v15  ;;  %v2506_v16 = vsub.f32 %v9330_v31, %v2418_v13  ;;  %6591 = vmatprep.subr.bf16.mxu1 %v1735_v6  ;;  %2693 = vadd.xlane.f32.xlu1 %v7482_v35  ;;  %v9529_v5 = vpop.xlane.xlu1 %2399  ;;  %v11218_v31 = vld [vmem:[#allocation52_spill] sm:$0xff]  ;;  %v1737_v13 = vpack.c.bf16 %v7130_v17, %v7129_v7  ;;  %v9549_v7 = vpop.eup %7489 }
 0x551   : > { %6573 = vmatprep.mubr.bf16.mxu0 %v2803_v25  ;;  %v2505_v35 = vsub.f32 %v11218_v31, %v9500_v8  ;;  %v2491_v25 = vsub.f32 %v11221_v54, %v2388_v19  ;;  %v7150_v8 = vunpack.i.h.bf16 %v11222_v20  ;;  %v2605_v19 = vmul.f32 1.442695, %v2504_v36 }
 0x552   : > { %v2609_v14 = vmul.f32 1.442695, %v2506_v16 }
 0x553   : > { %6592 = vmatpush3.bf16.msra.mxu1 %v1735_v6  ;;  %2683 = vadd.xlane.f32.xlu0 %v11217_v18  ;;  %v2382_v0 = vpop.xlane.xlu0 %2381  ;;  %v7139_v6 = vunpack.i.l.bf16 %v11220_v51  ;;  %v2607_v3 = vmul.f32 1.442695, %v2505_v35 }
 0x554   : > { %7493 = vpow2.f32 %v2609_v14  ;;  %v2488_v15 = vsub.f32 %v9340_v48, %v2382_v0  ;;  %6593 = vmatprep.subr.bf16.mxu1 %v1736_v26  ;;  %2725 = vadd.xlane.f32.xlu1 %v7488_v24  ;;  %v2396_v43 = vpop.xlane.xlu1 %2395  ;;  %v7149_v24 = vunpack.i.l.bf16 %v11222_v20  ;;  %v2493_v14 = vsub.f32 %v11223_v63, %v9510_v45  ;;  %v11225_v45 = vld [vmem:[#allocation58_spill] sm:$0xff] }
 0x555   : > { %7495 = vpow2.f32 %v2571_v23  ;;  %v2503_v37 = vsub.f32 %v11225_v45, %v9506_v57 }
 0x556   : > { %v2573_v16 = vmul.f32 1.442695, %v2488_v15  ;;  %v1739_v35 = vpack.c.bf16 %v7150_v8, %v7149_v24  ;;  %v11224_v15 = vld [vmem:[#allocation45_spill] sm:$0xff]  ;;  %v2583_v36 = vmul.f32 1.442695, %v2493_v14 }
 0x557   : > { %6594 = vmatpush3.bf16.msra.mxu1 %v1736_v26  ;;  %2695 = vadd.xlane.f32.xlu0 %v7484_v30  ;;  %v2394_v48 = vpop.xlane.xlu0 %2393  ;;  %v2579_v26 = vmul.f32 1.442695, %v2491_v25  ;;  %v1738_v30 = vpack.c.bf16 %v7140_v2, %v7139_v6  ;;  %v11226_v2 = vld [vmem:[#allocation62_spill] sm:$0xff]  ;;  %v2603_v20 = vmul.f32 1.442695, %v2503_v37  ;;  %v11227_v8 = vld [vmem:[#allocation61_spill] sm:$0xff] }
 0x558   : > { %7497 = vpow2.f32 %v2573_v16  ;;  %v2494_v50 = vsub.f32 %v9352_v21, %v2394_v48  ;;  %6595 = vmatprep.subr.bf16.mxu1 %v1737_v13  ;;  %v9547_v17 = vpop.xlane.xlu1 %2439  ;;  %v2495_v6 = vsub.f32 %v11226_v2, %v2396_v43  ;;  %v2497_v48 = vsub.f32 %v11227_v8, %v9529_v5 }
 0x559   : > { %7499 = vpow2.f32 %v2575_v34  ;;  %v7160_v34 = vunpack.i.h.bf16 %v11224_v15  ;;  %v2517_v45 = vsub.f32 %v9356_v9, %v9547_v17 }
 0x55a   : > { %v7492_v23 = vpop.eup %7491  ;;  %v2585_v18 = vmul.f32 1.442695, %v2494_v50  ;;  %7501 = vpow2.f32 %v2607_v3  ;;  %v2587_v24 = vmul.f32 1.442695, %v2495_v6  ;;  %v2591_v5 = vmul.f32 1.442695, %v2497_v48 }
 0x55b   : > { %6596 = vmatpush3.bf16.msra.mxu1 %v1737_v13  ;;  %2727 = vadd.xlane.f32.xlu0 %v9549_v7  ;;  %v2390_v0 = vpop.xlane.xlu0 %2389  ;;  %7503 = vpow2.f32 %v2605_v19  ;;  %v7159_v13 = vunpack.i.l.bf16 %v11224_v15 }
 0x55c   : > { %v2492_v21 = vsub.f32 %v9362_v32, %v2390_v0  ;;  %6597 = vmatprep.subr.bf16.mxu1 %v1738_v30  ;;  %2705 = vadd.xlane.f32.xlu1 %v7492_v23  ;;  %v9555_v31 = vpop.xlane.xlu1 %2441  ;;  %7505 = vpow2.f32 %v2579_v26 }
 0x55d   : > { %7507 = vpow2.f32 %v2585_v18  ;;  %v1740_v3 = vpack.c.bf16 %v7160_v34, %v7159_v13 }
 0x55e   : > { %v9560_v51 = vpop.eup %7493  ;;  %v2581_v32 = vmul.f32 1.442695, %v2492_v21 }
 0x55f   : > { %6598 = vmatpush3.bf16.msra.mxu1 %v1738_v30  ;;  %v2402_v54 = vpop.xlane.xlu0 %2401  ;;  %2691 = vadd.xlane.f32.xlu0 %v9508_v42  ;;  %v7496_v16 = vpop.eup %7495 }
 0x560   : > { %7509 = vpow2.f32 %v2581_v32  ;;  %v2498_v25 = vsub.f32 %v9372_v28, %v2402_v54  ;;  %6599 = vmatprep.subr.bf16.mxu1 %v1739_v35  ;;  %2737 = vadd.xlane.f32.xlu1 %v9560_v51  ;;  %v2438_v57 = vpop.xlane.xlu1 %2437 }
 0x561   : > { %7511 = vpow2.f32 %v2583_v36  ;;  %v2516_v42 = vsub.f32 %v9376_v56, %v2438_v57 }
 0x562   : > { %v7498_v43 = vpop.eup %7497  ;;  %v2593_v19 = vmul.f32 1.442695, %v2498_v25  ;;  %7513 = vpow2.f32 %v2603_v20  ;;  %v2631_v25 = vmul.f32 1.442695, %v2517_v45 }
 0x563   : > { %v7500_v50 = vpop.eup %7499  ;;  %6600 = vmatpush3.bf16.msra.mxu1 %v1739_v35  ;;  %v2398_v63 = vpop.xlane.xlu0 %2397  ;;  %2723 = vadd.xlane.f32.xlu0 %v9520_v12  ;;  %v2797_v28 = vpack.c.bf16 %v7498_v43, %v7496_v16  ;;  %7515 = vpow2.f32 %v2587_v24  ;;  %v2518_v12 = vsub.f32 %v9366_v61, %v9555_v31  ;;  %v2629_v21 = vmul.f32 1.442695, %v2516_v42 }
 0x564   : > { %v2496_v14 = vsub.f32 %v9382_v10, %v2398_v63  ;;  %6601 = vmatprep.subr.bf16.mxu1 %v1740_v3  ;;  %2701 = vadd.xlane.f32.xlu1 %v7498_v43  ;;  %v9572_v26 = vpop.xlane.xlu1 %2447  ;;  %v2798_v30 = vpack.c.bf16 %v7492_v23, %v7500_v50  ;;  %v9574_v18 = vpop.eup %7501  ;;  %7517 = vpow2.f32 %v2593_v19 }
 0x565   : > { %6545 = vmatprep.mubr.bf16.mxu1 %v2797_v28  ;;  %v7504_v56 = vpop.eup %7503  ;;  %v2633_v36 = vmul.f32 1.442695, %v2518_v12  ;;  %v2806_v12 = vpack.c.bf16 %v9560_v51, %v9574_v18 }
 0x566   : > { %v2589_v0 = vmul.f32 1.442695, %v2496_v14  ;;  %6546 = vmatmul.mubr.bf16.gmra.mrb[52].mxu1 %v2798_v30  ;;  %v9578_v35 = vpop.eup %7505 }
 0x567   : > { %6602 = vmatpush3.bf16.msra.mxu1 %v1740_v3  ;;  %v2436_v10 = vpop.xlane.xlu0 %2435  ;;  %2703 = vadd.xlane.f32.xlu0 %v7500_v50  ;;  %v7508_v34 = vpop.eup %7507  ;;  %v2804_v3 = vpack.c.bf16 %v9512_v53, %v9549_v7 }
 0x568   : > { %7519 = vpow2.f32 %v2589_v0  ;;  %v2515_v23 = vsub.f32 %v9391_v11, %v2436_v10  ;;  %2733 = vadd.xlane.f32.xlu1 %v7504_v56  ;;  %v9581_v15 = vpop.xlane.xlu1 %2449 }
 0x569   : > { %7521 = vpow2.f32 %v2591_v5 }
 0x56a   : > { %v9585_v37 = vpop.eup %7509  ;;  %v2627_v61 = vmul.f32 1.442695, %v2515_v23  ;;  %7523 = vpow2.f32 %v2629_v21 }
 0x56b   : > { %v7512_v31 = vpop.eup %7511  ;;  %v7163_v13 = vpop.permute.xlu0 %7162  ;;  %2735 = vadd.xlane.f32.xlu0 %v9574_v18  ;;  %v2799_v11 = vpack.c.bf16 %v9585_v37, %v9578_v35 }
 0x56c   : > { %7525 = vpow2.f32 %v2627_v61  ;;  %v7165_v2 = vunpack.i.h.bf16 %v7163_v13  ;;  %v7164_v6 = vunpack.i.l.bf16 %v7163_v13  ;;  %2713 = vadd.xlane.f32.xlu1 %v7508_v34  ;;  %v2446_v32 = vpop.xlane.xlu1 %2445  ;;  %v2800_v54 = vpack.c.bf16 %v7508_v34, %v7512_v31  ;;  %v7514_v17 = vpop.eup %7513 }
 0x56d   : > { %6549 = vmatprep.mubr.bf16.mxu1 %v2799_v11  ;;  %7527 = vpow2.f32 %v2633_v36  ;;  %v9590_v57 = vpop.eup %7515  ;;  %v2805_v19 = vpack.c.bf16 %v7504_v56, %v7514_v17 }
 0x56e   : > { %6550 = vmatmul.mubr.bf16.gmra.mrb[56].mxu1 %v2800_v54  ;;  %v1733_v9 = vpack.c.bf16 %v7165_v2, %v7164_v6  ;;  %v9592_v8 = vpop.eup %7517  ;;  %7529 = vpow2.f32 %v2631_v25  ;;  %v2522_v54 = vsub.f32 %v9394_v40, %v9581_v15  ;;  %v2520_v25 = vsub.f32 %v9399_v41, %v2446_v32 }
 0x56f   : > { %2699 = vadd.xlane.f32.xlu0 %v7496_v16 }
 0x570   : > { %6571 = vmatprep.subr.bf16.mxu0 %v1733_v9  ;;  %v7168_v20 = vpop.permute.xlu1 %7167 }
 0x571   : > { %v7170_v48 = vunpack.i.h.bf16 %v7168_v20  ;;  %v7169_v43 = vunpack.i.l.bf16 %v7168_v20  ;;  %6572 = vmatpush3.bf16.msra.mxu0 %v1733_v9  ;;  %v2521_v9 = vsub.f32 %v9385_v33, %v9572_v26  ;;  %v2637_v20 = vmul.f32 1.442695, %v2520_v25 }
 0x572   : > { %v9594_v24 = vpop.eup %7519 }
 0x573   : > { %v9598_v50 = vpop.eup %7521  ;;  %2731 = vadd.xlane.f32.xlu0 %v7514_v17  ;;  %v2801_v16 = vpack.c.bf16 %v9594_v24, %v9590_v57  ;;  %v1741_v42 = vpack.c.bf16 %v7170_v48, %v7169_v43  ;;  %v2641_v17 = vmul.f32 1.442695, %v2522_v54 }
 0x574   : > { %6574 = vmatmul.mubr.bf16.vlgmr.msra.gmra.mrb[80].mxu0 %v2804_v3  ;;  %v2802_v63 = vpack.c.bf16 %v9592_v8, %v9598_v50  ;;  %v9604_v28 = vpop.eup %7523  ;;  %v2639_v3 = vmul.f32 1.442695, %v2521_v9 }
 0x575   : > { %6553 = vmatprep.mubr.bf16.mxu1 %v2801_v16  ;;  %6577 = vmatprep.mubr.bf16.mxu0 %v2805_v19  ;;  %7531 = vpow2.f32 %v2641_v17 }
 0x576   : > { %v9606_v14 = vpop.eup %7525  ;;  %6603 = vmatprep.subr.bf16.mxu1 %v1741_v42  ;;  %v9608_v53 = vpop.f32.mrb[64].mxu0  ;;  %6554 = vmatmul.mubr.bf16.gmra.mrb[60].mxu1 %v2802_v63  ;;  %7533 = vpow2.f32 %v2637_v20 }
 0x577   : > { %6604 = vmatpush3.bf16.msra.mxu1 %v1741_v42  ;;  %v9610_v7 = vpop.f32.mrb[65].mxu0  ;;  %2711 = vadd.xlane.f32.xlu0 %v7512_v31  ;;  %v2811_v30 = vpack.c.bf16 %v9604_v28, %v9606_v14  ;;  %v9616_v0 = vpop.eup %7527 }
 0x578   : > { %v9614_v5 = vpop.f32.mrb[66].mxu0  ;;  %v9622_v21 = vpop.eup %7529 }
 0x579   : > { %v9618_v56 = vpop.f32.mrb[67].mxu0  ;;  %6605 = vmatprep.mubr.bf16.mxu1 %v2811_v30  ;;  %v2812_v10 = vpack.c.bf16 %v9616_v0, %v9622_v21 }
 0x57c   : > { %6578 = vmatmul.mubr.bf16.gmra.mrb[84].mxu0 %v2806_v12 }
 0x57e   : > { %v9626_v23 = vpop.f32.mrb[68].mxu0  ;;  %6606 = vmatmul.mubr.bf16.vlgmr.msra.gmra.mrb[64].mxu1 %v2812_v10 }
 0x57f   : > { %v9628_v34 = vpop.f32.mrb[69].mxu0  ;;  %v9660_v10 = vpop.eup %7531 }
 0x580   : > { %v9630_v45 = vpop.f32.mrb[70].mxu0  ;;  %v9663_v25 = vpop.eup %7533 }
 0x581   : > { %v9632_v61 = vpop.f32.mrb[71].mxu0 }
 0x586   : > { %v9634_v31 = vpop.f32.mrb[72].mxu0 }
 0x587   : > { %v9636_v36 = vpop.f32.mrb[73].mxu0 }
 0x588   : > { %v9638_v51 = vpop.f32.mrb[74].mxu0 }
 0x589   : > { %v9640_v18 = vpop.f32.mrb[75].mxu0 }
 0x58e   : > { %v9642_v13 = vpop.f32.mrb[76].mxu0 }
 0x58f   : > { %v9644_v11 = vpop.f32.mrb[77].mxu0 }
 0x590   : > { %11228 = vst [vmem:[#allocation46_spill] sm:$0xff] %v9644_v11  ;;  %v9646_v2 = vpop.f32.mrb[78].mxu0 }
 0x591   : > { %11229 = vst [vmem:[#allocation37_spill] sm:$0xff] %v9646_v2  ;;  %v9648_v6 = vpop.f32.mrb[79].mxu0 }
 0x592   : > { %11230 = vst [vmem:[#allocation35_spill] sm:$0xff] %v9648_v6 }
 0x59c   : > { %v2444_v48 = vpop.xlane.xlu0 %2443 }
 0x59d   : > { %v2519_v43 = vsub.f32 %v9407_v38, %v2444_v48 }
 0x59f   : > { %v2635_v16 = vmul.f32 1.442695, %v2519_v43 }
 0x5a0   : > { %v2420_v19 = vpop.xlane.xlu0 %2419 }
 0x5a1   : > { %7535 = vpow2.f32 %v2635_v16  ;;  %v2507_v42 = vsub.f32 %v9412_v4, %v2420_v19  ;;  %v2422_v63 = vpop.xlane.xlu1 %2421 }
 0x5a2   : > { %7537 = vpow2.f32 %v2639_v3  ;;  %v2508_v40 = vsub.f32 %v9416_v47, %v2422_v63 }
 0x5a3   : > { %v2611_v41 = vmul.f32 1.442695, %v2507_v42 }
 0x5a4   : > { %v2613_v15 = vmul.f32 1.442695, %v2508_v40  ;;  %v2424_v33 = vpop.xlane.xlu0 %2423 }
 0x5a5   : > { %7539 = vpow2.f32 %v2611_v41  ;;  %v2509_v26 = vsub.f32 %v9422_v59, %v2424_v33  ;;  %v2454_v32 = vpop.xlane.xlu1 %2453 }
 0x5a6   : > { %7541 = vpow2.f32 %v2613_v15  ;;  %v2524_v30 = vsub.f32 %v9425_v46, %v2454_v32 }
 0x5a7   : > { %v2615_v38 = vmul.f32 1.442695, %v2509_v26 }
 0x5a8   : > { %v2426_v12 = vpop.xlane.xlu0 %2425  ;;  %v2645_v59 = vmul.f32 1.442695, %v2524_v30 }
 0x5a9   : > { %7543 = vpow2.f32 %v2615_v38  ;;  %v2510_v4 = vsub.f32 %v9431_v39, %v2426_v12  ;;  %v2458_v54 = vpop.xlane.xlu1 %2457 }
 0x5aa   : > { %v2526_v20 = vsub.f32 %v9434_v58, %v2458_v54 }
 0x5ab   : > { %v9665_v47 = vpop.eup %7535  ;;  %v2617_v9 = vmul.f32 1.442695, %v2510_v4 }
 0x5ac   : > { %v9667_v17 = vpop.eup %7537  ;;  %v2452_v48 = vpop.xlane.xlu0 %2451  ;;  %v2813_v46 = vpack.c.bf16 %v9663_v25, %v9665_v47  ;;  %v2649_v63 = vmul.f32 1.442695, %v2526_v20 }
 0x5ad   : > { %7545 = vpow2.f32 %v2617_v9  ;;  %v2523_v43 = vsub.f32 %v9439_v1, %v2452_v48  ;;  %v2430_v3 = vpop.xlane.xlu1 %2429  ;;  %v2814_v39 = vpack.c.bf16 %v9660_v10, %v9667_v17 }
 0x5ae   : > { %6609 = vmatprep.mubr.bf16.mxu1 %v2813_v46  ;;  %7547 = vpow2.f32 %v2645_v59  ;;  %v2512_v58 = vsub.f32 %v9442_v44, %v2430_v3 }
 0x5af   : > { %v7540_v16 = vpop.eup %7539  ;;  %v2643_v19 = vmul.f32 1.442695, %v2523_v43  ;;  %6610 = vmatmul.mubr.bf16.gmra.mrb[68].mxu1 %v2814_v39 }
 0x5b0   : > { %v7542_v42 = vpop.eup %7541  ;;  %v2456_v40 = vpop.xlane.xlu0 %2455  ;;  %v2621_v32 = vmul.f32 1.442695, %v2512_v58 }
 0x5b1   : > { %7549 = vpow2.f32 %v2643_v19  ;;  %v2525_v41 = vsub.f32 %v9447_v29, %v2456_v40  ;;  %v2434_v15 = vpop.xlane.xlu1 %2433  ;;  %v2807_v33 = vpack.c.bf16 %v7542_v42, %v7540_v16 }
 0x5b2   : > { %7551 = vpow2.f32 %v2649_v63  ;;  %v2514_v38 = vsub.f32 %v9451_v52, %v2434_v15 }
 0x5b3   : > { %v7544_v1 = vpop.eup %7543  ;;  %v2647_v26 = vmul.f32 1.442695, %v2525_v41  ;;  %6581 = vmatprep.mubr.bf16.mxu0 %v2807_v33 }
 0x5b4   : > { %v2428_v30 = vpop.xlane.xlu0 %2427  ;;  %2743 = vadd.xlane.f32.xlu0 %v7544_v1  ;;  %v2625_v9 = vmul.f32 1.442695, %v2514_v38 }
 0x5b5   : > { %7553 = vpow2.f32 %v2647_v26  ;;  %v2511_v12 = vsub.f32 %v9457_v60, %v2428_v30  ;;  %v2462_v4 = vpop.xlane.xlu1 %2461 }
 0x5b6   : > { %7555 = vpow2.f32 %v2621_v32  ;;  %v2528_v29 = vsub.f32 %v9460_v22, %v2462_v4 }
 0x5b7   : > { %v7546_v44 = vpop.eup %7545  ;;  %v2619_v54 = vmul.f32 1.442695, %v2511_v12  ;;  %v11231_v12 = vmov 0  }
 0x5b8   : > { %v2432_v59 = vpop.xlane.xlu0 %2431  ;;  %2745 = vadd.xlane.f32.xlu1 %v7546_v44  ;;  %2707 = vadd.xlane.f32.xlu0 %v9578_v35  ;;  %v2808_v20 = vpack.c.bf16 %v7546_v44, %v7544_v1  ;;  %v9682_v46 = vpop.eup %7547  ;;  %v2653_v3 = vmul.f32 1.442695, %v2528_v29 }
 0x5b9   : > { %7557 = vpow2.f32 %v2619_v54  ;;  %v2513_v52 = vsub.f32 %v9466_v62, %v2432_v59  ;;  %v2466_v48 = vpop.xlane.xlu1 %2465 }
 0x5ba   : > { %6582 = vmatmul.mubr.bf16.gmra.mrb[88].mxu0 %v2808_v20  ;;  %7559 = vpow2.f32 %v2625_v9  ;;  %v2530_v39 = vsub.f32 %v9469_v55, %v2466_v48 }
 0x5bb   : > { %v9684_v60 = vpop.eup %7549  ;;  %v2623_v43 = vmul.f32 1.442695, %v2513_v52 }
 0x5bc   : > { %v2460_v22 = vpop.xlane.xlu0 %2459  ;;  %2709 = vadd.xlane.f32.xlu1 %v9585_v37  ;;  %2739 = vadd.xlane.f32.xlu0 %v7540_v16  ;;  %v2815_v35 = vpack.c.bf16 %v9682_v46, %v9684_v60  ;;  %v7552_v19 = vpop.eup %7551  ;;  %v2657_v40 = vmul.f32 1.442695, %v2530_v39 }
 0x5bd   : > { %7561 = vpow2.f32 %v2623_v43  ;;  %v2527_v62 = vsub.f32 %v9474_v49, %v2460_v22 }
 0x5be   : > { %6613 = vmatprep.mubr.bf16.mxu1 %v2815_v35  ;;  %7563 = vpow2.f32 %v2653_v3 }
 0x5bf   : > { %v7554_v63 = vpop.eup %7553  ;;  %v2651_v58 = vmul.f32 1.442695, %v2527_v62 }
 0x5c0   : > { %v2464_v41 = vpop.xlane.xlu0 %2463  ;;  %2719 = vadd.xlane.f32.xlu0 %v9598_v50  ;;  %2741 = vadd.xlane.f32.xlu1 %v7542_v42  ;;  %v2816_v55 = vpack.c.bf16 %v7552_v19, %v7554_v63  ;;  %v7556_v16 = vpop.eup %7555 }
 0x5c1   : > { %7565 = vpow2.f32 %v2651_v58  ;;  %v2529_v37 = vsub.f32 %v9480_v27, %v2464_v41 }
 0x5c2   : > { %6614 = vmatmul.mubr.bf16.gmra.mrb[72].mxu1 %v2816_v55  ;;  %7567 = vpow2.f32 %v2657_v40 }
 0x5c3   : > { %v7558_v15 = vpop.eup %7557  ;;  %v2655_v33 = vmul.f32 1.442695, %v2529_v37 }
 0x5c4   : > { %2721 = vadd.xlane.f32.xlu1 %v9592_v8  ;;  %v2809_v49 = vpack.c.bf16 %v7556_v16, %v7558_v15  ;;  %v7560_v1 = vpop.eup %7559  ;;  %v9697_v4 = vpop.xlane.xlu0 %2659 }
 0x5c5   : > { %7569 = vpow2.f32 %v2655_v33 }
 0x5c6   : > { %6585 = vmatprep.mubr.bf16.mxu0 %v2809_v49 }
 0x5c7   : > { %v7562_v26 = vpop.eup %7561 }
 0x5c8   : > { %2751 = vadd.xlane.f32.xlu0 %v7562_v26  ;;  %2753 = vadd.xlane.f32.xlu1 %v7560_v1  ;;  %v2810_v50 = vpack.c.bf16 %v7560_v1, %v7562_v26  ;;  %v7564_v42 = vpop.eup %7563 }
 0x5ca   : > { %6586 = vmatmul.mubr.bf16.gmra.mrb[92].mxu0 %v2810_v50 }
 0x5cb   : > { %v7566_v32 = vpop.eup %7565 }
 0x5cc   : > { %2715 = vadd.xlane.f32.xlu0 %v9590_v57  ;;  %2717 = vadd.xlane.f32.xlu1 %v9594_v24  ;;  %v2817_v27 = vpack.c.bf16 %v7564_v42, %v7566_v32  ;;  %v7568_v38 = vpop.eup %7567  ;;  %v9703_v57 = vpop.xlane.xlu0 %2663 }
 0x5ce   : > { %6617 = vmatprep.mubr.bf16.mxu1 %v2817_v27 }
 0x5cf   : > { %v7570_v30 = vpop.eup %7569 }
 0x5d0   : > { %2747 = vadd.xlane.f32.xlu0 %v7558_v15  ;;  %2749 = vadd.xlane.f32.xlu1 %v7556_v16  ;;  %v2818_v8 = vpack.c.bf16 %v7568_v38, %v7570_v30  ;;  %v9707_v24 = vpop.xlane.xlu0 %2667 }
 0x5d2   : > { %6618 = vmatmul.mubr.bf16.gmra.mrb[76].mxu1 %v2818_v8 }
 0x5d3   : > { %4261 = vmatprep.mubr.bf16.mxu1 %v11231_v12 }
 0x5d4   : > { %2759 = vadd.xlane.f32.xlu0 %v9622_v21  ;;  %2761 = vadd.xlane.f32.xlu1 %v9616_v0  ;;  %v9711_v21 = vpop.xlane.xlu0 %2671 }
 0x5d8   : > { %2755 = vadd.xlane.f32.xlu0 %v9606_v14  ;;  %2757 = vadd.xlane.f32.xlu1 %v9604_v28  ;;  %v9715_v28 = vpop.xlane.xlu1 %2661  ;;  %v9717_v14 = vpop.xlane.xlu0 %2675 }
 0x5dc   : > { %2767 = vadd.xlane.f32.xlu0 %v9667_v17  ;;  %2769 = vadd.xlane.f32.xlu1 %v9660_v10  ;;  %v9719_v0 = vpop.xlane.xlu1 %2665  ;;  %v9721_v10 = vpop.xlane.xlu0 %2679 }
 0x5e0   : > { %2763 = vadd.xlane.f32.xlu0 %v9665_v47  ;;  %2765 = vadd.xlane.f32.xlu1 %v9663_v25  ;;  %v9723_v25 = vpop.xlane.xlu1 %2669  ;;  %v9725_v47 = vpop.xlane.xlu0 %2681 }
 0x5e4   : > { %2775 = vadd.xlane.f32.xlu0 %v7554_v63  ;;  %2777 = vadd.xlane.f32.xlu1 %v7552_v19  ;;  %v9727_v17 = vpop.xlane.xlu1 %2673  ;;  %v9729_v44 = vpop.xlane.xlu0 %2683 }
 0x5e8   : > { %2771 = vadd.xlane.f32.xlu0 %v9684_v60  ;;  %2773 = vadd.xlane.f32.xlu1 %v9682_v46  ;;  %v9731_v54 = vpop.xlane.xlu1 %2677  ;;  %v2696_v9 = vpop.xlane.xlu0 %2695 }
 0x5ec   : > { %2783 = vadd.xlane.f32.xlu0 %v7570_v30  ;;  %2785 = vadd.xlane.f32.xlu1 %v7568_v38  ;;  %v2698_v29 = vpop.xlane.xlu1 %2697  ;;  %v2728_v59 = vpop.xlane.xlu0 %2727 }
 0x5ed   : > { %7571 = vrcp.f32 %v2698_v29 }
 0x5f0   : > { %2779 = vadd.xlane.f32.xlu0 %v7566_v32  ;;  %2781 = vadd.xlane.f32.xlu1 %v7564_v42  ;;  %v2730_v20 = vpop.xlane.xlu1 %2729  ;;  %v2692_v52 = vpop.xlane.xlu0 %2691 }
 0x5f4   : > { %v2694_v48 = vpop.xlane.xlu1 %2693  ;;  %v2724_v46 = vpop.xlane.xlu0 %2723 }
 0x5f5   : > { %7573 = vrcp.f32 %v2694_v48 }
 0x5f6   : > { %7575 = vrcp.f32 %v2696_v9 }
 0x5f7   : > { %7577 = vrcp.f32 %v2692_v52  ;;  %v7572_v39 = vpop.eup %7571 }
 0x5f8   : > { %v2726_v60 = vpop.xlane.xlu1 %2725  ;;  %v2704_v43 = vpop.xlane.xlu0 %2703 }
 0x5fc   : > { %v2706_v3 = vpop.xlane.xlu1 %2705  ;;  %v2736_v62 = vpop.xlane.xlu0 %2735 }
 0x5fd   : > { %7579 = vrcp.f32 %v2706_v3 }
 0x5ff   : > { %v7574_v35 = vpop.eup %7573 }
 0x600   : > { %v7576_v63 = vpop.eup %7575  ;;  %v2738_v41 = vpop.xlane.xlu1 %2737 }
 0x601   : > { %v7578_v40 = vpop.eup %7577  ;;  %v2700_v26 = vpop.xlane.xlu0 %2699 }
 0x604   : > { %v2702_v50 = vpop.xlane.xlu1 %2701 }
 0x605   : > { %v2732_v42 = vpop.xlane.xlu0 %2731  ;;  %7581 = vrcp.f32 %v2702_v50 }
 0x606   : > { %7583 = vrcp.f32 %v2704_v43  ;;  %v7324_v43 = vld [vmem:[#allocation8 + $0x8] sm:$0xff]  }
 0x607   : > { %7585 = vrcp.f32 %v2700_v26  ;;  %v7580_v30 = vpop.eup %7579 }
 0x608   : > { %v2734_v32 = vpop.xlane.xlu1 %2733 }
 0x609   : > { %v2712_v27 = vpop.xlane.xlu0 %2711 }
 0x60a   : > { %7587 = vrcp.f32 %v2712_v27 }
 0x60c   : > { %v2714_v38 = vpop.xlane.xlu1 %2713 }
 0x60d   : > { %7589 = vrcp.f32 %v2714_v38 }
 0x60e   : > { %7591 = vrcp.f32 %v2730_v20 }
 0x60f   : > { %v7582_v9 = vpop.eup %7581  ;;  %7593 = vrcp.f32 %v2728_v59 }
 0x610   : > { %v7584_v52 = vpop.eup %7583  ;;  %7595 = vrcp.f32 %v2726_v60 }
 0x611   : > { %7597 = vrcp.f32 %v2724_v46  ;;  %v7323_v46 = vld [vmem:[#allocation8] sm:$0xff]  }
 0x612   : > { %7599 = vrcp.f32 %v2738_v41  ;;  %6621 = vmatprep.subr.bf16.mxu0 %v7323_v46 }
 0x613   : > { %7601 = vrcp.f32 %v2734_v32  ;;  %6622 = vmatpush3.bf16.msra.mxu0 %v7323_v46  ;;  %v11233_v46 = vld [vmem:[#allocation57_spill] sm:$0xff] }
 0x614   : > { %6623 = vmatprep.subr.bf16.mxu0 %v7324_v43 }
 0x617   : > { %6624 = vmatpush3.bf16.msra.mxu0 %v7324_v43  ;;  %v7326_v43 = vld [vmem:[#allocation8 + $0x18] sm:$0xff]  }
 0x621   : > { %v6543_v22 = vpop.f32.mrb[48].mxu1 }
 0x622   : > { %v2950_v19 = vpop.f32.mrb[49].mxu1  ;;  %v3289_v55 = vmul.f32 %v7576_v63, %v6543_v22 }
 0x623   : > { %v6544_v58 = vpop.f32.mrb[50].mxu1  ;;  %v3287_v15 = vmul.f32 %v7578_v40, %v2950_v19 }
 0x624   : > { %v3290_v37 = vmul.f32 %v7572_v39, %v6544_v58  ;;  %v2953_v16 = vpop.f32.mrb[51].mxu1  ;;  %v7586_v39 = vpop.eup %7585 }
 0x625   : > { %v3288_v33 = vmul.f32 %v7574_v35, %v2953_v16  ;;  %v7588_v40 = vpop.eup %7587 }
 0x626   : > { %v7171_v49 = vpack.i.bf16 %v3290_v37, %v3289_v55 }
 0x627   : > { %v7181_v1 = vpack.i.bf16 %v3288_v33, %v3287_v15  ;;  %v7590_v33 = vpop.eup %7589 }
 0x628   : > { %7172 = vrot.lane.b32.xlu1 %v7171_v49, %s8126_s13  ;;  %v7592_v50 = vpop.eup %7591 }
 0x629   : > { %7182 = vrot.lane.b32.xlu0 %v7181_v1, %s8126_s13  ;;  %v7594_v38 = vpop.eup %7593 }
 0x639   : > { %v6547_v8 = vpop.f32.mrb[52].mxu1 }
 0x63a   : > { %v2966_v29 = vpop.f32.mrb[53].mxu1  ;;  %v9735_v22 = vmul.f32 %v7584_v52, %v6547_v8  ;;  %v7596_v8 = vpop.eup %7595 }
 0x63b   : > { %v6548_v48 = vpop.f32.mrb[54].mxu1  ;;  %v3291_v19 = vmul.f32 %v7586_v39, %v2966_v29 }
 0x63c   : > { %v9737_v35 = vmul.f32 %v7580_v30, %v6548_v48  ;;  %v2969_v3 = vpop.f32.mrb[55].mxu1  ;;  %v7598_v48 = vpop.eup %7597 }
 0x63d   : > { %v3292_v63 = vmul.f32 %v7582_v9, %v2969_v3 }
 0x63f   : > { %v7201_v58 = vpack.i.bf16 %v3292_v63, %v3291_v19 }
 0x641   : > { %v9741_v55 = vpop.xlane.xlu0 %2743  ;;  %v6551_v37 = vpop.f32.mrb[56].mxu1  ;;  %7202 = vrot.lane.b32.xlu0 %v7201_v58, %s8126_s13 }
 0x642   : > { %v9744_v16 = vmul.f32 %v7588_v40, %v6551_v37  ;;  %v2982_v15 = vpop.f32.mrb[57].mxu1  ;;  %v7600_v37 = vpop.eup %7599 }
 0x643   : > { %v6552_v49 = vpop.f32.mrb[58].mxu1 }
 0x644   : > { %v9746_v20 = vmul.f32 %v7590_v33, %v6552_v49  ;;  %v9748_v1 = vpop.f32.mrb[59].mxu1 }
 0x645   : > { %v2708_v59 = vpop.xlane.xlu0 %2707  ;;  %v9750_v60 = vpop.xlane.xlu1 %2745 }
 0x646   : > { %7603 = vrcp.f32 %v2708_v59  ;;  %v7602_v59 = vpop.eup %7601 }
 0x647   : > { %7605 = vrcp.f32 %v2736_v62  ;;  %v6575_v26 = vpop.f32.mrb[80].mxu0 }
 0x648   : > { %7607 = vrcp.f32 %v2732_v42  ;;  %v3047_v27 = vpop.f32.mrb[81].mxu0  ;;  %v3305_v9 = vmul.f32 %v7594_v38, %v6575_v26 }
 0x649   : > { %v6576_v30 = vpop.f32.mrb[82].mxu0  ;;  %v9754_v41 = vpop.xlane.xlu0 %2739  ;;  %v3303_v19 = vmul.f32 %v7598_v48, %v3047_v27 }
 0x64a   : > { %v3306_v29 = vmul.f32 %v7592_v50, %v6576_v30  ;;  %v6555_v32 = vpop.f32.mrb[60].mxu1  ;;  %v2710_v52 = vpop.xlane.xlu1 %2709 }
 0x64b   : > { %7609 = vrcp.f32 %v2710_v52  ;;  %v9756_v39 = vpop.f32.mrb[61].mxu1  ;;  %v3050_v3 = vpop.f32.mrb[83].mxu0 }
 0x64c   : > { %v7176_v62 = vpack.i.bf16 %v3306_v29, %v3305_v9  ;;  %v3304_v63 = vmul.f32 %v7596_v8, %v3050_v3  ;;  %v6556_v58 = vpop.f32.mrb[62].mxu1 }
 0x64d   : > { %v9758_v42 = vpop.f32.mrb[63].mxu1  ;;  %v2720_v40 = vpop.xlane.xlu0 %2719 }
 0x64e   : > { %v7186_v33 = vpack.i.bf16 %v3304_v63, %v3303_v19  ;;  %7611 = vrcp.f32 %v2720_v40  ;;  %v9760_v49 = vpop.xlane.xlu1 %2741  ;;  %7177 = vrot.lane.b32.xlu1 %v7176_v62, %s8125_s7 }
 0x64f   : > { %v6579_v26 = vpop.f32.mrb[84].mxu0 }
 0x650   : > { %v7604_v50 = vpop.eup %7603  ;;  %v3063_v38 = vpop.f32.mrb[85].mxu0 }
 0x651   : > { %v7606_v30 = vpop.eup %7605  ;;  %v6580_v52 = vpop.f32.mrb[86].mxu0  ;;  %v9765_v8 = vmul.f32 %v7604_v50, %v2982_v15 }
 0x652   : > { %v9763_v27 = vpop.f32.mrb[64].mxu1  ;;  %v7608_v9 = vpop.eup %7607  ;;  %v3309_v29 = vmul.f32 %v7606_v30, %v6579_v26  ;;  %v3310_v48 = vmul.f32 %v7600_v37, %v6580_v52  ;;  %7187 = vrot.lane.b32.xlu1 %v7186_v33, %s8125_s7  ;;  %v11232_v33 = vpack.i.bf16 %v9737_v35, %v9735_v22  ;;  %v7325_v26 = vld [vmem:[#allocation8 + $0x10] sm:$0xff]  }
 0x653   : > { %v2722_v3 = vpop.xlane.xlu1 %2721  ;;  %v3066_v19 = vpop.f32.mrb[87].mxu0  ;;  %v3307_v63 = vmul.f32 %v7608_v9, %v3063_v38  ;;  %6625 = vmatprep.subr.bf16.mxu0 %v7325_v26 }
 0x654   : > { %7613 = vrcp.f32 %v2722_v3  ;;  %v3308_v62 = vmul.f32 %v7602_v59, %v3066_v19  ;;  %v9768_v40 = vpop.f32.mrb[65].mxu1  ;;  %v7196_v12 = vpack.i.bf16 %v3310_v48, %v3309_v29  ;;  %6626 = vmatpush3.bf16.msra.mxu0 %v7325_v26 }
 0x655   : > { %v6608_v6 = vpop.f32.mrb[66].mxu1  ;;  %v7610_v11 = vpop.eup %7609  ;;  %6627 = vmatprep.subr.bf16.mxu0 %v7326_v43 }
 0x656   : > { %v7206_v2 = vpack.i.bf16 %v3308_v62, %v3307_v63  ;;  %v3147_v15 = vpop.f32.mrb[67].mxu1  ;;  %v9770_v50 = vpop.xlane.xlu0 %2751  ;;  %7192 = vrot.lane.b32.xlu1 %v11232_v33, %s8126_s13  ;;  %v9779_v59 = vmul.f32 %v7610_v11, %v9748_v1  ;;  %v7327_v33 = vld [vmem:[#allocation8 + $0x20] sm:$0xff]  }
 0x657   : > { %v9772_v37 = vpop.xlane.xlu1 %2753 }
 0x658   : > { %v7612_v38 = vpop.eup %7611  ;;  %6628 = vmatpush3.bf16.msra.mxu0 %v7326_v43 }
 0x659   : > { %v9783_v9 = vmul.f32 %v7612_v38, %v6555_v32  ;;  %v7328_v38 = vld [vmem:[#allocation8 + $0x28] sm:$0xff]   ;;  %6629 = vmatprep.subr.bf16.mxu0 %v7327_v33 }
 0x65a   : > { %v2716_v52 = vpop.xlane.xlu0 %2715  ;;  %7197 = vrot.lane.b32.xlu1 %v7196_v12, %s8125_s7 }
 0x65b   : > { %7615 = vrcp.f32 %v2716_v52  ;;  %v2718_v29 = vpop.xlane.xlu1 %2717 }
 0x65c   : > { %7617 = vrcp.f32 %v2718_v29  ;;  %6630 = vmatpush3.bf16.msra.mxu0 %v7327_v33 }
 0x65d   : > { %6631 = vmatprep.subr.bf16.mxu0 %v7328_v38 }
 0x65e   : > { %v7614_v22 = vpop.eup %7613  ;;  %v9786_v11 = vpop.xlane.xlu0 %2747  ;;  %7207 = vrot.lane.b32.xlu1 %v7206_v2, %s8125_s7 }
 0x65f   : > { %v9788_v35 = vpop.xlane.xlu1 %2749  ;;  %v9791_v1 = vmul.f32 %v7614_v22, %v6556_v58 }
 0x660   : > { %2687 = vadd.xlane.f32.xlu0 %v11233_v46  ;;  %6632 = vmatpush3.bf16.msra.mxu0 %v7328_v38  ;;  %v7329_v46 = vld [vmem:[#allocation8 + $0x30] sm:$0xff]  }
 0x661   : > { %6633 = vmatprep.subr.bf16.mxu0 %v7329_v46 }
 0x662   : > { %v2760_v48 = vpop.xlane.xlu0 %2759 }
 0x663   : > { %7619 = vrcp.f32 %v2760_v48  ;;  %v2762_v12 = vpop.xlane.xlu1 %2761 }
 0x664   : > { %7621 = vrcp.f32 %v2762_v12  ;;  %6634 = vmatpush3.bf16.msra.mxu0 %v7329_v46 }
 0x665   : > { %v7616_v3 = vpop.eup %7615 }
 0x666   : > { %v7618_v19 = vpop.eup %7617  ;;  %v2756_v63 = vpop.xlane.xlu0 %2755  ;;  %v9797_v62 = vmul.f32 %v7616_v3, %v9756_v39 }
 0x667   : > { %7623 = vrcp.f32 %v2756_v63  ;;  %v2758_v2 = vpop.xlane.xlu1 %2757  ;;  %v9800_v58 = vmul.f32 %v7618_v19, %v9758_v42 }
 0x668   : > { %7625 = vrcp.f32 %v2758_v2  ;;  %v7330_v2 = vld [vmem:[#allocation8 + $0x38] sm:$0xff]  }
 0x669   : > { %6635 = vmatprep.subr.bf16.mxu0 %v7330_v2 }
 0x66a   : > { %v2768_v43 = vpop.xlane.xlu0 %2767  ;;  %6636 = vmatpush3.bf16.msra.mxu0 %v7330_v2 }
 0x66b   : > { %v2770_v19 = vpop.xlane.xlu1 %2769  ;;  %7627 = vrcp.f32 %v2768_v43 }
 0x66c   : > { %7629 = vrcp.f32 %v2770_v19 }
 0x66d   : > { %v7620_v52 = vpop.eup %7619 }
 0x66e   : > { %v7622_v29 = vpop.eup %7621  ;;  %v3321_v39 = vmul.f32 %v7620_v52, %v9763_v27 }
 0x66f   : > { %v3322_v22 = vmul.f32 %v7622_v29, %v6608_v6  ;;  %v2764_v6 = vpop.xlane.xlu0 %2763  ;;  %v2766_v27 = vpop.xlane.xlu1 %2765 }
 0x670   : > { %7631 = vrcp.f32 %v2764_v6 }
 0x671   : > { %v7624_v48 = vpop.eup %7623  ;;  %v7211_v42 = vpack.i.bf16 %v3322_v22, %v3321_v39  ;;  %7633 = vrcp.f32 %v2766_v27 }
 0x672   : > { %v7626_v12 = vpop.eup %7625  ;;  %v3319_v3 = vmul.f32 %v7624_v48, %v9768_v40  ;;  %7635 = vrcp.f32 %v9741_v55 }
 0x673   : > { %7212 = vrot.lane.b32.xlu1 %v7211_v42, %s8124_s29  ;;  %v3320_v63 = vmul.f32 %v7626_v12, %v3147_v15  ;;  %7637 = vrcp.f32 %v9754_v41  ;;  %v2776_v39 = vpop.xlane.xlu0 %2775  ;;  %v2778_v48 = vpop.xlane.xlu1 %2777 }
 0x674   : > { %7639 = vrcp.f32 %v9750_v60 }
 0x675   : > { %v7216_v33 = vpack.i.bf16 %v3320_v63, %v3319_v3  ;;  %v7628_v38 = vpop.eup %7627  ;;  %7641 = vrcp.f32 %v9760_v49 }
 0x676   : > { %v7630_v40 = vpop.eup %7629  ;;  %7643 = vrcp.f32 %v2776_v39 }
 0x677   : > { %7217 = vrot.lane.b32.xlu0 %v7216_v33, %s8124_s29  ;;  %v2772_v41 = vpop.xlane.xlu0 %2771  ;;  %v2774_v2 = vpop.xlane.xlu1 %2773  ;;  %7645 = vrcp.f32 %v2778_v48 }
 0x678   : > { %7647 = vrcp.f32 %v2772_v41 }
 0x679   : > { %7649 = vrcp.f32 %v2774_v2  ;;  %v11234_v2 = vld [vmem:[#allocation56_spill] sm:$0xff] }
 0x67a   : > { %v7632_v15 = vpop.eup %7631  ;;  %7651 = vrcp.f32 %v9770_v50 }
 0x67b   : > { %v7634_v46 = vpop.eup %7633  ;;  %7653 = vrcp.f32 %v9786_v11 }
 0x67c   : > { %v7636_v60 = vpop.eup %7635  ;;  %7655 = vrcp.f32 %v9772_v37 }
 0x67d   : > { %v7638_v6 = vpop.eup %7637  ;;  %7657 = vrcp.f32 %v9788_v35 }
 0x682   : > { %v6611_v52 = vpop.f32.mrb[68].mxu1 }
 0x683   : > { %v3160_v29 = vpop.f32.mrb[69].mxu1  ;;  %v9811_v42 = vmul.f32 %v7628_v38, %v6611_v52  ;;  %v7640_v38 = vpop.eup %7639 }
 0x684   : > { %v6612_v22 = vpop.f32.mrb[70].mxu1  ;;  %v3323_v3 = vmul.f32 %v7632_v15, %v3160_v29  ;;  %v7642_v29 = vpop.eup %7641 }
 0x685   : > { %v9813_v12 = vmul.f32 %v7630_v40, %v6612_v22  ;;  %v3163_v43 = vpop.f32.mrb[71].mxu1 }
 0x686   : > { %v3324_v19 = vmul.f32 %v7634_v46, %v3163_v43  ;;  %v2784_v43 = vpop.xlane.xlu0 %2783 }
 0x687   : > { %v7221_v55 = vpack.i.bf16 %v9813_v12, %v9811_v42  ;;  %7659 = vrcp.f32 %v2784_v43  ;;  %v11237_v42 = vpack.i.bf16 %v9791_v1, %v9783_v9  ;;  %v11238_v12 = vpack.i.bf16 %v9779_v59, %v9765_v8 }
 0x688   : > { %v7226_v63 = vpack.i.bf16 %v3324_v19, %v3323_v3  ;;  %v7644_v3 = vpop.eup %7643  ;;  %v2786_v19 = vpop.xlane.xlu1 %2785 }
 0x689   : > { %v7646_v41 = vpop.eup %7645  ;;  %7661 = vrcp.f32 %v2786_v19 }
 0x68a   : > { %7227 = vrot.lane.b32.xlu0 %v7226_v63, %s8124_s29 }
 0x68c   : > { %v2782_v37 = vpop.xlane.xlu1 %2781 }
 0x68d   : > { %v6583_v33 = vpop.f32.mrb[88].mxu0 }
 0x68e   : > { %v9819_v27 = vmul.f32 %v7636_v60, %v6583_v33  ;;  %v3079_v49 = vpop.f32.mrb[89].mxu0  ;;  %v7648_v33 = vpop.eup %7647 }
 0x68f   : > { %v9821_v52 = vmul.f32 %v7638_v6, %v3079_v49  ;;  %v6584_v40 = vpop.f32.mrb[90].mxu0 }
 0x690   : > { %v9823_v15 = vmul.f32 %v7640_v38, %v6584_v40  ;;  %v3082_v22 = vpop.f32.mrb[91].mxu0  ;;  %v2780_v40 = vpop.xlane.xlu0 %2779 }
 0x691   : > { %v3312_v46 = vmul.f32 %v7642_v29, %v3082_v22  ;;  %7663 = vrcp.f32 %v2780_v40 }
 0x692   : > { %v7246_v39 = vpack.i.bf16 %v9823_v15, %v9819_v27  ;;  %v7650_v27 = vpop.eup %7649  ;;  %7665 = vrcp.f32 %v2782_v37 }
 0x693   : > { %v7241_v48 = vpack.i.bf16 %v3312_v46, %v9821_v52  ;;  %v7652_v22 = vpop.eup %7651  ;;  %7667 = vrcp.f32 %v9719_v0 }
 0x694   : > { %v7654_v46 = vpop.eup %7653  ;;  %7669 = vrcp.f32 %v9703_v57 }
 0x695   : > { %v6615_v63 = vpop.f32.mrb[72].mxu1  ;;  %v7656_v30 = vpop.eup %7655  ;;  %7671 = vrcp.f32 %v9715_v28 }
 0x696   : > { %v3176_v60 = vpop.f32.mrb[73].mxu1  ;;  %v3329_v50 = vmul.f32 %v7644_v3, %v6615_v63  ;;  %v7658_v63 = vpop.eup %7657  ;;  %7673 = vrcp.f32 %v9697_v4 }
 0x697   : > { %2685 = vadd.xlane.f32.xlu1 %v11234_v2  ;;  %v6616_v6 = vpop.f32.mrb[74].mxu1  ;;  %v3327_v52 = vmul.f32 %v7648_v33, %v3176_v60  ;;  %v7660_v43 = vpop.eup %7659  ;;  %7675 = vrcp.f32 %v9723_v25 }
 0x698   : > { %v3330_v49 = vmul.f32 %v7646_v41, %v6616_v6  ;;  %v3179_v38 = vpop.f32.mrb[75].mxu1  ;;  %7677 = vrcp.f32 %v9707_v24 }
 0x699   : > { %v3328_v11 = vmul.f32 %v7650_v27, %v3179_v38 }
 0x69a   : > { %v7256_v29 = vpack.i.bf16 %v3330_v49, %v3329_v50  ;;  %v7662_v49 = vpop.eup %7661 }
 0x69b   : > { %v7251_v15 = vpack.i.bf16 %v3328_v11, %v3327_v52  ;;  %v7664_v38 = vpop.eup %7663 }
 0x69c   : > { %v7666_v11 = vpop.eup %7665 }
 0x69d   : > { %v6587_v35 = vpop.f32.mrb[92].mxu0  ;;  %v7668_v59 = vpop.eup %7667 }
 0x69e   : > { %v3317_v2 = vmul.f32 %v7652_v22, %v6587_v35  ;;  %v3095_v26 = vpop.f32.mrb[93].mxu0  ;;  %v11235_v35 = vld [vmem:[#allocation53_spill] sm:$0xff]  ;;  %v3274_v0 = vmul.f32 %v7668_v59, %v9614_v5 }
 0x69f   : > { %v3315_v32 = vmul.f32 %v7654_v46, %v3095_v26  ;;  %v6588_v3 = vpop.f32.mrb[94].mxu0 }
 0x6a0   : > { %v3318_v41 = vmul.f32 %v7656_v30, %v6588_v3  ;;  %v3098_v60 = vpop.f32.mrb[95].mxu0 }
 0x6a1   : > { %v3316_v33 = vmul.f32 %v7658_v63, %v3098_v60  ;;  %v7183_v60 = vpop.permute.xlu0 %7182 }
 0x6a2   : > { %v7276_v6 = vpack.i.bf16 %v3318_v41, %v3317_v2  ;;  %v11236_v2 = vpack.i.bf16 %v9746_v20, %v9744_v16  ;;  %v7173_v16 = vpop.permute.xlu1 %7172  ;;  %v11239_v20 = vpack.i.bf16 %v9800_v58, %v9797_v62 }
 0x6a3   : > { %v7271_v27 = vpack.i.bf16 %v3316_v33, %v3315_v32  ;;  %v7175_v62 = vunpack.i.h.bf16 %v7173_v16  ;;  %v7174_v58 = vunpack.i.l.bf16 %v7173_v16 }
 0x6a5   : > { %v6619_v50 = vpop.f32.mrb[76].mxu1  ;;  %v3530_v63 = vsel %vm1758_vm0, %v3274_v0, %v7175_v62 }
 0x6a6   : > { %v3192_v19 = vpop.f32.mrb[77].mxu1  ;;  %v3333_v26 = vmul.f32 %v7660_v43, %v6619_v50 }
 0x6a7   : > { %v6620_v52 = vpop.f32.mrb[78].mxu1  ;;  %v3331_v30 = vmul.f32 %v7664_v38, %v3192_v19  ;;  %v7185_v38 = vunpack.i.h.bf16 %v7183_v60 }
 0x6a8   : > { %7222 = vrot.lane.b32.xlu1 %v7221_v55, %s8124_s29  ;;  %v3334_v40 = vmul.f32 %v7662_v49, %v6620_v52  ;;  %v3195_v37 = vpop.f32.mrb[79].mxu1  ;;  %v7184_v52 = vunpack.i.l.bf16 %v7183_v60 }
 0x6a9   : > { %v3332_v22 = vmul.f32 %v7666_v11, %v3195_v37  ;;  %2689 = vadd.xlane.f32.xlu0 %v11235_v35 }
 0x6aa   : > { %v7286_v32 = vpack.i.bf16 %v3334_v40, %v3333_v26 }
 0x6ab   : > { %v7281_v46 = vpack.i.bf16 %v3332_v22, %v3331_v30 }
 0x6ac   : > { %7237 = vrot.lane.b32.xlu1 %v11236_v2, %s8126_s13 }
 0x6b0   : > { %7242 = vrot.lane.b32.xlu1 %v7241_v48, %s8125_s7 }
 0x6b3   : > { %v7203_v5 = vpop.permute.xlu0 %7202 }
 0x6b4   : > { %7247 = vrot.lane.b32.xlu1 %v7246_v39, %s8125_s7  ;;  %v7670_v39 = vpop.eup %7669 }
 0x6b5   : > { %v3273_v3 = vmul.f32 %v7670_v39, %v9608_v53  ;;  %v7672_v50 = vpop.eup %7671 }
 0x6b6   : > { %v7674_v49 = vpop.eup %7673  ;;  %v3272_v37 = vmul.f32 %v7672_v50, %v9618_v56 }
 0x6b7   : > { %v3529_v41 = vsel %vm1758_vm0, %v3273_v3, %v7174_v58  ;;  %v3271_v40 = vmul.f32 %v7674_v49, %v9610_v7  ;;  %v7676_v16 = vpop.eup %7675 }
 0x6b8   : > { %7257 = vrot.lane.b32.xlu1 %v7256_v29, %s8124_s29  ;;  %v3528_v22 = vsel %vm1758_vm0, %v3272_v37, %v7185_v38  ;;  %v7678_v7 = vpop.eup %7677  ;;  %v3276_v58 = vmul.f32 %v7676_v16, %v9632_v61 }
 0x6b9   : > { %v3527_v35 = vsel %vm1758_vm0, %v3271_v40, %v7184_v52  ;;  %v3275_v62 = vmul.f32 %v7678_v7, %v9628_v34 }
 0x6bc   : > { %7267 = vrot.lane.b32.xlu1 %v11237_v42, %s8126_s13 }
 0x6bf   : > { %7232 = vrot.lane.b32.xlu0 %v11238_v12, %s8126_s13 }
 0x6c0   : > { %7277 = vrot.lane.b32.xlu1 %v7276_v6, %s8125_s7  ;;  %v7178_v55 = vpop.permute.xlu1 %7177 }
 0x6c1   : > { %v7180_v29 = vunpack.i.h.bf16 %v7178_v55 }
 0x6c3   : > { %7252 = vrot.lane.b32.xlu0 %v7251_v15, %s8124_s29  ;;  %v7179_v15 = vunpack.i.l.bf16 %v7178_v55  ;;  %v7204_v55 = vunpack.i.l.bf16 %v7203_v5 }
 0x6c4   : > { %7287 = vrot.lane.b32.xlu1 %v7286_v32, %s8124_s29  ;;  %v7188_v9 = vpop.permute.xlu1 %7187 }
 0x6c5   : > { %v3546_v28 = vsel %vm3543_vm1, %v3529_v41, %v7179_v15  ;;  %v7190_v11 = vunpack.i.h.bf16 %v7188_v9  ;;  %v7189_v26 = vunpack.i.l.bf16 %v7188_v9  ;;  %v3531_v3 = vsel %vm1758_vm0, %v3275_v62, %v7204_v55 }
 0x6c7   : > { %7262 = vrot.lane.b32.xlu0 %v11239_v20, %s8126_s13  ;;  %v3544_v24 = vsel %vm3543_vm1, %v3527_v35, %v7189_v26  ;;  %v7205_v20 = vunpack.i.h.bf16 %v7203_v5 }
 0x6c8   : > { %v9862_v1 = vpop.permute.xlu1 %7192 }
 0x6c9   : > { %v3532_v15 = vsel %vm1758_vm0, %v3276_v58, %v7205_v20 }
 0x6cb   : > { %7272 = vrot.lane.b32.xlu0 %v7271_v27, %s8125_s7  ;;  %v3547_v27 = vsel %vm3543_vm1, %v3530_v63, %v7180_v29 }
 0x6cc   : > { %v9866_v8 = vpop.permute.xlu1 %7197 }
 0x6cf   : > { %7282 = vrot.lane.b32.xlu0 %v7281_v46, %s8124_s29  ;;  %v3545_v46 = vsel %vm3543_vm1, %v3528_v22, %v7190_v11  ;;  %s11278_s29 = sld [smem:[#allocation67_spill]] }
 0x6d0   : > { %v9868_v48 = vpop.permute.xlu1 %7207 }
 0x6d1   : > { %v7210_v59 = vunpack.i.h.bf16 %v9868_v48  ;;  %v7209_v39 = vunpack.i.l.bf16 %v9868_v48 }
 0x6d3   : > { %v3549_v63 = vsel %vm3543_vm1, %v3532_v15, %v7210_v59 }
 0x6e5   : > { %v7213_v57 = vpop.permute.xlu1 %7212 }
 0x6e6   : > { %v7215_v33 = vunpack.i.h.bf16 %v7213_v57  ;;  %v7214_v6 = vunpack.i.l.bf16 %v7213_v57 }
 0x6e8   : > { %v3564_v4 = vsel %vm3560_vm2, %v3547_v27, %v7215_v33  ;;  %v3563_v53 = vsel %vm3560_vm2, %v3546_v28, %v7214_v6  ;;  %v7195_v6 = vunpack.i.h.bf16 %v9862_v1  ;;  %v7194_v28 = vunpack.i.l.bf16 %v9862_v1 }
 0x6e9   : > { %v3578_v43 = vpack.c.bf16 %v3564_v4, %v3563_v53  ;;  %v7200_v27 = vunpack.i.h.bf16 %v9866_v8  ;;  %v7199_v4 = vunpack.i.l.bf16 %v9866_v8 }
 0x6ed   : > { %v2688_v19 = vpop.xlane.xlu0 %2687 }
 0x6ee   : > { %7679 = vrcp.f32 %v2688_v19 }
 0x6ef   : > { %7681 = vrcp.f32 %v9727_v17 }
 0x6f0   : > { %7683 = vrcp.f32 %v9711_v21 }
 0x6f1   : > { %v7218_v30 = vpop.permute.xlu0 %7217  ;;  %7685 = vrcp.f32 %v9721_v10 }
 0x6f2   : > { %v7220_v32 = vunpack.i.h.bf16 %v7218_v30  ;;  %v7219_v25 = vunpack.i.l.bf16 %v7218_v30  ;;  %7687 = vrcp.f32 %v9725_v47 }
 0x6f3   : > { %7689 = vrcp.f32 %v9731_v54 }
 0x6f4   : > { %v3561_v2 = vsel %vm3560_vm2, %v3544_v24, %v7219_v25  ;;  %v3562_v42 = vsel %vm3560_vm2, %v3545_v46, %v7220_v32  ;;  %7691 = vrcp.f32 %v9717_v14 }
 0x6f5   : > { %v3577_v12 = vpack.c.bf16 %v3562_v42, %v3561_v2 }
 0x6f7   : > { %6637 = vmatprep.mubr.bf16.mxu0 %v3577_v12 }
 0x6f8   : > { %v7680_v56 = vpop.eup %7679  ;;  %6638 = vmatmul.mubr.bf16.vlgmr.msra.gmra.mrb[96].mxu0 %v3578_v43 }
 0x6f9   : > { %v9891_v9 = vmul.f32 %v7680_v56, %v9642_v13  ;;  %v3548_v13 = vsel %vm3543_vm1, %v3531_v3, %v7209_v39  ;;  %v7682_v34 = vpop.eup %7681 }
 0x6fa   : > { %v7684_v61 = vpop.eup %7683  ;;  %v3278_v43 = vmul.f32 %v7682_v34, %v9630_v45 }
 0x6fb   : > { %v3277_v53 = vmul.f32 %v7684_v61, %v9626_v23  ;;  %v7686_v52 = vpop.eup %7685  ;;  %v11240_v61 = vld [vmem:[#allocation37_spill] sm:$0xff] }
 0x6fc   : > { %v7228_v29 = vpop.permute.xlu0 %7227  ;;  %v3534_v21 = vsel %vm1758_vm0, %v3278_v43, %v7195_v6  ;;  %v7688_v11 = vpop.eup %7687  ;;  %v3281_v35 = vmul.f32 %v7686_v52, %v9634_v31 }
 0x6fd   : > { %v7230_v0 = vunpack.i.h.bf16 %v7228_v29  ;;  %v7229_v57 = vunpack.i.l.bf16 %v7228_v29  ;;  %v3533_v5 = vsel %vm1758_vm0, %v3277_v53, %v7194_v28  ;;  %v3551_v19 = vsel %vm3543_vm1, %v3534_v21, %v7200_v27  ;;  %v7690_v22 = vpop.eup %7689 }
 0x6fe   : > { %v3550_v1 = vsel %vm3543_vm1, %v3533_v5, %v7199_v4  ;;  %v3282_v32 = vmul.f32 %v7688_v11, %v9638_v51  ;;  %v7692_v46 = vpop.eup %7691  ;;  %v3280_v31 = vmul.f32 %v7690_v22, %v9640_v18 }
 0x6ff   : > { %v3565_v41 = vsel %vm3560_vm2, %v3548_v13, %v7229_v57  ;;  %v3566_v60 = vsel %vm3560_vm2, %v3549_v63, %v7230_v0  ;;  %v3279_v7 = vmul.f32 %v7692_v46, %v9636_v36 }
 0x700   : > { %v3579_v48 = vpack.c.bf16 %v3566_v60, %v3565_v41 }
 0x702   : > { %6641 = vmatprep.mubr.bf16.mxu0 %v3579_v48 }
 0x724   : > { %v2686_v33 = vpop.xlane.xlu1 %2685 }
 0x728   : > { %v7223_v17 = vpop.permute.xlu1 %7222 }
 0x729   : > { %v7225_v50 = vunpack.i.h.bf16 %v7223_v17  ;;  %v7224_v49 = vunpack.i.l.bf16 %v7223_v17 }
 0x72b   : > { %v3567_v8 = vsel %vm3560_vm2, %v3550_v1, %v7224_v49  ;;  %v3568_v23 = vsel %vm3560_vm2, %v3551_v19, %v7225_v50 }
 0x72c   : > { %v7238_v45 = vpop.permute.xlu1 %7237  ;;  %v3580_v38 = vpack.c.bf16 %v3568_v23, %v3567_v8 }
 0x72d   : > { %v7240_v47 = vunpack.i.h.bf16 %v7238_v45  ;;  %v7239_v40 = vunpack.i.l.bf16 %v7238_v45 }
 0x72e   : > { %6642 = vmatmul.mubr.bf16.gmra.mrb[100].mxu0 %v3580_v38 }
 0x72f   : > { %v3538_v14 = vsel %vm1758_vm0, %v3282_v32, %v7240_v47  ;;  %v3537_v24 = vsel %vm1758_vm0, %v3281_v35, %v7239_v40  ;;  %v11242_v40 = vld [vmem:[#allocation35_spill] sm:$0xff] }
 0x730   : > { %v7243_v10 = vpop.permute.xlu1 %7242 }
 0x731   : > { %v7245_v15 = vunpack.i.h.bf16 %v7243_v10  ;;  %v7244_v36 = vunpack.i.l.bf16 %v7243_v10 }
 0x734   : > { %v7248_v26 = vpop.permute.xlu1 %7247 }
 0x735   : > { %v7250_v37 = vunpack.i.h.bf16 %v7248_v26  ;;  %v7249_v30 = vunpack.i.l.bf16 %v7248_v26  ;;  %v11241_v26 = vld [vmem:[#allocation46_spill] sm:$0xff] }
 0x736   : > { %v2690_v25 = vpop.xlane.xlu0 %2689 }
 0x737   : > { %7693 = vrcp.f32 %v2690_v25  ;;  %v3554_v12 = vsel %vm3543_vm1, %v3537_v24, %v7249_v30  ;;  %v3555_v16 = vsel %vm3543_vm1, %v3538_v14, %v7250_v37 }
 0x738   : > { %v7258_v54 = vpop.permute.xlu1 %7257  ;;  %7695 = vrcp.f32 %v9729_v44 }
 0x739   : > { %v7260_v2 = vunpack.i.h.bf16 %v7258_v54  ;;  %v7259_v42 = vunpack.i.l.bf16 %v7258_v54  ;;  %7697 = vrcp.f32 %v2686_v33 }
 0x73a   : > { %v7233_v56 = vpop.permute.xlu0 %7232 }
 0x73b   : > { %v3571_v51 = vsel %vm3560_vm2, %v3554_v12, %v7259_v42  ;;  %v3572_v20 = vsel %vm3560_vm2, %v3555_v16, %v7260_v2  ;;  %v7235_v55 = vunpack.i.h.bf16 %v7233_v56  ;;  %v7234_v59 = vunpack.i.l.bf16 %v7233_v56  ;;  %v5852_v16 = vld [vmem:[%s11040_s6] ss:$0 sm:$0xff] }
 0x73c   : > { %v7268_v39 = vpop.permute.xlu1 %7267  ;;  %v3582_v62 = vpack.c.bf16 %v3572_v20, %v3571_v51  ;;  %v11243_v42 = vmov 0  }
 0x73d   : > { %v3536_v58 = vsel %vm1758_vm0, %v3280_v31, %v7235_v55  ;;  %v3535_v29 = vsel %vm1758_vm0, %v3279_v7, %v7234_v59  ;;  %v7269_v63 = vunpack.i.l.bf16 %v7268_v39  ;;  %v7270_v6 = vunpack.i.h.bf16 %v7268_v39  ;;  %v11244_v31 = vld [vmem:[#allocation19_spill] sm:$0xff]  ;;  %v11245_v55 = vld [vmem:[#allocation20_spill] sm:$0xff] }
 0x73e   : > { %v7253_v3 = vpop.permute.xlu0 %7252  ;;  %v3552_v13 = vsel %vm3543_vm1, %v3535_v29, %v7244_v36  ;;  %v3553_v44 = vsel %vm3543_vm1, %v3536_v58, %v7245_v15  ;;  %v11250_v36 = vld [vmem:[#allocation22_spill] sm:$0xff] }
 0x73f   : > { %v7255_v0 = vunpack.i.h.bf16 %v7253_v3  ;;  %v7254_v57 = vunpack.i.l.bf16 %v7253_v3  ;;  %v3541_v17 = vsel %vm1758_vm0, %v9891_v9, %v7269_v63  ;;  %v11252_v63 = vld [vmem:[#allocation23_spill] sm:$0xff] }
 0x740   : > { %v7278_v18 = vpop.permute.xlu1 %7277 }
 0x741   : > { %v7694_v41 = vpop.eup %7693  ;;  %v7279_v60 = vunpack.i.l.bf16 %v7278_v18  ;;  %v3569_v48 = vsel %vm3560_vm2, %v3552_v13, %v7254_v57  ;;  %v3570_v34 = vsel %vm3560_vm2, %v3553_v44, %v7255_v0  ;;  %v7280_v4 = vunpack.i.h.bf16 %v7278_v18 }
 0x742   : > { %v3286_v33 = vmul.f32 %v7694_v41, %v11240_v61  ;;  %v7263_v28 = vpop.permute.xlu0 %7262  ;;  %v3581_v27 = vpack.c.bf16 %v3570_v34, %v3569_v48  ;;  %v7696_v50 = vpop.eup %7695  ;;  %v11255_v61 = vld [vmem:[#allocation24_spill] sm:$0xff] }
 0x743   : > { %v3558_v49 = vsel %vm3543_vm1, %v3541_v17, %v7279_v60  ;;  %v7698_v19 = vpop.eup %7697  ;;  %v7265_v38 = vunpack.i.h.bf16 %v7263_v28  ;;  %v7264_v10 = vunpack.i.l.bf16 %v7263_v28  ;;  %v3283_v47 = vmul.f32 %v7696_v50, %v11241_v26  ;;  %v11253_v60 = vld [vmem:[#allocation25_spill] sm:$0xff] }
 0x744   : > { %v7288_v53 = vpop.permute.xlu1 %7287  ;;  %v3542_v43 = vsel %vm1758_vm0, %v3286_v33, %v7270_v6  ;;  %6645 = vmatprep.mubr.bf16.mxu0 %v3581_v27  ;;  %v3284_v37 = vmul.f32 %v7698_v19, %v11242_v40  ;;  %v11256_v6 = vld [vmem:[#allocation26_spill] sm:$0xff]  ;;  %v11268_v40 = vld [vmem:[#allocation31_spill] sm:$0xff] }
 0x745   : > { %v7290_v21 = vunpack.i.h.bf16 %v7288_v53  ;;  %v7289_v5 = vunpack.i.l.bf16 %v7288_v53  ;;  %v3559_v1 = vsel %vm3543_vm1, %v3542_v43, %v7280_v4  ;;  %6646 = vmatmul.mubr.bf16.gmra.mrb[104].mxu0 %v3582_v62  ;;  %v3539_v35 = vsel %vm1758_vm0, %v3283_v47, %v7264_v10  ;;  %v11247_v62 = vld [vmem:[#allocation21_spill] sm:$0xff] }
 0x746   : > { %v7273_v8 = vpop.permute.xlu0 %7272  ;;  %v3540_v22 = vsel %vm1758_vm0, %v3284_v37, %v7265_v38  ;;  %v11264_v38 = vld [vmem:[#allocation30_spill] sm:$0xff] }
 0x747   : > { %v3575_v23 = vsel %vm3560_vm2, %v3558_v49, %v7289_v5  ;;  %v3576_v45 = vsel %vm3560_vm2, %v3559_v1, %v7290_v21  ;;  %v7275_v11 = vunpack.i.h.bf16 %v7273_v8  ;;  %v7274_v9 = vunpack.i.l.bf16 %v7273_v8  ;;  %v11260_v21 = vld [vmem:[#allocation27_spill] sm:$0xff]  ;;  %v11261_v1 = vld [vmem:[#allocation29_spill] sm:$0xff] }
 0x748   : > { %v3584_v52 = vpack.c.bf16 %v3576_v45, %v3575_v23  ;;  %v11263_v23 = vld [vmem:[#allocation28_spill] sm:$0xff] }
 0x749   : > { %v3556_v46 = vsel %vm3543_vm1, %v3539_v35, %v7274_v9  ;;  %v3557_v54 = vsel %vm3543_vm1, %v3540_v22, %v7275_v11  ;;  %v11269_v35 = vld [vmem:[#allocation33_spill] sm:$0xff] }
 0x74a   : > { %v7283_v30 = vpop.permute.xlu0 %7282 }
 0x74b   : > { %v7285_v32 = vunpack.i.h.bf16 %v7283_v30  ;;  %v7284_v25 = vunpack.i.l.bf16 %v7283_v30 }
 0x74d   : > { %v3573_v14 = vsel %vm3560_vm2, %v3556_v46, %v7284_v25  ;;  %v3574_v24 = vsel %vm3560_vm2, %v3557_v54, %v7285_v32  ;;  %v11271_v46 = vld [vmem:[#allocation32_spill] sm:$0xff] }
 0x74e   : > { %v3583_v2 = vpack.c.bf16 %v3574_v24, %v3573_v14  ;;  %v11272_v14 = vld [vmem:[#allocation34_spill] sm:$0xff] }
 0x750   : > { %6649 = vmatprep.mubr.bf16.mxu0 %v3583_v2 }
 0x751   : > { %6650 = vmatmul.mubr.bf16.gmra.mrb[108].mxu0 %v3584_v52 }
 0x752   : > { %4374 = vmatprep.mubr.bf16.mxu0 %v11243_v42 }
 0x7cb   : > { %v6639_v12 = vpop.f32.mrb[96].mxu0 }
 0x7cc   : > { %v3683_v7 = vpop.f32.mrb[97].mxu0  ;;  %v3748_v59 = vadd.f32 %v6639_v12, %v11245_v55  ;;  %v7339_v55 = vld [vmem:[#allocation10 + $0x24] ss:$16 sps:$4 sm:$0xff]  }
 0x7cd   : > { %v3746_v56 = vadd.f32 %v11244_v31, %v3683_v7  ;;  %v6640_v51 = vpop.f32.mrb[98].mxu0  ;;  %v7331_v31 = vld [vmem:[#allocation10] ss:$16 sps:$4 sm:$0xff]  }
 0x7ce   : > { %v3686_v20 = vpop.f32.mrb[99].mxu0  ;;  %v9966_v15 = vadd.f32 %v5852_v16, %v3748_v59  ;;  %v3749_v3 = vadd.f32 %v6640_v51, %v11250_v36  ;;  %v7334_v51 = vld [vmem:[#allocation10 + $0x8] ss:$16 sps:$4 sm:$0xff]   ;;  %v7342_v59 = vld [vmem:[#allocation10 + $0x2c] ss:$16 sps:$4 sm:$0xff]  }
 0x7cf   : > { %v9960_v39 = vadd.f32 %v5852_v16, %v3746_v56  ;;  %v3747_v58 = vadd.f32 %v11247_v62, %v3686_v20  ;;  %v7333_v56 = vld [vmem:[#allocation10 + $0x4] ss:$16 sps:$4 sm:$0xff]   ;;  %v7336_v20 = vld [vmem:[#allocation10 + $0xc] ss:$16 sps:$4 sm:$0xff]   ;;  %v7337_v62 = vld [vmem:[#allocation10 + $0x20] ss:$16 sps:$4 sm:$0xff]  }
 0x7d0   : > { %11249 = vst [vmem:[#allocation49_spill] sm:$0xff] %v9966_v15  ;;  %v9971_v18 = vadd.f32 %v5852_v16, %v3749_v3  ;;  %4229 = vmatprep.subr.bf16.mxu1 %v7333_v56  ;;  %4342 = vmatprep.subr.bf16.mxu0 %v7336_v20 }
 0x7d1   : > { %11246 = vst [vmem:[#allocation42_spill] sm:$0xff] %v9960_v39  ;;  %v9963_v29 = vadd.f32 %v5852_v16, %v3747_v58  ;;  %3787 = vadd.xlane.f32.xlu0 %v9960_v39  ;;  %4230 = vmatpush1.bf16.msra.mxu1 %v7331_v31  ;;  %v7340_v58 = vld [vmem:[#allocation10 + $0x28] ss:$16 sps:$4 sm:$0xff]   ;;  %v7378_v31 = vld [vmem:[#allocation10 + $0xec] ss:$16 sps:$4 sm:$0xff]  }
 0x7d2   : > { %11251 = vst [vmem:[#allocation38_spill] sm:$0xff] %v9971_v18  ;;  %4343 = vmatpush1.bf16.msra.mxu0 %v7334_v51  ;;  %4231 = vmatprep.subr.bf16.mxu1 %v7339_v55 }
 0x7d3   : > { %11248 = vst [vmem:[#allocation40_spill] sm:$0xff] %v9963_v29  ;;  %3789 = vadd.xlane.f32.xlu1 %v9963_v29  ;;  %4344 = vmatprep.subr.bf16.mxu0 %v7342_v59 }
 0x7d5   : > { %3791 = vadd.xlane.f32.xlu0 %v9966_v15  ;;  %4232 = vmatpush1.bf16.msra.mxu1 %v7337_v62 }
 0x7d6   : > { %4345 = vmatpush1.bf16.msra.mxu0 %v7340_v58 }
 0x7d9   : > { %3793 = vadd.xlane.f32.xlu0 %v9971_v18 }
 0x801   : > { %v6643_v0 = vpop.f32.mrb[100].mxu0 }
 0x802   : > { %v3699_v57 = vpop.f32.mrb[101].mxu0  ;;  %v3752_v48 = vadd.f32 %v6643_v0, %v11253_v60 }
 0x803   : > { %v3750_v13 = vadd.f32 %v11252_v63, %v3699_v57  ;;  %v6644_v44 = vpop.f32.mrb[102].mxu0 }
 0x804   : > { %v3702_v41 = vpop.f32.mrb[103].mxu0  ;;  %v3753_v28 = vadd.f32 %v6644_v44, %v11256_v6  ;;  %v9983_v4 = vadd.f32 %v5852_v16, %v3752_v48 }
 0x805   : > { %v9976_v34 = vadd.f32 %v5852_v16, %v3750_v13  ;;  %v3751_v33 = vadd.f32 %v11255_v61, %v3702_v41 }
 0x806   : > { %11258 = vst [vmem:[#allocation51_spill] sm:$0xff] %v9983_v4  ;;  %v9986_v53 = vadd.f32 %v5852_v16, %v3753_v28 }
 0x807   : > { %11254 = vst [vmem:[#allocation50_spill] sm:$0xff] %v9976_v34  ;;  %v9980_v27 = vadd.f32 %v5852_v16, %v3751_v33  ;;  %3795 = vadd.xlane.f32.xlu0 %v9976_v34 }
 0x808   : > { %11259 = vst [vmem:[#allocation36_spill] sm:$0xff] %v9986_v53 }
 0x809   : > { %11257 = vst [vmem:[#allocation39_spill] sm:$0xff] %v9980_v27  ;;  %3797 = vadd.xlane.f32.xlu1 %v9980_v27 }
 0x80b   : > { %3799 = vadd.xlane.f32.xlu0 %v9983_v4 }
 0x80d   : > { %3801 = vadd.xlane.f32.xlu1 %v9986_v53 }
 0x818   : > { %v6647_v43 = vpop.f32.mrb[104].mxu0 }
 0x819   : > { %v3715_v17 = vpop.f32.mrb[105].mxu0  ;;  %v3756_v19 = vadd.f32 %v6647_v43, %v11261_v1  ;;  %v7354_v1 = vld [vmem:[#allocation10 + $0x6c] ss:$16 sps:$4 sm:$0xff]  }
 0x81a   : > { %v3754_v5 = vadd.f32 %v11260_v21, %v3715_v17  ;;  %v6648_v50 = vpop.f32.mrb[106].mxu0  ;;  %v7345_v17 = vld [vmem:[#allocation10 + $0x44] ss:$16 sps:$4 sm:$0xff]   ;;  %v7348_v21 = vld [vmem:[#allocation10 + $0x4c] ss:$16 sps:$4 sm:$0xff]  }
 0x81b   : > { %v3718_v49 = vpop.f32.mrb[107].mxu0  ;;  %v3757_v10 = vadd.f32 %v6648_v50, %v11264_v38  ;;  %v9999_v11 = vadd.f32 %v5852_v16, %v3756_v19  ;;  %v7346_v50 = vld [vmem:[#allocation10 + $0x48] ss:$16 sps:$4 sm:$0xff]   ;;  %4233 = vmatprep.subr.bf16.mxu1 %v7345_v17  ;;  %4346 = vmatprep.subr.bf16.mxu0 %v7348_v21  ;;  %v7349_v19 = vld [vmem:[#allocation10 + $0x60] ss:$16 sps:$4 sm:$0xff]  }
 0x81c   : > { %v9992_v8 = vadd.f32 %v5852_v16, %v3754_v5  ;;  %v3755_v45 = vadd.f32 %v11263_v23, %v3718_v49  ;;  %v7343_v5 = vld [vmem:[#allocation10 + $0x40] ss:$16 sps:$4 sm:$0xff]   ;;  %4347 = vmatpush1.bf16.msra.mxu0 %v7346_v50  ;;  %v7351_v49 = vld [vmem:[#allocation10 + $0x64] ss:$16 sps:$4 sm:$0xff]   ;;  %v7352_v23 = vld [vmem:[#allocation10 + $0x68] ss:$16 sps:$4 sm:$0xff]  }
 0x81d   : > { %11266 = vst [vmem:[#allocation48_spill] sm:$0xff] %v9999_v11  ;;  %v10002_v9 = vadd.f32 %v5852_v16, %v3757_v10  ;;  %4234 = vmatpush1.bf16.msra.mxu1 %v7343_v5  ;;  %4348 = vmatprep.subr.bf16.mxu0 %v7354_v1  ;;  %v7360_v38 = vld [vmem:[#allocation10 + $0x8c] ss:$16 sps:$4 sm:$0xff]   ;;  %v7355_v10 = vld [vmem:[#allocation10 + $0x80] ss:$16 sps:$4 sm:$0xff]  }
 0x81e   : > { %11262 = vst [vmem:[#allocation47_spill] sm:$0xff] %v9992_v8  ;;  %v9996_v52 = vadd.f32 %v5852_v16, %v3755_v45  ;;  %3803 = vadd.xlane.f32.xlu0 %v9992_v8  ;;  %4235 = vmatprep.subr.bf16.mxu1 %v7351_v49  ;;  %v7357_v45 = vld [vmem:[#allocation10 + $0x84] ss:$16 sps:$4 sm:$0xff]  }
 0x81f   : > { %11267 = vst [vmem:[#allocation55_spill] sm:$0xff] %v10002_v9 }
 0x820   : > { %11265 = vst [vmem:[#allocation41_spill] sm:$0xff] %v9996_v52  ;;  %3805 = vadd.xlane.f32.xlu1 %v9996_v52  ;;  %4349 = vmatpush1.bf16.msra.mxu0 %v7352_v23 }
 0x821   : > { %4236 = vmatpush1.bf16.msra.mxu1 %v7349_v19  ;;  %4350 = vmatprep.subr.bf16.mxu0 %v7360_v38 }
 0x822   : > { %3807 = vadd.xlane.f32.xlu0 %v9999_v11  ;;  %4237 = vmatprep.subr.bf16.mxu1 %v7357_v45 }
 0x824   : > { %3809 = vadd.xlane.f32.xlu1 %v10002_v9  ;;  %v6651_v26 = vpop.f32.mrb[108].mxu0 }
 0x825   : > { %v3731_v47 = vpop.f32.mrb[109].mxu0  ;;  %v3760_v32 = vadd.f32 %v6651_v26, %v11269_v35  ;;  %v7358_v26 = vld [vmem:[#allocation10 + $0x88] ss:$16 sps:$4 sm:$0xff]   ;;  %4238 = vmatpush1.bf16.msra.mxu1 %v7355_v10  ;;  %v7372_v35 = vld [vmem:[#allocation10 + $0xcc] ss:$16 sps:$4 sm:$0xff]  }
 0x826   : > { %v3758_v37 = vadd.f32 %v11268_v40, %v3731_v47  ;;  %v6652_v30 = vpop.f32.mrb[110].mxu0  ;;  %4351 = vmatpush1.bf16.msra.mxu0 %v7358_v26  ;;  %v7363_v47 = vld [vmem:[#allocation10 + $0xa4] ss:$16 sps:$4 sm:$0xff]   ;;  %v7366_v40 = vld [vmem:[#allocation10 + $0xac] ss:$16 sps:$4 sm:$0xff]  }
 0x827   : > { %v3734_v22 = vpop.f32.mrb[111].mxu0  ;;  %v3761_v24 = vadd.f32 %v6652_v30, %v11272_v14  ;;  %v10015_v12 = vadd.f32 %v5852_v16, %v3760_v32  ;;  %v7364_v30 = vld [vmem:[#allocation10 + $0xa8] ss:$16 sps:$4 sm:$0xff]   ;;  %4239 = vmatprep.subr.bf16.mxu1 %v7363_v47  ;;  %4352 = vmatprep.subr.bf16.mxu0 %v7366_v40  ;;  %v7367_v32 = vld [vmem:[#allocation10 + $0xc0] ss:$16 sps:$4 sm:$0xff]  }
 0x828   : > { %v10008_v25 = vadd.f32 %v5852_v16, %v3758_v37  ;;  %v3759_v54 = vadd.f32 %v11271_v46, %v3734_v22  ;;  %v7361_v37 = vld [vmem:[#allocation10 + $0xa0] ss:$16 sps:$4 sm:$0xff]   ;;  %v7369_v22 = vld [vmem:[#allocation10 + $0xc4] ss:$16 sps:$4 sm:$0xff]   ;;  %v7370_v46 = vld [vmem:[#allocation10 + $0xc8] ss:$16 sps:$4 sm:$0xff]  }
 0x829   : > { %11274 = vst [vmem:[#allocation43_spill] sm:$0xff] %v10015_v12  ;;  %v10018_v7 = vadd.f32 %v5852_v16, %v3761_v24  ;;  %4240 = vmatpush1.bf16.msra.mxu1 %v7361_v37  ;;  %v7375_v14 = vld [vmem:[#allocation10 + $0xe4] ss:$16 sps:$4 sm:$0xff]   ;;  %v7376_v24 = vld [vmem:[#allocation10 + $0xe8] ss:$16 sps:$4 sm:$0xff]  }
 0x82a   : > { %11270 = vst [vmem:[#allocation52_spill] sm:$0xff] %v10008_v25  ;;  %v10012_v2 = vadd.f32 %v5852_v16, %v3759_v54  ;;  %3811 = vadd.xlane.f32.xlu0 %v10008_v25  ;;  %4353 = vmatpush1.bf16.msra.mxu0 %v7364_v30  ;;  %v7373_v54 = vld [vmem:[#allocation10 + $0xe0] ss:$16 sps:$4 sm:$0xff]  }
 0x82b   : > { %11275 = vst [vmem:[#allocation60_spill] sm:$0xff] %v10018_v7  ;;  %4241 = vmatprep.subr.bf16.mxu1 %v7369_v22  ;;  %4354 = vmatprep.subr.bf16.mxu0 %v7372_v35 }
 0x82c   : > { %11273 = vst [vmem:[#allocation54_spill] sm:$0xff] %v10012_v2  ;;  %3813 = vadd.xlane.f32.xlu1 %v10012_v2 }
 0x82d   : > { %4242 = vmatpush1.bf16.msra.mxu1 %v7367_v32 }
 0x82e   : > { %3815 = vadd.xlane.f32.xlu0 %v10015_v12  ;;  %4355 = vmatpush1.bf16.msra.mxu0 %v7370_v46 }
 0x82f   : > { %4243 = vmatprep.subr.bf16.mxu1 %v7375_v14  ;;  %4356 = vmatprep.subr.bf16.mxu0 %v7378_v31 }
 0x830   : > { %3817 = vadd.xlane.f32.xlu1 %v10018_v7 }
 0x831   : > { %4244 = vmatpush1.bf16.msra.mxu1 %v7373_v54 }
 0x832   : > { %4357 = vmatpush1.bf16.msra.mxu0 %v7376_v24 }
 0x85e   : > { %v3788_v16 = vpop.xlane.xlu0 %3787 }
 0x85f   : > { %v3819_v36 = vmul.f32 0.0078125, %v3788_v16 }
 0x860   : > { %v3790_v3 = vpop.xlane.xlu1 %3789 }
 0x861   : > { %v10023_v0 = vsub.f32 %v9960_v39, %v3819_v36  ;;  %v3820_v57 = vmul.f32 0.0078125, %v3790_v3 }
 0x862   : > { %v3792_v63 = vpop.xlane.xlu0 %3791 }
 0x863   : > { %v10026_v13 = vsub.f32 %v9963_v29, %v3820_v57  ;;  %v3821_v44 = vmul.f32 0.0078125, %v3792_v63  ;;  %v3851_v41 = vmul.f32 %v10023_v0, %v10023_v0 }
 0x865   : > { %v10031_v60 = vsub.f32 %v9966_v15, %v3821_v44  ;;  %3867 = vadd.xlane.f32.xlu0 %v3851_v41  ;;  %v3852_v48 = vmul.f32 %v10026_v13, %v10026_v13 }
 0x866   : > { %v3794_v61 = vpop.xlane.xlu0 %3793 }
 0x867   : > { %v3822_v33 = vmul.f32 0.0078125, %v3794_v61  ;;  %3869 = vadd.xlane.f32.xlu1 %v3852_v48  ;;  %v3853_v6 = vmul.f32 %v10031_v60, %v10031_v60 }
 0x869   : > { %v10038_v28 = vsub.f32 %v9971_v18, %v3822_v33  ;;  %3871 = vadd.xlane.f32.xlu0 %v3853_v6 }
 0x86b   : > { %v3854_v43 = vmul.f32 %v10038_v28, %v10038_v28 }
 0x86d   : > { %3873 = vadd.xlane.f32.xlu1 %v3854_v43 }
 0x894   : > { %v3796_v56 = vpop.xlane.xlu0 %3795 }
 0x895   : > { %v3823_v51 = vmul.f32 0.0078125, %v3796_v56 }
 0x896   : > { %v3798_v20 = vpop.xlane.xlu1 %3797 }
 0x897   : > { %v10043_v55 = vsub.f32 %v9976_v34, %v3823_v51  ;;  %v3824_v59 = vmul.f32 0.0078125, %v3798_v20 }
 0x898   : > { %v3800_v62 = vpop.xlane.xlu0 %3799 }
 0x899   : > { %v10046_v58 = vsub.f32 %v9980_v27, %v3824_v59  ;;  %v3825_v16 = vmul.f32 0.0078125, %v3800_v62  ;;  %v3855_v36 = vmul.f32 %v10043_v55, %v10043_v55 }
 0x89a   : > { %v3802_v3 = vpop.xlane.xlu1 %3801 }
 0x89b   : > { %v10051_v57 = vsub.f32 %v9983_v4, %v3825_v16  ;;  %v3826_v63 = vmul.f32 0.0078125, %v3802_v3  ;;  %3875 = vadd.xlane.f32.xlu0 %v3855_v36  ;;  %v3856_v44 = vmul.f32 %v10046_v58, %v10046_v58 }
 0x89d   : > { %v10056_v41 = vsub.f32 %v9986_v53, %v3826_v63  ;;  %3877 = vadd.xlane.f32.xlu1 %v3856_v44  ;;  %v3857_v48 = vmul.f32 %v10051_v57, %v10051_v57 }
 0x89f   : > { %3879 = vadd.xlane.f32.xlu0 %v3857_v48  ;;  %v3858_v61 = vmul.f32 %v10056_v41, %v10056_v41 }
 0x8a1   : > { %3881 = vadd.xlane.f32.xlu1 %v3858_v61 }
 0x8ab   : > { %v3804_v33 = vpop.xlane.xlu0 %3803 }
 0x8ac   : > { %v3827_v6 = vmul.f32 0.0078125, %v3804_v33 }
 0x8ad   : > { %v3806_v43 = vpop.xlane.xlu1 %3805 }
 0x8ae   : > { %v10063_v17 = vsub.f32 %v9992_v8, %v3827_v6  ;;  %v3828_v21 = vmul.f32 0.0078125, %v3806_v43 }
 0x8af   : > { %v3808_v5 = vpop.xlane.xlu0 %3807 }
 0x8b0   : > { %v10066_v50 = vsub.f32 %v9996_v52, %v3828_v21  ;;  %v3829_v49 = vmul.f32 0.0078125, %v3808_v5  ;;  %v3859_v1 = vmul.f32 %v10063_v17, %v10063_v17 }
 0x8b1   : > { %v3810_v19 = vpop.xlane.xlu1 %3809 }
 0x8b2   : > { %v10071_v23 = vsub.f32 %v9999_v11, %v3829_v49  ;;  %v3830_v45 = vmul.f32 0.0078125, %v3810_v19  ;;  %3883 = vadd.xlane.f32.xlu0 %v3859_v1  ;;  %v3860_v38 = vmul.f32 %v10066_v50, %v10066_v50  ;;  %v10105_v1 = vld [vmem:[%s11276_s12] ss:$0 sm:$0xff] }
 0x8b4   : > { %v10076_v10 = vsub.f32 %v10002_v9, %v3830_v45  ;;  %3885 = vadd.xlane.f32.xlu1 %v3860_v38  ;;  %v3861_v26 = vmul.f32 %v10071_v23, %v10071_v23 }
 0x8b6   : > { %3887 = vadd.xlane.f32.xlu0 %v3861_v26  ;;  %v3862_v47 = vmul.f32 %v10076_v10, %v10076_v10 }
 0x8b7   : > { %v3812_v40 = vpop.xlane.xlu0 %3811 }
 0x8b8   : > { %v3831_v37 = vmul.f32 0.0078125, %v3812_v40  ;;  %3889 = vadd.xlane.f32.xlu1 %v3862_v47  ;;  %v10113_v40 = vld [vmem:[%s11277_s15] ss:$0 sm:$0xff]  ;;  %s10985_s15 = scalar_lea.hbm %s11334_s1, %s5958_s23 }
 0x8b9   : > { %v3814_v30 = vpop.xlane.xlu1 %3813 }
 0x8ba   : > { %v10083_v22 = vsub.f32 %v10008_v25, %v3831_v37  ;;  %v3832_v35 = vmul.f32 0.0078125, %v3814_v30 }
 0x8bb   : > { %v3816_v32 = vpop.xlane.xlu0 %3815 }
 0x8bc   : > { %v10086_v46 = vsub.f32 %v10012_v2, %v3832_v35  ;;  %v3833_v54 = vmul.f32 0.0078125, %v3816_v32  ;;  %v3863_v14 = vmul.f32 %v10083_v22, %v10083_v22 }
 0x8bd   : > { %v3818_v24 = vpop.xlane.xlu1 %3817 }
 0x8be   : > { %v10091_v31 = vsub.f32 %v10015_v12, %v3833_v54  ;;  %v3834_v56 = vmul.f32 0.0078125, %v3818_v24  ;;  %3891 = vadd.xlane.f32.xlu0 %v3863_v14  ;;  %v3864_v51 = vmul.f32 %v10086_v46, %v10086_v46 }
 0x8c0   : > { %v10096_v20 = vsub.f32 %v10018_v7, %v3834_v56  ;;  %3893 = vadd.xlane.f32.xlu1 %v3864_v51  ;;  %v3865_v59 = vmul.f32 %v10091_v31, %v10091_v31 }
 0x8c2   : > { %3895 = vadd.xlane.f32.xlu0 %v3865_v59  ;;  %v3866_v62 = vmul.f32 %v10096_v20, %v10096_v20 }
 0x8c4   : > { %3897 = vadd.xlane.f32.xlu1 %v3866_v62 }
 0x8f2   : > { %v3868_v16 = vpop.xlane.xlu0 %3867 }
 0x8f3   : > { %v3899_v36 = vmul.f32 0.0078125, %v3868_v16 }
 0x8f4   : > { %v3870_v3 = vpop.xlane.xlu1 %3869 }
 0x8f5   : > { %v3915_v63 = vadd.f32 1e-05, %v3899_v36  ;;  %v3900_v44 = vmul.f32 0.0078125, %v3870_v3 }
 0x8f6   : > { %v3872_v48 = vpop.xlane.xlu0 %3871 }
 0x8f7   : > { %7699 = vrsqrt.f32 %v3915_v63  ;;  %v3916_v61 = vadd.f32 1e-05, %v3900_v44  ;;  %v3901_v33 = vmul.f32 0.0078125, %v3872_v48 }
 0x8f9   : > { %7701 = vrsqrt.f32 %v3916_v61  ;;  %v3917_v6 = vadd.f32 1e-05, %v3901_v33 }
 0x8fa   : > { %v3874_v43 = vpop.xlane.xlu1 %3873 }
 0x8fb   : > { %7703 = vrsqrt.f32 %v3917_v6  ;;  %v3902_v21 = vmul.f32 0.0078125, %v3874_v43 }
 0x8fd   : > { %v3918_v5 = vadd.f32 1e-05, %v3902_v21 }
 0x8ff   : > { %7705 = vrsqrt.f32 %v3918_v5 }
 0x901   : > { %v7700_v49 = vpop.eup %7699 }
 0x902   : > { %v3947_v19 = vmul.f32 %v7700_v49, %v10023_v0 }
 0x903   : > { %v7702_v45 = vpop.eup %7701 }
 0x904   : > { %v3969_v38 = vmul.f32 %v10105_v1, %v3947_v19  ;;  %v3948_v26 = vmul.f32 %v7702_v45, %v10026_v13 }
 0x905   : > { %v7704_v47 = vpop.eup %7703 }
 0x906   : > { %v3970_v37 = vmul.f32 %v10105_v1, %v3948_v26  ;;  %v3991_v30 = vadd.f32 %v10113_v40, %v3969_v38  ;;  %v3949_v32 = vmul.f32 %v7704_v47, %v10031_v60 }
 0x908   : > { %v3992_v35 = vadd.f32 %v10113_v40, %v3970_v37  ;;  %v3971_v13 = vmul.f32 %v10105_v1, %v3949_v32 }
 0x909   : > { %v7706_v0 = vpop.eup %7705 }
 0x90a   : > { %v4007_v54 = vpack.c.bf16 %v3992_v35, %v3991_v30  ;;  %v3950_v14 = vmul.f32 %v7706_v0, %v10038_v28  ;;  %v3993_v51 = vadd.f32 %v10113_v40, %v3971_v13 }
 0x90c   : > { %4262 = vmatmul.mubr.bf16.vlgmr.msra.gmra.mrb[80].mxu1 %v4007_v54  ;;  %4375 = vmatmul.mubr.bf16.vlgmr.msra.gmra.mrb[112].mxu0 %v4007_v54  ;;  %v3972_v24 = vmul.f32 %v10105_v1, %v3950_v14 }
 0x90d   : > { %4271 = vmatprep.mubr.bf16.mxu1 %v11243_v42  ;;  %4384 = vmatprep.mubr.bf16.mxu0 %v11243_v42 }
 0x90e   : > { %v3994_v56 = vadd.f32 %v10113_v40, %v3972_v24 }
 0x910   : > { %v4008_v59 = vpack.c.bf16 %v3994_v56, %v3993_v51 }
 0x914   : > { %4272 = vmatmul.mubr.bf16.gmra.mrb[84].mxu1 %v4008_v59  ;;  %4385 = vmatmul.mubr.bf16.gmra.mrb[116].mxu0 %v4008_v59 }
 0x915   : > { %4281 = vmatprep.mubr.bf16.mxu1 %v11243_v42  ;;  %4394 = vmatprep.mubr.bf16.mxu0 %v11243_v42 }
 0x928   : > { %v3876_v60 = vpop.xlane.xlu0 %3875 }
 0x929   : > { %v3903_v28 = vmul.f32 0.0078125, %v3876_v60 }
 0x92a   : > { %v3878_v62 = vpop.xlane.xlu1 %3877 }
 0x92b   : > { %v3919_v16 = vadd.f32 1e-05, %v3903_v28  ;;  %v3904_v36 = vmul.f32 0.0078125, %v3878_v62 }
 0x92c   : > { %v3880_v3 = vpop.xlane.xlu0 %3879 }
 0x92d   : > { %7707 = vrsqrt.f32 %v3919_v16  ;;  %v3920_v63 = vadd.f32 1e-05, %v3904_v36  ;;  %v3905_v44 = vmul.f32 0.0078125, %v3880_v3 }
 0x92e   : > { %v3882_v48 = vpop.xlane.xlu1 %3881 }
 0x92f   : > { %7709 = vrsqrt.f32 %v3920_v63  ;;  %v3921_v61 = vadd.f32 1e-05, %v3905_v44  ;;  %v3906_v33 = vmul.f32 0.0078125, %v3882_v48 }
 0x931   : > { %7711 = vrsqrt.f32 %v3921_v61  ;;  %v3922_v6 = vadd.f32 1e-05, %v3906_v33 }
 0x933   : > { %7713 = vrsqrt.f32 %v3922_v6 }
 0x937   : > { %v7708_v43 = vpop.eup %7707 }
 0x938   : > { %v3951_v21 = vmul.f32 %v7708_v43, %v10043_v55 }
 0x939   : > { %v7710_v5 = vpop.eup %7709 }
 0x93a   : > { %v3952_v49 = vmul.f32 %v7710_v5, %v10046_v58  ;;  %v3973_v19 = vmul.f32 %v10105_v1, %v3951_v21 }
 0x93b   : > { %v7712_v45 = vpop.eup %7711 }
 0x93c   : > { %v3974_v38 = vmul.f32 %v10105_v1, %v3952_v49  ;;  %v3995_v47 = vadd.f32 %v10113_v40, %v3973_v19  ;;  %v3953_v30 = vmul.f32 %v7712_v45, %v10051_v57 }
 0x93d   : > { %v7714_v26 = vpop.eup %7713 }
 0x93e   : > { %v3996_v37 = vadd.f32 %v10113_v40, %v3974_v38  ;;  %v3954_v35 = vmul.f32 %v7714_v26, %v10056_v41  ;;  %v3975_v14 = vmul.f32 %v10105_v1, %v3953_v30 }
 0x93f   : > { %v3884_v32 = vpop.xlane.xlu0 %3883 }
 0x940   : > { %v4009_v0 = vpack.c.bf16 %v3996_v37, %v3995_v47  ;;  %v3976_v55 = vmul.f32 %v10105_v1, %v3954_v35  ;;  %v3907_v54 = vmul.f32 0.0078125, %v3884_v32  ;;  %v3997_v60 = vadd.f32 %v10113_v40, %v3975_v14 }
 0x941   : > { %v3886_v58 = vpop.xlane.xlu1 %3885 }
 0x942   : > { %4282 = vmatmul.mubr.bf16.gmra.mrb[88].mxu1 %v4009_v0  ;;  %4395 = vmatmul.mubr.bf16.gmra.mrb[120].mxu0 %v4009_v0  ;;  %v3923_v13 = vadd.f32 1e-05, %v3907_v54  ;;  %v3908_v24 = vmul.f32 0.0078125, %v3886_v58  ;;  %v3998_v57 = vadd.f32 %v10113_v40, %v3976_v55 }
 0x943   : > { %4291 = vmatprep.mubr.bf16.mxu1 %v11243_v42  ;;  %4404 = vmatprep.mubr.bf16.mxu0 %v11243_v42  ;;  %v3888_v56 = vpop.xlane.xlu0 %3887 }
 0x944   : > { %7715 = vrsqrt.f32 %v3923_v13  ;;  %v3924_v41 = vadd.f32 1e-05, %v3908_v24  ;;  %v3909_v51 = vmul.f32 0.0078125, %v3888_v56  ;;  %v4010_v16 = vpack.c.bf16 %v3998_v57, %v3997_v60 }
 0x945   : > { %v3890_v59 = vpop.xlane.xlu1 %3889 }
 0x946   : > { %7717 = vrsqrt.f32 %v3924_v41  ;;  %v3925_v28 = vadd.f32 1e-05, %v3909_v51  ;;  %v3910_v62 = vmul.f32 0.0078125, %v3890_v59 }
 0x948   : > { %7719 = vrsqrt.f32 %v3925_v28  ;;  %v3926_v36 = vadd.f32 1e-05, %v3910_v62  ;;  %v7379_v62 = vld [vmem:[#allocation11 + $0x40] sm:$0xff]  }
 0x949   : > { %6205 = vmatprep.subr.bf16.mxu1 %v7379_v62 }
 0x94a   : > { %4292 = vmatmul.mubr.bf16.gmra.mrb[92].mxu1 %v4010_v16  ;;  %4405 = vmatmul.mubr.bf16.gmra.mrb[124].mxu0 %v4010_v16  ;;  %7721 = vrsqrt.f32 %v3926_v36  ;;  %v10164_v16 = vld [vmem:[#allocation11 + $0xc0] sm:$0xff]  }
 0x94b   : > { %4301 = vmatprep.mubr.bf16.mxu1 %v11243_v42  ;;  %4414 = vmatprep.mubr.bf16.mxu0 %v11243_v42  ;;  %v3892_v3 = vpop.xlane.xlu0 %3891  ;;  %v7381_v36 = vld [vmem:[#allocation11] sm:$0xff]  }
 0x94c   : > { %v3911_v63 = vmul.f32 0.0078125, %v3892_v3  ;;  %6269 = vmatprep.subr.bf16.mxu0 %v10164_v16  ;;  %v10169_v3 = vld [vmem:[#allocation11 + $0x80] sm:$0xff]   ;;  %6206 = vmatpush3.bf16.msra.mxu1 %v7381_v36 }
 0x94d   : > { %v3894_v44 = vpop.xlane.xlu1 %3893  ;;  %6270 = vmatpush3.bf16.msra.mxu0 %v10169_v3 }
 0x94e   : > { %v7716_v48 = vpop.eup %7715  ;;  %v3927_v61 = vadd.f32 1e-05, %v3911_v63  ;;  %v3912_v33 = vmul.f32 0.0078125, %v3894_v44 }
 0x94f   : > { %v3896_v6 = vpop.xlane.xlu0 %3895  ;;  %v3955_v43 = vmul.f32 %v7716_v48, %v10063_v17 }
 0x950   : > { %v7718_v21 = vpop.eup %7717  ;;  %7723 = vrsqrt.f32 %v3927_v61  ;;  %v3928_v5 = vadd.f32 1e-05, %v3912_v33  ;;  %v3913_v49 = vmul.f32 0.0078125, %v3896_v6  ;;  %v7383_v33 = vld [vmem:[#allocation11 + $0x48] sm:$0xff]  }
 0x951   : > { %v3898_v19 = vpop.xlane.xlu1 %3897  ;;  %v3956_v45 = vmul.f32 %v7718_v21, %v10066_v50  ;;  %v3977_v38 = vmul.f32 %v10105_v1, %v3955_v43  ;;  %v10175_v6 = vld [vmem:[#allocation11 + $0xc8] sm:$0xff]   ;;  %6207 = vmatprep.subr.bf16.mxu1 %v7383_v33 }
 0x952   : > { %v7720_v26 = vpop.eup %7719  ;;  %7725 = vrsqrt.f32 %v3928_v5  ;;  %v3914_v47 = vmul.f32 0.0078125, %v3898_v19  ;;  %v3929_v35 = vadd.f32 1e-05, %v3913_v49  ;;  %v10177_v43 = vld [vmem:[#allocation11 + $0x88] sm:$0xff]   ;;  %6271 = vmatprep.subr.bf16.mxu0 %v10175_v6  ;;  %v7387_v19 = vld [vmem:[#allocation11 + $0x50] sm:$0xff]  }
 0x953   : > { %v3978_v37 = vmul.f32 %v10105_v1, %v3956_v45  ;;  %v3999_v0 = vadd.f32 %v10113_v40, %v3977_v38  ;;  %v3957_v55 = vmul.f32 %v7720_v26, %v10071_v23  ;;  %6272 = vmatpush3.bf16.msra.mxu0 %v10177_v43  ;;  %v10186_v45 = vld [vmem:[#allocation11 + $0xd0] sm:$0xff]   ;;  %v7391_v38 = vld [vmem:[#allocation11 + $0x58] sm:$0xff]  }
 0x954   : > { %v7722_v30 = vpop.eup %7721  ;;  %v3930_v32 = vadd.f32 1e-05, %v3914_v47  ;;  %6273 = vmatprep.subr.bf16.mxu0 %v10186_v45  ;;  %v10192_v26 = vld [vmem:[#allocation11 + $0xd8] sm:$0xff]  }
 0x955   : > { %v4000_v17 = vadd.f32 %v10113_v40, %v3978_v37  ;;  %v3958_v54 = vmul.f32 %v7722_v30, %v10076_v10  ;;  %v3979_v14 = vmul.f32 %v10105_v1, %v3957_v55  ;;  %v7393_v47 = vld [vmem:[#allocation11 + $0x18] sm:$0xff]   ;;  %v7395_v37 = vld [vmem:[#allocation11 + $0x60] sm:$0xff]   ;;  %v7401_v55 = vld [vmem:[#allocation11 + $0x28] sm:$0xff]  }
 0x956   : > { %7727 = vrsqrt.f32 %v3930_v32  ;;  %v10198_v30 = vld [vmem:[#allocation11 + $0xe0] sm:$0xff]  }
 0x957   : > { %v4011_v50 = vpack.c.bf16 %v4000_v17, %v3999_v0  ;;  %v3980_v58 = vmul.f32 %v10105_v1, %v3958_v54  ;;  %7729 = vrsqrt.f32 %v3929_v35  ;;  %v4001_v23 = vadd.f32 %v10113_v40, %v3979_v14  ;;  %v7397_v35 = vld [vmem:[#allocation11 + $0x20] sm:$0xff]   ;;  %v7399_v0 = vld [vmem:[#allocation11 + $0x68] sm:$0xff]   ;;  %v7405_v14 = vld [vmem:[#allocation11 + $0x30] sm:$0xff]  }
 0x958   : > { %v10200_v32 = vld [vmem:[#allocation11 + $0xa0] sm:$0xff]   ;;  %v10204_v17 = vld [vmem:[#allocation11 + $0xe8] sm:$0xff]  }
 0x959   : > { %4302 = vmatmul.mubr.bf16.gmra.mrb[96].mxu1 %v4011_v50  ;;  %4415 = vmatmul.mubr.bf16.gmra.mrb[128].mxu0 %v4011_v50  ;;  %v4002_v24 = vadd.f32 %v10113_v40, %v3980_v58  ;;  %v10206_v54 = vld [vmem:[#allocation11 + $0xa8] sm:$0xff]   ;;  %v7403_v50 = vld [vmem:[#allocation11 + $0x70] sm:$0xff]  }
 0x95a   : > { %v7724_v13 = vpop.eup %7723  ;;  %4311 = vmatprep.mubr.bf16.mxu1 %v11243_v42  ;;  %4424 = vmatprep.mubr.bf16.mxu0 %v11243_v42  ;;  %v10210_v58 = vld [vmem:[#allocation11 + $0xf0] sm:$0xff]  }
 0x95b   : > { %v3959_v10 = vmul.f32 %v7724_v13, %v10083_v22  ;;  %v4012_v41 = vpack.c.bf16 %v4002_v24, %v4001_v23  ;;  %v10212_v13 = vld [vmem:[#allocation11 + $0xb0] sm:$0xff]   ;;  %v7407_v24 = vld [vmem:[#allocation11 + $0x78] sm:$0xff]  }
 0x95c   : > { %v7726_v56 = vpop.eup %7725  ;;  %v7409_v23 = vld [vmem:[#allocation11 + $0x38] sm:$0xff]  }
 0x95d   : > { %v3960_v57 = vmul.f32 %v7726_v56, %v10086_v46  ;;  %v3981_v60 = vmul.f32 %v10105_v1, %v3959_v10  ;;  %v10214_v56 = vld [vmem:[#allocation11 + $0xf8] sm:$0xff]  }
 0x95e   : > { %v10218_v10 = vld [vmem:[#allocation11 + $0xb8] sm:$0xff]  }
 0x95f   : > { %v3982_v51 = vmul.f32 %v10105_v1, %v3960_v57  ;;  %v4003_v63 = vadd.f32 %v10113_v40, %v3981_v60  ;;  %v4049_v57 = vlaneseq  ;;  %v4047_v60 = vld [vmem:[%s11278_s29] sm:$0xf]  ;;  %s8033_s29 = sshll.u32 %s8127_s14, 4  ;;  %s8034_s29 = int_to_ptr.vmem [resolvable:$false] %s8033_s29 }
 0x960   : > { %v7728_v59 = vpop.eup %7727  ;;  %s8035_s13 = scalar_lea.vmem %s8034_s29, 2048  ;;  %p8036_p11 = scmp.lt.s32.totalorder %s10987_s8, %s8034_s29 }
 0x961   : > { %4312 = vmatmul.mubr.bf16.gmra.mrb[100].mxu1 %v4012_v41  ;;  %4425 = vmatmul.mubr.bf16.gmra.mrb[132].mxu0 %v4012_v41  ;;  %v7730_v28 = vpop.eup %7729  ;;  %v4004_v22 = vadd.f32 %v10113_v40, %v3982_v51  ;;  %v3962_v46 = vmul.f32 %v7728_v59, %v10096_v20  ;;  %v7385_v20 = vld [vmem:[#allocation11 + $0x8] sm:$0xff]   ;;  %v4050_v41 = vshrl.u32 %v4049_v57, 7  ;;  %p8037_p12 = scmp.lt.s32.totalorder %s8035_s13, %s8029_s10 }
 0x962   : > { %4321 = vmatprep.mubr.bf16.mxu1 %v11243_v42  ;;  %4434 = vmatprep.mubr.bf16.mxu0 %v11243_v42  ;;  %v3961_v44 = vmul.f32 %v7730_v28, %v10091_v31 }
 0x963   : > { %v4013_v48 = vpack.c.bf16 %v4004_v22, %v4003_v63  ;;  %v3984_v61 = vmul.f32 %v10105_v1, %v3962_v46  ;;  %6208 = vmatpush3.bf16.msra.mxu1 %v7385_v20  ;;  %v4051_v51 = vsub.s32 0, %v4050_v41  ;;  %v4059_v59 = vsub.s32 2, %v4050_v41  ;;  %p8038_p13 = por %p8037_p12, %p8036_p11 }
 0x964   : > { %v3983_v21 = vmul.f32 %v10105_v1, %v3961_v44  ;;  %6209 = vmatprep.subr.bf16.mxu1 %v7387_v19  ;;  %v10189_v1 = vld [vmem:[#allocation11 + $0x90] sm:$0xff]   ;;  %v4055_v28 = vsub.s32 1, %v4050_v41  ;;  %v4063_v62 = vsub.s32 3, %v4050_v41 }
 0x965   : > { %v4006_v31 = vadd.f32 %v10113_v40, %v3984_v61  ;;  %6274 = vmatpush3.bf16.msra.mxu0 %v10189_v1  ;;  %v10226_v22 = vrot.slane %v4047_v60, %v4051_v51  ;;  %v10228_v46 = vrot.slane %v4047_v60, %v4059_v59  ;;  %p8039_p8 = pnand %p8038_p13, %p8032_p1 }
 0x966   : > { %v4005_v5 = vadd.f32 %v10113_v40, %v3983_v21  ;;  %v10194_v40 = vld [vmem:[#allocation11 + $0x98] sm:$0xff]   ;;  %6275 = vmatprep.subr.bf16.mxu0 %v10192_v26  ;;  %v10230_v36 = vrot.slane %v4047_v60, %v4055_v28  ;;  %v10232_v63 = vrot.slane %v4047_v60, %v4063_v62 }
 0x968   : > { %v4014_v49 = vpack.c.bf16 %v4006_v31, %v4005_v5 }
 0x969   : > { %4322 = vmatmul.mubr.bf16.gmra.mrb[104].mxu1 %v4013_v48  ;;  %4435 = vmatmul.mubr.bf16.gmra.mrb[136].mxu0 %v4013_v48 }
 0x96a   : > { %4331 = vmatprep.mubr.bf16.mxu1 %v11243_v42  ;;  %4444 = vmatprep.mubr.bf16.mxu0 %v11243_v42  ;;  %v7389_v42 = vld [vmem:[#allocation11 + $0x10] sm:$0xff]  }
 0x96b   : > { %6210 = vmatpush3.bf16.msra.mxu1 %v7389_v42  ;;  %6276 = vmatpush3.bf16.msra.mxu0 %v10194_v40 }
 0x96c   : > { %6211 = vmatprep.subr.bf16.mxu1 %v7391_v38  ;;  %6277 = vmatprep.subr.bf16.mxu0 %v10198_v30 }
 0x96f   : > { %6212 = vmatpush3.bf16.msra.mxu1 %v7393_v47  ;;  %6278 = vmatpush3.bf16.msra.mxu0 %v10200_v32 }
 0x970   : > { %6213 = vmatprep.subr.bf16.mxu1 %v7395_v37  ;;  %6279 = vmatprep.subr.bf16.mxu0 %v10204_v17 }
 0x971   : > { %4332 = vmatmul.mubr.bf16.gmra.mrb[108].mxu1 %v4014_v49  ;;  %4445 = vmatmul.mubr.bf16.gmra.mrb[140].mxu0 %v4014_v49 }
 0x973   : > { %6214 = vmatpush3.bf16.msra.mxu1 %v7397_v35  ;;  %6280 = vmatpush3.bf16.msra.mxu0 %v10206_v54 }
 0x974   : > { %6215 = vmatprep.subr.bf16.mxu1 %v7399_v0  ;;  %6281 = vmatprep.subr.bf16.mxu0 %v10210_v58 }
 0x977   : > { %6216 = vmatpush3.bf16.msra.mxu1 %v7401_v55  ;;  %6282 = vmatpush3.bf16.msra.mxu0 %v10212_v13 }
 0x978   : > { %6217 = vmatprep.subr.bf16.mxu1 %v7403_v50  ;;  %6283 = vmatprep.subr.bf16.mxu0 %v10214_v56 }
 0x97b   : > { %6218 = vmatpush3.bf16.msra.mxu1 %v7405_v14  ;;  %6284 = vmatpush3.bf16.msra.mxu0 %v10218_v10 }
 0x97c   : > { %6219 = vmatprep.subr.bf16.mxu1 %v7407_v24 }
 0x97f   : > { %6220 = vmatpush3.bf16.msra.mxu1 %v7409_v23 }
 0x980   : > { %6653 = vmatprep.subr.bf16.mxu1 %v10164_v16 }
 0x9df   : > { %v4263_v44 = vpop.f32.mrb[80].mxu1  ;;  %v4376_v16 = vpop.f32.mrb[112].mxu0 }
 0x9e0   : > { %v4264_v48 = vadd.f32 %v4263_v44, %v10226_v22  ;;  %v4377_v61 = vadd.f32 %v4376_v16, %v10228_v46  ;;  %v4265_v33 = vpop.f32.mrb[81].mxu1  ;;  %v4378_v20 = vpop.f32.mrb[113].mxu0 }
 0x9e1   : > { %v10237_v21 = vadd.f32 %v4265_v33, %v10230_v36  ;;  %v10240_v31 = vadd.f32 %v4378_v20, %v10232_v63  ;;  %v4267_v5 = vpop.f32.mrb[82].mxu1  ;;  %v4380_v49 = vpop.f32.mrb[114].mxu0 }
 0x9e2   : > { %v10242_v19 = vmul.f32 0.5, %v4264_v48  ;;  %v4519_v42 = vmul.f32 %v4264_v48, %v4264_v48  ;;  %v10244_v38 = vmul.f32 0.5, %v4377_v61  ;;  %v4521_v47 = vmul.f32 %v4377_v61, %v4377_v61  ;;  %v4269_v37 = vpop.f32.mrb[83].mxu1  ;;  %v4382_v35 = vpop.f32.mrb[115].mxu0 }
 0x9e3   : > { %v4520_v0 = vmul.f32 %v10237_v21, %v10237_v21  ;;  %v4522_v55 = vmul.f32 %v10240_v31, %v10240_v31  ;;  %v4268_v50 = vadd.f32 %v4267_v5, %v10226_v22  ;;  %v4381_v14 = vadd.f32 %v4380_v49, %v10228_v46 }
 0x9e4   : > { %v4583_v24 = vmul.f32 %v4519_v42, %v4264_v48  ;;  %v4585_v23 = vmul.f32 %v4521_v47, %v4377_v61  ;;  %v10253_v57 = vadd.f32 %v4269_v37, %v10230_v36  ;;  %v10256_v41 = vadd.f32 %v4382_v35, %v10232_v63 }
 0x9e5   : > { %v4584_v51 = vmul.f32 %v4520_v0, %v10237_v21  ;;  %v4586_v59 = vmul.f32 %v4522_v55, %v10240_v31  ;;  %v10260_v60 = vmul.f32 0.5, %v4268_v50  ;;  %v4523_v28 = vmul.f32 %v4268_v50, %v4268_v50 }
 0x9e6   : > { %v4647_v62 = vmul.f32 0.044715, %v4583_v24  ;;  %v4649_v44 = vmul.f32 0.044715, %v4585_v23  ;;  %v10262_v16 = vmul.f32 0.5, %v4381_v14  ;;  %v4525_v33 = vmul.f32 %v4381_v14, %v4381_v14 }
 0x9e7   : > { %v4648_v20 = vmul.f32 0.044715, %v4584_v51  ;;  %v4650_v5 = vmul.f32 0.044715, %v4586_v59  ;;  %v4587_v49 = vmul.f32 %v4523_v28, %v4268_v50  ;;  %v4524_v42 = vmul.f32 %v10253_v57, %v10253_v57  ;;  %v4273_v47 = vpop.f32.mrb[84].mxu1  ;;  %v4386_v37 = vpop.f32.mrb[116].mxu0 }
 0x9e8   : > { %v4711_v35 = vadd.f32 %v4647_v62, %v4264_v48  ;;  %v4713_v0 = vadd.f32 %v4649_v44, %v4377_v61  ;;  %v4589_v7 = vmul.f32 %v4525_v33, %v4381_v14  ;;  %v4526_v55 = vmul.f32 %v10256_v41, %v10256_v41  ;;  %v4275_v12 = vpop.f32.mrb[85].mxu1  ;;  %v4388_v24 = vpop.f32.mrb[117].mxu0 }
 0x9e9   : > { %v4712_v23 = vadd.f32 %v4648_v20, %v10237_v21  ;;  %v4714_v2 = vadd.f32 %v4650_v5, %v10240_v31  ;;  %v4651_v51 = vmul.f32 0.044715, %v4587_v49  ;;  %v4588_v59 = vmul.f32 %v4524_v42, %v10253_v57  ;;  %v4277_v28 = vpop.f32.mrb[86].mxu1  ;;  %v4390_v25 = vpop.f32.mrb[118].mxu0 }
 0x9ea   : > { %v4775_v9 = vmul.f32 0.7978846, %v4711_v35  ;;  %v4777_v11 = vmul.f32 0.7978846, %v4713_v0  ;;  %v4653_v52 = vmul.f32 0.044715, %v4589_v7  ;;  %v4590_v48 = vmul.f32 %v4526_v55, %v10256_v41 }
 0x9eb   : > { %v4776_v61 = vmul.f32 0.7978846, %v4712_v23  ;;  %v4778_v62 = vmul.f32 0.7978846, %v4714_v2  ;;  %v4715_v44 = vadd.f32 %v4651_v51, %v4268_v50  ;;  %v4652_v33 = vmul.f32 0.044715, %v4588_v59 }
 0x9ec   : > { %7731 = vtanh.f32 %v4775_v9  ;;  %v4717_v8 = vadd.f32 %v4653_v52, %v4381_v14  ;;  %v4654_v53 = vmul.f32 0.044715, %v4590_v48  ;;  %v10273_v20 = vadd.f32 %v4273_v47, %v10226_v22  ;;  %v4279_v5 = vpop.f32.mrb[87].mxu1  ;;  %v4392_v49 = vpop.f32.mrb[119].mxu0 }
 0x9ed   : > { %7733 = vtanh.f32 %v4777_v11  ;;  %v4779_v42 = vmul.f32 0.7978846, %v4715_v44  ;;  %v4716_v35 = vadd.f32 %v4652_v33, %v10253_v57  ;;  %v10277_v7 = vadd.f32 %v4386_v37, %v10228_v46 }
 0x9ee   : > { %7735 = vtanh.f32 %v4776_v61  ;;  %v4781_v0 = vmul.f32 0.7978846, %v4717_v8  ;;  %v4718_v2 = vadd.f32 %v4654_v53, %v10256_v41  ;;  %v4527_v52 = vmul.f32 %v10273_v20, %v10273_v20 }
 0x9ef   : > { %7737 = vtanh.f32 %v4778_v62  ;;  %v4780_v9 = vmul.f32 0.7978846, %v4716_v35  ;;  %v4529_v50 = vmul.f32 %v10277_v7, %v10277_v7  ;;  %v10285_v11 = vadd.f32 %v4275_v12, %v10230_v36 }
 0x9f0   : > { %7739 = vtanh.f32 %v4779_v42  ;;  %v4782_v14 = vmul.f32 0.7978846, %v4718_v2  ;;  %v4591_v47 = vmul.f32 %v4527_v52, %v10273_v20  ;;  %v10289_v37 = vadd.f32 %v4388_v24, %v10232_v63 }
 0x9f1   : > { %7741 = vtanh.f32 %v4781_v0  ;;  %v4593_v53 = vmul.f32 %v4529_v50, %v10277_v7  ;;  %v4528_v8 = vmul.f32 %v10285_v11, %v10285_v11  ;;  %v10295_v55 = vadd.f32 %v4277_v28, %v10226_v22 }
 0x9f2   : > { %7743 = vtanh.f32 %v4780_v9  ;;  %v4655_v23 = vmul.f32 0.044715, %v4591_v47  ;;  %v4530_v12 = vmul.f32 %v10289_v37, %v10289_v37  ;;  %v10300_v51 = vadd.f32 %v4390_v25, %v10228_v46 }
 0x9f3   : > { %7745 = vtanh.f32 %v4782_v14  ;;  %v4657_v24 = vmul.f32 0.044715, %v4593_v53  ;;  %v4592_v59 = vmul.f32 %v4528_v8, %v10285_v11  ;;  %v4531_v48 = vmul.f32 %v10295_v55, %v10295_v55 }
 0x9f4   : > { %v4719_v61 = vadd.f32 %v4655_v23, %v10273_v20  ;;  %v4594_v28 = vmul.f32 %v4530_v12, %v10289_v37  ;;  %v4533_v62 = vmul.f32 %v10300_v51, %v10300_v51  ;;  %v10310_v44 = vadd.f32 %v4279_v5, %v10230_v36 }
 0x9f5   : > { %v4721_v25 = vadd.f32 %v4657_v24, %v10277_v7  ;;  %v4656_v33 = vmul.f32 0.044715, %v4592_v59  ;;  %v4595_v42 = vmul.f32 %v4531_v48, %v10295_v55  ;;  %v10315_v35 = vadd.f32 %v4392_v49, %v10232_v63 }
 0x9f6   : > { %v7732_v0 = vpop.eup %7731  ;;  %v4783_v2 = vmul.f32 0.7978846, %v4719_v61  ;;  %v4658_v52 = vmul.f32 0.044715, %v4594_v28  ;;  %v4597_v9 = vmul.f32 %v4533_v62, %v10300_v51  ;;  %v4532_v50 = vmul.f32 %v10310_v44, %v10310_v44 }
 0x9f7   : > { %v7734_v14 = vpop.eup %7733  ;;  %v4903_v47 = vadd.f32 1.0, %v7732_v0  ;;  %v4785_v5 = vmul.f32 0.7978846, %v4721_v25  ;;  %v4720_v53 = vadd.f32 %v4656_v33, %v10285_v11  ;;  %v4659_v8 = vmul.f32 0.044715, %v4595_v42 }
 0x9f8   : > { %v7736_v23 = vpop.eup %7735  ;;  %v4905_v12 = vadd.f32 1.0, %v7734_v14  ;;  %7747 = vtanh.f32 %v4783_v2  ;;  %v4722_v49 = vadd.f32 %v4658_v52, %v10289_v37  ;;  %v4661_v24 = vmul.f32 0.044715, %v4597_v9 }
 0x9f9   : > { %v7738_v59 = vpop.eup %7737  ;;  %v4967_v48 = vmul.f32 %v4903_v47, %v10242_v19  ;;  %7749 = vtanh.f32 %v4785_v5  ;;  %v4784_v61 = vmul.f32 0.7978846, %v4720_v53  ;;  %v4723_v28 = vadd.f32 %v4659_v8, %v10295_v55 }
 0x9fa   : > { %v7740_v62 = vpop.eup %7739  ;;  %v4969_v0 = vmul.f32 %v4905_v12, %v10244_v38  ;;  %v4786_v25 = vmul.f32 0.7978846, %v4722_v49  ;;  %v4725_v33 = vadd.f32 %v4661_v24, %v10300_v51  ;;  %v4596_v42 = vmul.f32 %v4532_v50, %v10310_v44 }
 0x9fb   : > { %v7742_v14 = vpop.eup %7741  ;;  %v4907_v2 = vadd.f32 1.0, %v7740_v62  ;;  %7751 = vtanh.f32 %v4784_v61  ;;  %v4787_v52 = vmul.f32 0.7978846, %v4723_v28  ;;  %v4534_v9 = vmul.f32 %v10315_v35, %v10315_v35 }
 0x9fc   : > { %v7744_v19 = vpop.eup %7743  ;;  %v4909_v47 = vadd.f32 1.0, %v7742_v14  ;;  %7753 = vtanh.f32 %v4786_v25  ;;  %v4789_v5 = vmul.f32 0.7978846, %v4725_v33  ;;  %v4660_v53 = vmul.f32 0.044715, %v4596_v42 }
 0x9fd   : > { %v7746_v8 = vpop.eup %7745  ;;  %v4971_v38 = vmul.f32 %v4907_v2, %v10260_v60  ;;  %7755 = vtanh.f32 %v4787_v52  ;;  %v4598_v12 = vmul.f32 %v4534_v9, %v10315_v35  ;;  %v4456_v50 = vmul.f32 0.5, %v10237_v21 }
 0x9fe   : > { %v4973_v49 = vmul.f32 %v4909_v47, %v10262_v16  ;;  %7757 = vtanh.f32 %v4789_v5  ;;  %v4724_v24 = vadd.f32 %v4660_v53, %v10310_v44  ;;  %v4460_v61 = vmul.f32 0.5, %v10253_v57 }
 0x9ff   : > { %v4662_v28 = vmul.f32 0.044715, %v4598_v12  ;;  %v4904_v62 = vadd.f32 1.0, %v7736_v23  ;;  %v4908_v25 = vadd.f32 1.0, %v7744_v19  ;;  %v4458_v33 = vmul.f32 0.5, %v10240_v31 }
 0xa00   : > { %v4788_v42 = vmul.f32 0.7978846, %v4724_v24  ;;  %v4462_v60 = vmul.f32 0.5, %v10256_v41  ;;  %v4906_v14 = vadd.f32 1.0, %v7738_v59  ;;  %v4910_v2 = vadd.f32 1.0, %v7746_v8 }
 0xa01   : > { %v4726_v52 = vadd.f32 %v4662_v28, %v10315_v35  ;;  %v4968_v21 = vmul.f32 %v4904_v62, %v4456_v50  ;;  %v4972_v9 = vmul.f32 %v4908_v25, %v4460_v61  ;;  %v5031_v16 = vpack.c.bf16 %v4971_v38, %v4967_v48 }
 0xa02   : > { %v7748_v47 = vpop.eup %7747  ;;  %7759 = vtanh.f32 %v4788_v42  ;;  %v4970_v5 = vmul.f32 %v4906_v14, %v4458_v33  ;;  %v4974_v53 = vmul.f32 %v4910_v2, %v4462_v60  ;;  %v5033_v57 = vpack.c.bf16 %v4973_v49, %v4969_v0 }
 0xa03   : > { %v7750_v12 = vpop.eup %7749  ;;  %v4790_v23 = vmul.f32 0.7978846, %v4726_v52  ;;  %v5032_v19 = vpack.c.bf16 %v4972_v9, %v4968_v21  ;;  %v4911_v59 = vadd.f32 1.0, %v7748_v47  ;;  %v4463_v38 = vmul.f32 0.5, %v10273_v20 }
 0xa04   : > { %v5034_v4 = vpack.c.bf16 %v4974_v53, %v4970_v5  ;;  %v4913_v50 = vadd.f32 1.0, %v7750_v12  ;;  %v4467_v0 = vmul.f32 0.5, %v10295_v55  ;;  %v4465_v24 = vmul.f32 0.5, %v10277_v7 }
 0xa05   : > { %v7752_v31 = vpop.eup %7751  ;;  %7761 = vtanh.f32 %v4790_v23  ;;  %5351 = vmatprep.mubr.bf16.mxu1 %v5032_v19  ;;  %v4469_v61 = vmul.f32 0.5, %v10300_v51  ;;  %v4975_v28 = vmul.f32 %v4911_v59, %v4463_v38  ;;  %v4464_v20 = vmul.f32 0.5, %v10285_v11 }
 0xa06   : > { %v7754_v41 = vpop.eup %7753  ;;  %5448 = vmatprep.mubr.bf16.mxu0 %v5034_v4  ;;  %5352 = vmatmul.mubr.bf16.vlgmr.msra.gmra.mrb[112].mxu1 %v5031_v16  ;;  %v4912_v25 = vadd.f32 1.0, %v7752_v31  ;;  %v4977_v33 = vmul.f32 %v4913_v50, %v4465_v24  ;;  %v4466_v21 = vmul.f32 0.5, %v10289_v37 }
 0xa07   : > { %v7756_v8 = vpop.eup %7755  ;;  %5449 = vmatmul.mubr.bf16.vlgmr.msra.gmra.mrb[144].mxu0 %v5033_v57  ;;  %6661 = vmatpush3.bf16.msra.mxu1 %v10169_v3  ;;  %v4914_v14 = vadd.f32 1.0, %v7754_v41 }
 0xa08   : > { %v7758_v48 = vpop.eup %7757  ;;  %v4915_v49 = vadd.f32 1.0, %v7756_v8  ;;  %6654 = vmatprep.subr.bf16.mxu1 %v10175_v6  ;;  %v4468_v6 = vmul.f32 0.5, %v10310_v44  ;;  %v4976_v2 = vmul.f32 %v4912_v25, %v4464_v20 }
 0xa09   : > { %v4917_v4 = vadd.f32 1.0, %v7758_v48  ;;  %v4978_v16 = vmul.f32 %v4914_v14, %v4466_v21 }
 0xa0a   : > { %v4979_v62 = vmul.f32 %v4915_v49, %v4467_v0 }
 0xa0b   : > { %v4981_v42 = vmul.f32 %v4917_v4, %v4469_v61  ;;  %6662 = vmatpush3.bf16.msra.mxu1 %v10177_v43  ;;  %v4470_v43 = vmul.f32 0.5, %v10315_v35 }
 0xa0c   : > { %v7760_v3 = vpop.eup %7759  ;;  %v5035_v60 = vpack.c.bf16 %v4979_v62, %v4975_v28  ;;  %6655 = vmatprep.subr.bf16.mxu1 %v10186_v45 }
 0xa0d   : > { %v4916_v55 = vadd.f32 1.0, %v7760_v3  ;;  %v5037_v7 = vpack.c.bf16 %v4981_v42, %v4977_v33 }
 0xa0f   : > { %v7762_v51 = vpop.eup %7761  ;;  %v4980_v52 = vmul.f32 %v4916_v55, %v4468_v6  ;;  %6663 = vmatpush3.bf16.msra.mxu1 %v10189_v1 }
 0xa10   : > { %v4918_v9 = vadd.f32 1.0, %v7762_v51  ;;  %6656 = vmatprep.subr.bf16.mxu1 %v10192_v26 }
 0xa11   : > { %v5036_v45 = vpack.c.bf16 %v4980_v52, %v4976_v2 }
 0xa12   : > { %v4982_v11 = vmul.f32 %v4918_v9, %v4470_v43 }
 0xa13   : > { %5359 = vmatprep.mubr.bf16.mxu1 %v5036_v45  ;;  %6664 = vmatpush3.bf16.msra.mxu1 %v10194_v40 }
 0xa14   : > { %v5038_v44 = vpack.c.bf16 %v4982_v11, %v4978_v16  ;;  %5360 = vmatmul.mubr.bf16.gmra.mrb[116].mxu1 %v5035_v60  ;;  %6657 = vmatprep.subr.bf16.mxu1 %v10198_v30 }
 0xa15   : > { %v4283_v47 = vpop.f32.mrb[88].mxu1  ;;  %v4396_v5 = vpop.f32.mrb[120].mxu0 }
 0xa16   : > { %v10355_v1 = vadd.f32 %v4283_v47, %v10226_v22  ;;  %v10358_v37 = vadd.f32 %v4396_v5, %v10228_v46  ;;  %v4285_v35 = vpop.f32.mrb[89].mxu1  ;;  %v4398_v26 = vpop.f32.mrb[121].mxu0  ;;  %5456 = vmatprep.mubr.bf16.mxu0 %v5038_v44 }
 0xa17   : > { %v10361_v53 = vadd.f32 %v4285_v35, %v10230_v36  ;;  %v10364_v40 = vadd.f32 %v4398_v26, %v10232_v63  ;;  %v4287_v57 = vpop.f32.mrb[90].mxu1  ;;  %v4400_v12 = vpop.f32.mrb[122].mxu0  ;;  %5457 = vmatmul.mubr.bf16.gmra.mrb[148].mxu0 %v5037_v7  ;;  %6665 = vmatpush3.bf16.msra.mxu1 %v10200_v32 }
 0xa18   : > { %v4535_v30 = vmul.f32 %v10355_v1, %v10355_v1  ;;  %v4537_v23 = vmul.f32 %v10358_v37, %v10358_v37  ;;  %v10371_v19 = vadd.f32 %v4287_v57, %v10226_v22  ;;  %v10374_v31 = vadd.f32 %v4400_v12, %v10228_v46  ;;  %v4289_v41 = vpop.f32.mrb[91].mxu1  ;;  %v4402_v59 = vpop.f32.mrb[123].mxu0  ;;  %6658 = vmatprep.subr.bf16.mxu1 %v10204_v17 }
 0xa19   : > { %v4536_v8 = vmul.f32 %v10361_v53, %v10361_v53  ;;  %v4538_v50 = vmul.f32 %v10364_v40, %v10364_v40  ;;  %v10381_v48 = vadd.f32 %v4289_v41, %v10230_v36  ;;  %v10384_v38 = vadd.f32 %v4402_v59, %v10232_v63 }
 0xa1a   : > { %v4599_v0 = vmul.f32 %v4535_v30, %v10355_v1  ;;  %v4601_v49 = vmul.f32 %v4537_v23, %v10358_v37  ;;  %v4539_v24 = vmul.f32 %v10371_v19, %v10371_v19  ;;  %v4541_v61 = vmul.f32 %v10374_v31, %v10374_v31 }
 0xa1b   : > { %v4600_v4 = vmul.f32 %v4536_v8, %v10361_v53  ;;  %v4602_v28 = vmul.f32 %v4538_v50, %v10364_v40  ;;  %v4540_v62 = vmul.f32 %v10381_v48, %v10381_v48  ;;  %v4542_v32 = vmul.f32 %v10384_v38, %v10384_v38  ;;  %6666 = vmatpush3.bf16.msra.mxu1 %v10206_v54 }
 0xa1c   : > { %v4663_v25 = vmul.f32 0.044715, %v4599_v0  ;;  %v4665_v33 = vmul.f32 0.044715, %v4601_v49  ;;  %v4603_v42 = vmul.f32 %v4539_v24, %v10371_v19  ;;  %v4605_v3 = vmul.f32 %v4541_v61, %v10374_v31  ;;  %6659 = vmatprep.subr.bf16.mxu1 %v10210_v58 }
 0xa1d   : > { %v4664_v60 = vmul.f32 0.044715, %v4600_v4  ;;  %v4666_v20 = vmul.f32 0.044715, %v4602_v28  ;;  %v4604_v17 = vmul.f32 %v4540_v62, %v10381_v48  ;;  %v4606_v6 = vmul.f32 %v4542_v32, %v10384_v38  ;;  %v4293_v55 = vpop.f32.mrb[92].mxu1  ;;  %v4406_v7 = vpop.f32.mrb[124].mxu0 }
 0xa1e   : > { %v4727_v14 = vadd.f32 %v4663_v25, %v10355_v1  ;;  %v4729_v51 = vadd.f32 %v4665_v33, %v10358_v37  ;;  %v4667_v2 = vmul.f32 0.044715, %v4603_v42  ;;  %v4669_v52 = vmul.f32 0.044715, %v4605_v3  ;;  %v4295_v21 = vpop.f32.mrb[93].mxu1  ;;  %v4408_v43 = vpop.f32.mrb[125].mxu0 }
 0xa1f   : > { %v4728_v9 = vadd.f32 %v4664_v60, %v10361_v53  ;;  %v4730_v45 = vadd.f32 %v4666_v20, %v10364_v40  ;;  %v4668_v16 = vmul.f32 0.044715, %v4604_v17  ;;  %v4670_v11 = vmul.f32 0.044715, %v4606_v6  ;;  %v4297_v44 = vpop.f32.mrb[94].mxu1  ;;  %v4410_v47 = vpop.f32.mrb[126].mxu0  ;;  %6667 = vmatpush3.bf16.msra.mxu1 %v10212_v13 }
 0xa20   : > { %v4791_v5 = vmul.f32 0.7978846, %v4727_v14  ;;  %v4793_v54 = vmul.f32 0.7978846, %v4729_v51  ;;  %v4731_v35 = vadd.f32 %v4667_v2, %v10371_v19  ;;  %v4733_v26 = vadd.f32 %v4669_v52, %v10374_v31  ;;  %v4299_v57 = vpop.f32.mrb[95].mxu1  ;;  %v4412_v12 = vpop.f32.mrb[127].mxu0  ;;  %6660 = vmatprep.subr.bf16.mxu1 %v10214_v56 }
 0xa21   : > { %v4792_v30 = vmul.f32 0.7978846, %v4728_v9  ;;  %v4794_v23 = vmul.f32 0.7978846, %v4730_v45  ;;  %v4732_v58 = vadd.f32 %v4668_v16, %v10381_v48  ;;  %v4734_v41 = vadd.f32 %v4670_v11, %v10384_v38 }
 0xa22   : > { %7763 = vtanh.f32 %v4791_v5  ;;  %v4795_v59 = vmul.f32 0.7978846, %v4731_v35  ;;  %v4797_v8 = vmul.f32 0.7978846, %v4733_v26  ;;  %v10416_v50 = vadd.f32 %v4293_v55, %v10226_v22 }
 0xa23   : > { %7765 = vtanh.f32 %v4793_v54  ;;  %v4796_v0 = vmul.f32 0.7978846, %v4732_v58  ;;  %v4798_v49 = vmul.f32 0.7978846, %v4734_v41  ;;  %v10420_v24 = vadd.f32 %v4406_v7, %v10228_v46  ;;  %6668 = vmatpush3.bf16.msra.mxu1 %v10218_v10 }
 0xa24   : > { %7767 = vtanh.f32 %v4792_v30  ;;  %v4543_v61 = vmul.f32 %v10416_v50, %v10416_v50  ;;  %v10425_v13 = vadd.f32 %v4295_v21, %v10230_v36  ;;  %v10428_v4 = vadd.f32 %v4408_v43, %v10232_v63 }
 0xa25   : > { %7769 = vtanh.f32 %v4794_v23  ;;  %v4545_v56 = vmul.f32 %v10420_v24, %v10420_v24  ;;  %v10433_v28 = vadd.f32 %v4297_v44, %v10226_v22  ;;  %v10436_v62 = vadd.f32 %v4410_v47, %v10228_v46 }
 0xa26   : > { %7771 = vtanh.f32 %v4795_v59  ;;  %v4607_v32 = vmul.f32 %v4543_v61, %v10416_v50  ;;  %v4544_v25 = vmul.f32 %v10425_v13, %v10425_v13  ;;  %v4546_v33 = vmul.f32 %v10428_v4, %v10428_v4 }
 0xa27   : > { %7773 = vtanh.f32 %v4797_v8  ;;  %v4609_v42 = vmul.f32 %v4545_v56, %v10420_v24  ;;  %v4547_v3 = vmul.f32 %v10433_v28, %v10433_v28  ;;  %v4549_v60 = vmul.f32 %v10436_v62, %v10436_v62 }
 0xa28   : > { %7775 = vtanh.f32 %v4796_v0  ;;  %v4671_v10 = vmul.f32 0.044715, %v4607_v32  ;;  %v4608_v20 = vmul.f32 %v4544_v25, %v10425_v13  ;;  %v4610_v17 = vmul.f32 %v4546_v33, %v10428_v4 }
 0xa29   : > { %7777 = vtanh.f32 %v4798_v49  ;;  %v4673_v6 = vmul.f32 0.044715, %v4609_v42  ;;  %v4611_v55 = vmul.f32 %v4547_v3, %v10433_v28  ;;  %v4613_v7 = vmul.f32 %v4549_v60, %v10436_v62 }
 0xa2a   : > { %v4735_v14 = vadd.f32 %v4671_v10, %v10416_v50  ;;  %v4672_v51 = vmul.f32 0.044715, %v4608_v20  ;;  %v4674_v2 = vmul.f32 0.044715, %v4610_v17  ;;  %v10455_v52 = vadd.f32 %v4299_v57, %v10230_v36 }
 0xa2b   : > { %v4737_v21 = vadd.f32 %v4673_v6, %v10420_v24  ;;  %v4675_v43 = vmul.f32 0.044715, %v4611_v55  ;;  %v4677_v9 = vmul.f32 0.044715, %v4613_v7  ;;  %v10459_v45 = vadd.f32 %v4412_v12, %v10232_v63 }
 0xa2c   : > { %v10461_v16 = vpop.eup %7763  ;;  %v4799_v11 = vmul.f32 0.7978846, %v4735_v14  ;;  %v4736_v44 = vadd.f32 %v4672_v51, %v10425_v13  ;;  %v4738_v47 = vadd.f32 %v4674_v2, %v10428_v4  ;;  %v4548_v5 = vmul.f32 %v10455_v52, %v10455_v52  ;;  %v4303_v30 = vpop.f32.mrb[96].mxu1 }
 0xa2d   : > { %v10467_v54 = vpop.eup %7765  ;;  %v4801_v35 = vmul.f32 0.7978846, %v4737_v21  ;;  %v4739_v26 = vadd.f32 %v4675_v43, %v10433_v28  ;;  %v4741_v57 = vadd.f32 %v4677_v9, %v10436_v62  ;;  %v4550_v12 = vmul.f32 %v10459_v45, %v10459_v45  ;;  %v4416_v23 = vpop.f32.mrb[128].mxu0 }
 0xa2e   : > { %v10473_v58 = vpop.eup %7767  ;;  %7779 = vtanh.f32 %v4799_v11  ;;  %v4800_v41 = vmul.f32 0.7978846, %v4736_v44  ;;  %v4802_v59 = vmul.f32 0.7978846, %v4738_v47  ;;  %v4612_v8 = vmul.f32 %v4548_v5, %v10455_v52  ;;  %v4305_v0 = vpop.f32.mrb[97].mxu1 }
 0xa2f   : > { %v4418_v49 = vpop.f32.mrb[129].mxu0  ;;  %v10476_v61 = vpop.eup %7769  ;;  %7781 = vtanh.f32 %v4801_v35  ;;  %v4803_v56 = vmul.f32 0.7978846, %v4739_v26  ;;  %v4805_v32 = vmul.f32 0.7978846, %v4741_v57  ;;  %v4614_v25 = vmul.f32 %v4550_v12, %v10459_v45 }
 0xa30   : > { %v4307_v33 = vpop.f32.mrb[98].mxu1  ;;  %v4420_v42 = vpop.f32.mrb[130].mxu0  ;;  %7783 = vtanh.f32 %v4800_v41  ;;  %v4676_v60 = vmul.f32 0.044715, %v4612_v8  ;;  %v10482_v10 = vadd.f32 %v4303_v30, %v10226_v22  ;;  %v10485_v20 = vadd.f32 %v4416_v23, %v10228_v46 }
 0xa31   : > { %v10479_v3 = vpop.eup %7771  ;;  %v4309_v17 = vpop.f32.mrb[99].mxu1  ;;  %7785 = vtanh.f32 %v4802_v59  ;;  %v4678_v7 = vmul.f32 0.044715, %v4614_v25  ;;  %v10490_v14 = vadd.f32 %v4305_v0, %v10230_v36  ;;  %v10493_v51 = vadd.f32 %v4418_v49, %v10232_v63 }
 0xa32   : > { %11279 = vst [vmem:[#allocation44_spill] sm:$0xff] %v10482_v10  ;;  %11280 = vst [vmem:[#allocation59_spill] sm:$0xff] %v10485_v20  ;;  %v4422_v6 = vpop.f32.mrb[131].mxu0  ;;  %v10487_v55 = vpop.eup %7773  ;;  %7787 = vtanh.f32 %v4803_v56  ;;  %v4740_v21 = vadd.f32 %v4676_v60, %v10455_v52  ;;  %v4551_v43 = vmul.f32 %v10482_v10, %v10482_v10  ;;  %v4553_v9 = vmul.f32 %v10485_v20, %v10485_v20 }
 0xa33   : > { %11281 = vst [vmem:[#allocation45_spill] sm:$0xff] %v10490_v14  ;;  %11282 = vst [vmem:[#allocation58_spill] sm:$0xff] %v10493_v51  ;;  %v10495_v2 = vpop.eup %7775  ;;  %7789 = vtanh.f32 %v4805_v32  ;;  %v4742_v44 = vadd.f32 %v4678_v7, %v10459_v45  ;;  %v4552_v47 = vmul.f32 %v10490_v14, %v10490_v14  ;;  %v4554_v5 = vmul.f32 %v10493_v51, %v10493_v51 }
 0xa34   : > { %v10502_v11 = vpop.eup %7777  ;;  %v4804_v35 = vmul.f32 0.7978846, %v4740_v21  ;;  %v4615_v26 = vmul.f32 %v4551_v43, %v10482_v10  ;;  %v4617_v57 = vmul.f32 %v4553_v9, %v10485_v20  ;;  %v10512_v12 = vadd.f32 %v4307_v33, %v10226_v22  ;;  %v4313_v8 = vpop.f32.mrb[100].mxu1 }
 0xa35   : > { %v4806_v30 = vmul.f32 0.7978846, %v4742_v44  ;;  %v4616_v23 = vmul.f32 %v4552_v47, %v10490_v14  ;;  %v4618_v41 = vmul.f32 %v4554_v5, %v10493_v51  ;;  %v10517_v59 = vadd.f32 %v4420_v42, %v10228_v46  ;;  %v4426_v0 = vpop.f32.mrb[132].mxu0  ;;  %v10521_v25 = vpop.f32.mrb[101].mxu1 }
 0xa36   : > { %11283 = vst [vmem:[#allocation62_spill] sm:$0xff] %v10512_v12  ;;  %7791 = vtanh.f32 %v4804_v35  ;;  %v4679_v49 = vmul.f32 0.044715, %v4615_v26  ;;  %v4681_v56 = vmul.f32 0.044715, %v4617_v57  ;;  %v4555_v32 = vmul.f32 %v10512_v12, %v10512_v12  ;;  %v10523_v33 = vpop.f32.mrb[133].mxu0 }
 0xa37   : > { %11284 = vst [vmem:[#allocation61_spill] sm:$0xff] %v10517_v59  ;;  %7793 = vtanh.f32 %v4806_v30  ;;  %v4680_v60 = vmul.f32 0.044715, %v4616_v23  ;;  %v4682_v7 = vmul.f32 0.044715, %v4618_v41  ;;  %v4557_v21 = vmul.f32 %v10517_v59, %v10517_v59  ;;  %v10527_v42 = vpop.f32.mrb[102].mxu1 }
 0xa38   : > { %v10529_v43 = vpop.f32.mrb[134].mxu0  ;;  %v10531_v9 = vpop.eup %7779  ;;  %v4743_v44 = vadd.f32 %v4679_v49, %v10482_v10  ;;  %v4745_v47 = vadd.f32 %v4681_v56, %v10485_v20  ;;  %v4619_v5 = vmul.f32 %v4555_v32, %v10512_v12  ;;  %v10537_v35 = vadd.f32 %v4309_v17, %v10230_v36 }
 0xa39   : > { %v10539_v26 = vpop.f32.mrb[103].mxu1  ;;  %v10541_v57 = vpop.f32.mrb[135].mxu0  ;;  %v4744_v23 = vadd.f32 %v4680_v60, %v10490_v14  ;;  %v4746_v41 = vadd.f32 %v4682_v7, %v10493_v51  ;;  %v4621_v27 = vmul.f32 %v4557_v21, %v10517_v59  ;;  %v10549_v49 = vadd.f32 %v4422_v6, %v10232_v63 }
 0xa3a   : > { %11285 = vst [vmem:[#allocation57_spill] sm:$0xff] %v10537_v35  ;;  %v10543_v30 = vpop.eup %7781  ;;  %v4807_v32 = vmul.f32 0.7978846, %v4743_v44  ;;  %v4809_v17 = vmul.f32 0.7978846, %v4745_v47  ;;  %v4556_v18 = vmul.f32 %v10537_v35, %v10537_v35  ;;  %v10564_v47 = vadd.f32 %v4313_v8, %v10226_v22 }
 0xa3b   : > { %11286 = vst [vmem:[#allocation56_spill] sm:$0xff] %v10549_v49  ;;  %v10551_v56 = vpop.eup %7783  ;;  %v4683_v34 = vmul.f32 0.044715, %v4619_v5  ;;  %v4808_v29 = vmul.f32 0.7978846, %v4744_v23  ;;  %v4558_v7 = vmul.f32 %v10549_v49, %v10549_v49  ;;  %v4472_v51 = vmul.f32 0.5, %v10361_v53 }
 0xa3c   : > { %v10555_v15 = vpop.eup %7785  ;;  %v4810_v39 = vmul.f32 0.7978846, %v4746_v41  ;;  %v4685_v60 = vmul.f32 0.044715, %v4621_v27  ;;  %7795 = vtanh.f32 %v4807_v32  ;;  %v4620_v44 = vmul.f32 %v4556_v18, %v10537_v35  ;;  %11287 = vst [vmem:[#allocation53_spill] sm:$0xff] %v10564_v47  ;;  %v10573_v20 = vpop.f32.mrb[104].mxu1 }
 0xa3d   : > { %v10559_v21 = vpop.eup %7787  ;;  %v4747_v6 = vadd.f32 %v4683_v34, %v10512_v12  ;;  %7797 = vtanh.f32 %v4809_v17  ;;  %v4622_v27 = vmul.f32 %v4558_v7, %v10549_v49  ;;  %v10571_v41 = vadd.f32 %v4426_v0, %v10228_v46  ;;  %v10575_v32 = vpop.f32.mrb[136].mxu0 }
 0xa3e   : > { %v10566_v5 = vpop.eup %7789  ;;  %v4749_v23 = vadd.f32 %v4685_v60, %v10517_v59  ;;  %7799 = vtanh.f32 %v4808_v29  ;;  %v4684_v18 = vmul.f32 0.044715, %v4620_v44  ;;  %v4559_v8 = vmul.f32 %v10564_v47, %v10564_v47  ;;  %v10579_v12 = vpop.f32.mrb[105].mxu1 }
 0xa3f   : > { %11288 = vst [vmem:[#allocation37_spill] sm:$0xff] %v10566_v5  ;;  %11289 = vst [vmem:[#allocation46_spill] sm:$0xff] %v10571_v41  ;;  %v4811_v34 = vmul.f32 0.7978846, %v4747_v6  ;;  %v10581_v17 = vpop.f32.mrb[137].mxu0  ;;  %7801 = vtanh.f32 %v4810_v39  ;;  %v4561_v0 = vmul.f32 %v10571_v41, %v10571_v41  ;;  %v10585_v59 = vpop.f32.mrb[106].mxu1 }
 0xa40   : > { %v4813_v60 = vmul.f32 0.7978846, %v4749_v23  ;;  %v4686_v7 = vmul.f32 0.044715, %v4622_v27  ;;  %11290 = vst [vmem:[#allocation35_spill] sm:$0xff] %v10585_v59  ;;  %v10587_v10 = vpop.f32.mrb[138].mxu0  ;;  %v10589_v29 = vpop.eup %7791  ;;  %v4748_v6 = vadd.f32 %v4684_v18, %v10537_v35  ;;  %v4623_v44 = vmul.f32 %v4559_v8, %v10564_v47 }
 0xa41   : > { %11291 = vst [vmem:[#allocation19_spill] sm:$0xff] %v10587_v10  ;;  %7803 = vtanh.f32 %v4811_v34  ;;  %v10594_v14 = vpop.f32.mrb[107].mxu1  ;;  %v10596_v39 = vpop.f32.mrb[139].mxu0  ;;  %v4625_v10 = vmul.f32 %v4561_v0, %v10571_v41  ;;  %v4476_v59 = vmul.f32 0.5, %v10381_v48  ;;  %v4920_v18 = vadd.f32 1.0, %v10473_v58 }
 0xa42   : > { %11292 = vst [vmem:[#allocation20_spill] sm:$0xff] %v10594_v14  ;;  %11293 = vst [vmem:[#allocation21_spill] sm:$0xff] %v10596_v39  ;;  %v10598_v23 = vpop.eup %7793  ;;  %7805 = vtanh.f32 %v4813_v60  ;;  %v4750_v27 = vadd.f32 %v4686_v7, %v10549_v49  ;;  %v4812_v34 = vmul.f32 0.7978846, %v4748_v6  ;;  %v4687_v5 = vmul.f32 0.044715, %v4623_v44 }
 0xa43   : > { %v4924_v8 = vadd.f32 1.0, %v10495_v2  ;;  %v4689_v35 = vmul.f32 0.044715, %v4625_v10  ;;  %v4474_v14 = vmul.f32 0.5, %v10364_v40  ;;  %v4478_v39 = vmul.f32 0.5, %v10384_v38 }
 0xa44   : > { %v4814_v53 = vmul.f32 0.7978846, %v4750_v27  ;;  %7807 = vtanh.f32 %v4812_v34  ;;  %v4751_v60 = vadd.f32 %v4687_v5, %v10564_v47  ;;  %v4984_v7 = vmul.f32 %v4920_v18, %v4472_v51  ;;  %v10611_v6 = vpop.f32.mrb[108].mxu1  ;;  %v10613_v2 = vpop.f32.mrb[140].mxu0 }
 0xa45   : > { %v4988_v49 = vmul.f32 %v4924_v8, %v4476_v59  ;;  %v4753_v48 = vadd.f32 %v4689_v35, %v10571_v41  ;;  %v4922_v0 = vadd.f32 1.0, %v10476_v61  ;;  %v4926_v58 = vadd.f32 1.0, %v10502_v11  ;;  %v10625_v59 = vpop.f32.mrb[109].mxu1  ;;  %v10627_v61 = vpop.f32.mrb[141].mxu0 }
 0xa46   : > { %7809 = vtanh.f32 %v4814_v53  ;;  %v10615_v10 = vpop.eup %7795  ;;  %v4815_v40 = vmul.f32 0.7978846, %v4751_v60  ;;  %v10619_v5 = vadd.f32 %v10521_v25, %v10230_v36  ;;  %v10623_v51 = vadd.f32 %v10523_v33, %v10232_v63  ;;  %v10634_v18 = vpop.f32.mrb[142].mxu0 }
 0xa47   : > { %v5040_v38 = vpack.c.bf16 %v4988_v49, %v4984_v7  ;;  %v10629_v11 = vpop.eup %7797  ;;  %v4817_v35 = vmul.f32 0.7978846, %v4753_v48  ;;  %v4986_v44 = vmul.f32 %v4922_v0, %v4474_v14  ;;  %v4990_v27 = vmul.f32 %v4926_v58, %v4478_v39  ;;  %v10632_v49 = vpop.f32.mrb[110].mxu1 }
 0xa48   : > { %v4471_v34 = vmul.f32 0.5, %v10355_v1  ;;  %v10636_v25 = vpop.eup %7799  ;;  %7811 = vtanh.f32 %v4815_v40  ;;  %v4560_v33 = vmul.f32 %v10619_v5, %v10619_v5  ;;  %v4562_v8 = vmul.f32 %v10623_v51, %v10623_v51  ;;  %v10643_v14 = vpop.f32.mrb[111].mxu1 }
 0xa49   : > { %5367 = vmatprep.mubr.bf16.mxu1 %v5040_v38  ;;  %v4475_v53 = vmul.f32 0.5, %v10371_v19  ;;  %v10645_v39 = vpop.f32.mrb[143].mxu0  ;;  %v10647_v1 = vpop.eup %7801  ;;  %7813 = vtanh.f32 %v4817_v35  ;;  %v5042_v60 = vpack.c.bf16 %v4990_v27, %v4986_v44  ;;  %v4919_v7 = vadd.f32 1.0, %v10461_v16 }
 0xa4a   : > { %v4923_v48 = vadd.f32 1.0, %v10479_v3  ;;  %v4624_v58 = vmul.f32 %v4560_v33, %v10619_v5  ;;  %v4626_v40 = vmul.f32 %v4562_v8, %v10623_v51  ;;  %v4473_v19 = vmul.f32 0.5, %v10358_v37 }
 0xa4b   : > { %v10651_v0 = vpop.eup %7803  ;;  %v4477_v38 = vmul.f32 0.5, %v10374_v31  ;;  %5464 = vmatprep.mubr.bf16.mxu0 %v5042_v60  ;;  %v4983_v47 = vmul.f32 %v4919_v7, %v4471_v34  ;;  %v4921_v44 = vadd.f32 1.0, %v10467_v54  ;;  %v4925_v16 = vadd.f32 1.0, %v10487_v55 }
 0xa4c   : > { %v10657_v41 = vpop.eup %7805  ;;  %v4987_v35 = vmul.f32 %v4923_v48, %v4475_v53  ;;  %v4688_v3 = vmul.f32 0.044715, %v4624_v58  ;;  %v4690_v27 = vmul.f32 0.044715, %v4626_v40  ;;  %v10663_v33 = vadd.f32 %v10527_v42, %v10226_v22 }
 0xa4d   : > { %11294 = vst [vmem:[#allocation22_spill] sm:$0xff] %v10657_v41  ;;  %v10667_v37 = vadd.f32 %v10529_v43, %v10228_v46  ;;  %v4985_v8 = vmul.f32 %v4921_v44, %v4473_v19  ;;  %v4989_v41 = vmul.f32 %v4925_v16, %v4477_v38  ;;  %v10671_v34 = vadd.f32 %v10539_v26, %v10230_v36 }
 0xa4e   : > { %v5039_v31 = vpack.c.bf16 %v4987_v35, %v4983_v47  ;;  %v10673_v54 = vpop.eup %7807  ;;  %v4752_v55 = vadd.f32 %v4688_v3, %v10619_v5  ;;  %v4754_v53 = vadd.f32 %v4690_v27, %v10623_v51  ;;  %v4563_v42 = vmul.f32 %v10663_v33, %v10663_v33 }
 0xa4f   : > { %11295 = vst [vmem:[#allocation23_spill] sm:$0xff] %v10667_v37  ;;  %v4565_v43 = vmul.f32 %v10667_v37, %v10667_v37  ;;  %v5041_v47 = vpack.c.bf16 %v4989_v41, %v4985_v8  ;;  %v4564_v26 = vmul.f32 %v10671_v34, %v10671_v34  ;;  %v10687_v7 = vadd.f32 %v10541_v57, %v10232_v63 }
 0xa50   : > { %v10681_v60 = vpop.eup %7809  ;;  %5368 = vmatmul.mubr.bf16.gmra.mrb[120].mxu1 %v5039_v31  ;;  %v10691_v48 = vadd.f32 %v10573_v20, %v10226_v22  ;;  %v4816_v58 = vmul.f32 0.7978846, %v4752_v55  ;;  %v4818_v40 = vmul.f32 0.7978846, %v4754_v53  ;;  %v4627_v19 = vmul.f32 %v4563_v42, %v10663_v33 }
 0xa51   : > { %v4629_v38 = vmul.f32 %v4565_v43, %v10667_v37  ;;  %5465 = vmatmul.mubr.bf16.gmra.mrb[152].mxu0 %v5041_v47  ;;  %v4628_v41 = vmul.f32 %v4564_v26, %v10671_v34  ;;  %v4566_v35 = vmul.f32 %v10687_v7, %v10687_v7  ;;  %v4437_v44 = vadd.f32 %v10575_v32, %v10228_v46 }
 0xa52   : > { %v4567_v57 = vmul.f32 %v10691_v48, %v10691_v48  ;;  %v10702_v20 = vpop.eup %7811  ;;  %7815 = vtanh.f32 %v4816_v58  ;;  %v4691_v16 = vmul.f32 0.044715, %v4627_v19  ;;  %v4480_v27 = vmul.f32 0.5, %v10425_v13 }
 0xa53   : > { %11296 = vst [vmem:[#allocation25_spill] sm:$0xff] %v10702_v20  ;;  %v4693_v3 = vmul.f32 0.044715, %v4629_v38  ;;  %v10705_v31 = vpop.eup %7813  ;;  %7817 = vtanh.f32 %v4818_v40  ;;  %v4692_v8 = vmul.f32 0.044715, %v4628_v41  ;;  %v4630_v55 = vmul.f32 %v4566_v35, %v10687_v7 }
 0xa54   : > { %11297 = vst [vmem:[#allocation24_spill] sm:$0xff] %v10705_v31  ;;  %v4631_v53 = vmul.f32 %v4567_v57, %v10691_v48  ;;  %v4755_v42 = vadd.f32 %v4691_v16, %v10663_v33  ;;  %v10711_v32 = vmul.f32 0.5, %v4437_v44  ;;  %v4569_v47 = vmul.f32 %v4437_v44, %v4437_v44 }
 0xa55   : > { %v4757_v43 = vadd.f32 %v4693_v3, %v10667_v37  ;;  %v4756_v26 = vadd.f32 %v4692_v8, %v10671_v34  ;;  %v4694_v58 = vmul.f32 0.044715, %v4630_v55  ;;  %v4484_v13 = vmul.f32 0.5, %v10455_v52 }
 0xa56   : > { %v4695_v19 = vmul.f32 0.044715, %v4631_v53  ;;  %v4819_v38 = vmul.f32 0.7978846, %v4755_v42  ;;  %v4633_v41 = vmul.f32 %v4569_v47, %v4437_v44  ;;  %v4928_v35 = vadd.f32 1.0, %v10551_v56 }
 0xa57   : > { %v4821_v40 = vmul.f32 0.7978846, %v4757_v43  ;;  %v4820_v31 = vmul.f32 0.7978846, %v4756_v26  ;;  %v4758_v57 = vadd.f32 %v4694_v58, %v10687_v7  ;;  %v4932_v3 = vadd.f32 1.0, %v10589_v29 }
 0xa58   : > { %v4759_v16 = vadd.f32 %v4695_v19, %v10691_v48  ;;  %7819 = vtanh.f32 %v4819_v38  ;;  %v4697_v37 = vmul.f32 0.044715, %v4633_v41  ;;  %v4992_v20 = vmul.f32 %v4928_v35, %v4480_v27 }
 0xa59   : > { %v4482_v8 = vmul.f32 0.5, %v10428_v4  ;;  %7821 = vtanh.f32 %v4821_v40  ;;  %v4822_v55 = vmul.f32 0.7978846, %v4758_v57  ;;  %v4996_v53 = vmul.f32 %v4932_v3, %v4484_v13 }
 0xa5a   : > { %v4823_v52 = vmul.f32 0.7978846, %v4759_v16  ;;  %7823 = vtanh.f32 %v4820_v31  ;;  %v4761_v42 = vadd.f32 %v4697_v37, %v4437_v44  ;;  %v4486_v56 = vmul.f32 0.5, %v10459_v45  ;;  %v11298_v16 = vld [vmem:[#allocation37_spill] sm:$0xff] }
 0xa5b   : > { %v4930_v43 = vadd.f32 1.0, %v10555_v15  ;;  %7825 = vtanh.f32 %v4822_v55  ;;  %v5044_v47 = vpack.c.bf16 %v4996_v53, %v4992_v20  ;;  %v4934_v26 = vadd.f32 1.0, %v10598_v23 }
 0xa5c   : > { %v10725_v29 = vadd.f32 %v10579_v12, %v10230_v36  ;;  %v10727_v27 = vpop.eup %7815  ;;  %7827 = vtanh.f32 %v4823_v52  ;;  %v4825_v4 = vmul.f32 0.7978846, %v4761_v42  ;;  %v10731_v37 = vadd.f32 %v10581_v17, %v10232_v63  ;;  %v11301_v42 = vld [vmem:[#allocation20_spill] sm:$0xff] }
 0xa5d   : > { %v4994_v58 = vmul.f32 %v4930_v43, %v4482_v8  ;;  %v10733_v45 = vpop.eup %7817  ;;  %5375 = vmatprep.mubr.bf16.mxu1 %v5044_v47  ;;  %v4998_v15 = vmul.f32 %v4934_v26, %v4486_v56  ;;  %v4479_v44 = vmul.f32 0.5, %v10416_v50  ;;  %v4483_v12 = vmul.f32 0.5, %v10433_v28  ;;  %v11300_v8 = vld [vmem:[#allocation19_spill] sm:$0xff] }
 0xa5e   : > { %v4568_v23 = vmul.f32 %v10725_v29, %v10725_v29  ;;  %7829 = vtanh.f32 %v4825_v4  ;;  %v4570_v20 = vmul.f32 %v10731_v37, %v10731_v37  ;;  %v4927_v31 = vadd.f32 1.0, %v10531_v9  ;;  %v11299_v9 = vld [vmem:[#allocation35_spill] sm:$0xff] }
 0xa5f   : > { %v4931_v17 = vadd.f32 1.0, %v10559_v21  ;;  %v5046_v19 = vpack.c.bf16 %v4998_v15, %v4994_v58  ;;  %v4481_v38 = vmul.f32 0.5, %v10420_v24  ;;  %v4485_v40 = vmul.f32 0.5, %v10436_v62 }
 0xa60   : > { %v4632_v13 = vmul.f32 %v4568_v23, %v10725_v29  ;;  %v4634_v41 = vmul.f32 %v4570_v20, %v10731_v37  ;;  %v4991_v50 = vmul.f32 %v4927_v31, %v4479_v44  ;;  %v4929_v28 = vadd.f32 1.0, %v10543_v30 }
 0xa61   : > { %v4995_v35 = vmul.f32 %v4931_v17, %v4483_v12  ;;  %5472 = vmatprep.mubr.bf16.mxu0 %v5046_v19  ;;  %v4933_v3 = vadd.f32 1.0, %v11298_v16  ;;  %v10751_v21 = vadd.f32 %v11299_v9, %v10226_v22  ;;  %v4441_v55 = vadd.f32 %v11300_v8, %v10228_v46  ;;  %v11302_v12 = vld [vmem:[#allocation21_spill] sm:$0xff] }
 0xa62   : > { %v4696_v57 = vmul.f32 0.044715, %v4632_v13  ;;  %v10755_v24 = vpop.eup %7819  ;;  %v4698_v62 = vmul.f32 0.044715, %v4634_v41  ;;  %v4993_v53 = vmul.f32 %v4929_v28, %v4481_v38  ;;  %v10759_v56 = vadd.f32 %v11301_v42, %v10230_v36 }
 0xa63   : > { %v5043_v52 = vpack.c.bf16 %v4995_v35, %v4991_v50  ;;  %v10761_v30 = vpop.eup %7821  ;;  %v4997_v47 = vmul.f32 %v4933_v3, %v4485_v40  ;;  %v4571_v26 = vmul.f32 %v10751_v21, %v10751_v21  ;;  %v10766_v4 = vmul.f32 0.5, %v4441_v55 }
 0xa64   : > { %v4760_v43 = vadd.f32 %v4696_v57, %v10725_v29  ;;  %v10768_v58 = vpop.eup %7823  ;;  %v4762_v15 = vadd.f32 %v4698_v62, %v10731_v37  ;;  %v4573_v23 = vmul.f32 %v4441_v55, %v4441_v55  ;;  %v4572_v44 = vmul.f32 %v10759_v56, %v10759_v56 }
 0xa65   : > { %5376 = vmatmul.mubr.bf16.gmra.mrb[124].mxu1 %v5043_v52  ;;  %v10775_v20 = vadd.f32 %v11302_v12, %v10232_v63  ;;  %v10777_v31 = vpop.eup %7825  ;;  %v5045_v19 = vpack.c.bf16 %v4997_v47, %v4993_v53  ;;  %v4635_v13 = vmul.f32 %v4571_v26, %v10751_v21  ;;  %v10782_v38 = vadd.f32 %v10611_v6, %v10226_v22 }
 0xa66   : > { %v4824_v17 = vmul.f32 0.7978846, %v4760_v43  ;;  %v10784_v40 = vpop.eup %7827  ;;  %v4826_v41 = vmul.f32 0.7978846, %v4762_v15  ;;  %v4637_v50 = vmul.f32 %v4573_v23, %v4441_v55  ;;  %v4636_v35 = vmul.f32 %v4572_v44, %v10759_v56 }
 0xa67   : > { %v4574_v28 = vmul.f32 %v10775_v20, %v10775_v20  ;;  %5473 = vmatmul.mubr.bf16.gmra.mrb[156].mxu0 %v5045_v19  ;;  %v4699_v57 = vmul.f32 0.044715, %v4635_v13  ;;  %v4575_v16 = vmul.f32 %v10782_v38, %v10782_v38  ;;  %v10793_v3 = vadd.f32 %v10613_v2, %v10228_v46 }
 0xa68   : > { %7831 = vtanh.f32 %v4824_v17  ;;  %v7830_v6 = vpop.eup %7829  ;;  %v4701_v9 = vmul.f32 0.044715, %v4637_v50  ;;  %v4700_v8 = vmul.f32 0.044715, %v4636_v35  ;;  %v10803_v2 = vadd.f32 %v10625_v59, %v10230_v36 }
 0xa69   : > { %7833 = vtanh.f32 %v4826_v41  ;;  %v4638_v62 = vmul.f32 %v4574_v28, %v10775_v20  ;;  %v4953_v52 = vadd.f32 1.0, %v7830_v6  ;;  %v4763_v53 = vadd.f32 %v4699_v57, %v10751_v21 }
 0xa6a   : > { %v4639_v42 = vmul.f32 %v4575_v16, %v10782_v38  ;;  %v4577_v43 = vmul.f32 %v10793_v3, %v10793_v3  ;;  %v4765_v47 = vadd.f32 %v4701_v9, %v4441_v55  ;;  %v4764_v26 = vadd.f32 %v4700_v8, %v10759_v56 }
 0xa6b   : > { %v4702_v15 = vmul.f32 0.044715, %v4638_v62  ;;  %v10806_v23 = vmul.f32 %v4953_v52, %v10711_v32  ;;  %v4827_v44 = vmul.f32 0.7978846, %v4763_v53  ;;  %v4576_v55 = vmul.f32 %v10803_v2, %v10803_v2 }
 0xa6c   : > { %v4703_v12 = vmul.f32 0.044715, %v4639_v42  ;;  %v4641_v17 = vmul.f32 %v4577_v43, %v10793_v3  ;;  %v4829_v19 = vmul.f32 0.7978846, %v4765_v47  ;;  %v4828_v13 = vmul.f32 0.7978846, %v4764_v26 }
 0xa6d   : > { %v4766_v41 = vadd.f32 %v4702_v15, %v10775_v20  ;;  %7835 = vtanh.f32 %v4827_v44  ;;  %v10815_v59 = vadd.f32 %v10627_v61, %v10232_v63  ;;  %v4640_v28 = vmul.f32 %v4576_v55, %v10803_v2 }
 0xa6e   : > { %v4767_v50 = vadd.f32 %v4703_v12, %v10782_v38  ;;  %v4705_v35 = vmul.f32 0.044715, %v4641_v17  ;;  %7837 = vtanh.f32 %v4829_v19  ;;  %v10820_v57 = vadd.f32 %v10632_v49, %v10226_v22 }
 0xa6f   : > { %v4830_v32 = vmul.f32 0.7978846, %v4766_v41  ;;  %7839 = vtanh.f32 %v4828_v13  ;;  %v4578_v9 = vmul.f32 %v10815_v59, %v10815_v59  ;;  %v4704_v8 = vmul.f32 0.044715, %v4640_v28 }
 0xa70   : > { %v4831_v16 = vmul.f32 0.7978846, %v4767_v50  ;;  %v4769_v6 = vadd.f32 %v4705_v35, %v10793_v3  ;;  %v4579_v61 = vmul.f32 %v10820_v57, %v10820_v57  ;;  %v10829_v62 = vadd.f32 %v10634_v18, %v10228_v46 }
 0xa71   : > { %7841 = vtanh.f32 %v4830_v32  ;;  %v4642_v49 = vmul.f32 %v4578_v9, %v10815_v59  ;;  %v10836_v53 = vadd.f32 %v10643_v14, %v10230_v36  ;;  %v4768_v43 = vadd.f32 %v4704_v8, %v10803_v2  ;;  %v11303_v36 = vld [vmem:[#allocation45_spill] sm:$0xff] }
 0xa72   : > { %v10831_v52 = vpop.eup %7831  ;;  %7843 = vtanh.f32 %v4831_v16  ;;  %v4833_v22 = vmul.f32 0.7978846, %v4769_v6  ;;  %v4643_v47 = vmul.f32 %v4579_v61, %v10820_v57  ;;  %v4581_v46 = vmul.f32 %v10829_v62, %v10829_v62 }
 0xa73   : > { %v10838_v42 = vpop.eup %7833  ;;  %v10846_v18 = vadd.f32 %v10645_v39, %v10232_v63  ;;  %v4706_v26 = vmul.f32 0.044715, %v4642_v49  ;;  %v4580_v15 = vmul.f32 %v10836_v53, %v10836_v53  ;;  %v4488_v14 = vmul.f32 0.5, %v11303_v36  ;;  %v11304_v63 = vld [vmem:[#allocation57_spill] sm:$0xff] }
 0xa74   : > { %7845 = vtanh.f32 %v4833_v22  ;;  %v4832_v44 = vmul.f32 0.7978846, %v4768_v43  ;;  %v4707_v12 = vmul.f32 0.044715, %v4643_v47  ;;  %v4645_v17 = vmul.f32 %v4581_v46, %v10829_v62  ;;  %v11305_v47 = vld [vmem:[#allocation58_spill] sm:$0xff] }
 0xa75   : > { %v4582_v19 = vmul.f32 %v10846_v18, %v10846_v18  ;;  %v4770_v13 = vadd.f32 %v4706_v26, %v10815_v59  ;;  %v4644_v41 = vmul.f32 %v4580_v15, %v10836_v53  ;;  %v4492_v39 = vmul.f32 0.5, %v11304_v63 }
 0xa76   : > { %v4936_v55 = vadd.f32 1.0, %v10636_v25  ;;  %7847 = vtanh.f32 %v4832_v44  ;;  %v4771_v50 = vadd.f32 %v4707_v12, %v10820_v57  ;;  %v4709_v35 = vmul.f32 0.044715, %v4645_v17 }
 0xa77   : > { %v4646_v32 = vmul.f32 %v4582_v19, %v10846_v18  ;;  %v10860_v28 = vpop.eup %7835  ;;  %v4834_v16 = vmul.f32 0.7978846, %v4770_v13  ;;  %v4708_v6 = vmul.f32 0.044715, %v4644_v41  ;;  %v4940_v9 = vadd.f32 1.0, %v10673_v54 }
 0xa78   : > { %v5000_v8 = vmul.f32 %v4936_v55, %v4488_v14  ;;  %v7838_v61 = vpop.eup %7837  ;;  %v4835_v22 = vmul.f32 0.7978846, %v4771_v50  ;;  %v4773_v49 = vadd.f32 %v4709_v35, %v10829_v62  ;;  %v4490_v25 = vmul.f32 0.5, %v11305_v47  ;;  %v11306_v14 = vld [vmem:[#allocation56_spill] sm:$0xff]  ;;  %v11310_v47 = vld [vmem:[#allocation61_spill] sm:$0xff] }
 0xa79   : > { %v4710_v43 = vmul.f32 0.044715, %v4646_v32  ;;  %v10865_v46 = vpop.eup %7839  ;;  %v4957_v26 = vadd.f32 1.0, %v7838_v61  ;;  %7849 = vtanh.f32 %v4834_v16  ;;  %v4772_v15 = vadd.f32 %v4708_v6, %v10836_v53  ;;  %v11307_v35 = vld [vmem:[#allocation44_spill] sm:$0xff] }
 0xa7a   : > { %v5004_v36 = vmul.f32 %v4940_v9, %v4492_v39  ;;  %7851 = vtanh.f32 %v4835_v22  ;;  %v4837_v12 = vmul.f32 0.7978846, %v4773_v49  ;;  %v4494_v17 = vmul.f32 0.5, %v11306_v14  ;;  %v11308_v9 = vld [vmem:[#allocation62_spill] sm:$0xff] }
 0xa7b   : > { %v10868_v44 = vpop.eup %7841  ;;  %v4774_v54 = vadd.f32 %v4710_v43, %v10846_v18  ;;  %v10875_v13 = vmul.f32 %v4957_v26, %v10766_v4  ;;  %v4836_v41 = vmul.f32 0.7978846, %v4772_v15  ;;  %v4938_v55 = vadd.f32 1.0, %v10647_v1  ;;  %v11309_v1 = vld [vmem:[#allocation59_spill] sm:$0xff]  ;;  %v11311_v15 = vld [vmem:[#allocation22_spill] sm:$0xff] }
 0xa7c   : > { %v10872_v19 = vpop.eup %7843  ;;  %v5048_v63 = vpack.c.bf16 %v5004_v36, %v5000_v8  ;;  %7853 = vtanh.f32 %v4837_v12  ;;  %v4942_v39 = vadd.f32 1.0, %v10681_v60  ;;  %v4487_v32 = vmul.f32 0.5, %v11307_v35 }
 0xa7d   : > { %v4838_v50 = vmul.f32 0.7978846, %v4774_v54  ;;  %7855 = vtanh.f32 %v4836_v41  ;;  %v5002_v6 = vmul.f32 %v4938_v55, %v4490_v25  ;;  %v4491_v61 = vmul.f32 0.5, %v11308_v9 }
 0xa7e   : > { %v10880_v16 = vpop.eup %7845  ;;  %5383 = vmatprep.mubr.bf16.mxu1 %v5048_v63  ;;  %v4935_v4 = vadd.f32 1.0, %v10615_v10  ;;  %v5006_v22 = vmul.f32 %v4942_v39, %v4494_v17  ;;  %v4939_v8 = vadd.f32 1.0, %v10651_v0  ;;  %v4489_v49 = vmul.f32 0.5, %v11309_v1  ;;  %v11314_v1 = vld [vmem:[#allocation46_spill] sm:$0xff] }
 0xa7f   : > { %7857 = vtanh.f32 %v4838_v50  ;;  %v4493_v60 = vmul.f32 0.5, %v11310_v47  ;;  %v4937_v26 = vadd.f32 1.0, %v10629_v11  ;;  %v4941_v36 = vadd.f32 1.0, %v11311_v15 }
 0xa80   : > { %v4999_v43 = vmul.f32 %v4935_v4, %v4487_v32  ;;  %v7848_v12 = vpop.eup %7847  ;;  %v5050_v54 = vpack.c.bf16 %v5006_v22, %v5002_v6  ;;  %v5003_v25 = vmul.f32 %v4939_v8, %v4491_v61  ;;  %v4496_v14 = vmul.f32 0.5, %v10619_v5  ;;  %v11312_v61 = vld [vmem:[#allocation53_spill] sm:$0xff] }
 0xa81   : > { %v4500_v10 = vmul.f32 0.5, %v10671_v34  ;;  %v5001_v41 = vmul.f32 %v4937_v26, %v4489_v49  ;;  %v5005_v17 = vmul.f32 %v4941_v36, %v4493_v60  ;;  %v4944_v0 = vadd.f32 1.0, %v10727_v27  ;;  %v11313_v22 = vld [vmem:[#allocation25_spill] sm:$0xff]  ;;  %v11315_v60 = vld [vmem:[#allocation23_spill] sm:$0xff]  ;;  %v11316_v26 = vld [vmem:[#allocation24_spill] sm:$0xff] }
 0xa82   : > { %v4948_v63 = vadd.f32 1.0, %v10768_v58  ;;  %5480 = vmatprep.mubr.bf16.mxu0 %v5050_v54  ;;  %v5047_v55 = vpack.c.bf16 %v5003_v25, %v4999_v43  ;;  %v4498_v50 = vmul.f32 0.5, %v10623_v51  ;;  %v4502_v11 = vmul.f32 0.5, %v10687_v7 }
 0xa83   : > { %v4946_v39 = vadd.f32 1.0, %v10733_v45  ;;  %v10896_v35 = vpop.eup %7849  ;;  %v5049_v32 = vpack.c.bf16 %v5005_v17, %v5001_v41  ;;  %v5008_v5 = vmul.f32 %v4944_v0, %v4496_v14  ;;  %v4950_v34 = vadd.f32 1.0, %v10777_v31 }
 0xa84   : > { %v5012_v6 = vmul.f32 %v4948_v63, %v4500_v10  ;;  %v7852_v9 = vpop.eup %7851  ;;  %5384 = vmatmul.mubr.bf16.gmra.mrb[128].mxu1 %v5047_v55  ;;  %v4495_v58 = vmul.f32 0.5, %v11312_v61  ;;  %v4499_v4 = vmul.f32 0.5, %v10663_v33  ;;  %v4943_v51 = vadd.f32 1.0, %v11313_v22 }
 0xa85   : > { %v5010_v27 = vmul.f32 %v4946_v39, %v4498_v50  ;;  %5481 = vmatmul.mubr.bf16.gmra.mrb[160].mxu0 %v5049_v32  ;;  %v5014_v8 = vmul.f32 %v4950_v34, %v4502_v11  ;;  %v4947_v45 = vadd.f32 1.0, %v10755_v24  ;;  %v4497_v49 = vmul.f32 0.5, %v11314_v1 }
 0xa86   : > { %v5052_v7 = vpack.c.bf16 %v5012_v6, %v5008_v5  ;;  %v7854_v43 = vpop.eup %7853  ;;  %v5007_v47 = vmul.f32 %v4943_v51, %v4495_v58  ;;  %v4501_v31 = vmul.f32 0.5, %v11315_v60  ;;  %v4945_v15 = vadd.f32 1.0, %v11316_v26 }
 0xa87   : > { %v4949_v36 = vadd.f32 1.0, %v10761_v30  ;;  %v7856_v54 = vpop.eup %7855  ;;  %v5054_v33 = vpack.c.bf16 %v5014_v8, %v5010_v27  ;;  %v5011_v25 = vmul.f32 %v4947_v45, %v4499_v4  ;;  %v4504_v14 = vmul.f32 0.5, %v10725_v29 }
 0xa88   : > { %5391 = vmatprep.mubr.bf16.mxu1 %v5052_v7  ;;  %v4508_v10 = vmul.f32 0.5, %v10759_v56  ;;  %v5009_v24 = vmul.f32 %v4945_v15, %v4497_v49  ;;  %v4952_v0 = vadd.f32 1.0, %v10831_v52  ;;  %v4956_v63 = vadd.f32 1.0, %v10865_v46 }
 0xa89   : > { %v7858_v41 = vpop.eup %7857  ;;  %v5013_v17 = vmul.f32 %v4949_v36, %v4501_v31  ;;  %5488 = vmatprep.mubr.bf16.mxu0 %v5054_v33  ;;  %v5051_v55 = vpack.c.bf16 %v5011_v25, %v5007_v47  ;;  %v4503_v50 = vmul.f32 0.5, %v10691_v48  ;;  %v4507_v30 = vmul.f32 0.5, %v10751_v21 }
 0xa8a   : > { %v4951_v11 = vadd.f32 1.0, %v10784_v40  ;;  %v5016_v32 = vmul.f32 %v4952_v0, %v4504_v14  ;;  %v5020_v29 = vmul.f32 %v4956_v63, %v4508_v10  ;;  %v4955_v56 = vadd.f32 1.0, %v10860_v28 }
 0xa8b   : > { %v5053_v39 = vpack.c.bf16 %v5013_v17, %v5009_v24  ;;  %v4512_v6 = vmul.f32 0.5, %v10803_v2  ;;  %v4516_v52 = vmul.f32 0.5, %v10836_v53  ;;  %v4960_v34 = vadd.f32 1.0, %v7848_v12  ;;  %v11317_v17 = vld [vmem:[#allocation42_spill] sm:$0xff] }
 0xa8c   : > { %v5015_v5 = vmul.f32 %v4951_v11, %v4503_v50  ;;  %5392 = vmatmul.mubr.bf16.gmra.mrb[132].mxu1 %v5051_v55  ;;  %v5056_v46 = vpack.c.bf16 %v5020_v29, %v5016_v32  ;;  %v5019_v27 = vmul.f32 %v4955_v56, %v4507_v30  ;;  %v4964_v61 = vadd.f32 1.0, %v7856_v54  ;;  %v10936_v55 = vld [vmem:[%s11318_s30] ss:$0 sm:$0xff]  ;;  %v11319_v50 = vld [vmem:[#allocation40_spill] sm:$0xff] }
 0xa8d   : > { %v4511_v48 = vmul.f32 0.5, %v10782_v38  ;;  %5489 = vmatmul.mubr.bf16.gmra.mrb[164].mxu0 %v5053_v39  ;;  %v5024_v21 = vmul.f32 %v4960_v34, %v4512_v6  ;;  %v4515_v40 = vmul.f32 0.5, %v10820_v57  ;;  %v4959_v58 = vadd.f32 1.0, %v10872_v19 }
 0xa8e   : > { %v4963_v4 = vadd.f32 1.0, %v7852_v9  ;;  %5399 = vmatprep.mubr.bf16.mxu1 %v5056_v46  ;;  %v5055_v28 = vpack.c.bf16 %v5019_v27, %v5015_v5  ;;  %v5028_v22 = vmul.f32 %v4964_v61, %v4516_v52  ;;  %v4506_v2 = vmul.f32 0.5, %v10731_v37 }
 0xa8f   : > { %v4510_v53 = vmul.f32 0.5, %v10775_v20  ;;  %v5023_v12 = vmul.f32 %v4959_v58, %v4511_v48  ;;  %v4954_v7 = vadd.f32 1.0, %v10838_v42  ;;  %v4958_v38 = vadd.f32 1.0, %v10868_v44 }
 0xa90   : > { %v5027_v51 = vmul.f32 %v4963_v4, %v4515_v40  ;;  %v5060_v8 = vpack.c.bf16 %v5028_v22, %v5024_v21  ;;  %v5057_v57 = vpack.c.bf16 %v10875_v13, %v10806_v23  ;;  %v4962_v1 = vadd.f32 1.0, %v10896_v35  ;;  %v11320_v4 = vld [vmem:[#allocation49_spill] sm:$0xff] }
 0xa91   : > { %v5018_v19 = vmul.f32 %v4954_v7, %v4506_v2  ;;  %v5022_v9 = vmul.f32 %v4958_v38, %v4510_v53  ;;  %v4514_v49 = vmul.f32 0.5, %v10815_v59  ;;  %v4518_v37 = vmul.f32 0.5, %v10846_v18  ;;  %v11321_v2 = vld [vmem:[#allocation38_spill] sm:$0xff] }
 0xa92   : > { %v5059_v45 = vpack.c.bf16 %v5027_v51, %v5023_v12  ;;  %v4966_v20 = vadd.f32 1.0, %v7858_v41  ;;  %v4961_v47 = vadd.f32 1.0, %v10880_v16  ;;  %v4513_v42 = vmul.f32 0.5, %v10793_v3 }
 0xa93   : > { %v5058_v60 = vpack.c.bf16 %v5022_v9, %v5018_v19  ;;  %v4517_v44 = vmul.f32 0.5, %v10829_v62  ;;  %v4965_v31 = vadd.f32 1.0, %v7854_v43  ;;  %v5026_v23 = vmul.f32 %v4962_v1, %v4514_v49 }
 0xa94   : > { %5400 = vmatmul.mubr.bf16.gmra.mrb[136].mxu1 %v5055_v28  ;;  %v5030_v13 = vmul.f32 %v4966_v20, %v4518_v37  ;;  %v5025_v26 = vmul.f32 %v4961_v47, %v4513_v42 }
 0xa95   : > { %5407 = vmatprep.mubr.bf16.mxu1 %v5060_v8  ;;  %v5029_v15 = vmul.f32 %v4965_v31, %v4517_v44  ;;  %v11322_v44 = vld [vmem:[#allocation50_spill] sm:$0xff] }
 0xa96   : > { %v5062_v35 = vpack.c.bf16 %v5030_v13, %v5026_v23  ;;  %v11323_v13 = vld [vmem:[#allocation39_spill] sm:$0xff] }
 0xa97   : > { %v5061_v36 = vpack.c.bf16 %v5029_v15, %v5025_v26 }
 0xa9c   : > { %5408 = vmatmul.mubr.bf16.gmra.mrb[140].mxu1 %v5059_v45 }
 0xa9d   : > { %5496 = vmatprep.mubr.bf16.mxu1 %v5058_v60 }
 0xaa4   : > { %5497 = vmatmul.mubr.bf16.vlgmr.msra.gmra.mrb[144].mxu1 %v5057_v57 }
 0xaa5   : > { %5504 = vmatprep.mubr.bf16.mxu1 %v5062_v35 }
 0xaac   : > { %5505 = vmatmul.mubr.bf16.gmra.mrb[148].mxu1 %v5061_v36 }
 0xad9   : > { %v6221_v59 = vpop.f32.mrb[112].mxu1 }
 0xada   : > { %v6285_v18 = vpop.f32.mrb[144].mxu0  ;;  %v6222_v16 = vpop.f32.mrb[113].mxu1 }
 0xadb   : > { %v6223_v3 = vadd.f32 %v6222_v16, %v6221_v59  ;;  %v6286_v54 = vpop.f32.mrb[145].mxu0  ;;  %v6224_v62 = vpop.f32.mrb[114].mxu1 }
 0xadc   : > { %v6287_v43 = vadd.f32 %v6286_v54, %v6285_v18  ;;  %v6288_v33 = vpop.f32.mrb[146].mxu0  ;;  %v6225_v25 = vpop.f32.mrb[115].mxu1 }
 0xadd   : > { %v6226_v14 = vadd.f32 %v6225_v25, %v6224_v62  ;;  %v6289_v10 = vpop.f32.mrb[147].mxu0 }
 0xade   : > { %v5451_v41 = vadd.f32 %v6287_v43, %v6223_v3  ;;  %v6290_v24 = vadd.f32 %v6289_v10, %v6288_v33 }
 0xae0   : > { %v5513_v0 = vadd.f32 %v5451_v41, %v11317_v17  ;;  %v5454_v63 = vadd.f32 %v6290_v24, %v6226_v14  ;;  %v11324_v17 = vld [vmem:[#allocation51_spill] sm:$0xff] }
 0xae2   : > { %v5514_v30 = vadd.f32 %v5454_v63, %v11319_v50  ;;  %v5536_v11 = vadd.f32 %v10936_v55, %v5513_v0  ;;  %v11325_v50 = vld [vmem:[#allocation36_spill] sm:$0xff] }
 0xae4   : > { %v5537_v39 = vadd.f32 %v10936_v55, %v5514_v30 }
 0xae6   : > { %v5994_v32 = vpack.c.bf16 %v5537_v39, %v5536_v11 }
 0xae7   : > { %v6227_v29 = vpop.f32.mrb[116].mxu1 }
 0xae8   : > { %5995 = vst [vmem:[%s10943_s20] sm:$0xff] %v5994_v32   ;;  %v6228_v56 = vpop.f32.mrb[117].mxu1 }
 0xae9   : > { %v6229_v5 = vadd.f32 %v6228_v56, %v6227_v29  ;;  %v6230_v6 = vpop.f32.mrb[118].mxu1 }
 0xaea   : > { %v6291_v52 = vpop.f32.mrb[148].mxu0  ;;  %v6231_v34 = vpop.f32.mrb[119].mxu1 }
 0xaeb   : > { %v6292_v46 = vpop.f32.mrb[149].mxu0  ;;  %v6232_v27 = vadd.f32 %v6231_v34, %v6230_v6 }
 0xaec   : > { %v6293_v61 = vadd.f32 %v6292_v46, %v6291_v52  ;;  %v6294_v48 = vpop.f32.mrb[150].mxu0 }
 0xaed   : > { %v6295_v21 = vpop.f32.mrb[151].mxu0 }
 0xaee   : > { %v5459_v40 = vadd.f32 %v6293_v61, %v6229_v5  ;;  %v6296_v58 = vadd.f32 %v6295_v21, %v6294_v48 }
 0xaf0   : > { %v5515_v28 = vadd.f32 %v5459_v40, %v11320_v4  ;;  %v5462_v22 = vadd.f32 %v6296_v58, %v6232_v27  ;;  %v11326_v4 = vld [vmem:[#allocation47_spill] sm:$0xff] }
 0xaf2   : > { %v5516_v53 = vadd.f32 %v5462_v22, %v11321_v2  ;;  %v5538_v12 = vadd.f32 %v10936_v55, %v5515_v28 }
 0xaf4   : > { %v5539_v51 = vadd.f32 %v10936_v55, %v5516_v53  ;;  %v11327_v53 = vld [vmem:[#allocation41_spill] sm:$0xff] }
 0xaf6   : > { %v5999_v7 = vpack.c.bf16 %v5539_v51, %v5538_v12 }
 0xaf8   : > { %6038 = vst [vmem:[%s10943_s20 + $0x8] sm:$0xff] %v5999_v7  }
 0xb23   : > { %v6233_v38 = vpop.f32.mrb[120].mxu1 }
 0xb24   : > { %v6234_v8 = vpop.f32.mrb[121].mxu1  ;;  %v6297_v57 = vpop.f32.mrb[152].mxu0 }
 0xb25   : > { %v6235_v45 = vadd.f32 %v6234_v8, %v6233_v38  ;;  %v6236_v19 = vpop.f32.mrb[122].mxu1  ;;  %v6298_v9 = vpop.f32.mrb[153].mxu0 }
 0xb26   : > { %v6237_v1 = vpop.f32.mrb[123].mxu1  ;;  %v6299_v49 = vadd.f32 %v6298_v9, %v6297_v57  ;;  %v6300_v37 = vpop.f32.mrb[154].mxu0 }
 0xb27   : > { %v6238_v20 = vadd.f32 %v6237_v1, %v6236_v19  ;;  %v6301_v47 = vpop.f32.mrb[155].mxu0 }
 0xb28   : > { %v5467_v60 = vadd.f32 %v6299_v49, %v6235_v45  ;;  %v6302_v42 = vadd.f32 %v6301_v47, %v6300_v37 }
 0xb2a   : > { %v5517_v31 = vadd.f32 %v5467_v60, %v11322_v44  ;;  %v5470_v23 = vadd.f32 %v6302_v42, %v6238_v20  ;;  %v11328_v44 = vld [vmem:[#allocation48_spill] sm:$0xff] }
 0xb2c   : > { %v5518_v26 = vadd.f32 %v5470_v23, %v11323_v13  ;;  %v5540_v15 = vadd.f32 %v10936_v55, %v5517_v31 }
 0xb2e   : > { %v5541_v35 = vadd.f32 %v10936_v55, %v5518_v26  ;;  %v11329_v26 = vld [vmem:[#allocation55_spill] sm:$0xff] }
 0xb30   : > { %v6004_v36 = vpack.c.bf16 %v5541_v35, %v5540_v15 }
 0xb32   : > { %6039 = vst [vmem:[%s10943_s20 + $0x10] sm:$0xff] %v6004_v36  }
 0xb38   : > { %v6239_v59 = vpop.f32.mrb[124].mxu1 }
 0xb39   : > { %v6240_v18 = vpop.f32.mrb[125].mxu1 }
 0xb3a   : > { %v6241_v16 = vadd.f32 %v6240_v18, %v6239_v59  ;;  %v6242_v3 = vpop.f32.mrb[126].mxu1  ;;  %v6303_v54 = vpop.f32.mrb[156].mxu0 }
 0xb3b   : > { %v6243_v62 = vpop.f32.mrb[127].mxu1  ;;  %v6304_v43 = vpop.f32.mrb[157].mxu0 }
 0xb3c   : > { %v6244_v33 = vadd.f32 %v6243_v62, %v6242_v3  ;;  %v6305_v25 = vadd.f32 %v6304_v43, %v6303_v54  ;;  %v6306_v14 = vpop.f32.mrb[158].mxu0 }
 0xb3d   : > { %v6307_v10 = vpop.f32.mrb[159].mxu0 }
 0xb3e   : > { %v5475_v41 = vadd.f32 %v6305_v25, %v6241_v16  ;;  %v6308_v24 = vadd.f32 %v6307_v10, %v6306_v14 }
 0xb40   : > { %v5519_v0 = vadd.f32 %v5475_v41, %v11324_v17  ;;  %v5478_v63 = vadd.f32 %v6308_v24, %v6244_v33 }
 0xb42   : > { %v5520_v30 = vadd.f32 %v5478_v63, %v11325_v50  ;;  %v5542_v11 = vadd.f32 %v10936_v55, %v5519_v0 }
 0xb44   : > { %v5543_v39 = vadd.f32 %v10936_v55, %v5520_v30 }
 0xb46   : > { %v6009_v32 = vpack.c.bf16 %v5543_v39, %v5542_v11  ;;  %v11330_v39 = vld [vmem:[#allocation52_spill] sm:$0xff] }
 0xb48   : > { %6040 = vst [vmem:[%s10943_s20 + $0x18] sm:$0xff] %v6009_v32  }
 0xb57   : > { %v6245_v29 = vpop.f32.mrb[128].mxu1 }
 0xb58   : > { %v6309_v56 = vpop.f32.mrb[160].mxu0  ;;  %v6246_v5 = vpop.f32.mrb[129].mxu1 }
 0xb59   : > { %v6247_v6 = vadd.f32 %v6246_v5, %v6245_v29  ;;  %v6310_v52 = vpop.f32.mrb[161].mxu0  ;;  %v6248_v34 = vpop.f32.mrb[130].mxu1 }
 0xb5a   : > { %v6311_v46 = vadd.f32 %v6310_v52, %v6309_v56  ;;  %v6312_v27 = vpop.f32.mrb[162].mxu0  ;;  %v6249_v61 = vpop.f32.mrb[131].mxu1  ;;  %v11331_v56 = vld [vmem:[#allocation54_spill] sm:$0xff] }
 0xb5b   : > { %v6250_v48 = vadd.f32 %v6249_v61, %v6248_v34  ;;  %v6313_v21 = vpop.f32.mrb[163].mxu0 }
 0xb5c   : > { %v5483_v40 = vadd.f32 %v6311_v46, %v6247_v6  ;;  %v6314_v58 = vadd.f32 %v6313_v21, %v6312_v27 }
 0xb5e   : > { %v5521_v28 = vadd.f32 %v5483_v40, %v11326_v4  ;;  %v5486_v22 = vadd.f32 %v6314_v58, %v6250_v48  ;;  %v11332_v4 = vld [vmem:[#allocation43_spill] sm:$0xff] }
 0xb5f   : > { %v6251_v2 = vpop.f32.mrb[132].mxu1 }
 0xb60   : > { %v5522_v12 = vadd.f32 %v5486_v22, %v11327_v53  ;;  %v6315_v51 = vpop.f32.mrb[164].mxu0  ;;  %v6252_v7 = vpop.f32.mrb[133].mxu1  ;;  %v5544_v45 = vadd.f32 %v10936_v55, %v5521_v28 }
 0xb61   : > { %v6253_v38 = vadd.f32 %v6252_v7, %v6251_v2  ;;  %v6316_v8 = vpop.f32.mrb[165].mxu0  ;;  %v6254_v57 = vpop.f32.mrb[134].mxu1  ;;  %v11333_v2 = vld [vmem:[#allocation60_spill] sm:$0xff] }
 0xb62   : > { %v5545_v19 = vadd.f32 %v10936_v55, %v5522_v12  ;;  %v6317_v9 = vadd.f32 %v6316_v8, %v6315_v51  ;;  %v6318_v1 = vpop.f32.mrb[166].mxu0  ;;  %v6255_v49 = vpop.f32.mrb[135].mxu1 }
 0xb63   : > { %v6256_v37 = vadd.f32 %v6255_v49, %v6254_v57  ;;  %v6319_v20 = vpop.f32.mrb[167].mxu0 }
 0xb64   : > { %v6014_v47 = vpack.c.bf16 %v5545_v19, %v5544_v45  ;;  %v5491_v60 = vadd.f32 %v6317_v9, %v6253_v38  ;;  %v6320_v42 = vadd.f32 %v6319_v20, %v6318_v1 }
 0xb66   : > { %6041 = vst [vmem:[%s10943_s20 + $0x20] sm:$0xff] %v6014_v47   ;;  %v5523_v31 = vadd.f32 %v5491_v60, %v11328_v44  ;;  %v5494_v23 = vadd.f32 %v6320_v42, %v6256_v37 }
 0xb67   : > { %v6257_v13 = vpop.f32.mrb[136].mxu1 }
 0xb68   : > { %v5524_v15 = vadd.f32 %v5494_v23, %v11329_v26  ;;  %v6258_v35 = vpop.f32.mrb[137].mxu1  ;;  %v5546_v18 = vadd.f32 %v10936_v55, %v5523_v31 }
 0xb69   : > { %v6259_v36 = vadd.f32 %v6258_v35, %v6257_v13  ;;  %v6260_v59 = vpop.f32.mrb[138].mxu1 }
 0xb6a   : > { %v5547_v16 = vadd.f32 %v10936_v55, %v5524_v15  ;;  %v6261_v3 = vpop.f32.mrb[139].mxu1 }
 0xb6b   : > { %v6262_v54 = vadd.f32 %v6261_v3, %v6260_v59 }
 0xb6c   : > { %v6019_v62 = vpack.c.bf16 %v5547_v16, %v5546_v18 }
 0xb6e   : > { %6042 = vst [vmem:[%s10943_s20 + $0x28] sm:$0xff] %v6019_v62  }
 0xb6f   : > { %v6263_v43 = vpop.f32.mrb[140].mxu1 }
 0xb70   : > { %v6264_v33 = vpop.f32.mrb[141].mxu1 }
 0xb71   : > { %v6265_v25 = vadd.f32 %v6264_v33, %v6263_v43  ;;  %v6266_v14 = vpop.f32.mrb[142].mxu1 }
 0xb72   : > { %v6267_v10 = vpop.f32.mrb[143].mxu1 }
 0xb73   : > { %v6268_v41 = vadd.f32 %v6267_v10, %v6266_v14 }
 0xb77   : > { %v6321_v24 = vpop.f32.mrb[144].mxu1 }
 0xb78   : > { %v6322_v17 = vpop.f32.mrb[145].mxu1 }
 0xb79   : > { %v6323_v0 = vadd.f32 %v6322_v17, %v6321_v24  ;;  %v6324_v63 = vpop.f32.mrb[146].mxu1 }
 0xb7a   : > { %v6325_v50 = vpop.f32.mrb[147].mxu1 }
 0xb7b   : > { %v5499_v30 = vadd.f32 %v6323_v0, %v6259_v36  ;;  %v6326_v11 = vadd.f32 %v6325_v50, %v6324_v63 }
 0xb7d   : > { %v5525_v32 = vadd.f32 %v5499_v30, %v11330_v39  ;;  %v5502_v29 = vadd.f32 %v6326_v11, %v6262_v54 }
 0xb7f   : > { %v5526_v5 = vadd.f32 %v5502_v29, %v11331_v56  ;;  %v6327_v6 = vpop.f32.mrb[148].mxu1  ;;  %v5548_v34 = vadd.f32 %v10936_v55, %v5525_v32 }
 0xb80   : > { %v6328_v52 = vpop.f32.mrb[149].mxu1 }
 0xb81   : > { %v5549_v46 = vadd.f32 %v10936_v55, %v5526_v5  ;;  %v6329_v27 = vadd.f32 %v6328_v52, %v6327_v6  ;;  %v6330_v61 = vpop.f32.mrb[150].mxu1 }
 0xb82   : > { %v6331_v48 = vpop.f32.mrb[151].mxu1 }
 0xb83   : > { %v6024_v21 = vpack.c.bf16 %v5549_v46, %v5548_v34  ;;  %v5507_v40 = vadd.f32 %v6329_v27, %v6265_v25  ;;  %v6332_v58 = vadd.f32 %v6331_v48, %v6330_v61 }
 0xb85   : > { %6043 = vst [vmem:[%s10943_s20 + $0x30] sm:$0xff] %v6024_v21   ;;  %v5527_v28 = vadd.f32 %v5507_v40, %v11332_v4  ;;  %v5510_v22 = vadd.f32 %v6332_v58, %v6268_v41 }
 0xb87   : > { %v5528_v53 = vadd.f32 %v5510_v22, %v11333_v2  ;;  %v5550_v12 = vadd.f32 %v10936_v55, %v5527_v28 }
 0xb89   : > { %v5551_v51 = vadd.f32 %v10936_v55, %v5528_v53 }
 0xb8b   : > { %v6029_v7 = vpack.c.bf16 %v5551_v51, %v5550_v12 }
 0xb8d   : > { %6044 = vst [vmem:[%s10943_s20 + $0x38] sm:$0xff] %v6029_v7  }
 0xb8e   : > { %8042 = shalt.err (!%p8039_p8)
}
 0xb8f   : > { %s8043_s19 = scalar_lea.hbm %s10985_s15, 1024  ;;  %s8047_s23 = scalar_lea.hbm %s11334_s1, 2048 }
 0xb90   : > { %p8044_p6 = scmp.ne.s32.totalorder %s10985_s15, %s8043_s19  ;;  %p8048_p3 = scmp.lt.u32.totalorder %s10985_s15, %s11334_s1 }
 0xb91   : > { %p8049_p0 = scmp.lt.u32.totalorder %s8047_s23, %s8043_s19  ;;  %p8051_p2 = scmp.lt.u32.totalorder %s8043_s19, %s10985_s15 }
 0xb92   : > { %p8045_p9 = pnand %p8044_p6, %p11335_p7 }
 0xb93   : > { %p8050_p5 = por %p8049_p0, %p8048_p3 }
 0xb94   : > { %p8046_p4 = pneg %p8045_p9 }
 0xb95   : > { %p8052_p10 = por %p8051_p2, %p8050_p5 }
 0xb97   : > { %p8053_p1 = pnand %p8052_p10, %p8046_p4 }
 0xb99   : > { %8056 = shalt.err (!%p8053_p1)
}
 0xb9a   : > { %s8128_s10 = smov 4  }
 0xb9b   : > { %6723 = dma.vmem_to_hbm [thread:$0]  (%p11335_p7), %s10987_s8, 1024, %s10985_s15, %s5633_s17, %s8125_s7, %s8125_s7, %s8128_s10  }
 0xb9c PF: > { %s5661_s14 = sand.u32 1, %s8095_s25   ;;  %p11336_p11 = scmp.ne.s32.totalorder %s11147_s21, 0 }
 0xb9d   : > { %p11337_p12 = scmp.ge.s32.totalorder %s8107_s28, 2  ;;  %s5662_s29 = scalar_lea.sflag [#allocation4], %s5661_s14 }
 0xb9f   : > { %p6746_p13 = pnand %p11337_p12, %p11336_p11 }
 0xba1   : > { %8090 = dma.done.wait (!%p6746_p13), %s5662_s29, 1024  }
 0xba2   : > { %8092 = vsyncadd (!%p6746_p13), %s5662_s29, 4294966272  ;;  %p29_p8 = scmp.ge.s32.totalorder %s8359_s16, 4   ;;  %s11338_s25 = smov %s8099_s26 }
 0xba3   : > { %s11339_s26 = smov %s8103_s27  ;;  %s11340_s27 = smov %s8371_s24 }
 0xba4   : > { %s11341_s28 = smov %s8359_s16  ;;  %31 = sbr.rel (!%p29_p8) target bundleno = 16 (0x10), region = 137 }
 0xbab   :  { %5667 = vsyncpa [#allocation3], 1 }
 0xbac   :  { %5669 = vsyncpa [#allocation3 + $0x1], 1 }
 0xbad   :  { %5670 = vsyncpa [#allocation6], 1 }
 0xbae   :  { %5671 = vsyncpa [#allocation9], 1 }
 0xbaf   :  { %5672 = vsyncpa [#allocation12], 1 }
 0xbb0   :  { %5673 = vsyncpa [#allocation4], 1 }
 0xbb1   :  { %5675 = vsyncpa [#allocation4 + $0x1], 1 }

</bundles_post_ra>
